<compile_context>
chip_gen: v7x
topology: tpu7x:2x2x1
jax: 0.10.0
libtpu: 0.0.40
codegen_flags: <defaults>
</compile_context>

<pallas_src>
import functools

import jax
import jax.numpy as jnp
from jax import lax
from jax.experimental import pallas as pl
from jax.experimental.pallas import tpu as pltpu


_VMEM_LIMIT = 64 * 1024 * 1024


# --------------------------------------------------------------------------- #
# Kernels
# --------------------------------------------------------------------------- #
def _stage_a_kernel(TR, W, Cin, C1,
                    xb_ref, xh_ref, dw_ref, b1_ref, pw_ref, b2_ref, out_ref):
    """5x5 depthwise conv (BN scale folded into dw) + bias + ReLU,
    then 1x1 conv (BN scale folded) + bias + ReLU, for one TR-row tile."""
    # body rows [t*TR, t*TR+TR) + halo rows [t*TR+TR, t*TR+TR+4) of the padded input
    xt = jnp.concatenate([xb_ref[0], xh_ref[0]], axis=0)      # (TR+4, W+4, Cin)
    dw = dw_ref[...]                                          # (5, 5, Cin)

    # hoist the 5 W-axis (sublane) shifts out of the dy loop; dy slices (axis 0) are free
    cols = [xt[:, dx:dx + W, :] for dx in range(5)]           # 5 x (TR+4, W, Cin)

    acc = jnp.zeros((TR, W, Cin), jnp.float32)
    for dy in range(5):
        for dx in range(5):
            acc = acc + cols[dx][dy:dy + TR] * dw[dy:dy + 1, dx:dx + 1, :]

    h = jnp.maximum(acc + b1_ref[...], 0.0)                   # (TR, W, Cin)
    y = jnp.dot(h.reshape(TR * W, Cin), pw_ref[...],
                preferred_element_type=jnp.float32)           # (TR*W, C1)
    y = jnp.maximum(y + b2_ref[...], 0.0)
    out_ref[0] = y.reshape(TR, W, C1)


def _stage_bc_kernel(H2, W2, C1, C2, K,
                     p00_ref, p01_ref, p10_ref, p11_ref,
                     dw_ref, b3_ref, pw_ref, b4_ref, cw_ref, wh_ref, wwt_ref,
                     out_ref):
    """3x3 depthwise stride-2 (phase-split input, BN folded) + bias + ReLU,
    1x1 conv (BN folded) + bias + ReLU, final 1x1 conv (num_class),
    bilinear x8 upsample as two matmuls, sigmoid * 88."""
    phases = ((p00_ref, p01_ref), (p10_ref, p11_ref))
    dw = dw_ref[...]                                          # (3, 3, C1)

    acc = jnp.zeros((H2, W2, C1), jnp.float32)
    for dy in range(3):
        for dx in range(3):
            ph = phases[dy % 2][dx % 2]
            oy, ox = dy // 2, dx // 2
            acc = acc + ph[0, oy:oy + H2, ox:ox + W2, :] * dw[dy:dy + 1, dx:dx + 1, :]

    h = jnp.maximum(acc + b3_ref[...], 0.0)                   # (H2, W2, C1)
    y = jnp.dot(h.reshape(H2 * W2, C1), pw_ref[...],
                preferred_element_type=jnp.float32)           # (H2*W2, C2)
    y = jnp.maximum(y + b4_ref[...], 0.0)
    y3 = y.reshape(H2, W2, C2)

    wh = wh_ref[...]                                          # (HO, H2)
    wwt = wwt_ref[...]                                        # (W2, WO)
    for k in range(K):
        # class contraction BEFORE upsample (linear ops commute): only K maps get upsampled
        wk = cw_ref[k:k + 1, :].reshape(1, 1, C2)
        lk = jnp.sum(y3 * wk, axis=-1)                        # (H2, W2)
        t = jnp.dot(wh, lk, preferred_element_type=jnp.float32)   # (HO, W2)
        u = jnp.dot(t, wwt, preferred_element_type=jnp.float32)   # (HO, WO)
        out_ref[0, k] = 88.0 / (1.0 + jnp.exp(-u))            # sigmoid(u) * 88


# --------------------------------------------------------------------------- #
# Glue: BN folding, interpolation matrices, pallas_call wiring
# --------------------------------------------------------------------------- #
def _fold_bn(gamma, beta, mean, var, eps=1e-5):
    scale = gamma * jax.lax.rsqrt(var + eps)
    bias = beta - mean * scale
    return scale.astype(jnp.float32), bias.astype(jnp.float32)


def _interp_matrix(out_size, in_size):
    # bilinear, align_corners=True:  src = o * (in-1) / (out-1)
    o = jnp.arange(out_size, dtype=jnp.float32)
    src = o * (in_size - 1) / (out_size - 1)
    i0 = jnp.clip(jnp.floor(src).astype(jnp.int32), 0, in_size - 2)
    frac = src - i0.astype(jnp.float32)
    w = jnp.zeros((out_size, in_size), jnp.float32)
    rows = jnp.arange(out_size)
    w = w.at[rows, i0].add(1.0 - frac)
    w = w.at[rows, i0 + 1].add(frac)
    return w


def make_params(key, num_class=1, decoder_ch=256, head_ch_1=32, head_ch_2=64):
    ks = jax.random.split(key, 9)

    def nrm(k, shape, s=0.1):
        return s * jax.random.normal(k, shape, jnp.float32)

    def bn(k, c):
        k1, k2, k3, k4 = jax.random.split(k, 4)
        gamma = 1.0 + 0.1 * jax.random.normal(k1, (c,), jnp.float32)
        beta = 0.1 * jax.random.normal(k2, (c,), jnp.float32)
        mean = 0.1 * jax.random.normal(k3, (c,), jnp.float32)
        var = 1.0 + 0.1 * jnp.abs(jax.random.normal(k4, (c,), jnp.float32))
        return gamma, beta, mean, var

    return {
        'dw5':  nrm(ks[0], (5, 5, decoder_ch)),        # depthwise 5x5 weight [ky,kx,c]
        'bn1a': bn(ks[1], decoder_ch),
        'pw1':  nrm(ks[2], (decoder_ch, head_ch_1)),   # 1x1 conv as (Cin, Cout)
        'bn1b': bn(ks[3], head_ch_1),
        'dw3':  nrm(ks[4], (3, 3, head_ch_1)),         # depthwise 3x3 stride-2 weight
        'bn2a': bn(ks[5], head_ch_1),
        'pw2':  nrm(ks[6], (head_ch_1, head_ch_2)),
        'bn2b': bn(ks[7], head_ch_2),
        'conv': nrm(ks[8], (num_class, head_ch_2)),    # final 1x1, bias=False
    }


def _const_spec(arr, n_grid):
    nd = arr.ndim
    if n_grid == 1:
        return pl.BlockSpec(arr.shape, lambda b, nd=nd: (0,) * nd)
    return pl.BlockSpec(arr.shape, lambda b, t, nd=nd: (0,) * nd)


def depth_head_forward(x_nchw, params, *, row_tile=8):
    B, Cin, H, W = x_nchw.shape
    C1 = params['pw1'].shape[1]
    C2 = params['pw2'].shape[1]
    K = params['conv'].shape[0]
    H2 = (H - 1) // 2 + 1            # conv k=3, s=2, p=1
    W2 = (W - 1) // 2 + 1
    HO, WO = 8 * H2, 8 * W2

    x = jnp.transpose(x_nchw, (0, 2, 3, 1)).astype(jnp.float32)   # -> NHWC

    # ---- fold BN scales into the conv weights (only bias + ReLU stay in-kernel) ----
    s1, b1 = _fold_bn(*params['bn1a'])
    s2, b2 = _fold_bn(*params['bn1b'])
    s3, b3 = _fold_bn(*params['bn2a'])
    s4, b4 = _fold_bn(*params['bn2b'])
    dw5f = (params['dw5'] * s1[None, None, :]).astype(jnp.float32)
    pw1f = (params['pw1'] * s2[None, :]).astype(jnp.float32)
    dw3f = (params['dw3'] * s3[None, None, :]).astype(jnp.float32)
    pw2f = (params['pw2'] * s4[None, :]).astype(jnp.float32)
    bias1 = b1.reshape(1, 1, Cin)
    bias2 = b2.reshape(1, C1)
    bias3 = b3.reshape(1, 1, C1)
    bias4 = b4.reshape(1, C2)
    cw = params['conv'].astype(jnp.float32)                       # (K, C2)

    # ---- stage A: 5x5 depthwise-separable block, row-tiled with a 4-row halo ----
    TR = max(4, (min(row_tile, max(H, 4)) // 4) * 4)              # tile rows, multiple of 4
    n_tiles = (H + TR - 1) // TR
    Hp = n_tiles * TR + 4                                         # padded rows
    xp = jnp.pad(x, ((0, 0), (2, Hp - H - 2), (2, 2), (0, 0)))    # (B, Hp, W+4, Cin)

    body_spec = pl.BlockSpec((1, TR, W + 4, Cin), lambda b, t: (b, t, 0, 0))
    # halo = first 4 rows of the next TR-block of the SAME padded array
    halo_spec = pl.BlockSpec((1, 4, W + 4, Cin),
                             lambda b, t, s=TR // 4: (b, (t + 1) * s, 0, 0))

    h1_full = pl.pallas_call(
        functools.partial(_stage_a_kernel, TR, W, Cin, C1),
        out_shape=jax.ShapeDtypeStruct((B, n_tiles * TR, W, C1), jnp.float32),
        grid=(B, n_tiles),
        in_specs=[body_spec, halo_spec,
                  _const_spec(dw5f, 2), _const_spec(bias1, 2),
                  _const_spec(pw1f, 2), _const_spec(bias2, 2)],
        out_specs=pl.BlockSpec((1, TR, W, C1), lambda b, t: (b, t, 0, 0)),
        compiler_params=pltpu.CompilerParams(
            dimension_semantics=("parallel", "parallel"),
            vmem_limit_bytes=_VMEM_LIMIT),
    )(xp, xp, dw5f, bias1, pw1f, bias2)
    h1 = h1_full[:, :H]                                           # (B, H, W, C1)

    # ---- stage B+C fused: stride-2 depthwise-separable, 1x1 head, x8 upsample, sigmoid ----
    # zero-pad by 1 and split into stride-2 phases (works for odd H/W too: all phases padded
    # to the same (H2+1, W2+1) extent).
    Hp2, Wp2 = H2 + 1, W2 + 1
    h1p = jnp.pad(h1, ((0, 0), (1, 2 * H2 + 1 - H), (1, 2 * W2 + 1 - W), (0, 0)))
    p00 = h1p[:, 0::2, 0::2, :]
    p01 = h1p[:, 0::2, 1::2, :]
    p10 = h1p[:, 1::2, 0::2, :]
    p11 = h1p[:, 1::2, 1::2, :]

    Wh = _interp_matrix(HO, H2)          # (HO, H2)
    WwT = _interp_matrix(WO, W2).T       # (W2, WO)

    phase_spec = pl.BlockSpec((1, Hp2, Wp2, C1), lambda b: (b, 0, 0, 0))
    pred = pl.pallas_call(
        functools.partial(_stage_bc_kernel, H2, W2, C1, C2, K),
        out_shape=jax.ShapeDtypeStruct((B, K, HO, WO), jnp.float32),
        grid=(B,),
        in_specs=[phase_spec, phase_spec, phase_spec, phase_spec,
                  _const_spec(dw3f, 1), _const_spec(bias3, 1),
                  _const_spec(pw2f, 1), _const_spec(bias4, 1),
                  _const_spec(cw, 1), _const_spec(Wh, 1), _const_spec(WwT, 1)],
        out_specs=pl.BlockSpec((1, K, HO, WO), lambda b: (b, 0, 0, 0)),
        compiler_params=pltpu.CompilerParams(
            dimension_semantics=("parallel",),
            vmem_limit_bytes=_VMEM_LIMIT),
    )(p00, p01, p10, p11, dw3f, bias3, pw2f, bias4, cw, Wh, WwT)

    return pred                                                   # NCHW, like PyTorch


# --------------------------------------------------------------------------- #
# Pure-JAX (XLA) reference for validation
# --------------------------------------------------------------------------- #
def depth_head_reference(x_nchw, params):
    x = jnp.transpose(x_nchw, (0, 2, 3, 1)).astype(jnp.float32)   # NHWC
    Cin = x.shape[-1]
    C1 = params['pw1'].shape[1]
    s1, b1 = _fold_bn(*params['bn1a'])
    s2, b2 = _fold_bn(*params['bn1b'])
    s3, b3 = _fold_bn(*params['bn2a'])
    s4, b4 = _fold_bn(*params['bn2b'])
    dn = ('NHWC', 'HWIO', 'NHWC')
    hp = lax.conv_general_dilated(
        x, params['dw5'].reshape(5, 5, 1, Cin), (1, 1), [(2, 2), (2, 2)],
        dimension_numbers=dn, feature_group_count=Cin,
        precision=lax.Precision.HIGHEST)
    h = jnp.maximum(hp * s1 + b1, 0.0)
    h = jnp.einsum('bhwc,cd->bhwd', h, params['pw1'], precision=lax.Precision.HIGHEST)
    h = jnp.maximum(h * s2 + b2, 0.0)
    g = lax.conv_general_dilated(
        h, params['dw3'].reshape(3, 3, 1, C1), (2, 2), [(1, 1), (1, 1)],
        dimension_numbers=dn, feature_group_count=C1,
        precision=lax.Precision.HIGHEST)
    g = jnp.maximum(g * s3 + b3, 0.0)
    g = jnp.einsum('bhwc,cd->bhwd', g, params['pw2'], precision=lax.Precision.HIGHEST)
    g = jnp.maximum(g * s4 + b4, 0.0)
    H2, W2 = g.shape[1], g.shape[2]
    Wh = _interp_matrix(8 * H2, H2)
    Ww = _interp_matrix(8 * W2, W2)
    up = jnp.einsum('oh,bhwc->bowc', Wh, g, precision=lax.Precision.HIGHEST)
    up = jnp.einsum('pw,bowc->bopc', Ww, up, precision=lax.Precision.HIGHEST)
    pred = jnp.einsum('bhwc,kc->bkhw', up, params['conv'], precision=lax.Precision.HIGHEST)
    return 88.0 / (1.0 + jnp.exp(-pred))


# --------------------------------------------------------------------------- #
if __name__ == "__main__":
    key = jax.random.PRNGKey(0)
    kx, kp = jax.random.split(key)

    # small but representative config: decoder_ch=16, head_ch_1=8, head_ch_2=16
    B, decoder_ch, H, W = 2, 16, 16, 16
    head_ch_1, head_ch_2, num_class = 8, 16, 1

    x = jax.random.normal(kx, (B, decoder_ch, H, W), jnp.float32)  # NCHW input
    params = make_params(kp, num_class=num_class, decoder_ch=decoder_ch,
                         head_ch_1=head_ch_1, head_ch_2=head_ch_2)

    fwd = jax.jit(lambda xx, pp: depth_head_forward(xx, pp, row_tile=8))
    out = jax.block_until_ready(fwd(x, params))

    H2, W2 = (H - 1) // 2 + 1, (W - 1) // 2 + 1
    assert out.shape == (B, num_class, 8 * H2, 8 * W2), out.shape
    assert bool(jnp.all(jnp.isfinite(out)))
    assert bool(jnp.all(out >= 0.0)) and bool(jnp.all(out <= 88.0))

    ref = depth_head_reference(x, params)
    assert bool(jnp.allclose(out, ref, rtol=1e-2, atol=5e-2)), \
        float(jnp.max(jnp.abs(out - ref)))

    print("KERNEL_OK")
</pallas_src>

<mosaic_0001>
module attributes {stable_mosaic.version = 11 : i64} {
  func.func private @main(%arg0: i32) attributes {dimension_semantics = [#tpu.dimension_semantics<core_parallel>], iteration_bounds = array<i64: 2>, tpu.core_type = #tpu.core_type<sc_scalar_subcore>, window_params = []} {
    return
  }
}

module attributes {stable_mosaic.version = 11 : i64} {
  func.func private @main(%arg0: i32) attributes {dimension_semantics = [#tpu.dimension_semantics<core_parallel>], iteration_bounds = array<i64: 2>, tpu.core_type = #tpu.core_type<sc_scalar_subcore>, window_params = []} {
    return
  }
}

module attributes {stable_mosaic.version = 11 : i64} {
  func.func @_stage_a_kernel(%arg0: i32, %arg1: i32, %arg2: memref<1x8x20x16xf32, #tpu.memory_space<vmem>>, %arg3: memref<1x4x20x16xf32, #tpu.memory_space<vmem>>, %arg4: memref<5x5x16xf32, #tpu.memory_space<vmem>>, %arg5: memref<1x1x16xf32, #tpu.memory_space<vmem>>, %arg6: memref<16x8xf32, #tpu.memory_space<vmem>>, %arg7: memref<1x8xf32, #tpu.memory_space<vmem>>, %arg8: memref<1x8x16x8xf32, #tpu.memory_space<vmem>>) attributes {dimension_semantics = [#tpu.dimension_semantics<parallel>, #tpu.dimension_semantics<parallel>], iteration_bounds = array<i64: 2, 2>, scalar_prefetch = 0 : i64, scratch_operands = 0 : i64, tpu.core_type = #tpu.core_type<tc>, window_params = [{transform_indices = @transform_0, window_bounds = array<i64: 1, 8, 20, 16>}, {transform_indices = @transform_1, window_bounds = array<i64: 1, 4, 20, 16>}, {pipeline_mode = #tpu.pipeline_mode<synchronous>, transform_indices = @transform_2, window_bounds = array<i64: 5, 5, 16>}, {pipeline_mode = #tpu.pipeline_mode<synchronous>, transform_indices = @transform_3, window_bounds = array<i64: 1, 1, 16>}, {pipeline_mode = #tpu.pipeline_mode<synchronous>, transform_indices = @transform_4, window_bounds = array<i64: 16, 8>}, {pipeline_mode = #tpu.pipeline_mode<synchronous>, transform_indices = @transform_5, window_bounds = array<i64: 1, 8>}, {transform_indices = @transform_6, window_bounds = array<i64: 1, 8, 16, 8>}]} {
    %c0 = arith.constant 0 : index
    %c0_0 = arith.constant 0 : index
    %c0_1 = arith.constant 0 : index
    %c0_2 = arith.constant 0 : index
    %0 = vector.load %arg2[%c0, %c0_0, %c0_1, %c0_2] : memref<1x8x20x16xf32, #tpu.memory_space<vmem>>, vector<1x8x20x16xf32>
    %1 = vector.shape_cast %0 : vector<1x8x20x16xf32> to vector<8x20x16xf32>
    %c0_3 = arith.constant 0 : index
    %c0_4 = arith.constant 0 : index
    %c0_5 = arith.constant 0 : index
    %c0_6 = arith.constant 0 : index
    %2 = vector.load %arg3[%c0_3, %c0_4, %c0_5, %c0_6] : memref<1x4x20x16xf32, #tpu.memory_space<vmem>>, vector<1x4x20x16xf32>
    %3 = vector.shape_cast %2 : vector<1x4x20x16xf32> to vector<4x20x16xf32>
    %4 = tpu.concatenate %1, %3 in 0 : vector<8x20x16xf32>, vector<4x20x16xf32> -> vector<12x20x16xf32>
    %c0_7 = arith.constant 0 : index
    %c0_8 = arith.constant 0 : index
    %c0_9 = arith.constant 0 : index
    %5 = vector.load %arg4[%c0_7, %c0_8, %c0_9] : memref<5x5x16xf32, #tpu.memory_space<vmem>>, vector<5x5x16xf32>
    %6 = vector.extract_strided_slice %4 {offsets = [0, 0, 0], sizes = [12, 16, 16], strides = [1, 1, 1]} : vector<12x20x16xf32> to vector<12x16x16xf32>
    %7 = vector.extract_strided_slice %4 {offsets = [0, 1, 0], sizes = [12, 16, 16], strides = [1, 1, 1]} : vector<12x20x16xf32> to vector<12x16x16xf32>
    %8 = vector.extract_strided_slice %4 {offsets = [0, 2, 0], sizes = [12, 16, 16], strides = [1, 1, 1]} : vector<12x20x16xf32> to vector<12x16x16xf32>
    %9 = vector.extract_strided_slice %4 {offsets = [0, 3, 0], sizes = [12, 16, 16], strides = [1, 1, 1]} : vector<12x20x16xf32> to vector<12x16x16xf32>
    %10 = vector.extract_strided_slice %4 {offsets = [0, 4, 0], sizes = [12, 16, 16], strides = [1, 1, 1]} : vector<12x20x16xf32> to vector<12x16x16xf32>
    %cst = arith.constant 0.000000e+00 : f32
    %11 = vector.broadcast %cst : f32 to vector<8x16x16xf32>
    %12 = vector.extract_strided_slice %6 {offsets = [0, 0, 0], sizes = [8, 16, 16], strides = [1, 1, 1]} : vector<12x16x16xf32> to vector<8x16x16xf32>
    %13 = vector.extract_strided_slice %5 {offsets = [0, 0, 0], sizes = [1, 1, 16], strides = [1, 1, 1]} : vector<5x5x16xf32> to vector<1x1x16xf32>
    %14 = vector.broadcast %13 : vector<1x1x16xf32> to vector<8x16x16xf32>
    %15 = arith.mulf %12, %14 : vector<8x16x16xf32>
    %16 = arith.addf %11, %15 : vector<8x16x16xf32>
    %17 = vector.extract_strided_slice %7 {offsets = [0, 0, 0], sizes = [8, 16, 16], strides = [1, 1, 1]} : vector<12x16x16xf32> to vector<8x16x16xf32>
    %18 = vector.extract_strided_slice %5 {offsets = [0, 1, 0], sizes = [1, 1, 16], strides = [1, 1, 1]} : vector<5x5x16xf32> to vector<1x1x16xf32>
    %19 = vector.broadcast %18 : vector<1x1x16xf32> to vector<8x16x16xf32>
    %20 = arith.mulf %17, %19 : vector<8x16x16xf32>
    %21 = arith.addf %16, %20 : vector<8x16x16xf32>
    %22 = vector.extract_strided_slice %8 {offsets = [0, 0, 0], sizes = [8, 16, 16], strides = [1, 1, 1]} : vector<12x16x16xf32> to vector<8x16x16xf32>
    %23 = vector.extract_strided_slice %5 {offsets = [0, 2, 0], sizes = [1, 1, 16], strides = [1, 1, 1]} : vector<5x5x16xf32> to vector<1x1x16xf32>
    %24 = vector.broadcast %23 : vector<1x1x16xf32> to vector<8x16x16xf32>
    %25 = arith.mulf %22, %24 : vector<8x16x16xf32>
    %26 = arith.addf %21, %25 : vector<8x16x16xf32>
    %27 = vector.extract_strided_slice %9 {offsets = [0, 0, 0], sizes = [8, 16, 16], strides = [1, 1, 1]} : vector<12x16x16xf32> to vector<8x16x16xf32>
    %28 = vector.extract_strided_slice %5 {offsets = [0, 3, 0], sizes = [1, 1, 16], strides = [1, 1, 1]} : vector<5x5x16xf32> to vector<1x1x16xf32>
    %29 = vector.broadcast %28 : vector<1x1x16xf32> to vector<8x16x16xf32>
    %30 = arith.mulf %27, %29 : vector<8x16x16xf32>
    %31 = arith.addf %26, %30 : vector<8x16x16xf32>
    %32 = vector.extract_strided_slice %10 {offsets = [0, 0, 0], sizes = [8, 16, 16], strides = [1, 1, 1]} : vector<12x16x16xf32> to vector<8x16x16xf32>
    %33 = vector.extract_strided_slice %5 {offsets = [0, 4, 0], sizes = [1, 1, 16], strides = [1, 1, 1]} : vector<5x5x16xf32> to vector<1x1x16xf32>
    %34 = vector.broadcast %33 : vector<1x1x16xf32> to vector<8x16x16xf32>
    %35 = arith.mulf %32, %34 : vector<8x16x16xf32>
    %36 = arith.addf %31, %35 : vector<8x16x16xf32>
    %37 = vector.extract_strided_slice %6 {offsets = [1, 0, 0], sizes = [8, 16, 16], strides = [1, 1, 1]} : vector<12x16x16xf32> to vector<8x16x16xf32>
    %38 = vector.extract_strided_slice %5 {offsets = [1, 0, 0], sizes = [1, 1, 16], strides = [1, 1, 1]} : vector<5x5x16xf32> to vector<1x1x16xf32>
    %39 = vector.broadcast %38 : vector<1x1x16xf32> to vector<8x16x16xf32>
    %40 = arith.mulf %37, %39 : vector<8x16x16xf32>
    %41 = arith.addf %36, %40 : vector<8x16x16xf32>
    %42 = vector.extract_strided_slice %7 {offsets = [1, 0, 0], sizes = [8, 16, 16], strides = [1, 1, 1]} : vector<12x16x16xf32> to vector<8x16x16xf32>
    %43 = vector.extract_strided_slice %5 {offsets = [1, 1, 0], sizes = [1, 1, 16], strides = [1, 1, 1]} : vector<5x5x16xf32> to vector<1x1x16xf32>
    %44 = vector.broadcast %43 : vector<1x1x16xf32> to vector<8x16x16xf32>
    %45 = arith.mulf %42, %44 : vector<8x16x16xf32>
    %46 = arith.addf %41, %45 : vector<8x16x16xf32>
    %47 = vector.extract_strided_slice %8 {offsets = [1, 0, 0], sizes = [8, 16, 16], strides = [1, 1, 1]} : vector<12x16x16xf32> to vector<8x16x16xf32>
    %48 = vector.extract_strided_slice %5 {offsets = [1, 2, 0], sizes = [1, 1, 16], strides = [1, 1, 1]} : vector<5x5x16xf32> to vector<1x1x16xf32>
    %49 = vector.broadcast %48 : vector<1x1x16xf32> to vector<8x16x16xf32>
    %50 = arith.mulf %47, %49 : vector<8x16x16xf32>
    %51 = arith.addf %46, %50 : vector<8x16x16xf32>
    %52 = vector.extract_strided_slice %9 {offsets = [1, 0, 0], sizes = [8, 16, 16], strides = [1, 1, 1]} : vector<12x16x16xf32> to vector<8x16x16xf32>
    %53 = vector.extract_strided_slice %5 {offsets = [1, 3, 0], sizes = [1, 1, 16], strides = [1, 1, 1]} : vector<5x5x16xf32> to vector<1x1x16xf32>
    %54 = vector.broadcast %53 : vector<1x1x16xf32> to vector<8x16x16xf32>
    %55 = arith.mulf %52, %54 : vector<8x16x16xf32>
    %56 = arith.addf %51, %55 : vector<8x16x16xf32>
    %57 = vector.extract_strided_slice %10 {offsets = [1, 0, 0], sizes = [8, 16, 16], strides = [1, 1, 1]} : vector<12x16x16xf32> to vector<8x16x16xf32>
    %58 = vector.extract_strided_slice %5 {offsets = [1, 4, 0], sizes = [1, 1, 16], strides = [1, 1, 1]} : vector<5x5x16xf32> to vector<1x1x16xf32>
    %59 = vector.broadcast %58 : vector<1x1x16xf32> to vector<8x16x16xf32>
    %60 = arith.mulf %57, %59 : vector<8x16x16xf32>
    %61 = arith.addf %56, %60 : vector<8x16x16xf32>
    %62 = vector.extract_strided_slice %6 {offsets = [2, 0, 0], sizes = [8, 16, 16], strides = [1, 1, 1]} : vector<12x16x16xf32> to vector<8x16x16xf32>
    %63 = vector.extract_strided_slice %5 {offsets = [2, 0, 0], sizes = [1, 1, 16], strides = [1, 1, 1]} : vector<5x5x16xf32> to vector<1x1x16xf32>
    %64 = vector.broadcast %63 : vector<1x1x16xf32> to vector<8x16x16xf32>
    %65 = arith.mulf %62, %64 : vector<8x16x16xf32>
    %66 = arith.addf %61, %65 : vector<8x16x16xf32>
    %67 = vector.extract_strided_slice %7 {offsets = [2, 0, 0], sizes = [8, 16, 16], strides = [1, 1, 1]} : vector<12x16x16xf32> to vector<8x16x16xf32>
    %68 = vector.extract_strided_slice %5 {offsets = [2, 1, 0], sizes = [1, 1, 16], strides = [1, 1, 1]} : vector<5x5x16xf32> to vector<1x1x16xf32>
    %69 = vector.broadcast %68 : vector<1x1x16xf32> to vector<8x16x16xf32>
    %70 = arith.mulf %67, %69 : vector<8x16x16xf32>
    %71 = arith.addf %66, %70 : vector<8x16x16xf32>
    %72 = vector.extract_strided_slice %8 {offsets = [2, 0, 0], sizes = [8, 16, 16], strides = [1, 1, 1]} : vector<12x16x16xf32> to vector<8x16x16xf32>
    %73 = vector.extract_strided_slice %5 {offsets = [2, 2, 0], sizes = [1, 1, 16], strides = [1, 1, 1]} : vector<5x5x16xf32> to vector<1x1x16xf32>
    %74 = vector.broadcast %73 : vector<1x1x16xf32> to vector<8x16x16xf32>
    %75 = arith.mulf %72, %74 : vector<8x16x16xf32>
    %76 = arith.addf %71, %75 : vector<8x16x16xf32>
    %77 = vector.extract_strided_slice %9 {offsets = [2, 0, 0], sizes = [8, 16, 16], strides = [1, 1, 1]} : vector<12x16x16xf32> to vector<8x16x16xf32>
    %78 = vector.extract_strided_slice %5 {offsets = [2, 3, 0], sizes = [1, 1, 16], strides = [1, 1, 1]} : vector<5x5x16xf32> to vector<1x1x16xf32>
    %79 = vector.broadcast %78 : vector<1x1x16xf32> to vector<8x16x16xf32>
    %80 = arith.mulf %77, %79 : vector<8x16x16xf32>
    %81 = arith.addf %76, %80 : vector<8x16x16xf32>
    %82 = vector.extract_strided_slice %10 {offsets = [2, 0, 0], sizes = [8, 16, 16], strides = [1, 1, 1]} : vector<12x16x16xf32> to vector<8x16x16xf32>
    %83 = vector.extract_strided_slice %5 {offsets = [2, 4, 0], sizes = [1, 1, 16], strides = [1, 1, 1]} : vector<5x5x16xf32> to vector<1x1x16xf32>
    %84 = vector.broadcast %83 : vector<1x1x16xf32> to vector<8x16x16xf32>
    %85 = arith.mulf %82, %84 : vector<8x16x16xf32>
    %86 = arith.addf %81, %85 : vector<8x16x16xf32>
    %87 = vector.extract_strided_slice %6 {offsets = [3, 0, 0], sizes = [8, 16, 16], strides = [1, 1, 1]} : vector<12x16x16xf32> to vector<8x16x16xf32>
    %88 = vector.extract_strided_slice %5 {offsets = [3, 0, 0], sizes = [1, 1, 16], strides = [1, 1, 1]} : vector<5x5x16xf32> to vector<1x1x16xf32>
    %89 = vector.broadcast %88 : vector<1x1x16xf32> to vector<8x16x16xf32>
    %90 = arith.mulf %87, %89 : vector<8x16x16xf32>
    %91 = arith.addf %86, %90 : vector<8x16x16xf32>
    %92 = vector.extract_strided_slice %7 {offsets = [3, 0, 0], sizes = [8, 16, 16], strides = [1, 1, 1]} : vector<12x16x16xf32> to vector<8x16x16xf32>
    %93 = vector.extract_strided_slice %5 {offsets = [3, 1, 0], sizes = [1, 1, 16], strides = [1, 1, 1]} : vector<5x5x16xf32> to vector<1x1x16xf32>
    %94 = vector.broadcast %93 : vector<1x1x16xf32> to vector<8x16x16xf32>
    %95 = arith.mulf %92, %94 : vector<8x16x16xf32>
    %96 = arith.addf %91, %95 : vector<8x16x16xf32>
    %97 = vector.extract_strided_slice %8 {offsets = [3, 0, 0], sizes = [8, 16, 16], strides = [1, 1, 1]} : vector<12x16x16xf32> to vector<8x16x16xf32>
    %98 = vector.extract_strided_slice %5 {offsets = [3, 2, 0], sizes = [1, 1, 16], strides = [1, 1, 1]} : vector<5x5x16xf32> to vector<1x1x16xf32>
    %99 = vector.broadcast %98 : vector<1x1x16xf32> to vector<8x16x16xf32>
    %100 = arith.mulf %97, %99 : vector<8x16x16xf32>
    %101 = arith.addf %96, %100 : vector<8x16x16xf32>
    %102 = vector.extract_strided_slice %9 {offsets = [3, 0, 0], sizes = [8, 16, 16], strides = [1, 1, 1]} : vector<12x16x16xf32> to vector<8x16x16xf32>
    %103 = vector.extract_strided_slice %5 {offsets = [3, 3, 0], sizes = [1, 1, 16], strides = [1, 1, 1]} : vector<5x5x16xf32> to vector<1x1x16xf32>
    %104 = vector.broadcast %103 : vector<1x1x16xf32> to vector<8x16x16xf32>
    %105 = arith.mulf %102, %104 : vector<8x16x16xf32>
    %106 = arith.addf %101, %105 : vector<8x16x16xf32>
    %107 = vector.extract_strided_slice %10 {offsets = [3, 0, 0], sizes = [8, 16, 16], strides = [1, 1, 1]} : vector<12x16x16xf32> to vector<8x16x16xf32>
    %108 = vector.extract_strided_slice %5 {offsets = [3, 4, 0], sizes = [1, 1, 16], strides = [1, 1, 1]} : vector<5x5x16xf32> to vector<1x1x16xf32>
    %109 = vector.broadcast %108 : vector<1x1x16xf32> to vector<8x16x16xf32>
    %110 = arith.mulf %107, %109 : vector<8x16x16xf32>
    %111 = arith.addf %106, %110 : vector<8x16x16xf32>
    %112 = vector.extract_strided_slice %6 {offsets = [4, 0, 0], sizes = [8, 16, 16], strides = [1, 1, 1]} : vector<12x16x16xf32> to vector<8x16x16xf32>
    %113 = vector.extract_strided_slice %5 {offsets = [4, 0, 0], sizes = [1, 1, 16], strides = [1, 1, 1]} : vector<5x5x16xf32> to vector<1x1x16xf32>
    %114 = vector.broadcast %113 : vector<1x1x16xf32> to vector<8x16x16xf32>
    %115 = arith.mulf %112, %114 : vector<8x16x16xf32>
    %116 = arith.addf %111, %115 : vector<8x16x16xf32>
    %117 = vector.extract_strided_slice %7 {offsets = [4, 0, 0], sizes = [8, 16, 16], strides = [1, 1, 1]} : vector<12x16x16xf32> to vector<8x16x16xf32>
    %118 = vector.extract_strided_slice %5 {offsets = [4, 1, 0], sizes = [1, 1, 16], strides = [1, 1, 1]} : vector<5x5x16xf32> to vector<1x1x16xf32>
    %119 = vector.broadcast %118 : vector<1x1x16xf32> to vector<8x16x16xf32>
    %120 = arith.mulf %117, %119 : vector<8x16x16xf32>
    %121 = arith.addf %116, %120 : vector<8x16x16xf32>
    %122 = vector.extract_strided_slice %8 {offsets = [4, 0, 0], sizes = [8, 16, 16], strides = [1, 1, 1]} : vector<12x16x16xf32> to vector<8x16x16xf32>
    %123 = vector.extract_strided_slice %5 {offsets = [4, 2, 0], sizes = [1, 1, 16], strides = [1, 1, 1]} : vector<5x5x16xf32> to vector<1x1x16xf32>
    %124 = vector.broadcast %123 : vector<1x1x16xf32> to vector<8x16x16xf32>
    %125 = arith.mulf %122, %124 : vector<8x16x16xf32>
    %126 = arith.addf %121, %125 : vector<8x16x16xf32>
    %127 = vector.extract_strided_slice %9 {offsets = [4, 0, 0], sizes = [8, 16, 16], strides = [1, 1, 1]} : vector<12x16x16xf32> to vector<8x16x16xf32>
    %128 = vector.extract_strided_slice %5 {offsets = [4, 3, 0], sizes = [1, 1, 16], strides = [1, 1, 1]} : vector<5x5x16xf32> to vector<1x1x16xf32>
    %129 = vector.broadcast %128 : vector<1x1x16xf32> to vector<8x16x16xf32>
    %130 = arith.mulf %127, %129 : vector<8x16x16xf32>
    %131 = arith.addf %126, %130 : vector<8x16x16xf32>
    %132 = vector.extract_strided_slice %10 {offsets = [4, 0, 0], sizes = [8, 16, 16], strides = [1, 1, 1]} : vector<12x16x16xf32> to vector<8x16x16xf32>
    %133 = vector.extract_strided_slice %5 {offsets = [4, 4, 0], sizes = [1, 1, 16], strides = [1, 1, 1]} : vector<5x5x16xf32> to vector<1x1x16xf32>
    %134 = vector.broadcast %133 : vector<1x1x16xf32> to vector<8x16x16xf32>
    %135 = arith.mulf %132, %134 : vector<8x16x16xf32>
    %136 = arith.addf %131, %135 : vector<8x16x16xf32>
    %c0_10 = arith.constant 0 : index
    %c0_11 = arith.constant 0 : index
    %c0_12 = arith.constant 0 : index
    %137 = vector.load %arg5[%c0_10, %c0_11, %c0_12] : memref<1x1x16xf32, #tpu.memory_space<vmem>>, vector<1x1x16xf32>
    %138 = vector.broadcast %137 : vector<1x1x16xf32> to vector<8x16x16xf32>
    %139 = arith.addf %136, %138 : vector<8x16x16xf32>
    %cst_13 = arith.constant 0.000000e+00 : f32
    %140 = vector.broadcast %cst_13 : f32 to vector<8x16x16xf32>
    %141 = arith.maximumf %139, %140 : vector<8x16x16xf32>
    %142 = vector.shape_cast %141 : vector<8x16x16xf32> to vector<128x16xf32>
    %c0_14 = arith.constant 0 : index
    %c0_15 = arith.constant 0 : index
    %143 = vector.load %arg6[%c0_14, %c0_15] : memref<16x8xf32, #tpu.memory_space<vmem>>, vector<16x8xf32>
    %cst_16 = arith.constant dense<0.000000e+00> : vector<128x8xf32>
    %144 = tpu.matmul %142, %143, %cst_16 {dimension_numbers = #tpu.dot_dimension_numbers<[1], [0], [0], [1], [0, 0, 1, 1], [], []>} : vector<128x16xf32>, vector<16x8xf32>, vector<128x8xf32> -> vector<128x8xf32>
    %c0_17 = arith.constant 0 : index
    %c0_18 = arith.constant 0 : index
    %145 = vector.load %arg7[%c0_17, %c0_18] : memref<1x8xf32, #tpu.memory_space<vmem>>, vector<1x8xf32>
    %146 = vector.broadcast %145 : vector<1x8xf32> to vector<128x8xf32>
    %147 = arith.addf %144, %146 : vector<128x8xf32>
    %cst_19 = arith.constant 0.000000e+00 : f32
    %148 = vector.broadcast %cst_19 : f32 to vector<128x8xf32>
    %149 = arith.maximumf %147, %148 : vector<128x8xf32>
    %150 = vector.shape_cast %149 : vector<128x8xf32> to vector<8x16x8xf32>
    %c0_20 = arith.constant 0 : index
    %c0_21 = arith.constant 0 : index
    %c0_22 = arith.constant 0 : index
    %c0_23 = arith.constant 0 : index
    %151 = vector.load %arg8[%c0_20, %c0_21, %c0_22, %c0_23] : memref<1x8x16x8xf32, #tpu.memory_space<vmem>>, vector<1x8x16x8xf32>
    %152 = vector.shape_cast %151 : vector<1x8x16x8xf32> to vector<8x16x8xf32>
    %153 = vector.shape_cast %150 : vector<8x16x8xf32> to vector<1x8x16x8xf32>
    tpu.vector_store %arg8[%c0_20, %c0_21, %c0_22, %c0_23], %153 {strides = array<i32>} : memref<1x8x16x8xf32, #tpu.memory_space<vmem>>, vector<1x8x16x8xf32>,
    return
  }
  func.func @transform_0(%arg0: i32, %arg1: i32) -> (i32, i32, i32, i32) {
    %c0_i32 = arith.constant 0 : i32
    %c0_i32_0 = arith.constant 0 : i32
    %c0_i32_1 = arith.constant 0 : i32
    return %arg0, %arg1, %c0_i32, %c0_i32_0 : i32, i32, i32, i32
  }
  func.func @transform_1(%arg0: i32, %arg1: i32) -> (i32, i32, i32, i32) {
    %c1_i32 = arith.constant 1 : i32
    %0 = arith.addi %arg1, %c1_i32 : i32
    %c2_i32 = arith.constant 2 : i32
    %1 = arith.muli %0, %c2_i32 : i32
    %c0_i32 = arith.constant 0 : i32
    %c0_i32_0 = arith.constant 0 : i32
    %c0_i32_1 = arith.constant 0 : i32
    return %arg0, %1, %c0_i32, %c0_i32_0 : i32, i32, i32, i32
  }
  func.func @transform_2(%arg0: i32, %arg1: i32) -> (i32, i32, i32) {
    %c0_i32 = arith.constant 0 : i32
    %c0_i32_0 = arith.constant 0 : i32
    %c0_i32_1 = arith.constant 0 : i32
    %c0_i32_2 = arith.constant 0 : i32
    return %c0_i32, %c0_i32_0, %c0_i32_1 : i32, i32, i32
  }
  func.func @transform_3(%arg0: i32, %arg1: i32) -> (i32, i32, i32) {
    %c0_i32 = arith.constant 0 : i32
    %c0_i32_0 = arith.constant 0 : i32
    %c0_i32_1 = arith.constant 0 : i32
    %c0_i32_2 = arith.constant 0 : i32
    return %c0_i32, %c0_i32_0, %c0_i32_1 : i32, i32, i32
  }
  func.func @transform_4(%arg0: i32, %arg1: i32) -> (i32, i32) {
    %c0_i32 = arith.constant 0 : i32
    %c0_i32_0 = arith.constant 0 : i32
    %c0_i32_1 = arith.constant 0 : i32
    return %c0_i32, %c0_i32_0 : i32, i32
  }
  func.func @transform_5(%arg0: i32, %arg1: i32) -> (i32, i32) {
    %c0_i32 = arith.constant 0 : i32
    %c0_i32_0 = arith.constant 0 : i32
    %c0_i32_1 = arith.constant 0 : i32
    return %c0_i32, %c0_i32_0 : i32, i32
  }
  func.func @transform_6(%arg0: i32, %arg1: i32) -> (i32, i32, i32, i32) {
    %c0_i32 = arith.constant 0 : i32
    %c0_i32_0 = arith.constant 0 : i32
    %c0_i32_1 = arith.constant 0 : i32
    return %arg0, %arg1, %c0_i32, %c0_i32_0 : i32, i32, i32, i32
  }
}

module attributes {stable_mosaic.version = 11 : i64} {
  func.func @_stage_bc_kernel(%arg0: i32, %arg1: memref<1x9x9x8xf32, #tpu.memory_space<vmem>>, %arg2: memref<1x9x9x8xf32, #tpu.memory_space<vmem>>, %arg3: memref<1x9x9x8xf32, #tpu.memory_space<vmem>>, %arg4: memref<1x9x9x8xf32, #tpu.memory_space<vmem>>, %arg5: memref<3x3x8xf32, #tpu.memory_space<vmem>>, %arg6: memref<1x1x8xf32, #tpu.memory_space<vmem>>, %arg7: memref<8x16xf32, #tpu.memory_space<vmem>>, %arg8: memref<1x16xf32, #tpu.memory_space<vmem>>, %arg9: memref<1x16xf32, #tpu.memory_space<vmem>>, %arg10: memref<64x8xf32, #tpu.memory_space<vmem>>, %arg11: memref<8x64xf32, #tpu.memory_space<vmem>>, %arg12: memref<1x1x64x64xf32, #tpu.memory_space<vmem>>) attributes {dimension_semantics = [#tpu.dimension_semantics<parallel>], iteration_bounds = array<i64: 2>, scalar_prefetch = 0 : i64, scratch_operands = 0 : i64, tpu.core_type = #tpu.core_type<tc>, window_params = [{transform_indices = @transform_0, window_bounds = array<i64: 1, 9, 9, 8>}, {transform_indices = @transform_1, window_bounds = array<i64: 1, 9, 9, 8>}, {transform_indices = @transform_2, window_bounds = array<i64: 1, 9, 9, 8>}, {transform_indices = @transform_3, window_bounds = array<i64: 1, 9, 9, 8>}, {pipeline_mode = #tpu.pipeline_mode<synchronous>, transform_indices = @transform_4, window_bounds = array<i64: 3, 3, 8>}, {pipeline_mode = #tpu.pipeline_mode<synchronous>, transform_indices = @transform_5, window_bounds = array<i64: 1, 1, 8>}, {pipeline_mode = #tpu.pipeline_mode<synchronous>, transform_indices = @transform_6, window_bounds = array<i64: 8, 16>}, {pipeline_mode = #tpu.pipeline_mode<synchronous>, transform_indices = @transform_7, window_bounds = array<i64: 1, 16>}, {pipeline_mode = #tpu.pipeline_mode<synchronous>, transform_indices = @transform_8, window_bounds = array<i64: 1, 16>}, {pipeline_mode = #tpu.pipeline_mode<synchronous>, transform_indices = @transform_9, window_bounds = array<i64: 64, 8>}, {pipeline_mode = #tpu.pipeline_mode<synchronous>, transform_indices = @transform_10, window_bounds = array<i64: 8, 64>}, {transform_indices = @transform_11, window_bounds = array<i64: 1, 1, 64, 64>}]} {
    %c0 = arith.constant 0 : index
    %c0_0 = arith.constant 0 : index
    %c0_1 = arith.constant 0 : index
    %0 = vector.load %arg5[%c0, %c0_0, %c0_1] : memref<3x3x8xf32, #tpu.memory_space<vmem>>, vector<3x3x8xf32>
    %cst = arith.constant 0.000000e+00 : f32
    %1 = vector.broadcast %cst : f32 to vector<8x8x8xf32>
    %c0_2 = arith.constant 0 : index
    %c0_3 = arith.constant 0 : index
    %c0_4 = arith.constant 0 : index
    %c0_5 = arith.constant 0 : index
    %2 = vector.load %arg1[%c0_2, %c0_3, %c0_4, %c0_5] : memref<1x9x9x8xf32, #tpu.memory_space<vmem>>, vector<1x8x8x8xf32>
    %3 = vector.shape_cast %2 : vector<1x8x8x8xf32> to vector<8x8x8xf32>
    %4 = vector.extract_strided_slice %0 {offsets = [0, 0, 0], sizes = [1, 1, 8], strides = [1, 1, 1]} : vector<3x3x8xf32> to vector<1x1x8xf32>
    %5 = vector.broadcast %4 : vector<1x1x8xf32> to vector<8x8x8xf32>
    %6 = arith.mulf %3, %5 : vector<8x8x8xf32>
    %7 = arith.addf %1, %6 : vector<8x8x8xf32>
    %c0_6 = arith.constant 0 : index
    %c0_7 = arith.constant 0 : index
    %c0_8 = arith.constant 0 : index
    %c0_9 = arith.constant 0 : index
    %8 = vector.load %arg2[%c0_6, %c0_7, %c0_8, %c0_9] : memref<1x9x9x8xf32, #tpu.memory_space<vmem>>, vector<1x8x8x8xf32>
    %9 = vector.shape_cast %8 : vector<1x8x8x8xf32> to vector<8x8x8xf32>
    %10 = vector.extract_strided_slice %0 {offsets = [0, 1, 0], sizes = [1, 1, 8], strides = [1, 1, 1]} : vector<3x3x8xf32> to vector<1x1x8xf32>
    %11 = vector.broadcast %10 : vector<1x1x8xf32> to vector<8x8x8xf32>
    %12 = arith.mulf %9, %11 : vector<8x8x8xf32>
    %13 = arith.addf %7, %12 : vector<8x8x8xf32>
    %c0_10 = arith.constant 0 : index
    %c0_11 = arith.constant 0 : index
    %c1 = arith.constant 1 : index
    %c0_12 = arith.constant 0 : index
    %14 = vector.load %arg1[%c0_10, %c0_11, %c1, %c0_12] : memref<1x9x9x8xf32, #tpu.memory_space<vmem>>, vector<1x8x8x8xf32>
    %15 = vector.shape_cast %14 : vector<1x8x8x8xf32> to vector<8x8x8xf32>
    %16 = vector.extract_strided_slice %0 {offsets = [0, 2, 0], sizes = [1, 1, 8], strides = [1, 1, 1]} : vector<3x3x8xf32> to vector<1x1x8xf32>
    %17 = vector.broadcast %16 : vector<1x1x8xf32> to vector<8x8x8xf32>
    %18 = arith.mulf %15, %17 : vector<8x8x8xf32>
    %19 = arith.addf %13, %18 : vector<8x8x8xf32>
    %c0_13 = arith.constant 0 : index
    %c0_14 = arith.constant 0 : index
    %c0_15 = arith.constant 0 : index
    %c0_16 = arith.constant 0 : index
    %20 = vector.load %arg3[%c0_13, %c0_14, %c0_15, %c0_16] : memref<1x9x9x8xf32, #tpu.memory_space<vmem>>, vector<1x8x8x8xf32>
    %21 = vector.shape_cast %20 : vector<1x8x8x8xf32> to vector<8x8x8xf32>
    %22 = vector.extract_strided_slice %0 {offsets = [1, 0, 0], sizes = [1, 1, 8], strides = [1, 1, 1]} : vector<3x3x8xf32> to vector<1x1x8xf32>
    %23 = vector.broadcast %22 : vector<1x1x8xf32> to vector<8x8x8xf32>
    %24 = arith.mulf %21, %23 : vector<8x8x8xf32>
    %25 = arith.addf %19, %24 : vector<8x8x8xf32>
    %c0_17 = arith.constant 0 : index
    %c0_18 = arith.constant 0 : index
    %c0_19 = arith.constant 0 : index
    %c0_20 = arith.constant 0 : index
    %26 = vector.load %arg4[%c0_17, %c0_18, %c0_19, %c0_20] : memref<1x9x9x8xf32, #tpu.memory_space<vmem>>, vector<1x8x8x8xf32>
    %27 = vector.shape_cast %26 : vector<1x8x8x8xf32> to vector<8x8x8xf32>
    %28 = vector.extract_strided_slice %0 {offsets = [1, 1, 0], sizes = [1, 1, 8], strides = [1, 1, 1]} : vector<3x3x8xf32> to vector<1x1x8xf32>
    %29 = vector.broadcast %28 : vector<1x1x8xf32> to vector<8x8x8xf32>
    %30 = arith.mulf %27, %29 : vector<8x8x8xf32>
    %31 = arith.addf %25, %30 : vector<8x8x8xf32>
    %c0_21 = arith.constant 0 : index
    %c0_22 = arith.constant 0 : index
    %c1_23 = arith.constant 1 : index
    %c0_24 = arith.constant 0 : index
    %32 = vector.load %arg3[%c0_21, %c0_22, %c1_23, %c0_24] : memref<1x9x9x8xf32, #tpu.memory_space<vmem>>, vector<1x8x8x8xf32>
    %33 = vector.shape_cast %32 : vector<1x8x8x8xf32> to vector<8x8x8xf32>
    %34 = vector.extract_strided_slice %0 {offsets = [1, 2, 0], sizes = [1, 1, 8], strides = [1, 1, 1]} : vector<3x3x8xf32> to vector<1x1x8xf32>
    %35 = vector.broadcast %34 : vector<1x1x8xf32> to vector<8x8x8xf32>
    %36 = arith.mulf %33, %35 : vector<8x8x8xf32>
    %37 = arith.addf %31, %36 : vector<8x8x8xf32>
    %c0_25 = arith.constant 0 : index
    %c1_26 = arith.constant 1 : index
    %c0_27 = arith.constant 0 : index
    %c0_28 = arith.constant 0 : index
    %38 = vector.load %arg1[%c0_25, %c1_26, %c0_27, %c0_28] : memref<1x9x9x8xf32, #tpu.memory_space<vmem>>, vector<1x8x8x8xf32>
    %39 = vector.shape_cast %38 : vector<1x8x8x8xf32> to vector<8x8x8xf32>
    %40 = vector.extract_strided_slice %0 {offsets = [2, 0, 0], sizes = [1, 1, 8], strides = [1, 1, 1]} : vector<3x3x8xf32> to vector<1x1x8xf32>
    %41 = vector.broadcast %40 : vector<1x1x8xf32> to vector<8x8x8xf32>
    %42 = arith.mulf %39, %41 : vector<8x8x8xf32>
    %43 = arith.addf %37, %42 : vector<8x8x8xf32>
    %c0_29 = arith.constant 0 : index
    %c1_30 = arith.constant 1 : index
    %c0_31 = arith.constant 0 : index
    %c0_32 = arith.constant 0 : index
    %44 = vector.load %arg2[%c0_29, %c1_30, %c0_31, %c0_32] : memref<1x9x9x8xf32, #tpu.memory_space<vmem>>, vector<1x8x8x8xf32>
    %45 = vector.shape_cast %44 : vector<1x8x8x8xf32> to vector<8x8x8xf32>
    %46 = vector.extract_strided_slice %0 {offsets = [2, 1, 0], sizes = [1, 1, 8], strides = [1, 1, 1]} : vector<3x3x8xf32> to vector<1x1x8xf32>
    %47 = vector.broadcast %46 : vector<1x1x8xf32> to vector<8x8x8xf32>
    %48 = arith.mulf %45, %47 : vector<8x8x8xf32>
    %49 = arith.addf %43, %48 : vector<8x8x8xf32>
    %c0_33 = arith.constant 0 : index
    %c1_34 = arith.constant 1 : index
    %c1_35 = arith.constant 1 : index
    %c0_36 = arith.constant 0 : index
    %50 = vector.load %arg1[%c0_33, %c1_34, %c1_35, %c0_36] : memref<1x9x9x8xf32, #tpu.memory_space<vmem>>, vector<1x8x8x8xf32>
    %51 = vector.shape_cast %50 : vector<1x8x8x8xf32> to vector<8x8x8xf32>
    %52 = vector.extract_strided_slice %0 {offsets = [2, 2, 0], sizes = [1, 1, 8], strides = [1, 1, 1]} : vector<3x3x8xf32> to vector<1x1x8xf32>
    %53 = vector.broadcast %52 : vector<1x1x8xf32> to vector<8x8x8xf32>
    %54 = arith.mulf %51, %53 : vector<8x8x8xf32>
    %55 = arith.addf %49, %54 : vector<8x8x8xf32>
    %c0_37 = arith.constant 0 : index
    %c0_38 = arith.constant 0 : index
    %c0_39 = arith.constant 0 : index
    %56 = vector.load %arg6[%c0_37, %c0_38, %c0_39] : memref<1x1x8xf32, #tpu.memory_space<vmem>>, vector<1x1x8xf32>
    %57 = vector.broadcast %56 : vector<1x1x8xf32> to vector<8x8x8xf32>
    %58 = arith.addf %55, %57 : vector<8x8x8xf32>
    %cst_40 = arith.constant 0.000000e+00 : f32
    %59 = vector.broadcast %cst_40 : f32 to vector<8x8x8xf32>
    %60 = arith.maximumf %58, %59 : vector<8x8x8xf32>
    %61 = vector.shape_cast %60 : vector<8x8x8xf32> to vector<64x8xf32>
    %c0_41 = arith.constant 0 : index
    %c0_42 = arith.constant 0 : index
    %62 = vector.load %arg7[%c0_41, %c0_42] : memref<8x16xf32, #tpu.memory_space<vmem>>, vector<8x16xf32>
    %cst_43 = arith.constant dense<0.000000e+00> : vector<64x16xf32>
    %63 = tpu.matmul %61, %62, %cst_43 {dimension_numbers = #tpu.dot_dimension_numbers<[1], [0], [0], [1], [0, 0, 1, 1], [], []>} : vector<64x8xf32>, vector<8x16xf32>, vector<64x16xf32> -> vector<64x16xf32>
    %c0_44 = arith.constant 0 : index
    %c0_45 = arith.constant 0 : index
    %64 = vector.load %arg8[%c0_44, %c0_45] : memref<1x16xf32, #tpu.memory_space<vmem>>, vector<1x16xf32>
    %65 = vector.broadcast %64 : vector<1x16xf32> to vector<64x16xf32>
    %66 = arith.addf %63, %65 : vector<64x16xf32>
    %cst_46 = arith.constant 0.000000e+00 : f32
    %67 = vector.broadcast %cst_46 : f32 to vector<64x16xf32>
    %68 = arith.maximumf %66, %67 : vector<64x16xf32>
    %69 = vector.shape_cast %68 : vector<64x16xf32> to vector<8x8x16xf32>
    %c0_47 = arith.constant 0 : index
    %c0_48 = arith.constant 0 : index
    %70 = vector.load %arg10[%c0_47, %c0_48] : memref<64x8xf32, #tpu.memory_space<vmem>>, vector<64x8xf32>
    %c0_49 = arith.constant 0 : index
    %c0_50 = arith.constant 0 : index
    %71 = vector.load %arg11[%c0_49, %c0_50] : memref<8x64xf32, #tpu.memory_space<vmem>>, vector<8x64xf32>
    %c0_51 = arith.constant 0 : index
    %c0_52 = arith.constant 0 : index
    %72 = vector.load %arg9[%c0_51, %c0_52] : memref<1x16xf32, #tpu.memory_space<vmem>>, vector<1x16xf32>
    %73 = vector.shape_cast %72 : vector<1x16xf32> to vector<1x1x16xf32>
    %74 = vector.broadcast %73 : vector<1x1x16xf32> to vector<8x8x16xf32>
    %75 = arith.mulf %69, %74 : vector<8x8x16xf32>
    %cst_53 = arith.constant dense<0.000000e+00> : vector<8x8xf32>
    %76 = vector.multi_reduction <add>, %75, %cst_53 [2] : vector<8x8x16xf32> to vector<8x8xf32>
    %cst_54 = arith.constant dense<0.000000e+00> : vector<64x8xf32>
    %77 = tpu.matmul %70, %76, %cst_54 {dimension_numbers = #tpu.dot_dimension_numbers<[1], [0], [0], [1], [0, 0, 1, 1], [], []>} : vector<64x8xf32>, vector<8x8xf32>, vector<64x8xf32> -> vector<64x8xf32>
    %cst_55 = arith.constant dense<0.000000e+00> : vector<64x64xf32>
    %78 = tpu.matmul %77, %71, %cst_55 {dimension_numbers = #tpu.dot_dimension_numbers<[1], [0], [0], [1], [0, 0, 1, 1], [], []>} : vector<64x8xf32>, vector<8x64xf32>, vector<64x64xf32> -> vector<64x64xf32>
    %cst_56 = arith.constant 0.000000e+00 : f32
    %79 = vector.broadcast %cst_56 : f32 to vector<64x64xf32>
    %80 = arith.subf %79, %78 : vector<64x64xf32>
    %81 = math.exp %80 : vector<64x64xf32>
    %cst_57 = arith.constant 1.000000e+00 : f32
    %82 = vector.broadcast %cst_57 : f32 to vector<64x64xf32>
    %83 = arith.addf %82, %81 : vector<64x64xf32>
    %cst_58 = arith.constant 8.800000e+01 : f32
    %84 = vector.broadcast %cst_58 : f32 to vector<64x64xf32>
    %85 = arith.divf %84, %83 : vector<64x64xf32>
    %c0_59 = arith.constant 0 : index
    %c0_60 = arith.constant 0 : index
    %c0_61 = arith.constant 0 : index
    %c0_62 = arith.constant 0 : index
    %86 = vector.load %arg12[%c0_59, %c0_60, %c0_61, %c0_62] : memref<1x1x64x64xf32, #tpu.memory_space<vmem>>, vector<1x1x64x64xf32>
    %87 = vector.shape_cast %86 : vector<1x1x64x64xf32> to vector<64x64xf32>
    %88 = vector.shape_cast %85 : vector<64x64xf32> to vector<1x1x64x64xf32>
    tpu.vector_store %arg12[%c0_59, %c0_60, %c0_61, %c0_62], %88 {strides = array<i32>} : memref<1x1x64x64xf32, #tpu.memory_space<vmem>>, vector<1x1x64x64xf32>,
    return
  }
  func.func @transform_0(%arg0: i32) -> (i32, i32, i32, i32) {
    %c0_i32 = arith.constant 0 : i32
    %c0_i32_0 = arith.constant 0 : i32
    %c0_i32_1 = arith.constant 0 : i32
    %c0_i32_2 = arith.constant 0 : i32
    return %arg0, %c0_i32, %c0_i32_0, %c0_i32_1 : i32, i32, i32, i32
  }
  func.func @transform_1(%arg0: i32) -> (i32, i32, i32, i32) {
    %c0_i32 = arith.constant 0 : i32
    %c0_i32_0 = arith.constant 0 : i32
    %c0_i32_1 = arith.constant 0 : i32
    %c0_i32_2 = arith.constant 0 : i32
    return %arg0, %c0_i32, %c0_i32_0, %c0_i32_1 : i32, i32, i32, i32
  }
  func.func @transform_2(%arg0: i32) -> (i32, i32, i32, i32) {
    %c0_i32 = arith.constant 0 : i32
    %c0_i32_0 = arith.constant 0 : i32
    %c0_i32_1 = arith.constant 0 : i32
    %c0_i32_2 = arith.constant 0 : i32
    return %arg0, %c0_i32, %c0_i32_0, %c0_i32_1 : i32, i32, i32, i32
  }
  func.func @transform_3(%arg0: i32) -> (i32, i32, i32, i32) {
    %c0_i32 = arith.constant 0 : i32
    %c0_i32_0 = arith.constant 0 : i32
    %c0_i32_1 = arith.constant 0 : i32
    %c0_i32_2 = arith.constant 0 : i32
    return %arg0, %c0_i32, %c0_i32_0, %c0_i32_1 : i32, i32, i32, i32
  }
  func.func @transform_4(%arg0: i32) -> (i32, i32, i32) {
    %c0_i32 = arith.constant 0 : i32
    %c0_i32_0 = arith.constant 0 : i32
    %c0_i32_1 = arith.constant 0 : i32
    %c0_i32_2 = arith.constant 0 : i32
    return %c0_i32, %c0_i32_0, %c0_i32_1 : i32, i32, i32
  }
  func.func @transform_5(%arg0: i32) -> (i32, i32, i32) {
    %c0_i32 = arith.constant 0 : i32
    %c0_i32_0 = arith.constant 0 : i32
    %c0_i32_1 = arith.constant 0 : i32
    %c0_i32_2 = arith.constant 0 : i32
    return %c0_i32, %c0_i32_0, %c0_i32_1 : i32, i32, i32
  }
  func.func @transform_6(%arg0: i32) -> (i32, i32) {
    %c0_i32 = arith.constant 0 : i32
    %c0_i32_0 = arith.constant 0 : i32
    %c0_i32_1 = arith.constant 0 : i32
    return %c0_i32, %c0_i32_0 : i32, i32
  }
  func.func @transform_7(%arg0: i32) -> (i32, i32) {
    %c0_i32 = arith.constant 0 : i32
    %c0_i32_0 = arith.constant 0 : i32
    %c0_i32_1 = arith.constant 0 : i32
    return %c0_i32, %c0_i32_0 : i32, i32
  }
  func.func @transform_8(%arg0: i32) -> (i32, i32) {
    %c0_i32 = arith.constant 0 : i32
    %c0_i32_0 = arith.constant 0 : i32
    %c0_i32_1 = arith.constant 0 : i32
    return %c0_i32, %c0_i32_0 : i32, i32
  }
  func.func @transform_9(%arg0: i32) -> (i32, i32) {
    %c0_i32 = arith.constant 0 : i32
    %c0_i32_0 = arith.constant 0 : i32
    %c0_i32_1 = arith.constant 0 : i32
    return %c0_i32, %c0_i32_0 : i32, i32
  }
  func.func @transform_10(%arg0: i32) -> (i32, i32) {
    %c0_i32 = arith.constant 0 : i32
    %c0_i32_0 = arith.constant 0 : i32
    %c0_i32_1 = arith.constant 0 : i32
    return %c0_i32, %c0_i32_0 : i32, i32
  }
  func.func @transform_11(%arg0: i32) -> (i32, i32, i32, i32) {
    %c0_i32 = arith.constant 0 : i32
    %c0_i32_0 = arith.constant 0 : i32
    %c0_i32_1 = arith.constant 0 : i32
    %c0_i32_2 = arith.constant 0 : i32
    return %arg0, %c0_i32, %c0_i32_0, %c0_i32_1 : i32, i32, i32, i32
  }
}

</mosaic_0001>

<bundles_post_ra>
// kernel: _lambda_.2
= control target key start
LH: loop header
LB: loop body
LE: loop exit
PB: predicated region body
PF: predicated region fallthrough
CT: control target
= control target key end

     0   :  { %s7713_s0 = inlined_call_operand.hbm [shape: f32[2,20,20,16], index: 0, kind: input, shape index: {}, may-alias: {0,1}]   ;;  %s7714_s1 = inlined_call_operand.hbm [shape: f32[2,20,20,16], index: 1, kind: input, shape index: {}, may-alias: {0,1}]   ;;  %s7715_s2 = inlined_call_operand.hbm [shape: f32[5,5,16], index: 2, kind: input, shape index: {}]   ;;  %s7716_s3 = inlined_call_operand.hbm [shape: f32[1,1,16], index: 3, kind: input, shape index: {}]   ;;  %s7717_s4 = inlined_call_operand.hbm [shape: f32[16,8], index: 4, kind: input, shape index: {}]   ;;  %s7718_s5 = inlined_call_operand.hbm [shape: f32[1,8], index: 5, kind: input, shape index: {}]   ;;  %s7719_s6 = inlined_call_operand.hbm [shape: f32[2,16,16,8], index: 6, kind: output, shape index: {}]  }
   0x1   :  { %8078 = sst [smem:[#allocation86_spill]] %s7714_s1 }
   0x2   :  { %8079 = sst [smem:[#allocation87_spill]] %s7716_s3 }
   0x3   :  { %8080 = sst [smem:[#allocation88_spill]] %s7719_s6 }
   0x4   :  { %11 = vsyncpa [#allocation3], 0 }
   0x5   :  { %13 = vsyncpa [#allocation3 + $0x1], 0 }
   0x6   :  { %14 = vsyncpa [#allocation6], 0 }
   0x7   :  { %16 = vsyncpa [#allocation6 + $0x1], 0 }
   0x8   :  { %17 = vsyncpa [#allocation9], 0 }
   0x9   :  { %18 = vsyncpa [#allocation12], 0 }
   0xa   :  { %19 = vsyncpa [#allocation4], 0 }
   0xb   :  { %21 = vsyncpa [#allocation4 + $0x1], 0  ;;  %s4219_s21 = smov 0   ;;  %s4221_s22 = smov 0  }
   0xc   :  { %s4223_s23 = smov 0   ;;  %s4225_s24 = smov 0  }
   0xd   :  { %s4227_s25 = smov 0   ;;  %s4229_s26 = smov 0  }
   0xe   :  { %s4231_s27 = smov 0   ;;  %s4233_s28 = smov 0  }
   0xf   :  { %s4235_s29 = smov 0   ;;  %s4237_s30 = smov 0  }
  0x10   :  { %s4239_s7 = smov 0  }
  0x11 LB: > { %8081 = sst [smem:[#allocation20_spill]] %s4131_s22  ;;  %s4275_s8 = sadd.s32 4294967295, %s4167_s7   ;;  %s4167_s7 = sphi %s4239_s7, %s27_s7   ;;  %s4163_s30 = sphi %s4237_s30, %s8736_s30   ;;  %s4159_s29 = sphi %s4235_s29, %s8735_s29   ;;  %s4155_s28 = sphi %s4233_s28, %s8734_s28   ;;  %s4151_s27 = sphi %s4231_s27, %s8733_s27   ;;  %s4147_s26 = sphi %s4229_s26, %s8732_s26   ;;  %s4143_s25 = sphi %s4227_s25, %s8731_s25   ;;  %s4139_s24 = sphi %s4225_s24, %s8730_s24   ;;  %s4135_s23 = sphi %s4223_s23, %s8729_s23   ;;  %s4131_s22 = sphi %s4221_s22, %s8728_s22   ;;  %s4127_s21 = sphi %s4219_s21, %s8723_s21  }
  0x12   : > { %8082 = sst [smem:[#allocation21_spill]] %s4139_s24  ;;  %s36_s10 = sadd.s32 1, %s4159_s29 }
  0x13   : > { %8083 = sst [smem:[#allocation22_spill]] %s4151_s27  ;;  %s39_s11 = sadd.s32 1, %s4163_s30 }
  0x14   : > { %8084 = sst [smem:[#allocation23_spill]] %s4155_s28  ;;  %p37_p0 = scmp.ge.s32.totalorder %s36_s10, 2 }
  0x15   : > { %s48_s12 = sadd.s32 1, %s4147_s26  ;;  %p55_p1 = scmp.ne.s32.totalorder %s4147_s26, %s4143_s25 }
  0x16   : > { %p56_p2 = scmp.eq.s32.totalorder %s4167_s7, 0  ;;  %s8738_s10 = smov (%p37_p0, %s36_s10), 0 }
  0x17   : > { %8085 = sst [smem:[#allocation24_spill]] %s8738_s10  ;;  %s8740_s11 = smov (!%p37_p0, %s39_s11), %s4163_s30 }
  0x18   : > { %s44_s13 = ssub.s32 %s4159_s29, %s8738_s10  ;;  %p4294_p3 = por %p56_p2, %p55_p1 }
  0x19   : > { %p41_p4 = scmp.ge.s32.totalorder %s8740_s11, 2  ;;  %p7722_p5 = scmp.ne.s32.totalorder %s4143_s25, %s4139_s24 }
  0x1a   : > { %s8086_s14 = scalar_select %p4294_p3, 1, 0 }
  0x1b   : > { %p7728_p6 = scmp.eq.s32.totalorder %s4275_s8, 0  ;;  %s3614_s15 = sshll.u32 %s4159_s29, 1 }
  0x1c   : > { %s8742_s11 = smov (%p41_p4, %s8740_s11), 0  ;;  %s3615_s17 = sadd.s32 2, %s3614_s15 }
  0x1d   : > { %8087 = sst [smem:[#allocation25_spill]] %s8742_s11  ;;  %p4309_p7 = por %p7728_p6, %p7722_p5 }
  0x1e   : > { %s43_s18 = ssub.s32 %s4163_s30, %s8742_s11  ;;  %s3616_s19 = sshll.u32 %s8738_s10, 1 }
  0x1f   : > { %s8088_s16 = scalar_select %p4309_p7, 1, 0 }
  0x20   : > { %s45_s20 = sor.u32 %s44_s13, %s43_s18  ;;  %s3617_s9 = sadd.s32 2, %s3616_s19 }
  0x21   : > { %p46_p8 = scmp.eq.s32.totalorder %s45_s20, 0  ;;  %s76_s6 = ssub.s32 %s3615_s17, %s3617_s9 }
  0x22   : > { %s77_s28 = sor.u32 %s76_s6, %s43_s18  ;;  %s80_s27 = sadd.s32 1, %s4135_s23 }
  0x23   : > { %s4318_s1 = scalar_select %p46_p8, %s4147_s26, %s48_s12  }
  0x24   : > { %p78_p9 = scmp.eq.s32.totalorder %s77_s28, 0  ;;  %p87_p10 = scmp.ne.s32.totalorder %s4135_s23, %s4131_s22 }
  0x25   : > { %8089 = sst [smem:[#allocation26_spill]] %s4318_s1  ;;  %p93_p11 = scmp.ne.s32.totalorder %s4131_s22, %s4127_s21 }
  0x26   : > { %p203_p12 = scmp.eq.s32.totalorder %s4275_s8, 3  ;;  %p4330_p13 = por %p87_p10, %p56_p2 }
  0x27   : > { %s4326_s15 = scalar_select %p78_p9, %s4135_s23, %s80_s27  }
  0x28   : > { %s8091_s13 = scalar_select %p4330_p13, 1, 0 }
  0x29   : > { %8090 = sst [smem:[#allocation27_spill]] %s4326_s15  ;;  %p4336_p0 = por %p93_p11, %p7728_p6 }
  0x2a   : > { %p4343_p4 = por %p203_p12, %p55_p1  ;;  %s8096_s28 = sadd.s32 4294967294, %s4167_s7  }
  0x2b   : > { %s8092_s19 = scalar_select %p4336_p0, 1, 0 }
  0x2c   : > { %s8094_s6 = scalar_select %p4343_p4, 1, 0 }
  0x2d   : > { %8093 = sst [smem:[#allocation28_spill]] %s8092_s19  ;;  %p209_p8 = scmp.eq.s32.totalorder %s8096_s28, 3 }
  0x2e   : > { %8095 = sst [smem:[#allocation29_spill]] %s8094_s6  ;;  %p3568_p5 = scmp.ge.s32.totalorder %s4167_s7, 1 }
  0x2f   : > { %p216_p9 = scmp.lt.s32.totalorder %s4167_s7, 5  ;;  %p8097_p7 = scmp.ne.s32.totalorder %s4143_s25, %s4139_s24 }
  0x30   : > { %s4169_s9 = smov [#allocation8]   ;;  %s4170_s18 = smov [#allocation7]  }
  0x31   : > { %p4354_p3 = por %p209_p8, %p8097_p7  ;;  %p4358_p2 = pnand %p3568_p5, %p216_p9 }
  0x32   : > { %s242_s12 = sshll.u32 %s4169_s9, 4  ;;  %s228_s20 = sshll.u32 %s4170_s18, 4  ;;  %s243_s12 = int_to_ptr.vmem [resolvable:$true] %s242_s12  ;;  %s229_s20 = int_to_ptr.vmem [resolvable:$true] %s228_s20 }
  0x33   : > { %s8098_s21 = scalar_select %p4354_p3, 1, 0 }
  0x34   : > { %s8100_s27 = scalar_select %p4358_p2, 1, 0 }
  0x35   : > { %8099 = sst [smem:[#allocation30_spill]] %s8098_s21  ;;  %p3698_p1 = pneg %p4358_p2 }
  0x36   : > { %s8102_s3 = sld [smem:[#allocation87_spill]] }
  0x37   : > { %p4366_p10 = pnand %p3698_p1, %p7728_p6 }
  0x39   : > { %p4378_p7 = pneg %p4366_p10 }
  0x3c   : > { %s3858_s10 = scalar_lea.hbm %s8102_s3, 16 }
  0x3d   : > { %p3859_p5 = scmp.ne.s32.totalorder %s8102_s3, %s3858_s10  ;;  %p3865_p8 = scmp.lt.u32.totalorder %s3858_s10, %s8102_s3 }
  0x3f   : > { %p3861_p11 = pnand %p4378_p7, %p3859_p5 }
  0x41   : > { %p3862_p12 = pneg %p3861_p11 }
  0x43   : > { %p3867_p9 = pnand %p3865_p8, %p3862_p12 }
  0x45   : > { %3870 = shalt.err (!%p3867_p9)
}
  0x46   : > { %s3871_s11 = scalar_lea.vmem %s243_s12, 16  ;;  %s3878_s1 = scalar_lea.vmem %s243_s12, 32 }
  0x47   : > { %p3872_p1 = scmp.ne.s32.totalorder %s243_s12, %s3871_s11  ;;  %p3879_p4 = scmp.lt.s32.totalorder %s243_s12, %s243_s12 }
  0x48   : > { %p3880_p0 = scmp.lt.s32.totalorder %s3878_s1, %s3871_s11 }
  0x49   : > { %p3874_p6 = pnand %p3872_p1, %p4378_p7 }
  0x4a   : > { %p3881_p2 = por %p3880_p0, %p3879_p4 }
  0x4b   : > { %p3875_p3 = pneg %p3874_p6 }
  0x4d   : > { %p3882_p13 = pnand %p3881_p2, %p3875_p3 }
  0x4f   : > { %3885 = shalt.err (!%p3882_p13)
}
  0x50   : > { %3704 = dma.hbm_to_vmem [thread:$0]  (!%p4366_p10), %s8102_s3, 16, %s243_s12, [#allocation9]  }
  0x51   : > { %s3886_s21 = scalar_lea.hbm %s7715_s2, 640 }
  0x52   : > { %p3887_p6 = scmp.ne.s32.totalorder %s7715_s2, %s3886_s21  ;;  %p3893_p13 = scmp.lt.u32.totalorder %s3886_s21, %s7715_s2 }
  0x54   : > { %p3889_p0 = pnand %p3887_p6, %p4378_p7 }
  0x56   : > { %p3890_p3 = pneg %p3889_p0 }
  0x58   : > { %p3895_p4 = pnand %p3893_p13, %p3890_p3 }
  0x5a   : > { %3898 = shalt.err (!%p3895_p4)
}
  0x5b   : > { %s3899_s15 = scalar_lea.vmem %s229_s20, 640  ;;  %p3907_p12 = scmp.lt.s32.totalorder %s229_s20, %s229_s20 }
  0x5c   : > { %p3900_p2 = scmp.ne.s32.totalorder %s229_s20, %s3899_s15  ;;  %p3908_p8 = scmp.lt.s32.totalorder %s3899_s15, %s3899_s15 }
  0x5e   : > { %p3902_p5 = pnand %p3900_p2, %p4378_p7  ;;  %p3909_p9 = por %p3908_p8, %p3907_p12 }
  0x60   : > { %p3903_p11 = pneg %p3902_p5 }
  0x62   : > { %p3910_p1 = pnand %p3909_p9, %p3903_p11 }
  0x64   : > { %3913 = shalt.err (!%p3910_p1)
}
  0x65   : > { %s4171_s6 = smov 128   ;;  %s4172_s12 = smov 8  }
  0x66   : > { %3701 = dma.hbm_to_vmem [thread:$0]  (!%p4366_p10), %s7715_s2, 640, %s229_s20, [#allocation6], %s4171_s6, %s4171_s6, %s4172_s12  }
  0x67   : > { %s4173_s10 = smov [#allocation10]   ;;  %s4174_s28 = smov [#allocation11]  }
  0x68   : > { %s252_s21 = sshll.u32 %s4173_s10, 4  ;;  %s266_s11 = sshll.u32 %s4174_s28, 4  ;;  %s253_s21 = int_to_ptr.vmem [resolvable:$true] %s252_s21  ;;  %s4412_s11 = int_to_ptr.vmem [resolvable:$true] %s266_s11 }
  0x69   : > { %s3914_s3 = scalar_lea.hbm %s7717_s4, 256 }
  0x6a   : > { %p3915_p6 = scmp.ne.s32.totalorder %s7717_s4, %s3914_s3  ;;  %p3921_p13 = scmp.lt.u32.totalorder %s3914_s3, %s7717_s4 }
  0x6c   : > { %p3917_p0 = pnand %p3915_p6, %p4378_p7 }
  0x6e   : > { %p3918_p3 = pneg %p3917_p0 }
  0x70   : > { %p3923_p4 = pnand %p3921_p13, %p3918_p3 }
  0x72   : > { %3926 = shalt.err (!%p3923_p4)
}
  0x73   : > { %s3927_s24 = scalar_lea.vmem %s253_s21, 256  ;;  %p3935_p12 = scmp.lt.s32.totalorder %s253_s21, %s253_s21 }
  0x74   : > { %p3928_p2 = scmp.ne.s32.totalorder %s253_s21, %s3927_s24  ;;  %p3936_p8 = scmp.lt.s32.totalorder %s3927_s24, %s3927_s24 }
  0x76   : > { %p3930_p5 = pnand %p3928_p2, %p4378_p7  ;;  %p3937_p9 = por %p3936_p8, %p3935_p12 }
  0x78   : > { %p3931_p11 = pneg %p3930_p5 }
  0x7a   : > { %p3938_p1 = pnand %p3937_p9, %p3931_p11 }
  0x7c   : > { %3941 = shalt.err (!%p3938_p1)
}
  0x7d   : > { %3707 = dma.hbm_to_vmem [thread:$0]  (!%p4366_p10), %s7717_s4, 256, %s253_s21, [#allocation9], %s4171_s6, %s4171_s6, %s4172_s12  }
  0x7e   : > { %s3942_s28 = scalar_lea.hbm %s7718_s5, 16 }
  0x7f   : > { %p3943_p6 = scmp.ne.s32.totalorder %s7718_s5, %s3942_s28  ;;  %p3949_p13 = scmp.lt.u32.totalorder %s3942_s28, %s7718_s5 }
  0x81   : > { %p3945_p0 = pnand %p3943_p6, %p4378_p7 }
  0x83   : > { %p3946_p3 = pneg %p3945_p0 }
  0x85   : > { %p3951_p4 = pnand %p3949_p13, %p3946_p3 }
  0x87   : > { %3954 = shalt.err (!%p3951_p4)
}
  0x88   : > { %s3955_s6 = scalar_lea.vmem %s4412_s11, 16  ;;  %s3962_s12 = scalar_lea.vmem %s4412_s11, 32 }
  0x89   : > { %p3956_p2 = scmp.ne.s32.totalorder %s4412_s11, %s3955_s6  ;;  %p3963_p12 = scmp.lt.s32.totalorder %s4412_s11, %s4412_s11 }
  0x8a   : > { %p3964_p8 = scmp.lt.s32.totalorder %s3962_s12, %s3955_s6 }
  0x8b   : > { %p3958_p5 = pnand %p3956_p2, %p4378_p7 }
  0x8c   : > { %p3965_p9 = por %p3964_p8, %p3963_p12 }
  0x8d   : > { %p3959_p11 = pneg %p3958_p5 }
  0x8f   : > { %p3966_p1 = pnand %p3965_p9, %p3959_p11 }
  0x91   : > { %3969 = shalt.err (!%p3966_p1)
}
  0x92   : > { %3710 = dma.hbm_to_vmem [thread:$0]  (!%p4366_p10), %s7718_s5, 16, %s4412_s11, [#allocation12]  }
  0x93   : > { %p3573_p6 = scmp.ge.s32.totalorder %s4167_s7, 4 }
  0x94   : > { %p8104_p7 = scmp.ne.s32.totalorder (!%p3573_p6), %s8086_s14, 0 }
  0x95   : > { %273 = sbr.rel (%p3573_p6) target bundleno = 217 (0xd9), region = 32 }
  0x9c   : > { %276 = sbr.rel (!%p8104_p7) target bundleno = 186 (0xba), region = 36  ;;  %s277_s9 = sand.u32 (%p8104_p7), 1, %s4147_s26  }
  0x9d   : > { %s3671_s22 = smul.u32 (%p8104_p7), 192, %s277_s9  ;;  %s4460_s19 = scalar_lea.sflag (%p8104_p7), [#allocation3], %s277_s9 }
  0x9e   : > { %s3672_s17 = smul.u32 (%p8104_p7), 24, %s4159_s29  ;;  %s3974_s21 = scalar_lea.hbm (%p8104_p7), %s7713_s0, 15360 }
  0x9f   : > { %s281_s3 = scalar_lea.vmem (%p8104_p7), [#allocation2], %s3671_s22  ;;  %s3673_s10 = smul.u32 (%p8104_p7), 60, %s4163_s30 }
  0xa0   : > { %s299_s28 = sshll.u32 (%p8104_p7), %s281_s3, 4  ;;  %s4464_s28 = int_to_ptr.vmem [resolvable:$true] %s299_s28 }
  0xa1   : > { %s294_s11 = sadd.s32 (%p8104_p7), %s3673_s10, %s3672_s17 }
  0xa2   : > { %s3579_s1 = sshll.u32 (%p8104_p7), %s294_s11, 7 }
  0xa3   : > { %s296_s14 = scalar_lea.hbm %s7713_s0, %s3579_s1 }
  0xa4   : > { %s3970_s20 = scalar_lea.hbm %s296_s14, 3072  ;;  %p3975_p0 = scmp.lt.u32.totalorder %s296_s14, %s7713_s0 }
  0xa5   : > { %p3971_p10 = scmp.ne.s32.totalorder %s296_s14, %s3970_s20  ;;  %p3976_p3 = scmp.lt.u32.totalorder %s3974_s21, %s3970_s20 }
  0xa6   : > { %p3978_p4 = scmp.lt.u32.totalorder %s3970_s20, %s296_s14 }
  0xa7   : > { %p3977_p13 = por %p3976_p3, %p3975_p0 }
  0xa9   : > { %p3979_p2 = por %p3978_p4, %p3977_p13 }
  0xab   : > { %p3980_p5 = pnand %p3979_p2, %p3971_p10 }
  0xad   : > { %3983 = shalt.err (!%p3980_p5)
}
  0xae   : > { %s3984_s22 = scalar_lea.vmem %s4464_s28, 3072  ;;  %s4175_s3 = smov [#allocation2]  }
  0xaf   : > { %p3985_p11 = scmp.ne.s32.totalorder %s4464_s28, %s3984_s22  ;;  %s3988_s17 = sshll.u32 %s4175_s3, 4  ;;  %s3989_s17 = int_to_ptr.vmem [resolvable:$false] %s3988_s17 }
  0xb0   : > { %s3990_s10 = scalar_lea.vmem %s3989_s17, 6144  ;;  %p3991_p12 = scmp.lt.s32.totalorder %s4464_s28, %s3989_s17 }
  0xb1   : > { %p3992_p8 = scmp.lt.s32.totalorder %s3990_s10, %s3984_s22 }
  0xb3   : > { %p3993_p9 = por %p3992_p8, %p3991_p12 }
  0xb5   : > { %p3994_p1 = pnand %p3993_p9, %p3985_p11 }
  0xb7   : > { %3997 = shalt.err (!%p3994_p1)
}
  0xb8   : > { %s4176_s11 = smov 128   ;;  %s4177_s1 = smov 8  }
  0xb9   : > { %305 = dma.hbm_to_vmem [thread:$0]  %s296_s14, 3072, %s4464_s28, %s4460_s19, %s4176_s11, %s4176_s11, %s4177_s1  }
  0xba PF: > { %s309_s15 = sand.u32 1, %s4167_s7   ;;  %s311_s18 = sand.u32 1, %s4135_s23  }
  0xbb   : > { %s3674_s20 = smul.u32 96, %s311_s18  ;;  %s8105_s19 = sld [smem:[#allocation86_spill]] }
  0xbc   : > { %s3452_s6 = smul.u32 24, %s4159_s29  ;;  %s4491_s10 = scalar_lea.sflag [#allocation6], %s309_s15 }
  0xbd   : > { %s3453_s12 = smul.u32 60, %s4163_s30  ;;  %s313_s21 = scalar_lea.vmem [#allocation5], %s3674_s20 }
  0xbe   : > { %s325_s24 = sshll.u32 %s313_s21, 4  ;;  %p8106_p7 = scmp.ne.s32.totalorder %s8091_s13, 0  ;;  %s4484_s24 = int_to_ptr.vmem [resolvable:$true] %s325_s24 }
  0xbf   : > { %s3454_s9 = sadd.s32 %s3453_s12, %s3452_s6 }
  0xc0   : > { %s3582_s22 = sshll.u32 %s3454_s9, 7 }
  0xc1   : > { %s3456_s28 = scalar_lea.hbm %s8105_s19, %s3582_s22  ;;  %s4002_s20 = scalar_lea.hbm %s8105_s19, 15360 }
  0xc2   : > { %s4489_s14 = scalar_lea.hbm %s3456_s28, 3072  ;;  %s4026_s11 = scalar_lea.hbm %s3456_s28, 4608 }
  0xc3   : > { %p3999_p6 = scmp.ne.s32.totalorder %s4489_s14, %s4026_s11  ;;  %p4003_p3 = scmp.lt.u32.totalorder %s4489_s14, %s8105_s19 }
  0xc4   : > { %p4004_p13 = scmp.lt.u32.totalorder %s4002_s20, %s4026_s11  ;;  %p4006_p2 = scmp.lt.u32.totalorder %s4026_s11, %s4489_s14 }
  0xc5   : > { %p4000_p10 = pnand %p3999_p6, %p8106_p7 }
  0xc6   : > { %p4005_p4 = por %p4004_p13, %p4003_p3 }
  0xc7   : > { %p4001_p0 = pneg %p4000_p10 }
  0xc8   : > { %p4007_p5 = por %p4006_p2, %p4005_p4 }
  0xca   : > { %p4008_p11 = pnand %p4007_p5, %p4001_p0 }
  0xcc   : > { %4011 = shalt.err (!%p4008_p11)
}
  0xcd   : > { %s4012_s15 = scalar_lea.vmem %s4484_s24, 1536  ;;  %s4178_s21 = smov [#allocation5]  }
  0xce   : > { %p4013_p12 = scmp.ne.s32.totalorder %s4484_s24, %s4012_s15  ;;  %s4016_s9 = sshll.u32 %s4178_s21, 4  ;;  %s4017_s9 = int_to_ptr.vmem [resolvable:$false] %s4016_s9 }
  0xcf   : > { %s4018_s22 = scalar_lea.vmem %s4017_s9, 3072  ;;  %p4019_p1 = scmp.lt.s32.totalorder %s4484_s24, %s4017_s9 }
  0xd0   : > { %p4014_p8 = pnand %p4013_p12, %p8106_p7  ;;  %p4020_p6 = scmp.lt.s32.totalorder %s4018_s22, %s4012_s15 }
  0xd2   : > { %p4015_p9 = pneg %p4014_p8  ;;  %p4021_p10 = por %p4020_p6, %p4019_p1 }
  0xd4   : > { %p4022_p3 = pnand %p4021_p10, %p4015_p9 }
  0xd6   : > { %4025 = shalt.err (!%p4022_p3)
}
  0xd7   : > { %s4179_s3 = smov 128   ;;  %s4180_s17 = smov 8  }
  0xd8   : > { %3685 = dma.hbm_to_vmem [thread:$0]  (%p8106_p7), %s4489_s14, 1536, %s4484_s24, %s4491_s10, %s4179_s3, %s4179_s3, %s4180_s17  }
  0xd9 PF: > { %p8107_p0 = scmp.ne.s32.totalorder %s8100_s27, 0 }
  0xdb   : > { %337 = sbr.rel (%p8107_p0) target bundleno = 1000 (0x3e8), region = 44 }
  0xe2   : > { %s4517_s28 = sand.u32 1, %s4143_s25   ;;  %p8108_p13 = scmp.ne.s32.totalorder %s8088_s16, 0 }
  0xe3   : > { %s3675_s11 = smul.u32 192, %s4517_s28  ;;  %s340_s1 = scalar_lea.sflag [#allocation3], %s4517_s28 }
  0xe5   : > { %s4521_s18 = scalar_lea.vmem [#allocation2], %s3675_s11 }
  0xe6   : > { %4100 = dma.done.wait (%p8108_p13), %s340_s1, 3072  }
  0xe7   : > { %4102 = vsyncadd (%p8108_p13), %s340_s1, 4294964224  ;;  %s8109_s13 = sld [smem:[#allocation20_spill]]  ;;  %s348_s27 = sand.u32 1, %s4275_s8  }
  0xe8   : > { %s8110_s24 = sld [smem:[#allocation28_spill]]  ;;  %s349_s20 = scalar_lea.sflag [#allocation6], %s348_s27 }
  0xed   : > { %s350_s14 = sand.u32 1, %s8109_s13  }
  0xee   : > { %s3676_s10 = smul.u32 96, %s350_s14  ;;  %p8111_p7 = scmp.ne.s32.totalorder %s8110_s24, 0 }
  0xf0   : > { %s4529_s6 = scalar_lea.vmem [#allocation5], %s3676_s10 }
  0xf1   : > { %4104 = dma.done.wait (%p8111_p7), %s349_s20, 1536  }
  0xf2   : > { %4106 = vsyncadd (%p8111_p7), %s349_s20, 4294965760  ;;  %p8112_p4 = scmp.eq.s32.totalorder %s4275_s8, 0 }
  0xf4   : > { %4108 = dma.done.wait (%p8112_p4), [#allocation6], 640   ;;  %p8113_p2 = pmov %p8112_p4 }
  0xf6   : > { %4110 = vsyncadd (%p8113_p2), [#allocation6], 4294966656  ;;  %p8114_p5 = pmov %p8113_p2 }
  0xf7   : > { %p8115_p11 = pmov %p8113_p2 }
  0xf8   : > { %4112 = dma.done.wait (%p8114_p5), [#allocation9], 272  }
  0xf9   : > { %4114 = vsyncadd (%p8115_p11), [#allocation9], 4294967024  ;;  %p8116_p12 = pmov %p8113_p2 }
  0xfa   : > { %p8117_p8 = pmov %p8113_p2 }
  0xfb   : > { %4116 = dma.done.wait (%p8116_p12), [#allocation12], 16  }
  0xfc   : > { %4118 = vsyncadd (%p8117_p8), [#allocation12], 4294967280  ;;  %v453_v0 = vlaneseq  ;;  %v3156_v2 = vld [vmem:[#allocation10] sm:$0xff]  ;;  %v3157_v3 = vld [vmem:[#allocation10 + $0x8] sm:$0xff]  ;;  %vm541_vm0 = vcmask 1046528   ;;  %vm666_vm1 = vcmask 1045504  }
  0xfd   : > { %v3665_v5 = vpack.c.bf16 %v3157_v3, %v3156_v2  ;;  %v412_v10 = vld [vmem:[%s4521_s18] sm:$0xff]  ;;  %v4559_v11 = vld [vmem:[%s4521_s18 + $0x8] sm:$0xff]  ;;  %vm791_vm2 = vcmask 1044480   ;;  %v4605_v33 = vld [vmem:[%s4521_s18 + $0x18] sm:$0xff]  ;;  %vm916_vm3 = vcmask 1043456   ;;  %vm3165_vm4 = vcmask 130048  }
  0xfe   : > { %v454_v1 = vshrl.u32 %v453_v0, 7  ;;  %v448_v12 = vld [vmem:[#allocation7] sm:$0x1f]  ;;  %v449_v13 = vld [vmem:[#allocation7 + $0x8] sm:$0x1f]  ;;  %8118 = vst [vmem:[#allocation31_spill] sm:$0xff] %v4605_v33 }
  0xff   : > { %3666 = vmatprep.subr.bf16.mxu0 %v3665_v5  ;;  %3669 = vmatprep.subr.bf16.mxu1 %v3665_v5  ;;  %v4613_v38 = vld [vmem:[%s4521_s18 + $0x20] sm:$0xff]  ;;  %v450_v43 = vld [vmem:[#allocation7 + $0x10] sm:$0x1f]  ;;  %s3588_s8 = sshll.u32 %s4517_s28, 7  ;;  %vm3375_vm5 = vcmask 64512   ;;  %s8715_s12 = sld [smem:[#allocation22_spill]] }
 0x100   : > { %v4547_v4 = vsub.s32 0, %v454_v1  ;;  %v4549_v6 = vsub.s32 1, %v454_v1  ;;  %v4551_v7 = vsub.s32 2, %v454_v1  ;;  %v4553_v8 = vsub.s32 3, %v454_v1  ;;  %3668 = vmatpush3.bf16.msra.mxu0 %v3665_v5  ;;  %3670 = vmatpush3.bf16.msra.mxu1 %v3665_v5  ;;  %v4660_v63 = vld [vmem:[%s4521_s18 + $0x30] sm:$0xff]  ;;  %v4675_v5 = vld [vmem:[%s4521_s18 + $0x38] sm:$0xff] }
 0x101   : > { %v4555_v9 = vsub.s32 4, %v454_v1  ;;  %8120 = vst [vmem:[#allocation33_spill] sm:$0xff] %v4660_v63  ;;  %s7544_s16 = scalar_lea.vmem [#allocation13], %s3588_s8  ;;  %s8716_s15 = sld [smem:[#allocation23_spill]] }
 0x102   : > { %v4562_v14 = vrot.slane %v448_v12, %v4547_v4  ;;  %v4565_v15 = vrot.slane %v448_v12, %v4549_v6  ;;  %v4568_v16 = vrot.slane %v448_v12, %v4551_v7  ;;  %v4571_v17 = vrot.slane %v448_v12, %v4553_v8  ;;  %s8717_s3 = sld [smem:[#allocation29_spill]]  ;;  %s3409_s11 = sshll.u32 %s7544_s16, 4  ;;  %s7646_s11 = int_to_ptr.vmem [resolvable:$true] %s3409_s11 }
 0x103   : > { %v4574_v18 = vrot.slane %v448_v12, %v4555_v9  ;;  %v4577_v19 = vrot.slane %v449_v13, %v4549_v6  ;;  %v4580_v20 = vrot.slane %v449_v13, %v4551_v7  ;;  %v4610_v37 = vrot.slane %v449_v13, %v4547_v4  ;;  %s8718_s13 = sld [smem:[#allocation88_spill]]  ;;  %s3393_s27 = scalar_lea.sflag [#allocation4], %s4517_s28 }
 0x104   : > { %v457_v21 = vmul.f32 %v4562_v14, %v412_v10  ;;  %v493_v22 = vmul.f32 %v4565_v15, %v412_v10  ;;  %v4586_v23 = vmul.f32 %v4565_v15, %v4559_v11  ;;  %v618_v24 = vmul.f32 %v4568_v16, %v412_v10  ;;  %s4027_s14 = scalar_lea.vmem %s7646_s11, 2048  ;;  %s4181_s10 = smov [#allocation13]  }
 0x105   : > { %v4591_v25 = vmul.f32 %v4568_v16, %v4559_v11  ;;  %v743_v26 = vmul.f32 %v4571_v17, %v412_v10  ;;  %v4596_v27 = vmul.f32 %v4571_v17, %v4559_v11  ;;  %v868_v28 = vmul.f32 %v4574_v18, %v412_v10  ;;  %s3618_s21 = sshll.u32 %s8715_s12, 4  ;;  %p4028_p9 = scmp.ne.s32.totalorder %s7646_s11, %s4027_s14 }
 0x106   : > { %v542_v29 = vrot.slane %v493_v22, 1  ;;  %v7747_v30 = vrot.slane %v4586_v23, 1  ;;  %v667_v31 = vrot.slane %v618_v24, 2  ;;  %v4602_v32 = vmul.f32 %v4574_v18, %v4559_v11  ;;  %s4031_s20 = sshll.u32 %s4181_s10, 4  ;;  %s4032_s20 = int_to_ptr.vmem [resolvable:$false] %s4031_s20 }
 0x107   : > { %v7746_v34 = vrot.slane %v4591_v25, 2  ;;  %v792_v35 = vrot.slane %v743_v26, 3  ;;  %v7745_v36 = vrot.slane %v4596_v27, 3  ;;  %v917_v40 = vrot.slane %v868_v28, 4  ;;  %s3610_s9 = sshll.u32 %s8716_s15, 5  ;;  %p4034_p3 = scmp.lt.s32.totalorder %s7646_s11, %s4032_s20 }
 0x108   : > { %v544_v39 = vsel %vm541_vm0, %v542_v29, %v7747_v30  ;;  %v7744_v41 = vrot.slane %v4602_v32, 4  ;;  %v1029_v42 = vmul.f32 %v4577_v19, %v4605_v33  ;;  %v4626_v46 = vmul.f32 %v4577_v19, %v4613_v38  ;;  %s3406_s22 = sadd.s32 %s3618_s21, %s3610_s9  ;;  %p8719_p1 = scmp.ne.s32.totalorder %s8717_s3, 0 }
 0x109   : > { %v598_v44 = vadd.f32 %v544_v39, %v457_v21  ;;  %v669_v45 = vsel %vm666_vm1, %v667_v31, %v7746_v34  ;;  %v794_v47 = vsel %vm791_vm2, %v792_v35, %v7745_v36  ;;  %v1153_v49 = vmul.f32 %v4580_v20, %v4605_v33  ;;  %s3611_s17 = sshll.u32 %s3406_s22, 7 }
 0x10a   : > { %v1077_v48 = vrot.slane %v1029_v42, 1  ;;  %v4635_v50 = vmul.f32 %v4580_v20, %v4613_v38  ;;  %v7742_v52 = vrot.slane %v4626_v46, 1  ;;  %v4639_v53 = vrot.slane %v449_v13, %v4553_v8  ;;  %s7644_s24 = scalar_lea.hbm %s8718_s13, %s3611_s17  ;;  %p4029_p6 = pnand %p4028_p9, %p8719_p1 }
 0x10b   : > { %v723_v51 = vadd.f32 %v669_v45, %v598_v44  ;;  %v4642_v54 = vrot.slane %v449_v13, %v4555_v9  ;;  %v919_v55 = vsel %vm916_vm3, %v917_v40, %v7744_v41  ;;  %v993_v56 = vmul.f32 %v4610_v37, %v4605_v33  ;;  %v451_v40 = vld [vmem:[#allocation7 + $0x18] sm:$0x1f] }
 0x10c   : > { %v1201_v57 = vrot.slane %v1153_v49, 2  ;;  %v4650_v58 = vrot.slane %v450_v43, %v4549_v6  ;;  %v7741_v60 = vrot.slane %v4635_v50, 2  ;;  %v1277_v61 = vmul.f32 %v4639_v53, %v4605_v33  ;;  %p4030_p10 = pneg %p4029_p6 }
 0x10d   : > { %v848_v59 = vadd.f32 %v794_v47, %v723_v51  ;;  %v4657_v62 = vmul.f32 %v4639_v53, %v4613_v38  ;;  %v1079_v0 = vsel %vm541_vm0, %v1077_v48, %v7742_v52  ;;  %v1401_v1 = vmul.f32 %v4642_v54, %v4605_v33 }
 0x10e   : > { %v4669_v2 = vmul.f32 %v4642_v54, %v4613_v38  ;;  %v4672_v3 = vrot.slane %v450_v43, %v4547_v4  ;;  %v1325_v12 = vrot.slane %v1277_v61, 3  ;;  %v1561_v21 = vmul.f32 %v4650_v58, %v4660_v63 }
 0x10f   : > { %8119 = vst [vmem:[#allocation32_spill] sm:$0xff] %v4657_v62  ;;  %v973_v10 = vadd.f32 %v919_v55, %v848_v59  ;;  %v7740_v13 = vrot.slane %v4657_v62, 3  ;;  %v1449_v22 = vrot.slane %v1401_v1, 4  ;;  %v4683_v26 = vmul.f32 %v4650_v58, %v4675_v5  ;;  %v4897_v62 = vld [vmem:[%s4521_s18 + $0x80] sm:$0xff] }
 0x110   : > { %8121 = vst [vmem:[#allocation34_spill] sm:$0xff] %v4669_v2  ;;  %8122 = vst [vmem:[#allocation35_spill] sm:$0xff] %v4672_v3  ;;  %v7739_v24 = vrot.slane %v4669_v2, 4  ;;  %v4686_v28 = vrot.slane %v450_v43, %v4551_v7  ;;  %v1203_v31 = vsel %vm666_vm1, %v1201_v57, %v7741_v60  ;;  %v1609_v35 = vrot.slane %v1561_v21, 1 }
 0x111   : > { %8123 = vst [vmem:[#allocation36_spill] sm:$0xff] %v4683_v26  ;;  %v1009_v29 = vadd.f32 %v993_v56, %v973_v10  ;;  %v4692_v39 = vrot.slane %v450_v43, %v4553_v8  ;;  %v1525_v42 = vmul.f32 %v4672_v3, %v4660_v63  ;;  %v7738_v44 = vrot.slane %v4683_v26, 1  ;;  %8153 = vst [vmem:[#allocation61_spill] sm:$0xff] %v4897_v62 }
 0x112   : > { %v1685_v45 = vmul.f32 %v4686_v28, %v4660_v63  ;;  %v4701_v47 = vmul.f32 %v4686_v28, %v4675_v5  ;;  %v4710_v55 = vrot.slane %v450_v43, %v4555_v9  ;;  %v1327_v56 = vsel %vm791_vm2, %v1325_v12, %v7740_v13 }
 0x113   : > { %v1133_v48 = vadd.f32 %v1079_v0, %v1009_v29  ;;  %v1809_v49 = vmul.f32 %v4692_v39, %v4660_v63  ;;  %v4707_v51 = vmul.f32 %v4692_v39, %v4675_v5  ;;  %v1451_v57 = vsel %vm916_vm3, %v1449_v22, %v7739_v24 }
 0x114   : > { %8124 = vst [vmem:[#allocation37_spill] sm:$0xff] %v4701_v47  ;;  %8126 = vst [vmem:[#allocation39_spill] sm:$0xff] %v4710_v55  ;;  %v1733_v59 = vrot.slane %v1685_v45, 2  ;;  %v7743_v61 = vrot.slane %v4701_v47, 2  ;;  %v1611_v1 = vsel %vm541_vm0, %v1609_v35, %v7738_v44  ;;  %v1933_v43 = vmul.f32 %v4710_v55, %v4660_v63  ;;  %v4739_v45 = vld [vmem:[%s4521_s18 + $0x50] sm:$0xff] }
 0x115   : > { %8125 = vst [vmem:[#allocation38_spill] sm:$0xff] %v4707_v51  ;;  %v1257_v0 = vadd.f32 %v1203_v31, %v1133_v48  ;;  %v4725_v10 = vrot.slane %v451_v40, %v4547_v4  ;;  %v1857_v21 = vrot.slane %v1809_v49, 3  ;;  %v7754_v12 = vrot.slane %v4707_v51, 3  ;;  %v4736_v31 = vld [vmem:[%s4521_s18 + $0x48] sm:$0xff]  ;;  %8129 = vst [vmem:[#allocation42_spill] sm:$0xff] %v4739_v45 }
 0x116   : > { %v4730_v22 = vmul.f32 %v4710_v55, %v4675_v5  ;;  %v4733_v29 = vrot.slane %v451_v40, %v4549_v6  ;;  %8128 = vst [vmem:[#allocation41_spill] sm:$0xff] %v4736_v31  ;;  %v1735_v48 = vsel %vm666_vm1, %v1733_v59, %v7743_v61  ;;  %v1981_v44 = vrot.slane %v1933_v43, 4 }
 0x117   : > { %v1381_v35 = vadd.f32 %v1327_v56, %v1257_v0  ;;  %v4745_v49 = vrot.slane %v451_v40, %v4551_v7  ;;  %v4755_v52 = vrot.slane %v451_v40, %v4553_v8  ;;  %v4764_v43 = vrot.slane %v451_v40, %v4555_v9 }
 0x118   : > { %8127 = vst [vmem:[#allocation40_spill] sm:$0xff] %v4730_v22  ;;  %v2093_v13 = vmul.f32 %v4733_v29, %v4736_v31  ;;  %v4752_v60 = vmul.f32 %v4733_v29, %v4739_v45  ;;  %v2057_v61 = vmul.f32 %v4725_v10, %v4736_v31 }
 0x119   : > { %v1505_v56 = vadd.f32 %v1451_v57, %v1381_v35  ;;  %v2217_v59 = vmul.f32 %v4745_v49, %v4736_v31  ;;  %v4761_v0 = vmul.f32 %v4745_v49, %v4739_v45  ;;  %v2341_v34 = vmul.f32 %v4755_v52, %v4736_v31  ;;  %v452_v57 = vld [vmem:[#allocation7 + $0x20] sm:$0x1f] }
 0x11a   : > { %8130 = vst [vmem:[#allocation43_spill] sm:$0xff] %v4752_v60  ;;  %v2141_v41 = vrot.slane %v2093_v13, 1  ;;  %v4774_v40 = vmul.f32 %v4755_v52, %v4739_v45  ;;  %v1859_v13 = vsel %vm791_vm2, %v1857_v21, %v7754_v12  ;;  %v2465_v36 = vmul.f32 %v4764_v43, %v4736_v31 }
 0x11b   : > { %8131 = vst [vmem:[#allocation44_spill] sm:$0xff] %v4761_v0  ;;  %v1541_v35 = vadd.f32 %v1525_v42, %v1505_v56  ;;  %v2265_v30 = vrot.slane %v2217_v59, 2  ;;  %v2389_v63 = vrot.slane %v2341_v34, 3  ;;  %v4783_v42 = vmul.f32 %v4764_v43, %v4739_v45 }
 0x11c   : > { %8132 = vst [vmem:[#allocation45_spill] sm:$0xff] %v4774_v40  ;;  %v8134_v59 = vrot.slane %v4730_v22, 4  ;;  %v8135_v33 = vrot.slane %v4752_v60, 1  ;;  %v8136_v34 = vrot.slane %v4761_v0, 2  ;;  %v4796_v12 = vrot.slane %v452_v57, %v4547_v4 }
 0x11d   : > { %8133 = vst [vmem:[#allocation46_spill] sm:$0xff] %v4783_v42  ;;  %v1665_v56 = vadd.f32 %v1611_v1, %v1541_v35  ;;  %v4799_v31 = vrot.slane %v452_v57, %v4549_v6  ;;  %v4802_v1 = vrot.slane %v452_v57, %v4551_v7  ;;  %v4808_v35 = vld [vmem:[%s4521_s18 + $0x68] sm:$0xff]  ;;  %v4812_v51 = vrot.slane %v452_v57, %v4553_v8 }
 0x11e   : > { %v1983_v24 = vsel %vm916_vm3, %v1981_v44, %v8134_v59  ;;  %v2143_v47 = vsel %vm541_vm0, %v2141_v41, %v8135_v33  ;;  %v2267_v21 = vsel %vm666_vm1, %v2265_v30, %v8136_v34  ;;  %8137 = vst [vmem:[#allocation47_spill] sm:$0xff] %v4796_v12  ;;  %v4805_v44 = vld [vmem:[%s4521_s18 + $0x60] sm:$0xff]  ;;  %8141 = vst [vmem:[#allocation51_spill] sm:$0xff] %v4808_v35  ;;  %v2513_v41 = vrot.slane %v2465_v36, 4 }
 0x11f   : > { %8138 = vst [vmem:[#allocation48_spill] sm:$0xff] %v4799_v31  ;;  %8139 = vst [vmem:[#allocation49_spill] sm:$0xff] %v4802_v1  ;;  %v1789_v33 = vadd.f32 %v1735_v48, %v1665_v56  ;;  %v8142_v4 = vrot.slane %v4774_v40, 3  ;;  %v2625_v6 = vmul.f32 %v4799_v31, %v4805_v44  ;;  %v4821_v7 = vmul.f32 %v4799_v31, %v4808_v35 }
 0x120   : > { %8140 = vst [vmem:[#allocation50_spill] sm:$0xff] %v4805_v44  ;;  %v2749_v48 = vmul.f32 %v4802_v1, %v4805_v44  ;;  %v4827_v56 = vmul.f32 %v4802_v1, %v4808_v35  ;;  %v2873_v8 = vmul.f32 %v4812_v51, %v4805_v44  ;;  %v4837_v40 = vrot.slane %v452_v57, %v4555_v9 }
 0x121   : > { %v2391_v30 = vsel %vm791_vm2, %v2389_v63, %v8142_v4  ;;  %8143 = vst [vmem:[#allocation52_spill] sm:$0xff] %v4821_v7  ;;  %v1913_v36 = vadd.f32 %v1859_v13, %v1789_v33  ;;  %v4833_v63 = vmul.f32 %v4812_v51, %v4808_v35  ;;  %v2673_v34 = vrot.slane %v2625_v6, 1 }
 0x122   : > { %8144 = vst [vmem:[#allocation53_spill] sm:$0xff] %v4827_v56  ;;  %v7764_v4 = vrot.slane %v4821_v7, 1  ;;  %v2797_v59 = vrot.slane %v2749_v48, 2  ;;  %v8146_v13 = vrot.slane %v4783_v42, 4  ;;  %v2589_v60 = vmul.f32 %v4796_v12, %v4805_v44 }
 0x123   : > { %8145 = vst [vmem:[#allocation54_spill] sm:$0xff] %v4833_v63  ;;  %v2037_v0 = vadd.f32 %v1983_v24, %v1913_v36  ;;  %v7765_v22 = vrot.slane %v4827_v56, 2  ;;  %v2921_v26 = vrot.slane %v2873_v8, 3  ;;  %v2997_v6 = vmul.f32 %v4837_v40, %v4805_v44 }
 0x124   : > { %v2515_v33 = vsel %vm916_vm3, %v2513_v41, %v8146_v13  ;;  %v4850_v9 = vmul.f32 %v4837_v40, %v4808_v35  ;;  %v2675_v57 = vsel %vm541_vm0, %v2673_v34, %v7764_v4  ;;  %v465_v41 = vmul.f32 %v4562_v14, %v4805_v44 }
 0x125   : > { %v2073_v24 = vadd.f32 %v2057_v61, %v2037_v0  ;;  %v505_v48 = vmul.f32 %v4565_v15, %v4805_v44  ;;  %v2799_v36 = vsel %vm666_vm1, %v2797_v59, %v7765_v22  ;;  %v3045_v8 = vrot.slane %v2997_v6, 4 }
 0x126   : > { %8147 = vst [vmem:[#allocation55_spill] sm:$0xff] %v4850_v9  ;;  %v4864_v13 = vmul.f32 %v4565_v15, %v4808_v35  ;;  %v630_v61 = vmul.f32 %v4568_v16, %v4805_v44  ;;  %v4870_v4 = vmul.f32 %v4568_v16, %v4808_v35  ;;  %v755_v45 = vmul.f32 %v4571_v17, %v4805_v44 }
 0x127   : > { %v2197_v0 = vadd.f32 %v2143_v47, %v2073_v24  ;;  %v562_v34 = vrot.slane %v505_v48, 1  ;;  %v4878_v56 = vmul.f32 %v4571_v17, %v4808_v35  ;;  %v4881_v47 = vld [vmem:[%s4521_s18 + $0x78] sm:$0xff]  ;;  %v880_v42 = vmul.f32 %v4574_v18, %v4805_v44 }
 0x128   : > { %8148 = vst [vmem:[#allocation56_spill] sm:$0xff] %v4864_v13  ;;  %8149 = vst [vmem:[#allocation57_spill] sm:$0xff] %v4870_v4  ;;  %v7774_v6 = vrot.slane %v4864_v13, 1  ;;  %v687_v22 = vrot.slane %v630_v61, 2  ;;  %v7778_v24 = vrot.slane %v4870_v4, 2  ;;  %v812_v48 = vrot.slane %v755_v45, 3 }
 0x129   : > { %8150 = vst [vmem:[#allocation58_spill] sm:$0xff] %v4878_v56  ;;  %v2321_v7 = vadd.f32 %v2267_v21, %v2197_v0  ;;  %8151 = vst [vmem:[#allocation59_spill] sm:$0xff] %v4881_v47  ;;  %v7777_v2 = vrot.slane %v4878_v56, 3  ;;  %v4892_v61 = vmul.f32 %v4574_v18, %v4808_v35  ;;  %v1001_v21 = vmul.f32 %v4610_v37, %v4881_v47 }
 0x12a   : > { %v564_v59 = vsel %vm541_vm0, %v562_v34, %v7774_v6  ;;  %v689_v44 = vsel %vm666_vm1, %v687_v22, %v7778_v24  ;;  %v937_v13 = vrot.slane %v880_v42, 4  ;;  %v1041_v35 = vmul.f32 %v4577_v19, %v4881_v47 }
 0x12b   : > { %8152 = vst [vmem:[#allocation60_spill] sm:$0xff] %v4892_v61  ;;  %v2445_v0 = vadd.f32 %v2391_v30, %v2321_v7  ;;  %v606_v45 = vadd.f32 %v564_v59, %v465_v41  ;;  %v814_v34 = vsel %vm791_vm2, %v812_v48, %v7777_v2  ;;  %v7782_v6 = vrot.slane %v4892_v61, 4 }
 0x12c   : > { %v4910_v30 = vmul.f32 %v4577_v19, %v4897_v62  ;;  %v1165_v22 = vmul.f32 %v4580_v20, %v4881_v47  ;;  %v4916_v42 = vmul.f32 %v4580_v20, %v4897_v62  ;;  %v1097_v48 = vrot.slane %v1041_v35, 1 }
 0x12d   : > { %v2569_v7 = vadd.f32 %v2515_v33, %v2445_v0  ;;  %v731_v41 = vadd.f32 %v689_v44, %v606_v45  ;;  %v939_v59 = vsel %vm916_vm3, %v937_v13, %v7782_v6  ;;  %v1289_v33 = vmul.f32 %v4639_v53, %v4881_v47 }
 0x12e   : > { %8154 = vst [vmem:[#allocation62_spill] sm:$0xff] %v4910_v30  ;;  %8155 = vst [vmem:[#allocation63_spill] sm:$0xff] %v4916_v42  ;;  %v7787_v2 = vrot.slane %v4910_v30, 1  ;;  %v1221_v45 = vrot.slane %v1165_v22, 2  ;;  %v7786_v24 = vrot.slane %v4916_v42, 2  ;;  %v8156_v56 = vrot.slane %v4833_v63, 3 }
 0x12f   : > { %v2605_v44 = vadd.f32 %v2589_v60, %v2569_v7  ;;  %v856_v0 = vadd.f32 %v814_v34, %v731_v41  ;;  %v8157_v61 = vrot.slane %v4850_v9, 4  ;;  %v4933_v35 = vmul.f32 %v4639_v53, %v4897_v62  ;;  %v4938_v34 = vld [vmem:[%s4521_s18 + $0x90] sm:$0xff] }
 0x130   : > { %v2923_v4 = vsel %vm791_vm2, %v2921_v26, %v8156_v56  ;;  %v1413_v6 = vmul.f32 %v4642_v54, %v4881_v47  ;;  %8159 = vst [vmem:[#allocation65_spill] sm:$0xff] %v4938_v34  ;;  %v1345_v41 = vrot.slane %v1289_v33, 3  ;;  %v4942_v22 = vmul.f32 %v4642_v54, %v4897_v62  ;;  %v4945_v26 = vld [vmem:[%s4521_s18 + $0x98] sm:$0xff] }
 0x131   : > { %v3047_v13 = vsel %vm916_vm3, %v3045_v8, %v8157_v61  ;;  %8158 = vst [vmem:[#allocation64_spill] sm:$0xff] %v4933_v35  ;;  %v2729_v60 = vadd.f32 %v2675_v57, %v2605_v44  ;;  %v981_v7 = vadd.f32 %v939_v59, %v856_v0  ;;  %8161 = vst [vmem:[#allocation67_spill] sm:$0xff] %v4945_v26  ;;  %v7788_v57 = vrot.slane %v4933_v35, 3 }
 0x132   : > { %8160 = vst [vmem:[#allocation66_spill] sm:$0xff] %v4942_v22  ;;  %v1099_v56 = vsel %vm541_vm0, %v1097_v48, %v7787_v2  ;;  %v1223_v8 = vsel %vm666_vm1, %v1221_v45, %v7786_v24  ;;  %v1573_v61 = vmul.f32 %v4650_v58, %v4938_v34  ;;  %v1469_v44 = vrot.slane %v1413_v6, 4 }
 0x133   : > { %v2853_v59 = vadd.f32 %v2799_v36, %v2729_v60  ;;  %v1017_v33 = vadd.f32 %v1001_v21, %v981_v7  ;;  %v4958_v0 = vmul.f32 %v4650_v58, %v4945_v26  ;;  %v7792_v47 = vrot.slane %v4942_v22, 4  ;;  %v4971_v21 = vld [vmem:[#allocation8] ss:$0 sm:$0xff] }
 0x134   : > { %v1629_v30 = vrot.slane %v1573_v61, 1  ;;  %v1697_v48 = vmul.f32 %v4686_v28, %v4938_v34  ;;  %v4965_v45 = vmul.f32 %v4686_v28, %v4945_v26  ;;  %v1347_v36 = vsel %vm791_vm2, %v1345_v41, %v7788_v57 }
 0x135   : > { %8162 = vst [vmem:[#allocation68_spill] sm:$0xff] %v4958_v0  ;;  %v2977_v24 = vadd.f32 %v2923_v4, %v2853_v59  ;;  %v1141_v2 = vadd.f32 %v1099_v56, %v1017_v33  ;;  %v7795_v6 = vrot.slane %v4958_v0, 1  ;;  %v1821_v61 = vmul.f32 %v4692_v39, %v4938_v34 }
 0x136   : > { %8163 = vst [vmem:[#allocation69_spill] sm:$0xff] %v4965_v45  ;;  %v1753_v60 = vrot.slane %v1697_v48, 2  ;;  %v7794_v7 = vrot.slane %v4965_v45, 2  ;;  %v4978_v4 = vmul.f32 %v4692_v39, %v4945_v26  ;;  %v1533_v41 = vmul.f32 %v4672_v3, %v4938_v34 }
 0x137   : > { %v3101_v56 = vadd.f32 %v3047_v13, %v2977_v24  ;;  %v1265_v59 = vadd.f32 %v1223_v8, %v1141_v2  ;;  %v1945_v33 = vmul.f32 %v4710_v55, %v4938_v34  ;;  %v1471_v48 = vsel %vm916_vm3, %v1469_v44, %v7792_v47  ;;  %v4999_v13 = vld [vmem:[%s4521_s18 + $0xa8] sm:$0xff]  ;;  %v5002_v8 = vld [vmem:[%s4521_s18 + $0xb0] sm:$0xff] }
 0x138   : > { %8164 = vst [vmem:[#allocation70_spill] sm:$0xff] %v4978_v4  ;;  %v1631_v57 = vsel %vm541_vm0, %v1629_v30, %v7795_v6  ;;  %v1755_v35 = vsel %vm666_vm1, %v1753_v60, %v7794_v7  ;;  %v4995_v2 = vmul.f32 %v4710_v55, %v4945_v26  ;;  %8166 = vst [vmem:[#allocation72_spill] sm:$0xff] %v4999_v13  ;;  %v1877_v44 = vrot.slane %v1821_v61, 3 }
 0x139   : > { %v3124_v24 = vadd.f32 %v4971_v21, %v3101_v56  ;;  %8167 = vst [vmem:[#allocation73_spill] sm:$0xff] %v5002_v8  ;;  %v1389_v34 = vadd.f32 %v1347_v36, %v1265_v59  ;;  %v2001_v0 = vrot.slane %v1945_v33, 4  ;;  %v2105_v60 = vmul.f32 %v4733_v29, %v4999_v13 }
 0x13a   : > { %8165 = vst [vmem:[#allocation71_spill] sm:$0xff] %v4995_v2  ;;  %v5010_v7 = vmul.f32 %v4733_v29, %v5002_v8  ;;  %v2229_v45 = vmul.f32 %v4745_v49, %v4999_v13  ;;  %v5016_v36 = vmul.f32 %v4745_v49, %v5002_v8  ;;  %v2065_v61 = vmul.f32 %v4725_v10, %v4999_v13 }
 0x13b   : > { %v3140_v6 = vmax.f32 %v3124_v24, 0.0  ;;  %v1513_v56 = vadd.f32 %v1471_v48, %v1389_v34  ;;  %v2161_v59 = vrot.slane %v2105_v60, 1  ;;  %v2353_v30 = vmul.f32 %v4755_v52, %v4999_v13 }
 0x13c   : > { %8168 = vst [vmem:[#allocation74_spill] sm:$0xff] %v5010_v7  ;;  %8169 = vst [vmem:[#allocation75_spill] sm:$0xff] %v5016_v36  ;;  %v2285_v48 = vrot.slane %v2229_v45, 2  ;;  %v5027_v47 = vmul.f32 %v4755_v52, %v5002_v8  ;;  %v8171_v22 = vrot.slane %v4978_v4, 3  ;;  %v8172_v60 = vrot.slane %v4995_v2, 4 }
 0x13d   : > { %3641 = vmatprep.mubr.msk.f32.mxu0 %vm3165_vm4, %v3140_v6  ;;  %v1549_v34 = vadd.f32 %v1533_v41, %v1513_v56  ;;  %v2477_v42 = vmul.f32 %v4764_v43, %v4999_v13  ;;  %v5039_v45 = vmul.f32 %v4764_v43, %v5002_v8  ;;  %v5042_v6 = vld [vmem:[%s4529_s6] sm:$0xff]  ;;  %v5045_v41 = vld [vmem:[%s4529_s6 + $0x8] sm:$0xff]  ;;  %v8176_v24 = vrot.slane %v5010_v7, 1  ;;  %v414_v7 = vld [vmem:[%s4521_s18 + $0x10] sm:$0xf] }
 0x13e   : > { %8170 = vst [vmem:[#allocation76_spill] sm:$0xff] %v5027_v47  ;;  %v1879_v26 = vsel %vm791_vm2, %v1877_v44, %v8171_v22  ;;  %v2003_v33 = vsel %vm916_vm3, %v2001_v0, %v8172_v60  ;;  %8174 = vst [vmem:[#allocation78_spill] sm:$0xff] %v5042_v6  ;;  %v2409_v44 = vrot.slane %v2353_v30, 3  ;;  %v7812_v2 = vrot.slane %v5027_v47, 3 }
 0x13f   : > { %8173 = vst [vmem:[#allocation77_spill] sm:$0xff] %v5039_v45  ;;  %8175 = vst [vmem:[#allocation79_spill] sm:$0xff] %v5045_v41  ;;  %v1673_v56 = vadd.f32 %v1631_v57, %v1549_v34  ;;  %v2163_v22 = vsel %vm541_vm0, %v2161_v59, %v8176_v24  ;;  %v8177_v0 = vrot.slane %v5016_v36, 2  ;;  %v2533_v13 = vrot.slane %v2477_v42, 4 }
 0x140   : > { %v2637_v4 = vmul.f32 %v4799_v31, %v5042_v6  ;;  %v5058_v8 = vmul.f32 %v4799_v31, %v5045_v41  ;;  %v2761_v30 = vmul.f32 %v4802_v1, %v5042_v6  ;;  %v5065_v59 = vmul.f32 %v4802_v1, %v5045_v41 }
 0x141   : > { %v2287_v60 = vsel %vm666_vm1, %v2285_v48, %v8177_v0  ;;  %v1797_v57 = vadd.f32 %v1755_v35, %v1673_v56  ;;  %v5069_v42 = vmul.f32 %v4796_v12, %v5042_v6  ;;  %v2885_v0 = vmul.f32 %v4812_v51, %v5042_v6 }
 0x142   : > { %8178 = vst [vmem:[#allocation80_spill] sm:$0xff] %v5058_v8  ;;  %8179 = vst [vmem:[#allocation81_spill] sm:$0xff] %v5065_v59  ;;  %v2693_v48 = vrot.slane %v2637_v4, 1  ;;  %v7819_v24 = vrot.slane %v5058_v8, 1  ;;  %v2411_v56 = vsel %vm791_vm2, %v2409_v44, %v7812_v2  ;;  %v2817_v34 = vrot.slane %v2761_v30, 2 }
 0x143   : > { %v1921_v35 = vadd.f32 %v1879_v26, %v1797_v57  ;;  %v5079_v36 = vmul.f32 %v4812_v51, %v5045_v41  ;;  %v2941_v9 = vrot.slane %v2885_v0, 3  ;;  %v3009_v4 = vmul.f32 %v4837_v40, %v5042_v6 }
 0x144   : > { %v5087_v26 = vmul.f32 %v4837_v40, %v5045_v41  ;;  %v8182_v44 = vrot.slane %v5039_v45, 4  ;;  %v2695_v2 = vsel %vm541_vm0, %v2693_v48, %v7819_v24  ;;  %v458_v6 = vmul.f32 %v4562_v14, %v4559_v11  ;;  %v5112_v11 = vld [vmem:[%s4521_s18 + $0x28] sm:$0xf] }
 0x145   : > { %8180 = vst [vmem:[#allocation82_spill] sm:$0xff] %v5079_v36  ;;  %v2045_v57 = vadd.f32 %v2003_v33, %v1921_v35  ;;  %v7822_v62 = vrot.slane %v5079_v36, 3  ;;  %v3065_v0 = vrot.slane %v3009_v4, 4  ;;  %v495_v47 = vmul.f32 %v4565_v15, %v414_v7  ;;  %8184 = vst [vmem:[#allocation84_spill] sm:$0xff] %v5112_v11 }
 0x146   : > { %8181 = vst [vmem:[#allocation83_spill] sm:$0xff] %v5087_v26  ;;  %v2535_v30 = vsel %vm916_vm3, %v2533_v13, %v8182_v44  ;;  %v620_v41 = vmul.f32 %v4568_v16, %v414_v7  ;;  %v745_v35 = vmul.f32 %v4571_v17, %v414_v7  ;;  %v870_v13 = vmul.f32 %v4574_v18, %v414_v7 }
 0x147   : > { %v2081_v63 = vadd.f32 %v2065_v61, %v2045_v57  ;;  %v8183_v44 = vrot.slane %v5065_v59, 2  ;;  %v5109_v4 = vsel %vm791_vm2, %v2941_v9, %v7822_v62  ;;  %v545_v24 = vrot.slane %v495_v47, 1 }
 0x148   : > { %v670_v61 = vrot.slane %v620_v41, 2  ;;  %v795_v33 = vrot.slane %v745_v35, 3  ;;  %v920_v8 = vrot.slane %v870_v13, 4  ;;  %v1031_v7 = vmul.f32 %v4577_v19, %v5112_v11 }
 0x149   : > { %v2819_v48 = vsel %vm666_vm1, %v2817_v34, %v8183_v44  ;;  %v2205_v57 = vadd.f32 %v2163_v22, %v2081_v63  ;;  %v8185_v59 = vrot.slane %v4586_v23, 1  ;;  %v8186_v44 = vrot.slane %v4591_v25, 2 }
 0x14a   : > { %v1155_v62 = vmul.f32 %v4580_v20, %v5112_v11  ;;  %v1279_v47 = vmul.f32 %v4639_v53, %v5112_v11  ;;  %v8187_v41 = vrot.slane %v5087_v26, 4  ;;  %v8188_v23 = vrot.slane %v4596_v27, 3  ;;  %v8206_v26 = vld [vmem:[#allocation40_spill] sm:$0xff] }
 0x14b   : > { %v546_v34 = vsel %vm541_vm0, %v8185_v59, %v545_v24  ;;  %v671_v9 = vsel %vm666_vm1, %v8186_v44, %v670_v61  ;;  %v2329_v63 = vadd.f32 %v2287_v60, %v2205_v57  ;;  %v5133_v24 = vld [vmem:[%s4521_s18 + $0x40] sm:$0xf]  ;;  %v1080_v25 = vrot.slane %v1031_v7, 1 }
 0x14c   : > { %v3067_v22 = vsel %vm916_vm3, %v3065_v0, %v8187_v41  ;;  %v599_v35 = vadd.f32 %v546_v34, %v458_v6  ;;  %v796_v59 = vsel %vm791_vm2, %v8188_v23, %v795_v33  ;;  %8189 = vst [vmem:[#allocation85_spill] sm:$0xff] %v5133_v24  ;;  %v1204_v13 = vrot.slane %v1155_v62, 2 }
 0x14d   : > { %v1328_v61 = vrot.slane %v1279_v47, 3  ;;  %v1403_v44 = vmul.f32 %v4642_v54, %v5112_v11  ;;  %v2453_v36 = vadd.f32 %v2411_v56, %v2329_v63  ;;  %v994_v60 = vmul.f32 %v4610_v37, %v4613_v38 }
 0x14e   : > { %v724_v45 = vadd.f32 %v671_v9, %v599_v35  ;;  %v1563_v6 = vmul.f32 %v4650_v58, %v5133_v24  ;;  %v8190_v27 = vrot.slane %v4602_v32, 4  ;;  %v8191_v33 = vrot.slane %v4626_v46, 1  ;;  %v8193_v32 = vld [vmem:[#allocation32_spill] sm:$0xff] }
 0x14f   : > { %v1452_v57 = vrot.slane %v1403_v44, 4  ;;  %v1526_v56 = vmul.f32 %v4672_v3, %v4675_v5  ;;  %v2577_v7 = vadd.f32 %v2535_v30, %v2453_v36  ;;  %v8192_v9 = vrot.slane %v4635_v50, 2  ;;  %v8196_v30 = vld [vmem:[#allocation34_spill] sm:$0xff] }
 0x150   : > { %v921_v0 = vsel %vm916_vm3, %v8190_v27, %v920_v8  ;;  %v1081_v62 = vsel %vm541_vm0, %v8191_v33, %v1080_v25  ;;  %v849_v34 = vadd.f32 %v796_v59, %v724_v45  ;;  %v1687_v63 = vmul.f32 %v4686_v28, %v5133_v24  ;;  %v5163_v45 = vld [vmem:[%s4521_s18 + $0x58] sm:$0xf] }
 0x151   : > { %v1205_v47 = vsel %vm666_vm1, %v8192_v9, %v1204_v13  ;;  %v8194_v41 = vrot.slane %v8193_v32, 3  ;;  %v1612_v46 = vrot.slane %v1563_v6, 1  ;;  %v1811_v35 = vmul.f32 %v4692_v39, %v5133_v24  ;;  %8195 = vst [vmem:[#allocation32_spill] sm:$0xff] %v5163_v45  ;;  %v8201_v32 = vld [vmem:[#allocation37_spill] sm:$0xff] }
 0x152   : > { %v1935_v23 = vmul.f32 %v4710_v55, %v5133_v24  ;;  %v2613_v36 = vadd.f32 %v5069_v42, %v2577_v7  ;;  %v974_v50 = vadd.f32 %v921_v0, %v849_v34  ;;  %v8197_v59 = vrot.slane %v8196_v30, 4  ;;  %v8198_v42 = vld [vmem:[#allocation42_spill] sm:$0xff]  ;;  %v8199_v34 = vld [vmem:[#allocation36_spill] sm:$0xff] }
 0x153   : > { %v1329_v8 = vsel %vm791_vm2, %v8194_v41, %v1328_v61  ;;  %v1736_v13 = vrot.slane %v1687_v63, 2  ;;  %v1860_v44 = vrot.slane %v1811_v35, 3  ;;  %v2095_v6 = vmul.f32 %v4733_v29, %v5163_v45  ;;  %v8204_v24 = vld [vmem:[#allocation38_spill] sm:$0xff] }
 0x154   : > { %v1453_v25 = vsel %vm916_vm3, %v8197_v59, %v1452_v57  ;;  %v1984_v61 = vrot.slane %v1935_v23, 4  ;;  %v2219_v27 = vmul.f32 %v4745_v49, %v5163_v45  ;;  %v2737_v33 = vadd.f32 %v2695_v2, %v2613_v36  ;;  %v5185_v2 = vld [vmem:[%s4521_s18 + $0x70] sm:$0xf] }
 0x155   : > { %v1010_v9 = vadd.f32 %v994_v60, %v974_v50  ;;  %v5174_v7 = vmul.f32 %v4725_v10, %v8198_v42  ;;  %v2343_v0 = vmul.f32 %v4755_v52, %v5163_v45  ;;  %v8200_v57 = vrot.slane %v8199_v34, 1  ;;  %8203 = vst [vmem:[#allocation34_spill] sm:$0xff] %v5185_v2 }
 0x156   : > { %v8202_v41 = vrot.slane %v8201_v32, 2  ;;  %v2144_v23 = vrot.slane %v2095_v6, 1  ;;  %v2268_v30 = vrot.slane %v2219_v27, 2  ;;  %v2861_v59 = vadd.f32 %v2819_v48, %v2737_v33  ;;  %v8208_v32 = vld [vmem:[#allocation43_spill] sm:$0xff]  ;;  %v8210_v33 = vld [vmem:[#allocation44_spill] sm:$0xff] }
 0x157   : > { %v1613_v63 = vsel %vm541_vm0, %v8200_v57, %v1612_v46  ;;  %v1134_v60 = vadd.f32 %v1081_v62, %v1010_v9  ;;  %v2392_v36 = vrot.slane %v2343_v0, 3  ;;  %v2467_v50 = vmul.f32 %v4764_v43, %v5163_v45 }
 0x158   : > { %v1737_v35 = vsel %vm666_vm1, %v8202_v41, %v1736_v13  ;;  %v8205_v11 = vrot.slane %v8204_v24, 3  ;;  %v8207_v46 = vrot.slane %v8206_v26, 4  ;;  %v8209_v13 = vrot.slane %v8208_v32, 1 }
 0x159   : > { %v2627_v48 = vmul.f32 %v4799_v31, %v5185_v2  ;;  %v2985_v62 = vadd.f32 %v5109_v4, %v2861_v59  ;;  %v1258_v27 = vadd.f32 %v1205_v47, %v1134_v60  ;;  %v8211_v9 = vrot.slane %v8210_v33, 2  ;;  %v8212_v4 = vld [vmem:[#allocation45_spill] sm:$0xff]  ;;  %v8217_v33 = vld [vmem:[#allocation52_spill] sm:$0xff] }
 0x15a   : > { %v1861_v34 = vsel %vm791_vm2, %v8205_v11, %v1860_v44  ;;  %v1985_v57 = vsel %vm916_vm3, %v8207_v46, %v1984_v61  ;;  %v5198_v6 = vsel %vm541_vm0, %v8209_v13, %v2144_v23  ;;  %v2516_v11 = vrot.slane %v2467_v50, 4  ;;  %v8215_v50 = vld [vmem:[#allocation46_spill] sm:$0xff] }
 0x15b   : > { %v5206_v24 = vsel %vm666_vm1, %v8211_v9, %v2268_v30  ;;  %v2676_v26 = vrot.slane %v2627_v48, 1  ;;  %v2751_v44 = vmul.f32 %v4802_v1, %v5185_v2  ;;  %v2875_v61 = vmul.f32 %v4812_v51, %v5185_v2  ;;  %v8214_v30 = vld [vmem:[#allocation51_spill] sm:$0xff] }
 0x15c   : > { %v2999_v0 = vmul.f32 %v4837_v40, %v5185_v2  ;;  %v3109_v41 = vadd.f32 %v3067_v22, %v2985_v62  ;;  %v1382_v23 = vadd.f32 %v1329_v8, %v1258_v27  ;;  %v8213_v47 = vrot.slane %v8212_v4, 3 }
 0x15d   : > { %v5221_v60 = vmul.f32 %v4796_v12, %v8214_v30  ;;  %v8216_v46 = vrot.slane %v8215_v50, 4  ;;  %v2800_v13 = vrot.slane %v2751_v44, 2  ;;  %v2924_v48 = vrot.slane %v2875_v61, 3  ;;  %v5248_v50 = vld [vmem:[%s4521_s18 + $0x88] sm:$0xf] }
 0x15e   : > { %v5217_v59 = vsel %vm791_vm2, %v8213_v47, %v2392_v36  ;;  %v466_v22 = vmul.f32 %v4562_v14, %v8214_v30  ;;  %v3132_v8 = vadd.f32 %v4971_v21, %v3109_v41  ;;  %v1506_v62 = vadd.f32 %v1453_v25, %v1382_v23  ;;  %8221 = vst [vmem:[#allocation36_spill] sm:$0xff] %v5248_v50  ;;  %v8222_v30 = vld [vmem:[#allocation54_spill] sm:$0xff] }
 0x15f   : > { %v5226_v32 = vsel %vm916_vm3, %v8216_v46, %v2516_v11  ;;  %v507_v36 = vmul.f32 %v4565_v15, %v5185_v2  ;;  %v632_v27 = vmul.f32 %v4568_v16, %v5185_v2  ;;  %v8218_v9 = vrot.slane %v8217_v33, 1  ;;  %v8219_v11 = vld [vmem:[#allocation53_spill] sm:$0xff] }
 0x160   : > { %v8220_v44 = vrot.slane %v8219_v11, 2  ;;  %v3048_v47 = vrot.slane %v2999_v0, 4  ;;  %v757_v25 = vmul.f32 %v4571_v17, %v5185_v2  ;;  %v3148_v41 = vmax.f32 %v3132_v8, 0.0 }
 0x161   : > { %v5238_v4 = vsel %vm541_vm0, %v8218_v9, %v2676_v26  ;;  %v1542_v23 = vadd.f32 %v1526_v56, %v1506_v62  ;;  %v565_v46 = vrot.slane %v507_v36, 1  ;;  %v690_v45 = vrot.slane %v632_v27, 2  ;;  %v8224_v56 = vld [vmem:[#allocation56_spill] sm:$0xff]  ;;  %v8226_v27 = vld [vmem:[#allocation57_spill] sm:$0xff] }
 0x162   : > { %v5243_v61 = vsel %vm666_vm1, %v8220_v44, %v2800_v13  ;;  %v8223_v33 = vrot.slane %v8222_v30, 3  ;;  %v815_v9 = vrot.slane %v757_v25, 3  ;;  %v882_v13 = vmul.f32 %v4574_v18, %v5185_v2  ;;  %3653 = vmatprep.mubr.msk.f32.mxu1 %vm3165_vm4, %v3148_v41  ;;  %v8228_v25 = vld [vmem:[#allocation58_spill] sm:$0xff] }
 0x163   : > { %v1043_v0 = vmul.f32 %v4577_v19, %v5248_v50  ;;  %v1666_v8 = vadd.f32 %v1613_v63, %v1542_v23  ;;  %v8225_v62 = vrot.slane %v8224_v56, 1  ;;  %v8227_v11 = vrot.slane %v8226_v27, 2 }
 0x164   : > { %v5253_v26 = vsel %vm791_vm2, %v8223_v33, %v2924_v48  ;;  %v1167_v48 = vmul.f32 %v4580_v20, %v5248_v50  ;;  %v8229_v33 = vrot.slane %v8228_v25, 3  ;;  %v940_v42 = vrot.slane %v882_v13, 4  ;;  %v8234_v13 = vld [vmem:[#allocation61_spill] sm:$0xff] }
 0x165   : > { %v566_v36 = vsel %vm541_vm0, %v8225_v62, %v565_v46  ;;  %v691_v30 = vsel %vm666_vm1, %v8227_v11, %v690_v45  ;;  %v1100_v41 = vrot.slane %v1043_v0, 1  ;;  %v1790_v63 = vadd.f32 %v1737_v35, %v1666_v8  ;;  %v8230_v62 = vld [vmem:[#allocation55_spill] sm:$0xff] }
 0x166   : > { %v607_v44 = vadd.f32 %v566_v36, %v466_v22  ;;  %v816_v2 = vsel %vm791_vm2, %v8229_v33, %v815_v9  ;;  %v1224_v23 = vrot.slane %v1167_v48, 2  ;;  %v1291_v46 = vmul.f32 %v4639_v53, %v5248_v50  ;;  %v8232_v36 = vld [vmem:[#allocation60_spill] sm:$0xff]  ;;  %v5286_v8 = vld [vmem:[%s4521_s18 + $0xa0] sm:$0xf]  ;;  %v8236_v48 = vld [vmem:[#allocation62_spill] sm:$0xff] }
 0x167   : > { %v1415_v56 = vmul.f32 %v4642_v54, %v5248_v50  ;;  %v8231_v45 = vrot.slane %v8230_v62, 4  ;;  %v8233_v11 = vrot.slane %v8232_v36, 4  ;;  %v1002_v35 = vmul.f32 %v4610_v37, %v8234_v13  ;;  %8235 = vst [vmem:[#allocation37_spill] sm:$0xff] %v5286_v8 }
 0x168   : > { %v732_v22 = vadd.f32 %v691_v30, %v607_v44  ;;  %v1914_v0 = vadd.f32 %v1861_v34, %v1790_v63  ;;  %v8237_v25 = vrot.slane %v8236_v48, 1  ;;  %v1348_v62 = vrot.slane %v1291_v46, 3  ;;  %v8238_v34 = vld [vmem:[#allocation63_spill] sm:$0xff]  ;;  %v5305_v46 = vld [vmem:[%s4521_s18 + $0xb8] sm:$0xf] }
 0x169   : > { %v5278_v27 = vsel %vm916_vm3, %v8231_v45, %v3048_v47  ;;  %v941_v9 = vsel %vm916_vm3, %v8233_v11, %v940_v42  ;;  %v1472_v50 = vrot.slane %v1415_v56, 4  ;;  %v1575_v30 = vmul.f32 %v4650_v58, %v5286_v8  ;;  %v8240_v11 = vld [vmem:[#allocation67_spill] sm:$0xff]  ;;  %8241 = vst [vmem:[#allocation38_spill] sm:$0xff] %v5305_v46 }
 0x16a   : > { %v1101_v33 = vsel %vm541_vm0, %v8237_v25, %v1100_v41  ;;  %v857_v47 = vadd.f32 %v816_v2, %v732_v22  ;;  %v1699_v44 = vmul.f32 %v4686_v28, %v5286_v8  ;;  %v1823_v42 = vmul.f32 %v4692_v39, %v5286_v8 }
 0x16b   : > { %v2038_v45 = vadd.f32 %v1985_v57, %v1914_v0  ;;  %v8239_v63 = vrot.slane %v8238_v34, 2  ;;  %v1534_v41 = vmul.f32 %v4672_v3, %v8240_v11  ;;  %v1947_v2 = vmul.f32 %v4710_v55, %v5286_v8  ;;  %v8242_v57 = vld [vmem:[#allocation64_spill] sm:$0xff]  ;;  %v8244_v3 = vld [vmem:[#allocation66_spill] sm:$0xff] }
 0x16c   : > { %v982_v56 = vadd.f32 %v941_v9, %v857_v47  ;;  %v1632_v22 = vrot.slane %v1575_v30, 1  ;;  %v1756_v48 = vrot.slane %v1699_v44, 2  ;;  %v1880_v25 = vrot.slane %v1823_v42, 3  ;;  %v8246_v9 = vld [vmem:[#allocation68_spill] sm:$0xff]  ;;  %v8248_v44 = vld [vmem:[#allocation73_spill] sm:$0xff] }
 0x16d   : > { %v1225_v36 = vsel %vm666_vm1, %v8239_v63, %v1224_v23  ;;  %v2074_v13 = vadd.f32 %v5174_v7, %v2038_v45  ;;  %v8243_v0 = vrot.slane %v8242_v57, 3  ;;  %v2004_v23 = vrot.slane %v1947_v2, 4  ;;  %v8251_v57 = vld [vmem:[#allocation70_spill] sm:$0xff] }
 0x16e   : > { %v2107_v63 = vmul.f32 %v4733_v29, %v5305_v46  ;;  %v1018_v11 = vadd.f32 %v1002_v35, %v982_v56  ;;  %v8245_v8 = vrot.slane %v8244_v3, 4  ;;  %v8247_v47 = vrot.slane %v8246_v9, 1 }
 0x16f   : > { %v1349_v34 = vsel %vm791_vm2, %v8243_v0, %v1348_v62  ;;  %v5321_v7 = vmul.f32 %v4725_v10, %v8248_v44  ;;  %v2198_v42 = vadd.f32 %v5198_v6, %v2074_v13  ;;  %v8249_v62 = vld [vmem:[#allocation69_spill] sm:$0xff]  ;;  %v8252_v35 = vrot.slane %v8251_v57, 3 }
 0x170   : > { %v1473_v55 = vsel %vm916_vm3, %v8245_v8, %v1472_v50  ;;  %v1633_v30 = vsel %vm541_vm0, %v8247_v47, %v1632_v22  ;;  %v8250_v45 = vrot.slane %v8249_v62, 2  ;;  %v2231_v50 = vmul.f32 %v4745_v49, %v5305_v46  ;;  %v5333_v8 = vld [vmem:[%s4529_s6 + $0x10] sm:$0xf] }
 0x171   : > { %v1881_v3 = vsel %vm791_vm2, %v8252_v35, %v1880_v25  ;;  %8253 = vst [vmem:[#allocation40_spill] sm:$0xff] %v5333_v8  ;;  %v1142_v56 = vadd.f32 %v1101_v33, %v1018_v11  ;;  %v2164_v22 = vrot.slane %v2107_v63, 1  ;;  %v2355_v0 = vmul.f32 %v4755_v52, %v5305_v46  ;;  %v8256_v35 = vld [vmem:[#allocation79_spill] sm:$0xff]  ;;  %v8263_v44 = vld [vmem:[#allocation77_spill] sm:$0xff] }
 0x172   : > { %v1757_v2 = vsel %vm666_vm1, %v8250_v45, %v1756_v48  ;;  %v2479_v6 = vmul.f32 %v4764_v43, %v5305_v46  ;;  %v2322_v13 = vadd.f32 %v5206_v24, %v2198_v42  ;;  %v8254_v48 = vld [vmem:[#allocation71_spill] sm:$0xff]  ;;  %v2288_v25 = vrot.slane %v2231_v50, 2  ;;  %v8257_v50 = vld [vmem:[#allocation74_spill] sm:$0xff] }
 0x173   : > { %v8255_v9 = vrot.slane %v8254_v48, 4  ;;  %v2639_v62 = vmul.f32 %v4799_v31, %v5333_v8  ;;  %v1266_v45 = vadd.f32 %v1225_v36, %v1142_v56  ;;  %v2412_v57 = vrot.slane %v2355_v0, 3  ;;  %v8259_v56 = vld [vmem:[#allocation75_spill] sm:$0xff] }
 0x174   : > { %v2536_v33 = vrot.slane %v2479_v6, 4  ;;  %v2763_v11 = vmul.f32 %v4802_v1, %v5333_v8  ;;  %v2446_v63 = vadd.f32 %v5217_v59, %v2322_v13  ;;  %v5350_v46 = vmul.f32 %v4796_v12, %v8256_v35 }
 0x175   : > { %v2005_v47 = vsel %vm916_vm3, %v8255_v9, %v2004_v23  ;;  %v2696_v24 = vrot.slane %v2639_v62, 1  ;;  %v2887_v23 = vmul.f32 %v4812_v51, %v5333_v8  ;;  %v1390_v42 = vadd.f32 %v1349_v34, %v1266_v45  ;;  %v8261_v9 = vld [vmem:[#allocation76_spill] sm:$0xff] }
 0x176   : > { %v8258_v48 = vrot.slane %v8257_v50, 1  ;;  %v8260_v0 = vrot.slane %v8259_v56, 2  ;;  %v2820_v59 = vrot.slane %v2763_v11, 2  ;;  %v2570_v13 = vadd.f32 %v5226_v32, %v2446_v63  ;;  %v8267_v11 = vld [vmem:[#allocation31_spill] sm:$0xff] }
 0x177   : > { %v8262_v35 = vrot.slane %v8261_v9, 3  ;;  %v8264_v34 = vrot.slane %v8263_v44, 4  ;;  %v1514_v50 = vadd.f32 %v1473_v55, %v1390_v42  ;;  %v5382_v32 = vmul.f32 %v4837_v40, %v5333_v8  ;;  %v8268_v44 = vld [vmem:[#allocation81_spill] sm:$0xff] }
 0x178   : > { %v5357_v36 = vsel %vm541_vm0, %v8258_v48, %v2164_v22  ;;  %v5362_v6 = vsel %vm666_vm1, %v8260_v0, %v2288_v25  ;;  %v2944_v22 = vrot.slane %v2887_v23, 3  ;;  %v8265_v48 = vld [vmem:[#allocation80_spill] sm:$0xff]  ;;  %v2606_v63 = vadd.f32 %v5221_v60, %v2570_v13 }
 0x179   : > { %v5368_v62 = vsel %vm791_vm2, %v8262_v35, %v2412_v57  ;;  %v5373_v45 = vsel %vm916_vm3, %v8264_v34, %v2536_v33  ;;  %v8266_v56 = vrot.slane %v8265_v48, 1  ;;  %v496_v57 = vmul.f32 %v4565_v15, %v8267_v11 }
 0x17a   : > { %v8269_v35 = vrot.slane %v8268_v44, 2  ;;  %v459_v55 = vmul.f32 %v4562_v14, %v8267_v11  ;;  %v1550_v23 = vadd.f32 %v1534_v41, %v1514_v50  ;;  %v621_v0 = vmul.f32 %v4568_v16, %v8267_v11 }
 0x17b   : > { %v5378_v25 = vsel %vm541_vm0, %v8266_v56, %v2696_v24  ;;  %v5396_v24 = vmul.f32 %v4565_v15, %v4613_v38  ;;  %v547_v42 = vrot.slane %v496_v57, 1  ;;  %v5402_v60 = vmul.f32 %v4568_v16, %v4613_v38 }
 0x17c   : > { %v5390_v33 = vsel %vm666_vm1, %v8269_v35, %v2820_v59  ;;  %v2730_v13 = vadd.f32 %v5238_v4, %v2606_v63  ;;  %v8270_v59 = vld [vmem:[#allocation82_spill] sm:$0xff]  ;;  %v746_v41 = vmul.f32 %v4571_v17, %v8267_v11  ;;  %v1674_v50 = vadd.f32 %v1633_v30, %v1550_v23 }
 0x17d   : > { %v8271_v9 = vrot.slane %v8270_v59, 3  ;;  %v7845_v48 = vrot.slane %v5396_v24, 1  ;;  %v672_v56 = vrot.slane %v621_v0, 2  ;;  %v7852_v57 = vrot.slane %v5402_v60, 2 }
 0x17e   : > { %v5416_v44 = vmul.f32 %v4571_v17, %v4613_v38  ;;  %v2854_v4 = vadd.f32 %v5243_v61, %v2730_v13  ;;  %v797_v63 = vrot.slane %v746_v41, 3  ;;  %v871_v35 = vmul.f32 %v4574_v18, %v8267_v11 }
 0x17f   : > { %v5408_v34 = vsel %vm791_vm2, %v8271_v9, %v2944_v22  ;;  %v549_v22 = vsel %vm541_vm0, %v547_v42, %v7845_v48  ;;  %v1798_v59 = vadd.f32 %v1757_v2, %v1674_v50  ;;  %v674_v30 = vsel %vm666_vm1, %v672_v56, %v7852_v57  ;;  %v8272_v42 = vld [vmem:[#allocation33_spill] sm:$0xff]  ;;  %v8284_v57 = vld [vmem:[#allocation50_spill] sm:$0xff] }
 0x180   : > { %v600_v9 = vadd.f32 %v549_v22, %v459_v55  ;;  %v7850_v23 = vrot.slane %v5416_v44, 3  ;;  %v2978_v0 = vadd.f32 %v5253_v26, %v2854_v4  ;;  %v5431_v61 = vmul.f32 %v4574_v18, %v4613_v38 }
 0x181   : > { %v922_v13 = vrot.slane %v871_v35, 4  ;;  %v995_v41 = vmul.f32 %v4610_v37, %v8272_v42  ;;  %v1922_v48 = vadd.f32 %v1881_v3, %v1798_v59  ;;  %v1032_v55 = vmul.f32 %v4577_v19, %v8272_v42 }
 0x182   : > { %v725_v11 = vadd.f32 %v674_v30, %v600_v9  ;;  %v799_v2 = vsel %vm791_vm2, %v797_v63, %v7850_v23  ;;  %v3102_v50 = vadd.f32 %v5278_v27, %v2978_v0  ;;  %v7849_v26 = vrot.slane %v5431_v61, 4  ;;  %v8278_v23 = vld [vmem:[#allocation35_spill] sm:$0xff] }
 0x183   : > { %v5444_v38 = vmul.f32 %v4577_v19, %v4675_v5  ;;  %v1156_v56 = vmul.f32 %v4580_v20, %v8272_v42  ;;  %v2046_v3 = vadd.f32 %v2005_v47, %v1922_v48  ;;  %v1082_v22 = vrot.slane %v1032_v55, 1 }
 0x184   : > { %v850_v4 = vadd.f32 %v799_v2, %v725_v11  ;;  %v5450_v63 = vmul.f32 %v4580_v20, %v4675_v5  ;;  %v3125_v35 = vadd.f32 %v4971_v21, %v3102_v50  ;;  %v924_v27 = vsel %vm916_vm3, %v922_v13, %v7849_v26 }
 0x185   : > { %v7848_v59 = vrot.slane %v5444_v38, 1  ;;  %v1206_v9 = vrot.slane %v1156_v56, 2  ;;  %v2082_v30 = vadd.f32 %v5321_v7, %v2046_v3  ;;  %v1280_v48 = vmul.f32 %v4639_v53, %v8272_v42 }
 0x186   : > { %v975_v0 = vadd.f32 %v924_v27, %v850_v4  ;;  %v7847_v47 = vrot.slane %v5450_v63, 2  ;;  %v3141_v11 = vmax.f32 %v3125_v35, 0.0  ;;  %v5466_v55 = vmul.f32 %v4639_v53, %v4675_v5 }
 0x187   : > { %v1084_v2 = vsel %vm541_vm0, %v1082_v22, %v7848_v59  ;;  %v1404_v13 = vmul.f32 %v4642_v54, %v8272_v42  ;;  %v2206_v7 = vadd.f32 %v5357_v36, %v2082_v30  ;;  %v3068_v50 = vrot.slane %v5382_v32, 4  ;;  %v8274_v30 = vld [vmem:[#allocation41_spill] sm:$0xff] }
 0x188   : > { %v1011_v56 = vadd.f32 %v995_v41, %v975_v0  ;;  %v1330_v3 = vrot.slane %v1280_v48, 3  ;;  %3642 = vmatmul.mubr.msk.f32.vlgmr.msra.gmra.mrb[0].mxu0 %vm3165_vm4, %v3141_v11  ;;  %v1208_v4 = vsel %vm666_vm1, %v1206_v9, %v7847_v47  ;;  %v7846_v22 = vrot.slane %v5466_v55, 3  ;;  %v8275_v41 = vld [vmem:[#allocation42_spill] sm:$0xff] }
 0x189   : > { %v5479_v35 = vmul.f32 %v4642_v54, %v4675_v5  ;;  %v1454_v27 = vrot.slane %v1404_v13, 4  ;;  %v2330_v42 = vadd.f32 %v5362_v6, %v2206_v7  ;;  %v1564_v32 = vmul.f32 %v4650_v58, %v8274_v30 }
 0x18a   : > { %v1135_v36 = vadd.f32 %v1084_v2, %v1011_v56  ;;  %v5486_v0 = vmul.f32 %v4650_v58, %v8275_v41  ;;  %v1332_v9 = vsel %vm791_vm2, %v1330_v3, %v7846_v22  ;;  %v1688_v5 = vmul.f32 %v4686_v28, %v8274_v30 }
 0x18b   : > { %8273 = vst [vmem:[#allocation43_spill] sm:$0xff] %v5479_v35  ;;  %v7851_v48 = vrot.slane %v5479_v35, 4  ;;  %v5496_v6 = vmul.f32 %v4686_v28, %v8275_v41  ;;  %v2454_v11 = vadd.f32 %v5368_v62, %v2330_v42  ;;  %v1614_v13 = vrot.slane %v1564_v32, 1  ;;  %v8280_v42 = vld [vmem:[#allocation83_spill] sm:$0xff] }
 0x18c   : > { %8276 = vst [vmem:[#allocation44_spill] sm:$0xff] %v5486_v0  ;;  %v1259_v2 = vadd.f32 %v1208_v4, %v1135_v36  ;;  %v7853_v7 = vrot.slane %v5486_v0, 1  ;;  %v1738_v3 = vrot.slane %v1688_v5, 2  ;;  %v1812_v47 = vmul.f32 %v4692_v39, %v8274_v30  ;;  %v8282_v5 = vld [vmem:[#allocation39_spill] sm:$0xff] }
 0x18d   : > { %8277 = vst [vmem:[#allocation45_spill] sm:$0xff] %v5496_v6  ;;  %v1456_v56 = vsel %vm916_vm3, %v1454_v27, %v7851_v48  ;;  %v7856_v22 = vrot.slane %v5496_v6, 2  ;;  %v2578_v59 = vadd.f32 %v5373_v45, %v2454_v11  ;;  %v1527_v62 = vmul.f32 %v8278_v23, %v8274_v30 }
 0x18e   : > { %v1383_v26 = vadd.f32 %v1332_v9, %v1259_v2  ;;  %v5511_v4 = vmul.f32 %v4692_v39, %v8275_v41  ;;  %v8281_v36 = vrot.slane %v8280_v42, 4  ;;  %v1616_v32 = vsel %vm541_vm0, %v1614_v13, %v7853_v7  ;;  %v8285_v7 = vld [vmem:[#allocation51_spill] sm:$0xff] }
 0x18f   : > { %v1936_v48 = vmul.f32 %v8282_v5, %v8274_v30  ;;  %v5523_v45 = vmul.f32 %v8282_v5, %v8275_v41  ;;  %v2614_v9 = vadd.f32 %v5350_v46, %v2578_v59  ;;  %v1740_v2 = vsel %vm666_vm1, %v1738_v3, %v7856_v22 }
 0x190   : > { %8279 = vst [vmem:[#allocation46_spill] sm:$0xff] %v5511_v4  ;;  %v3069_v27 = vsel %vm916_vm3, %v8281_v36, %v3068_v50  ;;  %v1507_v11 = vadd.f32 %v1456_v56, %v1383_v26  ;;  %v1862_v42 = vrot.slane %v1812_v47, 3  ;;  %v7857_v50 = vrot.slane %v5511_v4, 3 }
 0x191   : > { %8283 = vst [vmem:[#allocation52_spill] sm:$0xff] %v5523_v45  ;;  %v1986_v36 = vrot.slane %v1936_v48, 4  ;;  %v2096_v13 = vmul.f32 %v4733_v29, %v8284_v57  ;;  %v5534_v30 = vmul.f32 %v4733_v29, %v8285_v7  ;;  %v2738_v41 = vadd.f32 %v5378_v25, %v2614_v9 }
 0x192   : > { %v1543_v8 = vadd.f32 %v1527_v62, %v1507_v11  ;;  %v7859_v46 = vrot.slane %v5523_v45, 4  ;;  %v2220_v26 = vmul.f32 %v4745_v49, %v8284_v57  ;;  %v2059_v59 = vmul.f32 %v4725_v10, %v8284_v57  ;;  %v8291_v45 = vld [vmem:[#allocation59_spill] sm:$0xff] }
 0x193   : > { %8286 = vst [vmem:[#allocation53_spill] sm:$0xff] %v5534_v30  ;;  %v2146_v47 = vrot.slane %v2096_v13, 1  ;;  %v5545_v56 = vmul.f32 %v4745_v49, %v8285_v7  ;;  %v2862_v3 = vadd.f32 %v5390_v33, %v2738_v41  ;;  %v2344_v62 = vmul.f32 %v4755_v52, %v8284_v57 }
 0x194   : > { %v1667_v22 = vadd.f32 %v1616_v32, %v1543_v8  ;;  %v2270_v25 = vrot.slane %v2220_v26, 2  ;;  %v1864_v9 = vsel %vm791_vm2, %v1862_v42, %v7857_v50  ;;  %v5556_v13 = vmul.f32 %v4755_v52, %v8285_v7 }
 0x195   : > { %8287 = vst [vmem:[#allocation54_spill] sm:$0xff] %v5545_v56  ;;  %v7861_v11 = vrot.slane %v5545_v56, 2  ;;  %v2468_v48 = vmul.f32 %v4764_v43, %v8284_v57  ;;  %v2986_v33 = vadd.f32 %v5408_v34, %v2862_v3  ;;  %v1988_v32 = vsel %vm916_vm3, %v1986_v36, %v7859_v46  ;;  %v8292_v46 = vld [vmem:[#allocation61_spill] sm:$0xff] }
 0x196   : > { %8288 = vst [vmem:[#allocation56_spill] sm:$0xff] %v5556_v13  ;;  %v1791_v8 = vadd.f32 %v1740_v2, %v1667_v22  ;;  %v5566_v41 = vmul.f32 %v4764_v43, %v8285_v7  ;;  %v8290_v42 = vrot.slane %v5534_v30, 1  ;;  %v2394_v57 = vrot.slane %v2344_v62, 3 }
 0x197   : > { %v2272_v50 = vsel %vm666_vm1, %v2270_v25, %v7861_v11  ;;  %v3110_v22 = vadd.f32 %v3069_v27, %v2986_v33  ;;  %v2518_v3 = vrot.slane %v2468_v48, 4  ;;  %v2628_v36 = vmul.f32 %v4799_v31, %v8291_v45 }
 0x198   : > { %8289 = vst [vmem:[#allocation57_spill] sm:$0xff] %v5566_v41  ;;  %v2148_v26 = vsel %vm541_vm0, %v2146_v47, %v8290_v42  ;;  %v1915_v2 = vadd.f32 %v1864_v9, %v1791_v8  ;;  %v5580_v30 = vmul.f32 %v4799_v31, %v8292_v46  ;;  %v2752_v47 = vmul.f32 %v4802_v1, %v8291_v45 }
 0x199   : > { %v5586_v25 = vmul.f32 %v4802_v1, %v8292_v46  ;;  %v3133_v27 = vadd.f32 %v4971_v21, %v3110_v22  ;;  %v2591_v48 = vmul.f32 %v4796_v12, %v8291_v45  ;;  %v2678_v9 = vrot.slane %v2628_v36, 1 }
 0x19a   : > { %8293 = vst [vmem:[#allocation58_spill] sm:$0xff] %v5580_v30  ;;  %v2039_v62 = vadd.f32 %v1988_v32, %v1915_v2  ;;  %v7866_v33 = vrot.slane %v5580_v30, 1  ;;  %v2802_v8 = vrot.slane %v2752_v47, 2  ;;  %v2876_v11 = vmul.f32 %v4812_v51, %v8291_v45 }
 0x19b   : > { %8294 = vst [vmem:[#allocation55_spill] sm:$0xff] %v5586_v25  ;;  %v7865_v42 = vrot.slane %v5586_v25, 2  ;;  %v3149_v7 = vmax.f32 %v3133_v27, 0.0  ;;  %v5597_v56 = vmul.f32 %v4812_v51, %v8292_v46  ;;  %v3000_v32 = vmul.f32 %v4837_v40, %v8291_v45 }
 0x19c   : > { %v2075_v34 = vadd.f32 %v2059_v59, %v2039_v62  ;;  %v8295_v22 = vrot.slane %v5556_v13, 3  ;;  %v8296_v36 = vrot.slane %v5566_v41, 4  ;;  %v2680_v27 = vsel %vm541_vm0, %v2678_v9, %v7866_v33 }
 0x19d   : > { %v5612_v59 = vmul.f32 %v4837_v40, %v8292_v46  ;;  %3654 = vmatmul.mubr.msk.f32.vlgmr.msra.gmra.mrb[0].mxu1 %vm3165_vm4, %v3149_v7  ;;  %v2804_v13 = vsel %vm666_vm1, %v2802_v8, %v7865_v42  ;;  %v3050_v41 = vrot.slane %v3000_v32, 4  ;;  %v5623_v9 = vmul.f32 %v4565_v15, %v8292_v46 }
 0x19e   : > { %v2396_v2 = vsel %vm791_vm2, %v2394_v57, %v8295_v22  ;;  %v2520_v47 = vsel %vm916_vm3, %v2518_v3, %v8296_v36  ;;  %v2199_v62 = vadd.f32 %v2148_v26, %v2075_v34  ;;  %v2926_v57 = vrot.slane %v2876_v11, 3 }
 0x19f   : > { %8297 = vst [vmem:[#allocation60_spill] sm:$0xff] %v5612_v59  ;;  %v508_v3 = vmul.f32 %v4565_v15, %v8291_v45  ;;  %8298 = vst [vmem:[#allocation62_spill] sm:$0xff] %v5623_v9  ;;  %v633_v36 = vmul.f32 %v4568_v16, %v8291_v45  ;;  %v467_v26 = vmul.f32 %v4562_v14, %v8291_v45  ;;  %v7872_v42 = vrot.slane %v5623_v9, 1 }
 0x1a0   : > { %v2323_v7 = vadd.f32 %v2272_v50, %v2199_v62  ;;  %v5631_v11 = vmul.f32 %v4568_v16, %v8292_v46  ;;  %v758_v34 = vmul.f32 %v4571_v17, %v8291_v45  ;;  %v5640_v50 = vmul.f32 %v4571_v17, %v8292_v46 }
 0x1a1   : > { %v567_v32 = vrot.slane %v508_v3, 1  ;;  %v692_v33 = vrot.slane %v633_v36, 2  ;;  %v883_v4 = vmul.f32 %v4574_v18, %v8291_v45  ;;  %v5649_v3 = vmul.f32 %v4574_v18, %v8292_v46  ;;  %v8302_v36 = vld [vmem:[#allocation65_spill] sm:$0xff] }
 0x1a2   : > { %8299 = vst [vmem:[#allocation63_spill] sm:$0xff] %v5631_v11  ;;  %v2447_v22 = vadd.f32 %v2396_v2, %v2323_v7  ;;  %v7876_v25 = vrot.slane %v5631_v11, 2  ;;  %8300 = vst [vmem:[#allocation64_spill] sm:$0xff] %v5640_v50  ;;  %v817_v62 = vrot.slane %v758_v34, 3  ;;  %v1003_v2 = vmul.f32 %v4610_v37, %v8302_v36 }
 0x1a3   : > { %v569_v30 = vsel %vm541_vm0, %v567_v32, %v7872_v42  ;;  %8301 = vst [vmem:[#allocation66_spill] sm:$0xff] %v5649_v3  ;;  %v7875_v9 = vrot.slane %v5640_v50, 3  ;;  %v942_v6 = vrot.slane %v883_v4, 4  ;;  %v7877_v32 = vrot.slane %v5649_v3, 4  ;;  %v8303_v42 = vld [vmem:[#allocation67_spill] sm:$0xff]  ;;  %v8311_v3 = vld [vmem:[#allocation73_spill] sm:$0xff] }
 0x1a4   : > { %v2571_v7 = vadd.f32 %v2520_v47, %v2447_v22  ;;  %v608_v8 = vadd.f32 %v569_v30, %v467_v26  ;;  %v694_v34 = vsel %vm666_vm1, %v692_v33, %v7876_v25  ;;  %v1044_v45 = vmul.f32 %v4577_v19, %v8302_v36 }
 0x1a5   : > { %v5662_v46 = vmul.f32 %v4577_v19, %v8303_v42  ;;  %v819_v30 = vsel %vm791_vm2, %v817_v62, %v7875_v9  ;;  %v1168_v33 = vmul.f32 %v4580_v20, %v8302_v36  ;;  %v944_v4 = vsel %vm916_vm3, %v942_v6, %v7877_v32 }
 0x1a6   : > { %v2607_v0 = vadd.f32 %v2591_v48, %v2571_v7  ;;  %v733_v35 = vadd.f32 %v694_v34, %v608_v8  ;;  %v1102_v47 = vrot.slane %v1044_v45, 1  ;;  %v5675_v26 = vmul.f32 %v4580_v20, %v8303_v42 }
 0x1a7   : > { %8304 = vst [vmem:[#allocation68_spill] sm:$0xff] %v5662_v46  ;;  %v7880_v22 = vrot.slane %v5662_v46, 1  ;;  %v1226_v7 = vrot.slane %v1168_v33, 2  ;;  %v1292_v62 = vmul.f32 %v4639_v53, %v8302_v36  ;;  %v8306_v34 = vrot.slane %v5597_v56, 3 }
 0x1a8   : > { %8305 = vst [vmem:[#allocation69_spill] sm:$0xff] %v5675_v26  ;;  %v2731_v48 = vadd.f32 %v2680_v27, %v2607_v0  ;;  %v858_v8 = vadd.f32 %v819_v30, %v733_v35  ;;  %v7879_v25 = vrot.slane %v5675_v26, 2  ;;  %v5685_v6 = vmul.f32 %v4639_v53, %v8303_v42 }
 0x1a9   : > { %v2928_v9 = vsel %vm791_vm2, %v2926_v57, %v8306_v34  ;;  %v1416_v45 = vmul.f32 %v4642_v54, %v8302_v36  ;;  %v1350_v35 = vrot.slane %v1292_v62, 3  ;;  %v5691_v27 = vmul.f32 %v4642_v54, %v8303_v42 }
 0x1aa   : > { %8307 = vst [vmem:[#allocation70_spill] sm:$0xff] %v5685_v6  ;;  %v2855_v32 = vadd.f32 %v2804_v13, %v2731_v48  ;;  %v983_v0 = vadd.f32 %v944_v4, %v858_v8  ;;  %v8309_v30 = vrot.slane %v5612_v59, 4  ;;  %v1104_v33 = vsel %vm541_vm0, %v1102_v47, %v7880_v22  ;;  %v8310_v8 = vld [vmem:[#allocation72_spill] sm:$0xff] }
 0x1ab   : > { %8308 = vst [vmem:[#allocation71_spill] sm:$0xff] %v5691_v27  ;;  %v1228_v34 = vsel %vm666_vm1, %v1226_v7, %v7879_v25  ;;  %v7882_v13 = vrot.slane %v5685_v6, 3  ;;  %v1474_v48 = vrot.slane %v1416_v45, 4  ;;  %v1576_v42 = vmul.f32 %v4650_v58, %v8310_v8 }
 0x1ac   : > { %v3052_v57 = vsel %vm916_vm3, %v3050_v41, %v8309_v30  ;;  %v2979_v36 = vadd.f32 %v2928_v9, %v2855_v32  ;;  %v1019_v4 = vadd.f32 %v1003_v2, %v983_v0  ;;  %v5708_v41 = vmul.f32 %v4650_v58, %v8311_v3 }
 0x1ad   : > { %v1700_v47 = vmul.f32 %v4686_v28, %v8310_v8  ;;  %v5714_v7 = vmul.f32 %v4686_v28, %v8311_v3  ;;  %v1352_v2 = vsel %vm791_vm2, %v1350_v35, %v7882_v13  ;;  %v1634_v32 = vrot.slane %v1576_v42, 1 }
 0x1ae   : > { %8312 = vst [vmem:[#allocation74_spill] sm:$0xff] %v5708_v41  ;;  %v3103_v30 = vadd.f32 %v3052_v57, %v2979_v36  ;;  %v1143_v9 = vadd.f32 %v1104_v33, %v1019_v4  ;;  %v7884_v45 = vrot.slane %v5708_v41, 1  ;;  %v1824_v22 = vmul.f32 %v4692_v39, %v8310_v8 }
 0x1af   : > { %8313 = vst [vmem:[#allocation75_spill] sm:$0xff] %v5714_v7  ;;  %v1758_v0 = vrot.slane %v1700_v47, 2  ;;  %v5726_v57 = vmul.f32 %v4692_v39, %v8311_v3  ;;  %v1948_v33 = vmul.f32 %v8282_v5, %v8310_v8  ;;  %v8315_v35 = vrot.slane %v5691_v27, 4 }
 0x1b0   : > { %v3126_v62 = vadd.f32 %v4971_v21, %v3103_v30  ;;  %v1267_v26 = vadd.f32 %v1228_v34, %v1143_v9  ;;  %v1535_v4 = vmul.f32 %v8278_v23, %v8310_v8  ;;  %v1636_v42 = vsel %vm541_vm0, %v1634_v32, %v7884_v45  ;;  %v8318_v8 = vld [vmem:[#allocation79_spill] sm:$0xff] }
 0x1b1   : > { %8314 = vst [vmem:[#allocation76_spill] sm:$0xff] %v5726_v57  ;;  %v1476_v36 = vsel %vm916_vm3, %v1474_v48, %v8315_v35  ;;  %v5740_v21 = vmul.f32 %v8282_v5, %v8311_v3  ;;  %v1882_v30 = vrot.slane %v1824_v22, 3  ;;  %v7887_v9 = vrot.slane %v5726_v57, 3  ;;  %v8317_v48 = vld [vmem:[#allocation78_spill] sm:$0xff] }
 0x1b2   : > { %v3142_v34 = vmax.f32 %v3126_v62, 0.0  ;;  %v1391_v47 = vadd.f32 %v1352_v2, %v1267_v26  ;;  %v2006_v13 = vrot.slane %v1948_v33, 4  ;;  %v2108_v35 = vmul.f32 %v4733_v29, %v8317_v48 }
 0x1b3   : > { %8316 = vst [vmem:[#allocation77_spill] sm:$0xff] %v5740_v21  ;;  %v5748_v41 = vmul.f32 %v4733_v29, %v8318_v8  ;;  %v8320_v3 = vrot.slane %v5714_v7, 2  ;;  %v2232_v26 = vmul.f32 %v4745_v49, %v8317_v48  ;;  %v5758_v62 = vmul.f32 %v4745_v49, %v8318_v8 }
 0x1b4   : > { %3644 = vmatprep.mubr.msk.f32.mxu0 %vm3165_vm4, %v3142_v34  ;;  %v1515_v32 = vadd.f32 %v1476_v36, %v1391_v47  ;;  %v2067_v2 = vmul.f32 %v4725_v10, %v8317_v48  ;;  %v2166_v33 = vrot.slane %v2108_v35, 1  ;;  %v2356_v36 = vmul.f32 %v4755_v52, %v8317_v48 }
 0x1b5   : > { %8319 = vst [vmem:[#allocation80_spill] sm:$0xff] %v5748_v41  ;;  %v1760_v22 = vsel %vm666_vm1, %v1758_v0, %v8320_v3  ;;  %8321 = vst [vmem:[#allocation31_spill] sm:$0xff] %v5758_v62  ;;  %v2290_v45 = vrot.slane %v2232_v26, 2  ;;  %v5768_v3 = vmul.f32 %v4755_v52, %v8318_v8  ;;  %v1884_v25 = vsel %vm791_vm2, %v1882_v30, %v7887_v9  ;;  %v5786_v26 = vld [vmem:[%s4529_s6 + $0x20] sm:$0xff] }
 0x1b6   : > { %v1551_v47 = vadd.f32 %v1535_v4, %v1515_v32  ;;  %v8323_v7 = vrot.slane %v5740_v21, 4  ;;  %v2480_v34 = vmul.f32 %v4764_v43, %v8317_v48  ;;  %v5780_v4 = vmul.f32 %v4764_v43, %v8318_v8  ;;  %v5783_v32 = vld [vmem:[%s4529_s6 + $0x18] sm:$0xff]  ;;  %8326 = vst [vmem:[#allocation41_spill] sm:$0xff] %v5786_v26 }
 0x1b7   : > { %8322 = vst [vmem:[#allocation81_spill] sm:$0xff] %v5768_v3  ;;  %8325 = vst [vmem:[#allocation33_spill] sm:$0xff] %v5783_v32  ;;  %v8327_v57 = vrot.slane %v5748_v41, 1  ;;  %v2414_v9 = vrot.slane %v2356_v36, 3  ;;  %v7893_v21 = vrot.slane %v5768_v3, 3  ;;  %v2640_v8 = vmul.f32 %v4799_v31, %v5783_v32 }
 0x1b8   : > { %v2008_v35 = vsel %vm916_vm3, %v2006_v13, %v8323_v7  ;;  %8324 = vst [vmem:[#allocation82_spill] sm:$0xff] %v5780_v4  ;;  %v1675_v0 = vadd.f32 %v1636_v42, %v1551_v47  ;;  %v8328_v13 = vrot.slane %v5758_v62, 2  ;;  %v2538_v48 = vrot.slane %v2480_v34, 4 }
 0x1b9   : > { %v2168_v30 = vsel %vm541_vm0, %v2166_v33, %v8327_v57  ;;  %v5799_v27 = vmul.f32 %v4799_v31, %v5786_v26  ;;  %v2764_v57 = vmul.f32 %v4802_v1, %v5783_v32  ;;  %v5806_v33 = vmul.f32 %v4802_v1, %v5786_v26 }
 0x1ba   : > { %v2292_v7 = vsel %vm666_vm1, %v2290_v45, %v8328_v13  ;;  %v1799_v42 = vadd.f32 %v1760_v22, %v1675_v0  ;;  %v5810_v45 = vmul.f32 %v4796_v12, %v5783_v32  ;;  %v2698_v34 = vrot.slane %v2640_v8, 1 }
 0x1bb   : > { %8329 = vst [vmem:[#allocation42_spill] sm:$0xff] %v5799_v27  ;;  %8330 = vst [vmem:[#allocation83_spill] sm:$0xff] %v5806_v33  ;;  %v2888_v22 = vmul.f32 %v4812_v51, %v5783_v32  ;;  %v2416_v13 = vsel %vm791_vm2, %v2414_v9, %v7893_v21  ;;  %v2822_v47 = vrot.slane %v2764_v57, 2  ;;  %v5820_v62 = vmul.f32 %v4812_v51, %v5786_v26 }
 0x1bc   : > { %v1923_v0 = vadd.f32 %v1884_v25, %v1799_v42  ;;  %v3012_v8 = vmul.f32 %v4837_v40, %v5783_v32  ;;  %v5827_v36 = vmul.f32 %v4837_v40, %v5786_v26  ;;  %v8332_v42 = vrot.slane %v5780_v4, 4  ;;  %v8334_v32 = vld [vmem:[#allocation84_spill] sm:$0xff]  ;;  %v8336_v4 = vld [vmem:[#allocation85_spill] sm:$0xff] }
 0x1bd   : > { %v2946_v6 = vrot.slane %v2888_v22, 3  ;;  %v8333_v57 = vrot.slane %v5799_v27, 1  ;;  %v7906_v3 = vrot.slane %v5820_v62, 3  ;;  %v3824_v22 = vld [vmem:[%s4521_s18 + $0x20] sm:$0xff]  ;;  %v498_v59 = vmul.f32 %v4565_v15, %v8334_v32 }
 0x1be   : > { %8331 = vst [vmem:[#allocation39_spill] sm:$0xff] %v5827_v36  ;;  %v2047_v25 = vadd.f32 %v2008_v35, %v1923_v0  ;;  %v2540_v9 = vsel %vm916_vm3, %v2538_v48, %v8332_v42  ;;  %v3070_v41 = vrot.slane %v3012_v8, 4  ;;  %v460_v46 = vmul.f32 %v3824_v22, %v4562_v14 }
 0x1bf   : > { %v2700_v21 = vsel %vm541_vm0, %v2698_v34, %v8333_v57  ;;  %v623_v35 = vmul.f32 %v4568_v16, %v8334_v32  ;;  %v748_v48 = vmul.f32 %v4571_v17, %v8334_v32  ;;  %v873_v34 = vmul.f32 %v4574_v18, %v8334_v32 }
 0x1c0   : > { %v2083_v0 = vadd.f32 %v2067_v2, %v2047_v25  ;;  %v8335_v8 = vrot.slane %v5806_v33, 2  ;;  %v2948_v57 = vsel %vm791_vm2, %v2946_v6, %v7906_v3  ;;  %v550_v22 = vrot.slane %v498_v59, 1  ;;  %v5874_v3 = vld [vmem:[%s4521_s18 + $0x38] sm:$0xff] }
 0x1c1   : > { %v675_v27 = vrot.slane %v623_v35, 2  ;;  %v800_v2 = vrot.slane %v748_v48, 3  ;;  %v925_v25 = vrot.slane %v873_v34, 4  ;;  %v1034_v50 = vmul.f32 %v4577_v19, %v8336_v4 }
 0x1c2   : > { %v2824_v42 = vsel %vm666_vm1, %v2822_v47, %v8335_v8  ;;  %v2207_v26 = vadd.f32 %v2168_v30, %v2083_v0  ;;  %v8337_v11 = vrot.slane %v5396_v24, 1  ;;  %v8338_v33 = vrot.slane %v5402_v60, 2 }
 0x1c3   : > { %v1158_v6 = vmul.f32 %v4580_v20, %v8336_v4  ;;  %v1282_v59 = vmul.f32 %v4639_v53, %v8336_v4  ;;  %v8339_v35 = vrot.slane %v5827_v36, 4  ;;  %v8340_v24 = vrot.slane %v5416_v44, 3 }
 0x1c4   : > { %v551_v32 = vsel %vm541_vm0, %v8337_v11, %v550_v22  ;;  %v676_v47 = vsel %vm666_vm1, %v8338_v33, %v675_v27  ;;  %v2331_v30 = vadd.f32 %v2292_v7, %v2207_v26  ;;  %v1085_v60 = vrot.slane %v1034_v50, 1  ;;  %v8341_v7 = vld [vmem:[#allocation32_spill] sm:$0xff] }
 0x1c5   : > { %v3072_v0 = vsel %vm916_vm3, %v3070_v41, %v8339_v35  ;;  %v601_v48 = vadd.f32 %v551_v32, %v460_v46  ;;  %v801_v11 = vsel %vm791_vm2, %v8340_v24, %v800_v2  ;;  %v1209_v34 = vrot.slane %v1158_v6, 2 }
 0x1c6   : > { %v1333_v27 = vrot.slane %v1282_v59, 3  ;;  %v1406_v33 = vmul.f32 %v4642_v54, %v8336_v4  ;;  %v2455_v8 = vadd.f32 %v2416_v13, %v2331_v30  ;;  %v996_v26 = vmul.f32 %v5874_v3, %v4610_v37  ;;  %v5887_v4 = vld [vmem:[%s4521_s18 + $0x50] sm:$0xff] }
 0x1c7   : > { %v726_v22 = vadd.f32 %v676_v47, %v601_v48  ;;  %v1566_v46 = vmul.f32 %v4650_v58, %v8341_v7  ;;  %v8342_v44 = vrot.slane %v5431_v61, 4  ;;  %v8343_v50 = vrot.slane %v5444_v38, 1  ;;  %8344 = vst [vmem:[#allocation50_spill] sm:$0xff] %v5887_v4 }
 0x1c8   : > { %v1457_v32 = vrot.slane %v1406_v33, 4  ;;  %v1528_v13 = vmul.f32 %v5887_v4, %v8278_v23  ;;  %v2579_v47 = vadd.f32 %v2540_v9, %v2455_v8  ;;  %v8345_v59 = vrot.slane %v5450_v63, 2 }
 0x1c9   : > { %v926_v41 = vsel %vm916_vm3, %v8342_v44, %v925_v25  ;;  %v1086_v2 = vsel %vm541_vm0, %v8343_v50, %v1085_v60  ;;  %v851_v6 = vadd.f32 %v801_v11, %v726_v22  ;;  %v1690_v61 = vmul.f32 %v4686_v28, %v8341_v7  ;;  %v8347_v11 = vld [vmem:[#allocation43_spill] sm:$0xff] }
 0x1ca   : > { %v1210_v30 = vsel %vm666_vm1, %v8345_v59, %v1209_v34  ;;  %v8346_v38 = vrot.slane %v5466_v55, 3  ;;  %v1617_v35 = vrot.slane %v1566_v46, 1  ;;  %v1814_v48 = vmul.f32 %v4692_v39, %v8341_v7  ;;  %v8349_v55 = vld [vmem:[#allocation34_spill] sm:$0xff]  ;;  %v5912_v59 = vld [vmem:[%s4521_s18 + $0x68] sm:$0xff] }
 0x1cb   : > { %v1938_v9 = vmul.f32 %v8282_v5, %v8341_v7  ;;  %v2615_v24 = vadd.f32 %v5810_v45, %v2579_v47  ;;  %v976_v63 = vadd.f32 %v926_v41, %v851_v6  ;;  %v8348_v60 = vrot.slane %v8347_v11, 4  ;;  %8350 = vst [vmem:[#allocation51_spill] sm:$0xff] %v5912_v59  ;;  %v8351_v41 = vld [vmem:[#allocation44_spill] sm:$0xff]  ;;  %v8353_v6 = vld [vmem:[#allocation45_spill] sm:$0xff]  ;;  %v8355_v11 = vld [vmem:[#allocation46_spill] sm:$0xff] }
 0x1cc   : > { %v1334_v25 = vsel %vm791_vm2, %v8346_v38, %v1333_v27  ;;  %v1741_v33 = vrot.slane %v1690_v61, 2  ;;  %v1865_v8 = vrot.slane %v1814_v48, 3  ;;  %v2098_v27 = vmul.f32 %v4733_v29, %v8349_v55 }
 0x1cd   : > { %v1458_v34 = vsel %vm916_vm3, %v8348_v60, %v1457_v32  ;;  %v1989_v22 = vrot.slane %v1938_v9, 4  ;;  %v2222_v46 = vmul.f32 %v4745_v49, %v8349_v55  ;;  %v2739_v44 = vadd.f32 %v2700_v21, %v2615_v24 }
 0x1ce   : > { %v1012_v50 = vadd.f32 %v996_v26, %v976_v63  ;;  %v5916_v45 = vmul.f32 %v5912_v59, %v4725_v10  ;;  %v2346_v7 = vmul.f32 %v4755_v52, %v8349_v55  ;;  %v8352_v32 = vrot.slane %v8351_v41, 1  ;;  %v8357_v41 = vld [vmem:[#allocation52_spill] sm:$0xff] }
 0x1cf   : > { %v8354_v61 = vrot.slane %v8353_v6, 2  ;;  %v2149_v48 = vrot.slane %v2098_v27, 1  ;;  %v2273_v21 = vrot.slane %v2222_v46, 2  ;;  %v2863_v26 = vadd.f32 %v2824_v42, %v2739_v44  ;;  %v8361_v42 = vld [vmem:[#allocation36_spill] sm:$0xff]  ;;  %v8362_v44 = vld [vmem:[#allocation54_spill] sm:$0xff] }
 0x1d0   : > { %v1618_v47 = vsel %vm541_vm0, %v8352_v32, %v1617_v35  ;;  %v1136_v9 = vadd.f32 %v1086_v2, %v1012_v50  ;;  %v2397_v24 = vrot.slane %v2346_v7, 3  ;;  %v2470_v63 = vmul.f32 %v4764_v43, %v8349_v55  ;;  %v8359_v32 = vld [vmem:[#allocation53_spill] sm:$0xff] }
 0x1d1   : > { %v1742_v38 = vsel %vm666_vm1, %v8354_v61, %v1741_v33  ;;  %v8356_v60 = vrot.slane %v8355_v11, 3  ;;  %v8358_v59 = vrot.slane %v8357_v41, 4  ;;  %v8360_v33 = vrot.slane %v8359_v32, 1 }
 0x1d2   : > { %v2630_v2 = vmul.f32 %v4799_v31, %v8361_v42  ;;  %v2987_v46 = vadd.f32 %v2948_v57, %v2863_v26  ;;  %v1260_v55 = vadd.f32 %v1210_v30, %v1136_v9  ;;  %v8363_v50 = vrot.slane %v8362_v44, 2  ;;  %v8364_v57 = vld [vmem:[#allocation56_spill] sm:$0xff]  ;;  %v8370_v44 = vld [vmem:[#allocation58_spill] sm:$0xff] }
 0x1d3   : > { %v1866_v36 = vsel %vm791_vm2, %v8356_v60, %v1865_v8  ;;  %v5934_v35 = vsel %vm916_vm3, %v8358_v59, %v1989_v22  ;;  %v5939_v27 = vsel %vm541_vm0, %v8360_v33, %v2149_v48  ;;  %v2521_v8 = vrot.slane %v2470_v63, 4  ;;  %v8367_v63 = vld [vmem:[#allocation57_spill] sm:$0xff] }
 0x1d4   : > { %v5946_v7 = vsel %vm666_vm1, %v8363_v50, %v2273_v21  ;;  %v2681_v6 = vrot.slane %v2630_v2, 1  ;;  %v2754_v22 = vmul.f32 %v4802_v1, %v8361_v42  ;;  %v2878_v59 = vmul.f32 %v4812_v51, %v8361_v42  ;;  %v5960_v21 = vld [vmem:[%s4521_s18 + $0x80] sm:$0xff] }
 0x1d5   : > { %v3002_v61 = vmul.f32 %v4837_v40, %v8361_v42  ;;  %v3111_v48 = vadd.f32 %v3072_v0, %v2987_v46  ;;  %v1384_v11 = vadd.f32 %v1334_v25, %v1260_v55  ;;  %v8365_v30 = vrot.slane %v8364_v57, 3  ;;  %8366 = vst [vmem:[#allocation59_spill] sm:$0xff] %v5960_v21  ;;  %v5973_v25 = vld [vmem:[#allocation8] ss:$0 sm:$0xff] }
 0x1d6   : > { %v5964_v9 = vmul.f32 %v5960_v21, %v4796_v12  ;;  %v8368_v60 = vrot.slane %v8367_v63, 4  ;;  %v2805_v32 = vrot.slane %v2754_v22, 2  ;;  %v2929_v33 = vrot.slane %v2878_v59, 3  ;;  %8369 = vst [vmem:[#allocation61_spill] sm:$0xff] %v5973_v25  ;;  %v8372_v22 = vld [vmem:[#allocation55_spill] sm:$0xff] }
 0x1d7   : > { %v5957_v26 = vsel %vm791_vm2, %v8365_v30, %v2397_v24  ;;  %v468_v0 = vmul.f32 %v5960_v21, %v4562_v14  ;;  %v3134_v24 = vadd.f32 %v5973_v25, %v3111_v48  ;;  %v1508_v2 = vadd.f32 %v1458_v34, %v1384_v11 }
 0x1d8   : > { %v5969_v41 = vsel %vm916_vm3, %v8368_v60, %v2521_v8  ;;  %v510_v46 = vmul.f32 %v4565_v15, %v8361_v42  ;;  %v635_v55 = vmul.f32 %v4568_v16, %v8361_v42  ;;  %v8371_v50 = vrot.slane %v8370_v44, 1 }
 0x1d9   : > { %v8373_v59 = vrot.slane %v8372_v22, 2  ;;  %v3053_v30 = vrot.slane %v3002_v61, 4  ;;  %v760_v34 = vmul.f32 %v4571_v17, %v8361_v42  ;;  %v3150_v48 = vmax.f32 %v3134_v24, 0.0  ;;  %v8375_v22 = vld [vmem:[#allocation37_spill] sm:$0xff]  ;;  %v8376_v24 = vld [vmem:[#allocation62_spill] sm:$0xff] }
 0x1da   : > { %v5983_v8 = vsel %vm541_vm0, %v8371_v50, %v2681_v6  ;;  %v1544_v11 = vadd.f32 %v1528_v13, %v1508_v2  ;;  %v570_v63 = vrot.slane %v510_v46, 1  ;;  %v695_v60 = vrot.slane %v635_v55, 2  ;;  %v8378_v46 = vld [vmem:[#allocation63_spill] sm:$0xff] }
 0x1db   : > { %v5988_v57 = vsel %vm666_vm1, %v8373_v59, %v2805_v32  ;;  %v8374_v21 = vrot.slane %v5597_v56, 3  ;;  %v820_v6 = vrot.slane %v760_v34, 3  ;;  %v885_v50 = vmul.f32 %v4574_v18, %v8361_v42  ;;  %3656 = vmatprep.mubr.msk.f32.mxu1 %vm3165_vm4, %v3150_v48  ;;  %v8380_v42 = vld [vmem:[#allocation64_spill] sm:$0xff] }
 0x1dc   : > { %v1046_v32 = vmul.f32 %v4577_v19, %v8375_v22  ;;  %v1668_v61 = vadd.f32 %v1618_v47, %v1544_v11  ;;  %v8377_v13 = vrot.slane %v8376_v24, 1  ;;  %v8379_v56 = vrot.slane %v8378_v46, 2  ;;  %v8382_v24 = vld [vmem:[#allocation60_spill] sm:$0xff] }
 0x1dd   : > { %v5995_v44 = vsel %vm791_vm2, %v8374_v21, %v2929_v33  ;;  %v1170_v33 = vmul.f32 %v4580_v20, %v8375_v22  ;;  %v8381_v59 = vrot.slane %v8380_v42, 3  ;;  %v945_v25 = vrot.slane %v885_v50, 4  ;;  %v6026_v50 = vld [vmem:[%s4521_s18 + $0x98] sm:$0xff] }
 0x1de   : > { %v571_v2 = vsel %vm541_vm0, %v8377_v13, %v570_v63  ;;  %v696_v21 = vsel %vm666_vm1, %v8379_v56, %v695_v60  ;;  %v1105_v48 = vrot.slane %v1046_v32, 1  ;;  %v1792_v4 = vadd.f32 %v1742_v38, %v1668_v61  ;;  %8386 = vst [vmem:[#allocation65_spill] sm:$0xff] %v6026_v50  ;;  %v8387_v61 = vld [vmem:[#allocation68_spill] sm:$0xff] }
 0x1df   : > { %v609_v55 = vadd.f32 %v571_v2, %v468_v0  ;;  %v821_v34 = vsel %vm791_vm2, %v8381_v59, %v820_v6  ;;  %v1229_v47 = vrot.slane %v1170_v33, 2  ;;  %v1294_v11 = vmul.f32 %v4639_v53, %v8375_v22  ;;  %v8384_v2 = vld [vmem:[#allocation66_spill] sm:$0xff] }
 0x1e0   : > { %v1418_v63 = vmul.f32 %v4642_v54, %v8375_v22  ;;  %v8383_v60 = vrot.slane %v8382_v24, 4  ;;  %v8385_v46 = vrot.slane %v8384_v2, 4  ;;  %v1004_v38 = vmul.f32 %v6026_v50, %v4610_v37 }
 0x1e1   : > { %v734_v0 = vadd.f32 %v696_v21, %v609_v55  ;;  %v1916_v32 = vadd.f32 %v1866_v36, %v1792_v4  ;;  %v8388_v56 = vrot.slane %v8387_v61, 1  ;;  %v1353_v33 = vrot.slane %v1294_v11, 3 }
 0x1e2   : > { %v6020_v13 = vsel %vm916_vm3, %v8383_v60, %v3053_v30  ;;  %v946_v6 = vsel %vm916_vm3, %v8385_v46, %v945_v25  ;;  %v1477_v42 = vrot.slane %v1418_v63, 4  ;;  %v8389_v30 = vld [vmem:[#allocation38_spill] sm:$0xff]  ;;  %v8390_v60 = vld [vmem:[#allocation69_spill] sm:$0xff] }
 0x1e3   : > { %v1106_v22 = vsel %vm541_vm0, %v8388_v56, %v1105_v48  ;;  %v859_v59 = vadd.f32 %v821_v34, %v734_v0  ;;  %v1578_v21 = vmul.f32 %v4650_v58, %v8389_v30  ;;  %v1702_v55 = vmul.f32 %v4686_v28, %v8389_v30  ;;  %v6044_v48 = vld [vmem:[%s4521_s18 + $0xb0] sm:$0xff] }
 0x1e4   : > { %v1826_v25 = vmul.f32 %v4692_v39, %v8389_v30  ;;  %v2040_v24 = vadd.f32 %v5934_v35, %v1916_v32  ;;  %v8391_v36 = vrot.slane %v8390_v60, 2  ;;  %8392 = vst [vmem:[#allocation67_spill] sm:$0xff] %v6044_v48  ;;  %v1536_v34 = vmul.f32 %v6044_v48, %v8278_v23  ;;  %v8393_v32 = vld [vmem:[#allocation70_spill] sm:$0xff]  ;;  %v8395_v60 = vld [vmem:[#allocation40_spill] sm:$0xff]  ;;  %v8396_v48 = vld [vmem:[#allocation71_spill] sm:$0xff] }
 0x1e5   : > { %v1950_v11 = vmul.f32 %v8282_v5, %v8389_v30  ;;  %v984_v63 = vadd.f32 %v946_v6, %v859_v59  ;;  %v1637_v0 = vrot.slane %v1578_v21, 1  ;;  %v1761_v2 = vrot.slane %v1702_v55, 2  ;;  %v8398_v6 = vld [vmem:[#allocation74_spill] sm:$0xff]  ;;  %v6063_v55 = vld [vmem:[%s4529_s6 + $0x8] sm:$0xff] }
 0x1e6   : > { %v1230_v4 = vsel %vm666_vm1, %v8391_v36, %v1229_v47  ;;  %v1885_v46 = vrot.slane %v1826_v25, 3  ;;  %v2076_v35 = vadd.f32 %v5916_v45, %v2040_v24  ;;  %v8394_v61 = vrot.slane %v8393_v32, 3  ;;  %8400 = vst [vmem:[#allocation72_spill] sm:$0xff] %v6063_v55  ;;  %v8401_v25 = vld [vmem:[#allocation75_spill] sm:$0xff] }
 0x1e7   : > { %v2009_v47 = vrot.slane %v1950_v11, 4  ;;  %v2110_v36 = vmul.f32 %v4733_v29, %v8395_v60  ;;  %v1020_v50 = vadd.f32 %v1004_v38, %v984_v63  ;;  %v8397_v23 = vrot.slane %v8396_v48, 4  ;;  %v8403_v11 = vld [vmem:[#allocation76_spill] sm:$0xff] }
 0x1e8   : > { %v1354_v56 = vsel %vm791_vm2, %v8394_v61, %v1353_v33  ;;  %v8399_v59 = vrot.slane %v8398_v6, 1  ;;  %v6067_v45 = vmul.f32 %v6063_v55, %v4725_v10  ;;  %v2200_v33 = vadd.f32 %v5939_v27, %v2076_v35  ;;  %v6079_v63 = vld [vmem:[%s4529_s6 + $0x28] sm:$0xf]  ;;  %v8415_v55 = vld [vmem:[#allocation82_spill] sm:$0xff] }
 0x1e9   : > { %v1478_v30 = vsel %vm916_vm3, %v8397_v23, %v1477_v42  ;;  %v8402_v24 = vrot.slane %v8401_v25, 2  ;;  %v8404_v48 = vrot.slane %v8403_v11, 3  ;;  %v2234_v42 = vmul.f32 %v4745_v49, %v8395_v60  ;;  %8405 = vst [vmem:[#allocation73_spill] sm:$0xff] %v6079_v63 }
 0x1ea   : > { %v1638_v21 = vsel %vm541_vm0, %v8399_v59, %v1637_v0  ;;  %v1144_v0 = vadd.f32 %v1106_v22, %v1020_v50  ;;  %v2169_v32 = vrot.slane %v2110_v36, 1  ;;  %v2358_v61 = vmul.f32 %v4755_v52, %v8395_v60 }
 0x1eb   : > { %v1762_v38 = vsel %vm666_vm1, %v8402_v24, %v1761_v2  ;;  %v1886_v23 = vsel %vm791_vm2, %v8404_v48, %v1885_v46  ;;  %v2482_v27 = vmul.f32 %v4764_v43, %v8395_v60  ;;  %v2324_v35 = vadd.f32 %v5946_v7, %v2200_v33  ;;  %v8406_v2 = vld [vmem:[#allocation77_spill] sm:$0xff] }
 0x1ec   : > { %v8407_v6 = vrot.slane %v8406_v2, 4  ;;  %v2293_v46 = vrot.slane %v2234_v42, 2  ;;  %v2642_v25 = vmul.f32 %v4799_v31, %v6079_v63  ;;  %v1268_v24 = vadd.f32 %v1230_v4, %v1144_v0  ;;  %v8408_v60 = vld [vmem:[#allocation41_spill] sm:$0xff]  ;;  %v8409_v42 = vld [vmem:[#allocation80_spill] sm:$0xff]  ;;  %v8411_v0 = vld [vmem:[#allocation31_spill] sm:$0xff] }
 0x1ed   : > { %v2417_v11 = vrot.slane %v2358_v61, 3  ;;  %v2541_v50 = vrot.slane %v2482_v27, 4  ;;  %v2766_v22 = vmul.f32 %v4802_v1, %v6079_v63  ;;  %v2448_v36 = vadd.f32 %v5957_v26, %v2324_v35 }
 0x1ee   : > { %v2010_v59 = vsel %vm916_vm3, %v8407_v6, %v2009_v47  ;;  %v6096_v7 = vmul.f32 %v4796_v12, %v8408_v60  ;;  %v2701_v33 = vrot.slane %v2642_v25, 1  ;;  %v2890_v47 = vmul.f32 %v4812_v51, %v6079_v63  ;;  %v8413_v6 = vld [vmem:[#allocation81_spill] sm:$0xff] }
 0x1ef   : > { %v1392_v48 = vadd.f32 %v1354_v56, %v1268_v24  ;;  %v8410_v2 = vrot.slane %v8409_v42, 1  ;;  %v8412_v61 = vrot.slane %v8411_v0, 2  ;;  %v2825_v26 = vrot.slane %v2766_v22, 2  ;;  %v3833_v22 = vld [vmem:[%s4521_s18 + $0x30] sm:$0xff] }
 0x1f0   : > { %v2572_v35 = vadd.f32 %v5969_v41, %v2448_v36  ;;  %v8414_v60 = vrot.slane %v8413_v6, 3  ;;  %v8416_v56 = vrot.slane %v8415_v55, 4  ;;  %v6128_v41 = vmul.f32 %v4837_v40, %v6079_v63  ;;  %v8419_v55 = vld [vmem:[#allocation83_spill] sm:$0xff] }
 0x1f1   : > { %v6103_v4 = vsel %vm541_vm0, %v8410_v2, %v2169_v32  ;;  %v6108_v27 = vsel %vm666_vm1, %v8412_v61, %v2293_v46  ;;  %v2949_v32 = vrot.slane %v2890_v47, 3  ;;  %v1516_v42 = vadd.f32 %v1478_v30, %v1392_v48  ;;  %v8417_v2 = vld [vmem:[#allocation42_spill] sm:$0xff] }
 0x1f2   : > { %v6114_v25 = vsel %vm791_vm2, %v8414_v60, %v2417_v11  ;;  %v6119_v24 = vsel %vm916_vm3, %v8416_v56, %v2541_v50  ;;  %v8418_v0 = vrot.slane %v8417_v2, 1  ;;  %v499_v11 = vmul.f32 %v3833_v22, %v4565_v15 }
 0x1f3   : > { %v2608_v36 = vadd.f32 %v5964_v9, %v2572_v35  ;;  %v8420_v60 = vrot.slane %v8419_v55, 2  ;;  %v461_v30 = vmul.f32 %v3833_v22, %v4562_v14  ;;  %v1552_v47 = vadd.f32 %v1536_v34, %v1516_v42 }
 0x1f4   : > { %v6124_v46 = vsel %vm541_vm0, %v8418_v0, %v2701_v33  ;;  %v6141_v33 = vmul.f32 %v5874_v3, %v4565_v15  ;;  %v552_v48 = vrot.slane %v499_v11, 1  ;;  %v624_v61 = vmul.f32 %v3833_v22, %v4568_v16 }
 0x1f5   : > { %v6136_v50 = vsel %vm666_vm1, %v8420_v60, %v2825_v26  ;;  %v6146_v6 = vmul.f32 %v5874_v3, %v4568_v16  ;;  %v2732_v9 = vadd.f32 %v5983_v8, %v2608_v36  ;;  %v8421_v35 = vrot.slane %v5820_v62, 3 }
 0x1f6   : > { %v7925_v56 = vrot.slane %v6141_v33, 1  ;;  %v749_v2 = vmul.f32 %v3833_v22, %v4571_v17  ;;  %v1676_v34 = vadd.f32 %v1638_v21, %v1552_v47  ;;  %v677_v42 = vrot.slane %v624_v61, 2 }
 0x1f7   : > { %v6152_v26 = vsel %vm791_vm2, %v8421_v35, %v2949_v32  ;;  %v7924_v0 = vrot.slane %v6146_v6, 2  ;;  %v6159_v11 = vmul.f32 %v5874_v3, %v4571_v17  ;;  %v2856_v8 = vadd.f32 %v5988_v57, %v2732_v9  ;;  %v6176_v35 = vld [vmem:[%s4521_s18 + $0x48] sm:$0xff] }
 0x1f8   : > { %v554_v62 = vsel %vm541_vm0, %v552_v48, %v7925_v56  ;;  %v802_v32 = vrot.slane %v749_v2, 3  ;;  %v874_v36 = vmul.f32 %v3833_v22, %v4574_v18  ;;  %v1800_v55 = vadd.f32 %v1762_v38, %v1676_v34  ;;  %8422 = vst [vmem:[#allocation78_spill] sm:$0xff] %v6176_v35 }
 0x1f9   : > { %v602_v60 = vadd.f32 %v554_v62, %v461_v30  ;;  %v679_v21 = vsel %vm666_vm1, %v677_v42, %v7924_v0  ;;  %v7923_v47 = vrot.slane %v6159_v11, 3  ;;  %v2980_v61 = vadd.f32 %v5995_v44, %v2856_v8  ;;  %v8423_v42 = vld [vmem:[#allocation50_spill] sm:$0xff] }
 0x1fa   : > { %v6173_v57 = vmul.f32 %v5874_v3, %v4574_v18  ;;  %v927_v9 = vrot.slane %v874_v36, 4  ;;  %v997_v22 = vmul.f32 %v6176_v35, %v4610_v37  ;;  %v1924_v38 = vadd.f32 %v1886_v23, %v1800_v55 }
 0x1fb   : > { %v727_v30 = vadd.f32 %v679_v21, %v602_v60  ;;  %v804_v48 = vsel %vm791_vm2, %v802_v32, %v7923_v47  ;;  %v1035_v2 = vmul.f32 %v6176_v35, %v4577_v19  ;;  %v3104_v44 = vadd.f32 %v6020_v13, %v2980_v61  ;;  %v8425_v60 = vld [vmem:[#allocation61_spill] sm:$0xff] }
 0x1fc   : > { %v7929_v34 = vrot.slane %v6173_v57, 4  ;;  %v6189_v8 = vmul.f32 %v8423_v42, %v4577_v19  ;;  %v1159_v62 = vmul.f32 %v6176_v35, %v4580_v20  ;;  %v2048_v23 = vadd.f32 %v2010_v59, %v1924_v38 }
 0x1fd   : > { %v852_v36 = vadd.f32 %v804_v48, %v727_v30  ;;  %v1087_v55 = vrot.slane %v1035_v2, 1  ;;  %v6195_v32 = vmul.f32 %v8423_v42, %v4580_v20  ;;  %v3127_v21 = vadd.f32 %v8425_v60, %v3104_v44 }
 0x1fe   : > { %v929_v13 = vsel %vm916_vm3, %v927_v9, %v7929_v34  ;;  %v7926_v61 = vrot.slane %v6189_v8, 1  ;;  %v1211_v47 = vrot.slane %v1159_v62, 2  ;;  %v2084_v0 = vadd.f32 %v6067_v45, %v2048_v23 }
 0x1ff   : > { %8424 = vst [vmem:[#allocation79_spill] sm:$0xff] %v6195_v32  ;;  %v977_v56 = vadd.f32 %v929_v13, %v852_v36  ;;  %v7927_v59 = vrot.slane %v6195_v32, 2  ;;  %v1283_v38 = vmul.f32 %v6176_v35, %v4639_v53  ;;  %v3143_v30 = vmax.f32 %v3127_v21, 0.0 }
 0x200   : > { %v1089_v48 = vsel %vm541_vm0, %v1087_v55, %v7926_v61  ;;  %v6211_v9 = vmul.f32 %v8423_v42, %v4639_v53  ;;  %v1407_v2 = vmul.f32 %v6176_v35, %v4642_v54  ;;  %v2208_v45 = vadd.f32 %v6103_v4, %v2084_v0  ;;  %v6228_v0 = vld [vmem:[%s4521_s18 + $0x60] sm:$0xff] }
 0x201   : > { %v3073_v44 = vrot.slane %v6128_v41, 4  ;;  %v1013_v62 = vadd.f32 %v997_v22, %v977_v56  ;;  %v1335_v23 = vrot.slane %v1283_v38, 3  ;;  %3645 = vmatmul.mubr.msk.f32.gmra.mrb[2].mxu0 %vm3165_vm4, %v3143_v30  ;;  %v1213_v36 = vsel %vm666_vm1, %v1211_v47, %v7927_v59  ;;  %8428 = vst [vmem:[#allocation32_spill] sm:$0xff] %v6228_v0  ;;  %v8429_v56 = vld [vmem:[#allocation51_spill] sm:$0xff] }
 0x202   : > { %8426 = vst [vmem:[#allocation84_spill] sm:$0xff] %v6211_v9  ;;  %v7928_v55 = vrot.slane %v6211_v9, 3  ;;  %v6224_v21 = vmul.f32 %v8423_v42, %v4642_v54  ;;  %v1459_v13 = vrot.slane %v1407_v2, 4  ;;  %v2332_v61 = vadd.f32 %v6108_v27, %v2208_v45  ;;  %v8432_v9 = vld [vmem:[#allocation35_spill] sm:$0xff] }
 0x203   : > { %v1137_v4 = vadd.f32 %v1089_v48, %v1013_v62  ;;  %v1567_v41 = vmul.f32 %v6228_v0, %v4650_v58  ;;  %v6234_v22 = vmul.f32 %v8429_v56, %v4650_v58  ;;  %v1691_v30 = vmul.f32 %v6228_v0, %v4686_v28 }
 0x204   : > { %8427 = vst [vmem:[#allocation85_spill] sm:$0xff] %v6224_v21  ;;  %v1337_v47 = vsel %vm791_vm2, %v1335_v23, %v7928_v55  ;;  %v7935_v38 = vrot.slane %v6224_v21, 4  ;;  %v6244_v27 = vmul.f32 %v8429_v56, %v4686_v28  ;;  %v2456_v48 = vadd.f32 %v6114_v25, %v2332_v61 }
 0x205   : > { %8430 = vst [vmem:[#allocation43_spill] sm:$0xff] %v6234_v22  ;;  %v1261_v2 = vadd.f32 %v1213_v36, %v1137_v4  ;;  %v1619_v45 = vrot.slane %v1567_v41, 1  ;;  %v7936_v62 = vrot.slane %v6234_v22, 1  ;;  %v1743_v23 = vrot.slane %v1691_v30, 2  ;;  %v8434_v36 = vld [vmem:[#allocation39_spill] sm:$0xff] }
 0x206   : > { %8431 = vst [vmem:[#allocation34_spill] sm:$0xff] %v6244_v27  ;;  %v1461_v59 = vsel %vm916_vm3, %v1459_v13, %v7935_v38  ;;  %v7939_v55 = vrot.slane %v6244_v27, 2  ;;  %v1815_v34 = vmul.f32 %v6228_v0, %v4692_v39  ;;  %v2580_v35 = vadd.f32 %v6119_v24, %v2456_v48  ;;  %v6279_v38 = vld [vmem:[%s4521_s18 + $0x78] sm:$0xff] }
 0x207   : > { %v1385_v63 = vadd.f32 %v1337_v47, %v1261_v2  ;;  %v1529_v25 = vmul.f32 %v6228_v0, %v8432_v9  ;;  %v6259_v61 = vmul.f32 %v8429_v56, %v4692_v39  ;;  %v8435_v4 = vrot.slane %v8434_v36, 4  ;;  %8437 = vst [vmem:[#allocation46_spill] sm:$0xff] %v6279_v38 }
 0x208   : > { %v1621_v41 = vsel %vm541_vm0, %v1619_v45, %v7936_v62  ;;  %v1939_v30 = vmul.f32 %v6228_v0, %v8282_v5  ;;  %v6271_v24 = vmul.f32 %v8429_v56, %v8282_v5  ;;  %v2616_v47 = vadd.f32 %v6096_v7, %v2580_v35  ;;  %v8438_v62 = vld [vmem:[#allocation59_spill] sm:$0xff] }
 0x209   : > { %8433 = vst [vmem:[#allocation44_spill] sm:$0xff] %v6259_v61  ;;  %v3074_v13 = vsel %vm916_vm3, %v8435_v4, %v3073_v44  ;;  %v1509_v48 = vadd.f32 %v1461_v59, %v1385_v63  ;;  %v1745_v2 = vsel %vm666_vm1, %v1743_v23, %v7939_v55  ;;  %v1867_v36 = vrot.slane %v1815_v34, 3 }
 0x20a   : > { %8436 = vst [vmem:[#allocation45_spill] sm:$0xff] %v6271_v24  ;;  %v1991_v4 = vrot.slane %v1939_v30, 4  ;;  %v2099_v45 = vmul.f32 %v6279_v38, %v4733_v29  ;;  %v6285_v0 = vmul.f32 %v8438_v62, %v4733_v29  ;;  %v2740_v7 = vadd.f32 %v6124_v46, %v2616_v47 }
 0x20b   : > { %v1545_v63 = vadd.f32 %v1529_v25, %v1509_v48  ;;  %v2223_v34 = vmul.f32 %v6279_v38, %v4745_v49  ;;  %v2061_v59 = vmul.f32 %v6279_v38, %v4725_v10  ;;  %v6296_v55 = vmul.f32 %v8438_v62, %v4745_v49 }
 0x20c   : > { %8439 = vst [vmem:[#allocation52_spill] sm:$0xff] %v6285_v0  ;;  %v2151_v23 = vrot.slane %v2099_v45, 1  ;;  %v2864_v44 = vadd.f32 %v6136_v50, %v2740_v7  ;;  %v2347_v25 = vmul.f32 %v6279_v38, %v4755_v52  ;;  %v8441_v47 = vrot.slane %v6259_v61, 3 }
 0x20d   : > { %8440 = vst [vmem:[#allocation53_spill] sm:$0xff] %v6296_v55  ;;  %v1669_v27 = vadd.f32 %v1621_v41, %v1545_v63  ;;  %v2275_v46 = vrot.slane %v2223_v34, 2  ;;  %v7946_v45 = vrot.slane %v6296_v55, 2  ;;  %v6307_v30 = vmul.f32 %v8438_v62, %v4755_v52 }
 0x20e   : > { %v1869_v48 = vsel %vm791_vm2, %v1867_v36, %v8441_v47  ;;  %v2471_v35 = vmul.f32 %v6279_v38, %v4764_v43  ;;  %v2988_v50 = vadd.f32 %v6152_v26, %v2864_v44  ;;  %v8443_v7 = vrot.slane %v6271_v24, 4  ;;  %v6327_v24 = vld [vmem:[%s4521_s18 + $0x90] sm:$0xff] }
 0x20f   : > { %8442 = vst [vmem:[#allocation36_spill] sm:$0xff] %v6307_v30  ;;  %v1793_v41 = vadd.f32 %v1745_v2, %v1669_v27  ;;  %v6317_v34 = vmul.f32 %v8438_v62, %v4764_v43  ;;  %v8445_v36 = vrot.slane %v6285_v0, 1  ;;  %v2277_v61 = vsel %vm666_vm1, %v2275_v46, %v7946_v45  ;;  %8446 = vst [vmem:[#allocation56_spill] sm:$0xff] %v6327_v24  ;;  %v8447_v0 = vld [vmem:[#allocation65_spill] sm:$0xff] }
 0x210   : > { %v1993_v63 = vsel %vm916_vm3, %v1991_v4, %v8443_v7  ;;  %v2399_v38 = vrot.slane %v2347_v25, 3  ;;  %v3112_v27 = vadd.f32 %v3074_v13, %v2988_v50  ;;  %v2523_v44 = vrot.slane %v2471_v35, 4 }
 0x211   : > { %8444 = vst [vmem:[#allocation54_spill] sm:$0xff] %v6317_v34  ;;  %v2153_v47 = vsel %vm541_vm0, %v2151_v23, %v8445_v36  ;;  %v1917_v2 = vadd.f32 %v1869_v48, %v1793_v41  ;;  %v2631_v4 = vmul.f32 %v6327_v24, %v4799_v31  ;;  %v6334_v23 = vmul.f32 %v8447_v0, %v4799_v31 }
 0x212   : > { %v2755_v46 = vmul.f32 %v6327_v24, %v4802_v1  ;;  %v6340_v25 = vmul.f32 %v8447_v0, %v4802_v1  ;;  %v3135_v13 = vadd.f32 %v8425_v60, %v3112_v27  ;;  %v2593_v48 = vmul.f32 %v6327_v24, %v4796_v12 }
 0x213   : > { %8448 = vst [vmem:[#allocation57_spill] sm:$0xff] %v6334_v23  ;;  %v2041_v35 = vadd.f32 %v1993_v63, %v1917_v2  ;;  %v2683_v50 = vrot.slane %v2631_v4, 1  ;;  %v7952_v41 = vrot.slane %v6334_v23, 1  ;;  %v2879_v7 = vmul.f32 %v6327_v24, %v4812_v51 }
 0x214   : > { %8449 = vst [vmem:[#allocation58_spill] sm:$0xff] %v6340_v25  ;;  %v2807_v36 = vrot.slane %v2755_v46, 2  ;;  %v7951_v45 = vrot.slane %v6340_v25, 2  ;;  %v3151_v26 = vmax.f32 %v3135_v13, 0.0  ;;  %v6351_v22 = vmul.f32 %v8447_v0, %v4812_v51 }
 0x215   : > { %v2077_v55 = vadd.f32 %v2061_v59, %v2041_v35  ;;  %v3003_v63 = vmul.f32 %v6327_v24, %v4837_v40  ;;  %v8450_v27 = vrot.slane %v6307_v30, 3  ;;  %v8451_v4 = vrot.slane %v6317_v34, 4 }
 0x216   : > { %v2685_v13 = vsel %vm541_vm0, %v2683_v50, %v7952_v41  ;;  %v6366_v59 = vmul.f32 %v8447_v0, %v4837_v40  ;;  %3657 = vmatmul.mubr.msk.f32.gmra.mrb[2].mxu1 %vm3165_vm4, %v3151_v26  ;;  %v2809_v30 = vsel %vm666_vm1, %v2807_v36, %v7951_v45  ;;  %v6377_v50 = vmul.f32 %v8447_v0, %v4565_v15 }
 0x217   : > { %v2401_v2 = vsel %vm791_vm2, %v2399_v38, %v8450_v27  ;;  %v2525_v46 = vsel %vm916_vm3, %v2523_v44, %v8451_v4  ;;  %v2201_v35 = vadd.f32 %v2153_v47, %v2077_v55  ;;  %v2931_v38 = vrot.slane %v2879_v7, 3 }
 0x218   : > { %8452 = vst [vmem:[#allocation55_spill] sm:$0xff] %v6366_v59  ;;  %v3055_v34 = vrot.slane %v3003_v63, 4  ;;  %v511_v44 = vmul.f32 %v6327_v24, %v4565_v15  ;;  %8453 = vst [vmem:[#allocation37_spill] sm:$0xff] %v6377_v50  ;;  %v636_v4 = vmul.f32 %v6327_v24, %v4568_v16  ;;  %v469_v47 = vmul.f32 %v6327_v24, %v4562_v14 }
 0x219   : > { %v2325_v55 = vadd.f32 %v2277_v61, %v2201_v35  ;;  %v6385_v26 = vmul.f32 %v8447_v0, %v4568_v16  ;;  %v761_v7 = vmul.f32 %v6327_v24, %v4571_v17  ;;  %v7956_v45 = vrot.slane %v6377_v50, 1 }
 0x21a   : > { %v572_v63 = vrot.slane %v511_v44, 1  ;;  %v697_v41 = vrot.slane %v636_v4, 2  ;;  %v6394_v61 = vmul.f32 %v8447_v0, %v4571_v17  ;;  %v886_v62 = vmul.f32 %v6327_v24, %v4574_v18  ;;  %v6406_v4 = vld [vmem:[%s4521_s18 + $0xa8] sm:$0xff] }
 0x21b   : > { %v2449_v27 = vadd.f32 %v2401_v2, %v2325_v55  ;;  %v7966_v25 = vrot.slane %v6385_v26, 2  ;;  %v822_v35 = vrot.slane %v761_v7, 3  ;;  %v6403_v44 = vmul.f32 %v8447_v0, %v4574_v18  ;;  %8456 = vst [vmem:[#allocation64_spill] sm:$0xff] %v6406_v4  ;;  %v8457_v0 = vld [vmem:[#allocation67_spill] sm:$0xff] }
 0x21c   : > { %8454 = vst [vmem:[#allocation62_spill] sm:$0xff] %v6394_v61  ;;  %v574_v23 = vsel %vm541_vm0, %v572_v63, %v7956_v45  ;;  %v1005_v2 = vmul.f32 %v6406_v4, %v4610_v37  ;;  %v7964_v63 = vrot.slane %v6394_v61, 3  ;;  %v947_v45 = vrot.slane %v886_v62, 4 }
 0x21d   : > { %8455 = vst [vmem:[#allocation63_spill] sm:$0xff] %v6403_v44  ;;  %v2573_v55 = vadd.f32 %v2525_v46, %v2449_v27  ;;  %v610_v36 = vadd.f32 %v574_v23, %v469_v47  ;;  %v699_v7 = vsel %vm666_vm1, %v697_v41, %v7966_v25  ;;  %v7965_v24 = vrot.slane %v6403_v44, 4 }
 0x21e   : > { %v1047_v50 = vmul.f32 %v6406_v4, %v4577_v19  ;;  %v6419_v21 = vmul.f32 %v8457_v0, %v4577_v19  ;;  %v824_v23 = vsel %vm791_vm2, %v822_v35, %v7964_v63  ;;  %v1171_v41 = vmul.f32 %v6406_v4, %v4580_v20 }
 0x21f   : > { %v2609_v32 = vadd.f32 %v2593_v48, %v2573_v55  ;;  %v735_v56 = vadd.f32 %v699_v7, %v610_v36  ;;  %v949_v62 = vsel %vm916_vm3, %v947_v45, %v7965_v24  ;;  %v6432_v47 = vmul.f32 %v8457_v0, %v4580_v20 }
 0x220   : > { %8458 = vst [vmem:[#allocation60_spill] sm:$0xff] %v6419_v21  ;;  %v1107_v46 = vrot.slane %v1047_v50, 1  ;;  %v7971_v27 = vrot.slane %v6419_v21, 1  ;;  %v1231_v55 = vrot.slane %v1171_v41, 2  ;;  %v1295_v35 = vmul.f32 %v6406_v4, %v4639_v53 }
 0x221   : > { %8459 = vst [vmem:[#allocation66_spill] sm:$0xff] %v6432_v47  ;;  %v2733_v48 = vadd.f32 %v2685_v13, %v2609_v32  ;;  %v860_v36 = vadd.f32 %v824_v23, %v735_v56  ;;  %v8460_v7 = vrot.slane %v6351_v22, 3  ;;  %v7970_v45 = vrot.slane %v6432_v47, 2 }
 0x222   : > { %v6442_v50 = vmul.f32 %v8457_v0, %v4639_v53  ;;  %v1419_v24 = vmul.f32 %v6406_v4, %v4642_v54  ;;  %v1355_v13 = vrot.slane %v1295_v35, 3  ;;  %v6448_v23 = vmul.f32 %v8457_v0, %v4642_v54  ;;  %v6461_v35 = vld [vmem:[%s4529_s6] sm:$0xff] }
 0x223   : > { %v2933_v63 = vsel %vm791_vm2, %v2931_v38, %v8460_v7  ;;  %v2857_v32 = vadd.f32 %v2809_v30, %v2733_v48  ;;  %v985_v56 = vadd.f32 %v949_v62, %v860_v36  ;;  %v8463_v41 = vrot.slane %v6366_v59, 4  ;;  %8464 = vst [vmem:[#allocation69_spill] sm:$0xff] %v6461_v35 }
 0x224   : > { %8461 = vst [vmem:[#allocation68_spill] sm:$0xff] %v6442_v50  ;;  %8462 = vst [vmem:[#allocation38_spill] sm:$0xff] %v6448_v23  ;;  %v1109_v7 = vsel %vm541_vm0, %v1107_v46, %v7971_v27  ;;  %v1233_v25 = vsel %vm666_vm1, %v1231_v55, %v7970_v45  ;;  %v7974_v30 = vrot.slane %v6442_v50, 3  ;;  %v1479_v36 = vrot.slane %v1419_v24, 4 }
 0x225   : > { %v3057_v38 = vsel %vm916_vm3, %v3055_v34, %v8463_v41  ;;  %v2981_v62 = vadd.f32 %v2933_v63, %v2857_v32  ;;  %v1021_v48 = vadd.f32 %v1005_v2, %v985_v56  ;;  %v1579_v4 = vmul.f32 %v6461_v35, %v4650_v58  ;;  %v8465_v41 = vld [vmem:[#allocation72_spill] sm:$0xff] }
 0x226   : > { %v6468_v21 = vmul.f32 %v8465_v41, %v4650_v58  ;;  %v1703_v46 = vmul.f32 %v6461_v35, %v4686_v28  ;;  %v6474_v55 = vmul.f32 %v8465_v41, %v4686_v28  ;;  %v1357_v63 = vsel %vm791_vm2, %v1355_v13, %v7974_v30 }
 0x227   : > { %v3105_v2 = vadd.f32 %v3057_v38, %v2981_v62  ;;  %v1145_v24 = vadd.f32 %v1109_v7, %v1021_v48  ;;  %v1639_v32 = vrot.slane %v1579_v4, 1  ;;  %v1827_v34 = vmul.f32 %v6461_v35, %v4692_v39 }
 0x228   : > { %8466 = vst [vmem:[#allocation70_spill] sm:$0xff] %v6468_v21  ;;  %8467 = vst [vmem:[#allocation40_spill] sm:$0xff] %v6474_v55  ;;  %v7979_v56 = vrot.slane %v6468_v21, 1  ;;  %v1763_v45 = vrot.slane %v1703_v46, 2  ;;  %v6486_v38 = vmul.f32 %v8465_v41, %v4692_v39  ;;  %v1951_v7 = vmul.f32 %v6461_v35, %v8282_v5 }
 0x229   : > { %v3128_v47 = vadd.f32 %v8425_v60, %v3105_v2  ;;  %v1269_v0 = vadd.f32 %v1233_v25, %v1145_v24  ;;  %v8469_v4 = vrot.slane %v6448_v23, 4  ;;  %v1537_v62 = vmul.f32 %v6461_v35, %v8432_v9  ;;  %v8472_v35 = vld [vmem:[#allocation41_spill] sm:$0xff] }
 0x22a   : > { %8468 = vst [vmem:[#allocation71_spill] sm:$0xff] %v6486_v38  ;;  %v1641_v48 = vsel %vm541_vm0, %v1639_v32, %v7979_v56  ;;  %v6500_v25 = vmul.f32 %v8465_v41, %v8282_v5  ;;  %v1887_v24 = vrot.slane %v1827_v34, 3  ;;  %v7983_v30 = vrot.slane %v6486_v38, 3 }
 0x22b   : > { %v1481_v13 = vsel %vm916_vm3, %v1479_v36, %v8469_v4  ;;  %v3144_v46 = vmax.f32 %v3128_v47, 0.0  ;;  %v1393_v2 = vadd.f32 %v1357_v63, %v1269_v0  ;;  %v2011_v27 = vrot.slane %v1951_v7, 4  ;;  %v8471_v36 = vld [vmem:[#allocation33_spill] sm:$0xff] }
 0x22c   : > { %8470 = vst [vmem:[#allocation74_spill] sm:$0xff] %v6500_v25  ;;  %v2111_v4 = vmul.f32 %v4733_v29, %v8471_v36  ;;  %v6508_v21 = vmul.f32 %v4733_v29, %v8472_v35  ;;  %v8474_v56 = vrot.slane %v6474_v55, 2  ;;  %v2235_v47 = vmul.f32 %v4745_v49, %v8471_v36 }
 0x22d   : > { %3647 = vmatprep.mubr.msk.f32.mxu0 %vm3165_vm4, %v3144_v46  ;;  %v1517_v32 = vadd.f32 %v1481_v13, %v1393_v2  ;;  %v6518_v34 = vmul.f32 %v4745_v49, %v8472_v35  ;;  %v2069_v63 = vmul.f32 %v4725_v10, %v8471_v36  ;;  %v2359_v13 = vmul.f32 %v4755_v52, %v8471_v36 }
 0x22e   : > { %8473 = vst [vmem:[#allocation75_spill] sm:$0xff] %v6508_v21  ;;  %v1765_v0 = vsel %vm666_vm1, %v1763_v45, %v8474_v56  ;;  %v2171_v7 = vrot.slane %v2111_v4, 1  ;;  %v2295_v23 = vrot.slane %v2235_v47, 2  ;;  %v6528_v56 = vmul.f32 %v4755_v52, %v8472_v35  ;;  %v6546_v47 = vld [vmem:[%s4529_s6 + $0x38] sm:$0xff] }
 0x22f   : > { %8475 = vst [vmem:[#allocation76_spill] sm:$0xff] %v6518_v34  ;;  %v1553_v2 = vadd.f32 %v1537_v62, %v1517_v32  ;;  %v1889_v55 = vsel %vm791_vm2, %v1887_v24, %v7983_v30  ;;  %v8477_v50 = vrot.slane %v6500_v25, 4  ;;  %v2483_v46 = vmul.f32 %v4764_v43, %v8471_v36  ;;  %v6543_v32 = vld [vmem:[%s4529_s6 + $0x30] sm:$0xff]  ;;  %8480 = vst [vmem:[#allocation81_spill] sm:$0xff] %v6546_v47 }
 0x230   : > { %8476 = vst [vmem:[#allocation77_spill] sm:$0xff] %v6528_v56  ;;  %v6540_v62 = vmul.f32 %v4764_v43, %v8472_v35  ;;  %8479 = vst [vmem:[#allocation31_spill] sm:$0xff] %v6543_v32  ;;  %v8481_v38 = vrot.slane %v6508_v21, 1  ;;  %v2419_v30 = vrot.slane %v2359_v13, 3  ;;  %v7989_v25 = vrot.slane %v6528_v56, 3 }
 0x231   : > { %v2013_v4 = vsel %vm916_vm3, %v2011_v27, %v8477_v50  ;;  %v1677_v45 = vadd.f32 %v1641_v48, %v1553_v2  ;;  %v8482_v27 = vrot.slane %v6518_v34, 2  ;;  %v2543_v36 = vrot.slane %v2483_v46, 4 }
 0x232   : > { %8478 = vst [vmem:[#allocation80_spill] sm:$0xff] %v6540_v62  ;;  %v2173_v24 = vsel %vm541_vm0, %v2171_v7, %v8481_v38  ;;  %v2643_v35 = vmul.f32 %v4799_v31, %v6543_v32  ;;  %v6559_v41 = vmul.f32 %v4799_v31, %v6546_v47  ;;  %v2767_v38 = vmul.f32 %v4802_v1, %v6543_v32 }
 0x233   : > { %v2297_v50 = vsel %vm666_vm1, %v2295_v23, %v8482_v27  ;;  %v1801_v48 = vadd.f32 %v1765_v0, %v1677_v45  ;;  %v6566_v7 = vmul.f32 %v4802_v1, %v6546_v47  ;;  %v6570_v23 = vmul.f32 %v4796_v12, %v6543_v32 }
 0x234   : > { %8483 = vst [vmem:[#allocation82_spill] sm:$0xff] %v6559_v41  ;;  %v2703_v46 = vrot.slane %v2643_v35, 1  ;;  %v2891_v0 = vmul.f32 %v4812_v51, %v6543_v32  ;;  %v2421_v27 = vsel %vm791_vm2, %v2419_v30, %v7989_v25  ;;  %v2827_v2 = vrot.slane %v2767_v38, 2 }
 0x235   : > { %v1925_v45 = vadd.f32 %v1889_v55, %v1801_v48  ;;  %v6580_v34 = vmul.f32 %v4812_v51, %v6546_v47  ;;  %v3015_v35 = vmul.f32 %v4837_v40, %v6543_v32  ;;  %v6587_v13 = vmul.f32 %v4837_v40, %v6546_v47  ;;  %v3840_v32 = vld [vmem:[%s4521_s18 + $0x40] sm:$0xf] }
 0x236   : > { %v2951_v44 = vrot.slane %v2891_v0, 3  ;;  %v8486_v48 = vrot.slane %v6540_v62, 4  ;;  %v8487_v38 = vrot.slane %v6559_v41, 1  ;;  %v462_v0 = vmul.f32 %v5874_v3, %v4562_v14 }
 0x237   : > { %8484 = vst [vmem:[#allocation42_spill] sm:$0xff] %v6580_v34  ;;  %8485 = vst [vmem:[#allocation83_spill] sm:$0xff] %v6587_v13  ;;  %v2049_v55 = vadd.f32 %v2013_v4, %v1925_v45  ;;  %v7999_v56 = vrot.slane %v6580_v34, 3  ;;  %v3075_v21 = vrot.slane %v3015_v35, 4  ;;  %v501_v47 = vmul.f32 %v3840_v32, %v4565_v15 }
 0x238   : > { %v2545_v30 = vsel %vm916_vm3, %v2543_v36, %v8486_v48  ;;  %v2705_v25 = vsel %vm541_vm0, %v2703_v46, %v8487_v38  ;;  %v626_v4 = vmul.f32 %v3840_v32, %v4568_v16  ;;  %v751_v36 = vmul.f32 %v3840_v32, %v4571_v17 }
 0x239   : > { %v2085_v45 = vadd.f32 %v2069_v63, %v2049_v55  ;;  %v876_v48 = vmul.f32 %v3840_v32, %v4574_v18  ;;  %v8488_v46 = vrot.slane %v6566_v7, 2  ;;  %v6610_v3 = vsel %vm791_vm2, %v2951_v44, %v7999_v56  ;;  %v6613_v55 = vld [vmem:[%s4521_s18 + $0x58] sm:$0xf] }
 0x23a   : > { %v555_v38 = vrot.slane %v501_v47, 1  ;;  %v680_v41 = vrot.slane %v626_v4, 2  ;;  %v805_v61 = vrot.slane %v751_v36, 3  ;;  %8489 = vst [vmem:[#allocation50_spill] sm:$0xff] %v6613_v55  ;;  %v1037_v62 = vmul.f32 %v6613_v55, %v4577_v19 }
 0x23b   : > { %v2829_v35 = vsel %vm666_vm1, %v2827_v2, %v8488_v46  ;;  %v2209_v59 = vadd.f32 %v2173_v24, %v2085_v45  ;;  %v930_v63 = vrot.slane %v876_v48, 4  ;;  %v8490_v32 = vrot.slane %v6141_v33, 1 }
 0x23c   : > { %v8491_v46 = vrot.slane %v6146_v6, 2  ;;  %v1161_v47 = vmul.f32 %v6613_v55, %v4580_v20  ;;  %v1285_v24 = vmul.f32 %v6613_v55, %v4639_v53  ;;  %v8492_v45 = vrot.slane %v6587_v13, 4  ;;  %v8512_v13 = vld [vmem:[#allocation45_spill] sm:$0xff] }
 0x23d   : > { %v556_v2 = vsel %vm541_vm0, %v8490_v32, %v555_v38  ;;  %v2333_v4 = vadd.f32 %v2297_v50, %v2209_v59  ;;  %v8493_v33 = vrot.slane %v6159_v11, 3  ;;  %v1090_v32 = vrot.slane %v1037_v62, 1  ;;  %v6638_v50 = vld [vmem:[%s4521_s18 + $0x70] sm:$0xf] }
 0x23e   : > { %v681_v44 = vsel %vm666_vm1, %v8491_v46, %v680_v41  ;;  %v3077_v36 = vsel %vm916_vm3, %v3075_v21, %v8492_v45  ;;  %v603_v48 = vadd.f32 %v556_v2, %v462_v0  ;;  %v1214_v6 = vrot.slane %v1161_v47, 2  ;;  %8494 = vst [vmem:[#allocation61_spill] sm:$0xff] %v6638_v50 }
 0x23f   : > { %v806_v38 = vsel %vm791_vm2, %v8493_v33, %v805_v61  ;;  %v1338_v56 = vrot.slane %v1285_v24, 3  ;;  %v1409_v41 = vmul.f32 %v6613_v55, %v4642_v54  ;;  %v2457_v46 = vadd.f32 %v2421_v27, %v2333_v4  ;;  %v8497_v27 = vld [vmem:[#allocation51_spill] sm:$0xff] }
 0x240   : > { %v728_v34 = vadd.f32 %v681_v44, %v603_v48  ;;  %v998_v59 = vmul.f32 %v8423_v42, %v4610_v37  ;;  %v1569_v21 = vmul.f32 %v6638_v50, %v4650_v58  ;;  %v8495_v11 = vrot.slane %v6173_v57, 4  ;;  %v8498_v24 = vld [vmem:[#allocation79_spill] sm:$0xff]  ;;  %v8500_v48 = vld [vmem:[#allocation84_spill] sm:$0xff] }
 0x241   : > { %v8496_v62 = vrot.slane %v6189_v8, 1  ;;  %v1462_v2 = vrot.slane %v1409_v41, 4  ;;  %v1530_v44 = vmul.f32 %v8497_v27, %v8432_v9  ;;  %v2581_v47 = vadd.f32 %v2545_v30, %v2457_v46 }
 0x242   : > { %v931_v61 = vsel %vm916_vm3, %v8495_v11, %v930_v63  ;;  %v853_v42 = vadd.f32 %v806_v38, %v728_v34  ;;  %v8499_v4 = vrot.slane %v8498_v24, 2  ;;  %v1693_v57 = vmul.f32 %v6638_v50, %v4686_v28  ;;  %v8502_v38 = vld [vmem:[#allocation85_spill] sm:$0xff]  ;;  %v6667_v24 = vld [vmem:[%s4521_s18 + $0x88] sm:$0xf] }
 0x243   : > { %v1091_v0 = vsel %vm541_vm0, %v8496_v62, %v1090_v32  ;;  %v8501_v63 = vrot.slane %v8500_v48, 3  ;;  %v1622_v33 = vrot.slane %v1569_v21, 1  ;;  %v1817_v32 = vmul.f32 %v6638_v50, %v4692_v39  ;;  %8504 = vst [vmem:[#allocation35_spill] sm:$0xff] %v6667_v24 }
 0x244   : > { %v1215_v45 = vsel %vm666_vm1, %v8499_v4, %v1214_v6  ;;  %v1941_v41 = vmul.f32 %v6638_v50, %v8282_v5  ;;  %v2617_v34 = vadd.f32 %v6570_v23, %v2581_v47  ;;  %v978_v30 = vadd.f32 %v931_v61, %v853_v42  ;;  %v8505_v23 = vld [vmem:[#allocation59_spill] sm:$0xff] }
 0x245   : > { %v1339_v8 = vsel %vm791_vm2, %v8501_v63, %v1338_v56  ;;  %v8503_v46 = vrot.slane %v8502_v38, 4  ;;  %v1746_v11 = vrot.slane %v1693_v57, 2  ;;  %v1870_v62 = vrot.slane %v1817_v32, 3  ;;  %v8506_v47 = vld [vmem:[#allocation43_spill] sm:$0xff]  ;;  %v8508_v63 = vld [vmem:[#allocation34_spill] sm:$0xff] }
 0x246   : > { %v1994_v27 = vrot.slane %v1941_v41, 4  ;;  %v2101_v56 = vmul.f32 %v6667_v24, %v4733_v29  ;;  %v2225_v21 = vmul.f32 %v6667_v24, %v4745_v49  ;;  %v2741_v4 = vadd.f32 %v2705_v25, %v2617_v34 }
 0x247   : > { %v1463_v6 = vsel %vm916_vm3, %v8503_v46, %v1462_v2  ;;  %v1014_v48 = vadd.f32 %v998_v59, %v978_v30  ;;  %v6675_v61 = vmul.f32 %v8505_v23, %v4725_v10  ;;  %v2349_v2 = vmul.f32 %v6667_v24, %v4755_v52  ;;  %v8510_v30 = vld [vmem:[#allocation44_spill] sm:$0xff] }
 0x248   : > { %v8507_v42 = vrot.slane %v8506_v47, 1  ;;  %v8509_v32 = vrot.slane %v8508_v63, 2  ;;  %v2154_v38 = vrot.slane %v2101_v56, 1  ;;  %v2278_v46 = vrot.slane %v2225_v21, 2 }
 0x249   : > { %v2865_v50 = vadd.f32 %v2829_v35, %v2741_v4  ;;  %v1138_v25 = vadd.f32 %v1091_v0, %v1014_v48  ;;  %v2402_v59 = vrot.slane %v2349_v2, 3  ;;  %v2473_v34 = vmul.f32 %v6667_v24, %v4764_v43  ;;  %v6701_v35 = vld [vmem:[%s4521_s18 + $0xa0] sm:$0xf]  ;;  %v8517_v4 = vld [vmem:[#allocation53_spill] sm:$0xff] }
 0x24a   : > { %v1623_v57 = vsel %vm541_vm0, %v8507_v42, %v1622_v33  ;;  %v1747_v41 = vsel %vm666_vm1, %v8509_v32, %v1746_v11  ;;  %v8511_v23 = vrot.slane %v8510_v30, 3  ;;  %v8513_v47 = vrot.slane %v8512_v13, 4  ;;  %v8514_v42 = vld [vmem:[#allocation52_spill] sm:$0xff]  ;;  %8516 = vst [vmem:[#allocation39_spill] sm:$0xff] %v6701_v35 }
 0x24b   : > { %v8515_v63 = vrot.slane %v8514_v42, 1  ;;  %v2633_v0 = vmul.f32 %v6701_v35, %v4799_v31  ;;  %v2989_v56 = vadd.f32 %v6610_v3, %v2865_v50  ;;  %v1262_v21 = vadd.f32 %v1215_v45, %v1138_v25  ;;  %v8519_v3 = vld [vmem:[#allocation36_spill] sm:$0xff] }
 0x24c   : > { %v1871_v55 = vsel %vm791_vm2, %v8511_v23, %v1870_v62  ;;  %v6693_v33 = vsel %vm916_vm3, %v8513_v47, %v1994_v27  ;;  %v8518_v62 = vrot.slane %v8517_v4, 2  ;;  %v2526_v27 = vrot.slane %v2473_v34, 4  ;;  %v8522_v34 = vld [vmem:[#allocation54_spill] sm:$0xff]  ;;  %v8524_v4 = vld [vmem:[#allocation57_spill] sm:$0xff] }
 0x24d   : > { %v6698_v11 = vsel %vm541_vm0, %v8515_v63, %v2154_v38  ;;  %v2686_v48 = vrot.slane %v2633_v0, 1  ;;  %v2757_v2 = vmul.f32 %v6701_v35, %v4802_v1  ;;  %v2881_v32 = vmul.f32 %v6701_v35, %v4812_v51 }
 0x24e   : > { %v6709_v13 = vsel %vm666_vm1, %v8518_v62, %v2278_v46  ;;  %v3005_v38 = vmul.f32 %v6701_v35, %v4837_v40  ;;  %v3113_v30 = vadd.f32 %v3077_v36, %v2989_v56  ;;  %v1386_v23 = vadd.f32 %v1339_v8, %v1262_v21  ;;  %v8521_v46 = vld [vmem:[#allocation65_spill] sm:$0xff] }
 0x24f   : > { %v8520_v50 = vrot.slane %v8519_v3, 3  ;;  %v6724_v25 = vmul.f32 %v8521_v46, %v4796_v12  ;;  %v8523_v47 = vrot.slane %v8522_v34, 4  ;;  %v2810_v63 = vrot.slane %v2757_v2, 2  ;;  %v8526_v2 = vld [vmem:[#allocation58_spill] sm:$0xff] }
 0x250   : > { %v2934_v0 = vrot.slane %v2881_v32, 3  ;;  %v470_v36 = vmul.f32 %v8521_v46, %v4562_v14  ;;  %v3136_v8 = vadd.f32 %v8425_v60, %v3113_v30  ;;  %v1510_v56 = vadd.f32 %v1463_v6, %v1386_v23 }
 0x251   : > { %v6720_v45 = vsel %vm791_vm2, %v8520_v50, %v2402_v59  ;;  %v6729_v42 = vsel %vm916_vm3, %v8523_v47, %v2526_v27  ;;  %v513_v59 = vmul.f32 %v6701_v35, %v4565_v15  ;;  %v638_v21 = vmul.f32 %v6701_v35, %v4568_v16 }
 0x252   : > { %v8525_v62 = vrot.slane %v8524_v4, 1  ;;  %v8527_v32 = vrot.slane %v8526_v2, 2  ;;  %v3058_v50 = vrot.slane %v3005_v38, 4  ;;  %v763_v60 = vmul.f32 %v6701_v35, %v4571_v17  ;;  %v8533_v2 = vld [vmem:[#allocation62_spill] sm:$0xff] }
 0x253   : > { %v3152_v6 = vmax.f32 %v3136_v8, 0.0  ;;  %v1546_v30 = vadd.f32 %v1530_v44, %v1510_v56  ;;  %v575_v23 = vrot.slane %v513_v59, 1  ;;  %v700_v46 = vrot.slane %v638_v21, 2  ;;  %v8530_v44 = vld [vmem:[#allocation37_spill] sm:$0xff] }
 0x254   : > { %v6741_v27 = vsel %vm541_vm0, %v8525_v62, %v2686_v48  ;;  %v6746_v3 = vsel %vm666_vm1, %v8527_v32, %v2810_v63  ;;  %v8528_v34 = vrot.slane %v6351_v22, 3  ;;  %v825_v48 = vrot.slane %v763_v60, 3  ;;  %v6758_v62 = vld [vmem:[%s4521_s18 + $0xb8] sm:$0xf] }
 0x255   : > { %v888_v4 = vmul.f32 %v6701_v35, %v4574_v18  ;;  %8529 = vst [vmem:[#allocation33_spill] sm:$0xff] %v6758_v62  ;;  %v1049_v38 = vmul.f32 %v6758_v62, %v4577_v19  ;;  %3659 = vmatprep.mubr.msk.f32.mxu1 %vm3165_vm4, %v3152_v6  ;;  %v1670_v63 = vadd.f32 %v1623_v57, %v1546_v30  ;;  %v8531_v8 = vrot.slane %v8530_v44, 1 }
 0x256   : > { %v6753_v47 = vsel %vm791_vm2, %v8528_v34, %v2934_v0  ;;  %v8532_v22 = vrot.slane %v6385_v26, 2  ;;  %v1173_v59 = vmul.f32 %v6758_v62, %v4580_v20  ;;  %v8534_v32 = vrot.slane %v8533_v2, 3 }
 0x257   : > { %v576_v56 = vsel %vm541_vm0, %v8531_v8, %v575_v23  ;;  %v950_v34 = vrot.slane %v888_v4, 4  ;;  %v1110_v6 = vrot.slane %v1049_v38, 1  ;;  %v1794_v57 = vadd.f32 %v1747_v41, %v1670_v63  ;;  %v8539_v4 = vld [vmem:[#allocation67_spill] sm:$0xff]  ;;  %v8540_v63 = vld [vmem:[#allocation60_spill] sm:$0xff] }
 0x258   : > { %v701_v0 = vsel %vm666_vm1, %v8532_v22, %v700_v46  ;;  %v611_v21 = vadd.f32 %v576_v56, %v470_v36  ;;  %v826_v60 = vsel %vm791_vm2, %v8534_v32, %v825_v48  ;;  %v1234_v30 = vrot.slane %v1173_v59, 2  ;;  %v8535_v46 = vld [vmem:[#allocation55_spill] sm:$0xff] }
 0x259   : > { %v1297_v23 = vmul.f32 %v6758_v62, %v4639_v53  ;;  %v1421_v26 = vmul.f32 %v6758_v62, %v4642_v54  ;;  %v8536_v44 = vrot.slane %v8535_v46, 4  ;;  %v8537_v56 = vld [vmem:[#allocation63_spill] sm:$0xff]  ;;  %v1006_v41 = vmul.f32 %v8539_v4, %v4610_v37  ;;  %v6792_v46 = vld [vmem:[%s4529_s6 + $0x10] sm:$0xf] }
 0x25a   : > { %v736_v36 = vadd.f32 %v701_v0, %v611_v21  ;;  %v8538_v22 = vrot.slane %v8537_v56, 4  ;;  %v1918_v38 = vadd.f32 %v1871_v55, %v1794_v57  ;;  %v8541_v59 = vrot.slane %v8540_v63, 1  ;;  %8542 = vst [vmem:[#allocation41_spill] sm:$0xff] %v6792_v46  ;;  %v8546_v63 = vld [vmem:[#allocation68_spill] sm:$0xff] }
 0x25b   : > { %v6781_v8 = vsel %vm916_vm3, %v8536_v44, %v3058_v50  ;;  %v1358_v32 = vrot.slane %v1297_v23, 3  ;;  %v1482_v35 = vrot.slane %v1421_v26, 4  ;;  %v1581_v50 = vmul.f32 %v6792_v46, %v4650_v58 }
 0x25c   : > { %v951_v48 = vsel %vm916_vm3, %v8538_v22, %v950_v34  ;;  %v1111_v2 = vsel %vm541_vm0, %v8541_v59, %v1110_v6  ;;  %v861_v62 = vadd.f32 %v826_v60, %v736_v36  ;;  %v1705_v0 = vmul.f32 %v6792_v46, %v4686_v28  ;;  %v8543_v34 = vld [vmem:[#allocation66_spill] sm:$0xff]  ;;  %v8545_v60 = vld [vmem:[#allocation72_spill] sm:$0xff] }
 0x25d   : > { %v1829_v21 = vmul.f32 %v6792_v46, %v4692_v39  ;;  %v2042_v55 = vadd.f32 %v6693_v33, %v1918_v38  ;;  %v8544_v57 = vrot.slane %v8543_v34, 2  ;;  %v1538_v23 = vmul.f32 %v8545_v60, %v8432_v9  ;;  %v8548_v34 = vld [vmem:[#allocation73_spill] sm:$0xff]  ;;  %v8549_v60 = vld [vmem:[#allocation38_spill] sm:$0xff] }
 0x25e   : > { %v1953_v26 = vmul.f32 %v6792_v46, %v8282_v5  ;;  %v986_v44 = vadd.f32 %v951_v48, %v861_v62  ;;  %v1642_v36 = vrot.slane %v1581_v50, 1  ;;  %v1766_v56 = vrot.slane %v1705_v0, 2  ;;  %v8551_v62 = vld [vmem:[#allocation70_spill] sm:$0xff]  ;;  %v6821_v0 = vld [vmem:[%s4529_s6 + $0x20] sm:$0xff] }
 0x25f   : > { %v1235_v6 = vsel %vm666_vm1, %v8544_v57, %v1234_v30  ;;  %v1890_v22 = vrot.slane %v1829_v21, 3  ;;  %v2078_v4 = vadd.f32 %v6675_v61, %v2042_v55  ;;  %v8547_v59 = vrot.slane %v8546_v63, 3  ;;  %8553 = vst [vmem:[#allocation51_spill] sm:$0xff] %v6821_v0  ;;  %v8554_v21 = vld [vmem:[#allocation40_spill] sm:$0xff] }
 0x260   : > { %v2014_v38 = vrot.slane %v1953_v26, 4  ;;  %v2113_v30 = vmul.f32 %v4733_v29, %v8548_v34  ;;  %v1022_v57 = vadd.f32 %v1006_v41, %v986_v44  ;;  %v8550_v24 = vrot.slane %v8549_v60, 4  ;;  %v8556_v26 = vld [vmem:[#allocation71_spill] sm:$0xff] }
 0x261   : > { %v1359_v33 = vsel %vm791_vm2, %v8547_v59, %v1358_v32  ;;  %v8552_v48 = vrot.slane %v8551_v62, 1  ;;  %v6825_v61 = vmul.f32 %v6821_v0, %v4725_v10  ;;  %v2202_v32 = vadd.f32 %v6698_v11, %v2078_v4  ;;  %v8568_v0 = vld [vmem:[#allocation80_spill] sm:$0xff] }
 0x262   : > { %v1483_v46 = vsel %vm916_vm3, %v8550_v24, %v1482_v35  ;;  %v8555_v55 = vrot.slane %v8554_v21, 2  ;;  %v8557_v44 = vrot.slane %v8556_v26, 3  ;;  %v2237_v35 = vmul.f32 %v4745_v49, %v8548_v34 }
 0x263   : > { %v1643_v50 = vsel %vm541_vm0, %v8552_v48, %v1642_v36  ;;  %v6837_v36 = vld [vmem:[%s4529_s6 + $0x40] sm:$0xf]  ;;  %v1146_v63 = vadd.f32 %v1111_v2, %v1022_v57  ;;  %v2174_v59 = vrot.slane %v2113_v30, 1  ;;  %v2361_v60 = vmul.f32 %v4755_v52, %v8548_v34 }
 0x264   : > { %v1767_v41 = vsel %vm666_vm1, %v8555_v55, %v1766_v56  ;;  %v1891_v24 = vsel %vm791_vm2, %v8557_v44, %v1890_v22  ;;  %8558 = vst [vmem:[#allocation79_spill] sm:$0xff] %v6837_v36  ;;  %v2485_v11 = vmul.f32 %v4764_v43, %v8548_v34  ;;  %v2326_v4 = vadd.f32 %v6709_v13, %v2202_v32  ;;  %v8559_v56 = vld [vmem:[#allocation74_spill] sm:$0xff]  ;;  %v8561_v44 = vld [vmem:[#allocation81_spill] sm:$0xff] }
 0x265   : > { %v8560_v62 = vrot.slane %v8559_v56, 4  ;;  %v2298_v22 = vrot.slane %v2237_v35, 2  ;;  %v2645_v21 = vmul.f32 %v4799_v31, %v6837_v36  ;;  %v1270_v55 = vadd.f32 %v1235_v6, %v1146_v63  ;;  %v8562_v35 = vld [vmem:[#allocation75_spill] sm:$0xff]  ;;  %v8564_v63 = vld [vmem:[#allocation76_spill] sm:$0xff] }
 0x266   : > { %v2422_v26 = vrot.slane %v2361_v60, 3  ;;  %v2546_v2 = vrot.slane %v2485_v11, 4  ;;  %v2769_v30 = vmul.f32 %v4802_v1, %v6837_v36  ;;  %v2450_v57 = vadd.f32 %v6720_v45, %v2326_v4 }
 0x267   : > { %v2015_v48 = vsel %vm916_vm3, %v8560_v62, %v2014_v38  ;;  %v6854_v34 = vmul.f32 %v4796_v12, %v8561_v44  ;;  %v2706_v13 = vrot.slane %v2645_v21, 1  ;;  %v2893_v38 = vmul.f32 %v4812_v51, %v6837_v36  ;;  %v8566_v62 = vld [vmem:[#allocation77_spill] sm:$0xff] }
 0x268   : > { %v1394_v32 = vadd.f32 %v1359_v33, %v1270_v55  ;;  %v8563_v56 = vrot.slane %v8562_v35, 1  ;;  %v8565_v60 = vrot.slane %v8564_v63, 2  ;;  %v2830_v45 = vrot.slane %v2769_v30, 2  ;;  %v8572_v30 = vld [vmem:[#allocation78_spill] sm:$0xff] }
 0x269   : > { %v2574_v4 = vadd.f32 %v6729_v42, %v2450_v57  ;;  %v8567_v21 = vrot.slane %v8566_v62, 3  ;;  %v8569_v33 = vrot.slane %v8568_v0, 4  ;;  %v6886_v42 = vmul.f32 %v4837_v40, %v6837_v36  ;;  %v7021_v36 = vpop.f32.mrb[0].mxu0 }
 0x26a   : > { %v6861_v6 = vsel %vm541_vm0, %v8563_v56, %v2174_v59  ;;  %v6866_v11 = vsel %vm666_vm1, %v8565_v60, %v2298_v22  ;;  %v2954_v59 = vrot.slane %v2893_v38, 3  ;;  %v1518_v35 = vadd.f32 %v1483_v46, %v1394_v32  ;;  %v8570_v56 = vld [vmem:[#allocation82_spill] sm:$0xff]  ;;  %8581 = vst [vmem:[#allocation43_spill] sm:$0xff] %v7021_v36 }
 0x26b   : > { %v6872_v44 = vsel %vm791_vm2, %v8567_v21, %v2422_v26  ;;  %v6877_v55 = vsel %vm916_vm3, %v8569_v33, %v2546_v2  ;;  %v8571_v63 = vrot.slane %v8570_v56, 1  ;;  %v502_v26 = vmul.f32 %v8572_v30, %v4565_v15  ;;  %v6899_v38 = vld [vmem:[%s4521_s18 + $0x50] sm:$0xff]  ;;  %v7052_v36 = vld [vmem:[%s4521_s18 + $0x98] sm:$0xff] }
 0x26c   : > { %v2610_v57 = vadd.f32 %v6724_v25, %v2574_v4  ;;  %v8573_v0 = vrot.slane %v6566_v7, 2  ;;  %v463_v46 = vmul.f32 %v8572_v30, %v4562_v14  ;;  %v1554_v32 = vadd.f32 %v1538_v23, %v1518_v35  ;;  %8588 = vst [vmem:[#allocation52_spill] sm:$0xff] %v7052_v36 }
 0x26d   : > { %v6882_v22 = vsel %vm541_vm0, %v8571_v63, %v2706_v13  ;;  %v6903_v13 = vmul.f32 %v6899_v38, %v4565_v15  ;;  %v557_v60 = vrot.slane %v502_v26, 1  ;;  %v627_v62 = vmul.f32 %v8572_v30, %v4568_v16 }
 0x26e   : > { %v6894_v2 = vsel %vm666_vm1, %v8573_v0, %v2830_v45  ;;  %v6909_v7 = vmul.f32 %v6899_v38, %v4568_v16  ;;  %v2734_v25 = vadd.f32 %v6741_v27, %v2610_v57  ;;  %v8574_v45 = vld [vmem:[#allocation42_spill] sm:$0xff]  ;;  %v752_v23 = vmul.f32 %v8572_v30, %v4571_v17 }
 0x26f   : > { %v8575_v4 = vrot.slane %v8574_v45, 3  ;;  %v8016_v33 = vrot.slane %v6903_v13, 1  ;;  %v1678_v35 = vadd.f32 %v1643_v50, %v1554_v32  ;;  %v682_v56 = vrot.slane %v627_v62, 2 }
 0x270   : > { %v8018_v63 = vrot.slane %v6909_v7, 2  ;;  %v6923_v26 = vmul.f32 %v6899_v38, %v4571_v17  ;;  %v2858_v27 = vadd.f32 %v6746_v3, %v2734_v25  ;;  %v807_v57 = vrot.slane %v752_v23, 3  ;;  %v8576_v25 = vld [vmem:[#allocation32_spill] sm:$0xff] }
 0x271   : > { %v6915_v21 = vsel %vm791_vm2, %v8575_v4, %v2954_v59  ;;  %v559_v59 = vsel %vm541_vm0, %v557_v60, %v8016_v33  ;;  %v877_v0 = vmul.f32 %v8572_v30, %v4574_v18  ;;  %v1802_v45 = vadd.f32 %v1767_v41, %v1678_v35 }
 0x272   : > { %v604_v50 = vadd.f32 %v559_v59, %v463_v46  ;;  %v684_v32 = vsel %vm666_vm1, %v682_v56, %v8018_v63  ;;  %v8017_v62 = vrot.slane %v6923_v26, 3  ;;  %v2982_v4 = vadd.f32 %v6753_v47, %v2858_v27  ;;  %v6950_v56 = vld [vmem:[%s4521_s18 + $0x68] sm:$0xff] }
 0x273   : > { %v6938_v3 = vmul.f32 %v6899_v38, %v4574_v18  ;;  %v932_v60 = vrot.slane %v877_v0, 4  ;;  %v999_v23 = vmul.f32 %v8576_v25, %v4610_v37  ;;  %v1926_v33 = vadd.f32 %v1891_v24, %v1802_v45 }
 0x274   : > { %v729_v30 = vadd.f32 %v684_v32, %v604_v50  ;;  %v809_v41 = vsel %vm791_vm2, %v807_v57, %v8017_v62  ;;  %v1038_v46 = vmul.f32 %v8576_v25, %v4577_v19  ;;  %v3106_v35 = vadd.f32 %v6781_v8, %v2982_v4  ;;  %v6962_v50 = vld [vmem:[#allocation8] ss:$0 sm:$0xff] }
 0x275   : > { %v8022_v47 = vrot.slane %v6938_v3, 4  ;;  %v6954_v27 = vmul.f32 %v6950_v56, %v4577_v19  ;;  %v1162_v24 = vmul.f32 %v8576_v25, %v4580_v20  ;;  %v2050_v59 = vadd.f32 %v2015_v48, %v1926_v33 }
 0x276   : > { %v854_v0 = vadd.f32 %v809_v41, %v729_v30  ;;  %v1092_v45 = vrot.slane %v1038_v46, 1  ;;  %v6960_v57 = vmul.f32 %v6950_v56, %v4580_v20  ;;  %v3129_v8 = vadd.f32 %v6962_v50, %v3106_v35 }
 0x277   : > { %v934_v32 = vsel %vm916_vm3, %v932_v60, %v8022_v47  ;;  %v8019_v4 = vrot.slane %v6954_v27, 1  ;;  %v1216_v62 = vrot.slane %v1162_v24, 2  ;;  %v2086_v63 = vadd.f32 %v6825_v61, %v2050_v59 }
 0x278   : > { %v979_v48 = vadd.f32 %v934_v32, %v854_v0  ;;  %v8020_v33 = vrot.slane %v6960_v57, 2  ;;  %v1286_v30 = vmul.f32 %v8576_v25, %v4639_v53  ;;  %v3145_v41 = vmax.f32 %v3129_v8, 0.0 }
 0x279   : > { %v1094_v46 = vsel %vm541_vm0, %v1092_v45, %v8019_v4  ;;  %v6978_v60 = vmul.f32 %v6950_v56, %v4639_v53  ;;  %v1410_v35 = vmul.f32 %v8576_v25, %v4642_v54  ;;  %v2210_v61 = vadd.f32 %v6861_v6, %v2086_v63 }
 0x27a   : > { %v3078_v24 = vrot.slane %v6886_v42, 4  ;;  %v1015_v59 = vadd.f32 %v999_v23, %v979_v48  ;;  %v1340_v0 = vrot.slane %v1286_v30, 3  ;;  %3648 = vmatmul.mubr.msk.f32.gmra.mrb[4].mxu0 %vm3165_vm4, %v3145_v41  ;;  %v1218_v8 = vsel %vm666_vm1, %v1216_v62, %v8020_v33  ;;  %v8578_v42 = vld [vmem:[#allocation46_spill] sm:$0xff]  ;;  %v6997_v23 = vld [vmem:[%s4521_s18 + $0x80] sm:$0xff] }
 0x27b   : > { %8577 = vst [vmem:[#allocation84_spill] sm:$0xff] %v6978_v60  ;;  %v8021_v45 = vrot.slane %v6978_v60, 3  ;;  %v6991_v32 = vmul.f32 %v6950_v56, %v4642_v54  ;;  %v1464_v4 = vrot.slane %v1410_v35, 4  ;;  %v2334_v25 = vadd.f32 %v6866_v11, %v2210_v61 }
 0x27c   : > { %v1139_v6 = vadd.f32 %v1094_v46, %v1015_v59  ;;  %v1570_v63 = vmul.f32 %v8578_v42, %v4650_v58  ;;  %v7001_v48 = vmul.f32 %v6997_v23, %v4650_v58  ;;  %v1694_v41 = vmul.f32 %v8578_v42, %v4686_v28 }
 0x27d   : > { %v1342_v62 = vsel %vm791_vm2, %v1340_v0, %v8021_v45  ;;  %v8026_v30 = vrot.slane %v6991_v32, 4  ;;  %v7011_v11 = vmul.f32 %v6997_v23, %v4686_v28  ;;  %v2458_v46 = vadd.f32 %v6872_v44, %v2334_v25 }
 0x27e   : > { %8579 = vst [vmem:[#allocation85_spill] sm:$0xff] %v7001_v48  ;;  %v1263_v35 = vadd.f32 %v1218_v8, %v1139_v6  ;;  %v1624_v61 = vrot.slane %v1570_v63, 1  ;;  %v8027_v59 = vrot.slane %v7001_v48, 1  ;;  %v1748_v0 = vrot.slane %v1694_v41, 2  ;;  %v8584_v6 = vld [vmem:[#allocation83_spill] sm:$0xff] }
 0x27f   : > { %8580 = vst [vmem:[#allocation59_spill] sm:$0xff] %v7011_v11  ;;  %v1466_v33 = vsel %vm916_vm3, %v1464_v4, %v8026_v30  ;;  %v8028_v45 = vrot.slane %v7011_v11, 2  ;;  %v1818_v47 = vmul.f32 %v8578_v42, %v4692_v39  ;;  %v2582_v60 = vadd.f32 %v6877_v55, %v2458_v46  ;;  %v7030_v4 = vpop.f32.mrb[1].mxu0 }
 0x280   : > { %v1387_v44 = vadd.f32 %v1342_v62, %v1263_v35  ;;  %v1531_v8 = vmul.f32 %v8578_v42, %v8432_v9  ;;  %v7028_v25 = vmul.f32 %v6997_v23, %v4692_v39  ;;  %8583 = vst [vmem:[#allocation44_spill] sm:$0xff] %v7030_v4  ;;  %v8585_v63 = vrot.slane %v8584_v6, 4 }
 0x281   : > { %v1626_v30 = vsel %vm541_vm0, %v1624_v61, %v8027_v59  ;;  %v1942_v55 = vmul.f32 %v8578_v42, %v8282_v5  ;;  %v7042_v62 = vmul.f32 %v6997_v23, %v8282_v5  ;;  %v2618_v46 = vadd.f32 %v6854_v34, %v2582_v60  ;;  %v8587_v61 = vld [vmem:[#allocation56_spill] sm:$0xff] }
 0x282   : > { %8582 = vst [vmem:[#allocation34_spill] sm:$0xff] %v7028_v25  ;;  %v3079_v41 = vsel %vm916_vm3, %v8585_v63, %v3078_v24  ;;  %v1511_v35 = vadd.f32 %v1466_v33, %v1387_v44  ;;  %v1750_v6 = vsel %vm666_vm1, %v1748_v0, %v8028_v45  ;;  %v1872_v4 = vrot.slane %v1818_v47, 3  ;;  %v7069_v24 = vpop.f32.mrb[0].mxu1 }
 0x283   : > { %8586 = vst [vmem:[#allocation45_spill] sm:$0xff] %v7042_v62  ;;  %v1996_v63 = vrot.slane %v1942_v55, 4  ;;  %v2102_v59 = vmul.f32 %v8587_v61, %v4733_v29  ;;  %v7056_v42 = vmul.f32 %v7052_v36, %v4733_v29  ;;  %v2742_v34 = vadd.f32 %v6882_v22, %v2618_v46  ;;  %8591 = vst [vmem:[#allocation65_spill] sm:$0xff] %v7069_v24  ;;  %v7074_v60 = vpop.f32.mrb[1].mxu1 }
 0x284   : > { %v1547_v33 = vadd.f32 %v1531_v8, %v1511_v35  ;;  %v2226_v47 = vmul.f32 %v8587_v61, %v4745_v49  ;;  %v2063_v0 = vmul.f32 %v8587_v61, %v4725_v10  ;;  %v7067_v45 = vmul.f32 %v7052_v36, %v4745_v49  ;;  %8592 = vst [vmem:[#allocation54_spill] sm:$0xff] %v7074_v60 }
 0x285   : > { %8589 = vst [vmem:[#allocation53_spill] sm:$0xff] %v7056_v42  ;;  %v2156_v44 = vrot.slane %v2102_v59, 1  ;;  %v2866_v22 = vadd.f32 %v6894_v2, %v2742_v34  ;;  %v2350_v35 = vmul.f32 %v8587_v61, %v4755_v52  ;;  %v8593_v11 = vrot.slane %v7028_v25, 3 }
 0x286   : > { %8590 = vst [vmem:[#allocation36_spill] sm:$0xff] %v7067_v45  ;;  %v1671_v8 = vadd.f32 %v1626_v30, %v1547_v33  ;;  %v2280_v46 = vrot.slane %v2226_v47, 2  ;;  %v7082_v48 = vmul.f32 %v7052_v36, %v4755_v52  ;;  %v2474_v2 = vmul.f32 %v8587_v61, %v4764_v43 }
 0x287   : > { %v1874_v59 = vsel %vm791_vm2, %v1872_v4, %v8593_v11  ;;  %v2990_v30 = vadd.f32 %v6915_v21, %v2866_v22  ;;  %v8595_v33 = vrot.slane %v7042_v62, 4  ;;  %v7092_v11 = vmul.f32 %v7052_v36, %v4764_v43  ;;  %v7105_v36 = vld [vmem:[%s4521_s18 + $0xb0] sm:$0xff] }
 0x288   : > { %8594 = vst [vmem:[#allocation57_spill] sm:$0xff] %v7082_v48  ;;  %v1795_v34 = vadd.f32 %v1750_v6, %v1671_v8  ;;  %v8597_v4 = vrot.slane %v7056_v42, 1  ;;  %v8598_v60 = vrot.slane %v7067_v45, 2  ;;  %v2404_v61 = vrot.slane %v2350_v35, 3  ;;  %8600 = vst [vmem:[#allocation37_spill] sm:$0xff] %v7105_v36 }
 0x289   : > { %v1998_v47 = vsel %vm916_vm3, %v1996_v63, %v8595_v33  ;;  %8596 = vst [vmem:[#allocation58_spill] sm:$0xff] %v7092_v11  ;;  %v3114_v6 = vadd.f32 %v3079_v41, %v2990_v30  ;;  %v2528_v8 = vrot.slane %v2474_v2, 4  ;;  %v8599_v63 = vld [vmem:[#allocation64_spill] sm:$0xff]  ;;  %v7126_v42 = vmul.f32 %v7105_v36, %v4812_v51 }
 0x28a   : > { %v2158_v55 = vsel %vm541_vm0, %v2156_v44, %v8597_v4  ;;  %v2282_v24 = vsel %vm666_vm1, %v2280_v46, %v8598_v60  ;;  %v1919_v22 = vadd.f32 %v1874_v59, %v1795_v34  ;;  %v2634_v33 = vmul.f32 %v8599_v63, %v4799_v31 }
 0x28b   : > { %v7109_v44 = vmul.f32 %v7105_v36, %v4799_v31  ;;  %v2758_v60 = vmul.f32 %v8599_v63, %v4802_v1  ;;  %v7115_v46 = vmul.f32 %v7105_v36, %v4802_v1  ;;  %v3137_v41 = vadd.f32 %v6962_v50, %v3114_v6  ;;  %8603 = vst [vmem:[#allocation63_spill] sm:$0xff] %v7126_v42 }
 0x28c   : > { %v2043_v35 = vadd.f32 %v1998_v47, %v1919_v22  ;;  %v2595_v59 = vmul.f32 %v8599_v63, %v4796_v12  ;;  %v2688_v2 = vrot.slane %v2634_v33, 1  ;;  %v2882_v62 = vmul.f32 %v8599_v63, %v4812_v51 }
 0x28d   : > { %8601 = vst [vmem:[#allocation62_spill] sm:$0xff] %v7109_v44  ;;  %8602 = vst [vmem:[#allocation55_spill] sm:$0xff] %v7115_v46  ;;  %v8038_v30 = vrot.slane %v7109_v44, 1  ;;  %v2812_v34 = vrot.slane %v2758_v60, 2  ;;  %v8037_v4 = vrot.slane %v7115_v46, 2  ;;  %v3153_v21 = vmax.f32 %v3137_v41, 0.0 }
 0x28e   : > { %v2079_v45 = vadd.f32 %v2063_v0, %v2043_v35  ;;  %v3006_v47 = vmul.f32 %v8599_v63, %v4837_v40  ;;  %v8604_v6 = vrot.slane %v7082_v48, 3  ;;  %v8605_v33 = vrot.slane %v7092_v11, 4 }
 0x28f   : > { %v2690_v41 = vsel %vm541_vm0, %v2688_v2, %v8038_v30  ;;  %v7141_v0 = vmul.f32 %v7105_v36, %v4837_v40  ;;  %3660 = vmatmul.mubr.msk.f32.gmra.mrb[4].mxu1 %vm3165_vm4, %v3153_v21  ;;  %v2814_v48 = vsel %vm666_vm1, %v2812_v34, %v8037_v4  ;;  %v7152_v2 = vmul.f32 %v7105_v36, %v4565_v15 }
 0x290   : > { %v2406_v22 = vsel %vm791_vm2, %v2404_v61, %v8604_v6  ;;  %v2530_v60 = vsel %vm916_vm3, %v2528_v8, %v8605_v33  ;;  %v2203_v35 = vadd.f32 %v2158_v55, %v2079_v45  ;;  %v2936_v61 = vrot.slane %v2882_v62, 3 }
 0x291   : > { %8606 = vst [vmem:[#allocation67_spill] sm:$0xff] %v7141_v0  ;;  %v3060_v11 = vrot.slane %v3006_v47, 4  ;;  %v514_v8 = vmul.f32 %v8599_v63, %v4565_v15  ;;  %8607 = vst [vmem:[#allocation60_spill] sm:$0xff] %v7152_v2  ;;  %v639_v33 = vmul.f32 %v8599_v63, %v4568_v16  ;;  %v471_v45 = vmul.f32 %v8599_v63, %v4562_v14 }
 0x292   : > { %v2327_v21 = vadd.f32 %v2282_v24, %v2203_v35  ;;  %v7160_v62 = vmul.f32 %v7105_v36, %v4568_v16  ;;  %v764_v55 = vmul.f32 %v8599_v63, %v4571_v17  ;;  %v8043_v4 = vrot.slane %v7152_v2, 1  ;;  %v7191_v2 = vld [vmem:[%s4529_s6 + $0x8] sm:$0xff] }
 0x293   : > { %v577_v47 = vrot.slane %v514_v8, 1  ;;  %v702_v30 = vrot.slane %v639_v33, 2  ;;  %v7169_v35 = vmul.f32 %v7105_v36, %v4571_v17  ;;  %v8610_v44 = vrot.slane %v7126_v42, 3 }
 0x294   : > { %8608 = vst [vmem:[#allocation66_spill] sm:$0xff] %v7160_v62  ;;  %v2451_v6 = vadd.f32 %v2406_v22, %v2327_v21  ;;  %v8045_v24 = vrot.slane %v7160_v62, 2  ;;  %v827_v46 = vrot.slane %v764_v55, 3  ;;  %v889_v33 = vmul.f32 %v8599_v63, %v4574_v18 }
 0x295   : > { %8609 = vst [vmem:[#allocation72_spill] sm:$0xff] %v7169_v35  ;;  %v2938_v25 = vsel %vm791_vm2, %v2936_v61, %v8610_v44  ;;  %v579_v8 = vsel %vm541_vm0, %v577_v47, %v8043_v4  ;;  %v7181_v22 = vmul.f32 %v7105_v36, %v4574_v18  ;;  %v8047_v42 = vrot.slane %v7169_v35, 3  ;;  %v8612_v47 = vld [vmem:[#allocation69_spill] sm:$0xff] }
 0x296   : > { %v2575_v21 = vadd.f32 %v2530_v60, %v2451_v6  ;;  %v612_v34 = vadd.f32 %v579_v8, %v471_v45  ;;  %v704_v55 = vsel %vm666_vm1, %v702_v30, %v8045_v24  ;;  %v952_v44 = vrot.slane %v889_v33, 4 }
 0x297   : > { %8611 = vst [vmem:[#allocation68_spill] sm:$0xff] %v7181_v22  ;;  %v8048_v61 = vrot.slane %v7181_v22, 4  ;;  %v1050_v4 = vmul.f32 %v8612_v47, %v4577_v19  ;;  %v7195_v63 = vmul.f32 %v7191_v2, %v4577_v19  ;;  %v829_v30 = vsel %vm791_vm2, %v827_v46, %v8047_v42 }
 0x298   : > { %v2611_v60 = vadd.f32 %v2595_v59, %v2575_v21  ;;  %v737_v6 = vadd.f32 %v704_v55, %v612_v34  ;;  %v1174_v45 = vmul.f32 %v8612_v47, %v4580_v20  ;;  %v7208_v62 = vmul.f32 %v7191_v2, %v4580_v20 }
 0x299   : > { %8613 = vst [vmem:[#allocation73_spill] sm:$0xff] %v7195_v63  ;;  %v954_v8 = vsel %vm916_vm3, %v952_v44, %v8048_v61  ;;  %v1112_v33 = vrot.slane %v1050_v4, 1  ;;  %v8054_v24 = vrot.slane %v7195_v63, 1  ;;  %v1007_v46 = vmul.f32 %v8612_v47, %v4610_v37 }
 0x29a   : > { %8614 = vst [vmem:[#allocation38_spill] sm:$0xff] %v7208_v62  ;;  %v2735_v59 = vadd.f32 %v2690_v41, %v2611_v60  ;;  %v862_v34 = vadd.f32 %v829_v30, %v737_v6  ;;  %v1298_v21 = vmul.f32 %v8612_v47, %v4639_v53  ;;  %v1236_v55 = vrot.slane %v1174_v45, 2 }
 0x29b   : > { %v7217_v4 = vmul.f32 %v7191_v2, %v4639_v53  ;;  %v1422_v44 = vmul.f32 %v8612_v47, %v4642_v54  ;;  %v7223_v60 = vmul.f32 %v7191_v2, %v4642_v54  ;;  %v8617_v6 = vrot.slane %v7141_v0, 4  ;;  %v3855_v47 = vld [vmem:[%s4529_s6 + $0x18] sm:$0xff] }
 0x29c   : > { %v2859_v61 = vadd.f32 %v2814_v48, %v2735_v59  ;;  %v987_v41 = vadd.f32 %v954_v8, %v862_v34  ;;  %v1114_v45 = vsel %vm541_vm0, %v1112_v33, %v8054_v24  ;;  %v1360_v42 = vrot.slane %v1298_v21, 3 }
 0x29d   : > { %8615 = vst [vmem:[#allocation70_spill] sm:$0xff] %v7217_v4  ;;  %8616 = vst [vmem:[#allocation40_spill] sm:$0xff] %v7223_v60  ;;  %v3062_v30 = vsel %vm916_vm3, %v3060_v11, %v8617_v6  ;;  %v8055_v22 = vrot.slane %v7217_v4, 3  ;;  %v1582_v48 = vmul.f32 %v3855_v47, %v4650_v58  ;;  %v8618_v8 = vrot.slane %v7208_v62, 2  ;;  %v8619_v11 = vld [vmem:[#allocation51_spill] sm:$0xff] }
 0x29e   : > { %v2983_v35 = vadd.f32 %v2938_v25, %v2859_v61  ;;  %v1023_v36 = vadd.f32 %v1007_v46, %v987_v41  ;;  %v1484_v34 = vrot.slane %v1422_v44, 4  ;;  %v8056_v0 = vrot.slane %v7223_v60, 4 }
 0x29f   : > { %v1238_v59 = vsel %vm666_vm1, %v1236_v55, %v8618_v8  ;;  %v7240_v6 = vmul.f32 %v8619_v11, %v4650_v58  ;;  %v1706_v24 = vmul.f32 %v3855_v47, %v4686_v28  ;;  %v7245_v25 = vmul.f32 %v8619_v11, %v4686_v28 }
 0x2a0   : > { %v3107_v33 = vadd.f32 %v3062_v30, %v2983_v35  ;;  %v1147_v21 = vadd.f32 %v1114_v45, %v1023_v36  ;;  %v1362_v61 = vsel %vm791_vm2, %v1360_v42, %v8055_v22  ;;  %v1644_v46 = vrot.slane %v1582_v48, 1 }
 0x2a1   : > { %8620 = vst [vmem:[#allocation71_spill] sm:$0xff] %v7240_v6  ;;  %8621 = vst [vmem:[#allocation74_spill] sm:$0xff] %v7245_v25  ;;  %v8057_v55 = vrot.slane %v7240_v6, 1  ;;  %v1830_v8 = vmul.f32 %v3855_v47, %v4692_v39  ;;  %v7255_v36 = vmul.f32 %v8619_v11, %v4692_v39  ;;  %v1486_v35 = vsel %vm916_vm3, %v1484_v34, %v8056_v0 }
 0x2a2   : > { %v3130_v44 = vadd.f32 %v6962_v50, %v3107_v33  ;;  %v1271_v41 = vadd.f32 %v1238_v59, %v1147_v21  ;;  %v1539_v30 = vmul.f32 %v3855_v47, %v8432_v9  ;;  %v1768_v48 = vrot.slane %v1706_v24, 2 }
 0x2a3   : > { %8622 = vst [vmem:[#allocation75_spill] sm:$0xff] %v7255_v36  ;;  %v1954_v33 = vmul.f32 %v3855_v47, %v8282_v5  ;;  %v7265_v59 = vmul.f32 %v8619_v11, %v8282_v5  ;;  %v1646_v34 = vsel %vm541_vm0, %v1644_v46, %v8057_v55  ;;  %v1892_v0 = vrot.slane %v1830_v8, 3 }
 0x2a4   : > { %v3146_v45 = vmax.f32 %v3130_v44, 0.0  ;;  %v1395_v42 = vadd.f32 %v1362_v61, %v1271_v41  ;;  %v8624_v61 = vld [vmem:[#allocation31_spill] sm:$0xff]  ;;  %v8625_v41 = vld [vmem:[#allocation81_spill] sm:$0xff]  ;;  %v8628_v46 = vrot.slane %v7245_v25, 2  ;;  %v8630_v60 = vrot.slane %v7255_v36, 3 }
 0x2a5   : > { %8623 = vst [vmem:[#allocation76_spill] sm:$0xff] %v7265_v59  ;;  %v2114_v24 = vmul.f32 %v4733_v29, %v8624_v61  ;;  %v7276_v47 = vmul.f32 %v4733_v29, %v8625_v41  ;;  %v2238_v22 = vmul.f32 %v4745_v49, %v8624_v61  ;;  %v2362_v44 = vmul.f32 %v4755_v52, %v8624_v61 }
 0x2a6   : > { %3650 = vmatprep.mubr.msk.f32.mxu0 %vm3165_vm4, %v3146_v45  ;;  %v1519_v21 = vadd.f32 %v1486_v35, %v1395_v42  ;;  %v7282_v35 = vmul.f32 %v4745_v49, %v8625_v41  ;;  %v1770_v8 = vsel %vm666_vm1, %v1768_v48, %v8628_v46  ;;  %v2016_v42 = vrot.slane %v1954_v33, 4  ;;  %v445_v46 = vld [vmem:[%s4529_s6 + $0x48] sm:$0xff] }
 0x2a7   : > { %8626 = vst [vmem:[#allocation77_spill] sm:$0xff] %v7276_v47  ;;  %v7292_v6 = vmul.f32 %v4755_v52, %v8625_v41  ;;  %v8065_v25 = vrot.slane %v7276_v47, 1  ;;  %v2300_v48 = vrot.slane %v2238_v22, 2  ;;  %v2486_v4 = vmul.f32 %v4764_v43, %v8624_v61 }
 0x2a8   : > { %8627 = vst [vmem:[#allocation80_spill] sm:$0xff] %v7282_v35  ;;  %v1555_v45 = vadd.f32 %v1539_v30, %v1519_v21  ;;  %v1894_v30 = vsel %vm791_vm2, %v1892_v0, %v8630_v60  ;;  %v2176_v21 = vrot.slane %v2114_v24, 1  ;;  %v8066_v33 = vrot.slane %v7282_v35, 2  ;;  %v7311_v24 = vld [vmem:[%s4529_s6 + $0x50] sm:$0xff] }
 0x2a9   : > { %8629 = vst [vmem:[#allocation82_spill] sm:$0xff] %v7292_v6  ;;  %v7304_v62 = vmul.f32 %v4764_v43, %v8625_v41  ;;  %v2424_v0 = vrot.slane %v2362_v44, 3  ;;  %v2548_v44 = vrot.slane %v2486_v4, 4  ;;  %v2646_v60 = vmul.f32 %v4799_v31, %v445_v46 }
 0x2aa   : > { %v1679_v11 = vadd.f32 %v1646_v34, %v1555_v45  ;;  %v8631_v34 = vrot.slane %v7265_v59, 4  ;;  %v2302_v41 = vsel %vm666_vm1, %v2300_v48, %v8066_v33  ;;  %v2603_v59 = vmul.f32 %v4796_v12, %v445_v46 }
 0x2ab   : > { %v464_v4 = vmul.f32 %v6899_v38, %v4562_v14  ;;  %v7344_v33 = vmul.f32 %v4802_v1, %v7311_v24  ;;  %v2708_v38 = vrot.slane %v2646_v60, 1  ;;  %v8635_v36 = vrot.slane %v6903_v13, 1 }
 0x2ac   : > { %v1803_v55 = vadd.f32 %v1770_v8, %v1679_v11  ;;  %v2018_v45 = vsel %vm916_vm3, %v2016_v42, %v8631_v34  ;;  %v2071_v11 = vmul.f32 %v4725_v10, %v8624_v61  ;;  %v2178_v8 = vsel %vm541_vm0, %v2176_v21, %v8065_v25  ;;  %v8633_v21 = vld [vmem:[#allocation50_spill] sm:$0xff] }
 0x2ad   : > { %v504_v25 = vmul.f32 %v8633_v21, %v4565_v15  ;;  %v629_v48 = vmul.f32 %v8633_v21, %v4568_v16  ;;  %v7361_v13 = vmul.f32 %v4812_v51, %v7311_v24 }
 0x2ae   : > { %v1927_v22 = vadd.f32 %v1894_v30, %v1803_v55  ;;  %v8632_v55 = vrot.slane %v7292_v6, 3  ;;  %v7329_v30 = vmul.f32 %v4799_v31, %v7311_v24 }
 0x2af   : > { %v560_v34 = vrot.slane %v504_v25, 1  ;;  %v685_v6 = vrot.slane %v629_v48, 2 }
 0x2b0   : > { %v2051_v42 = vadd.f32 %v2018_v45, %v1927_v22  ;;  %v2426_v61 = vsel %vm791_vm2, %v2424_v0, %v8632_v55  ;;  %v754_v22 = vmul.f32 %v8633_v21, %v4571_v17  ;;  %v879_v0 = vmul.f32 %v8633_v21, %v4574_v18 }
 0x2b1   : > { %v2770_v55 = vmul.f32 %v4802_v1, %v445_v46  ;;  %v561_v12 = vsel %vm541_vm0, %v8635_v36, %v560_v34  ;;  %v8636_v21 = vrot.slane %v6909_v7, 2  ;;  %v8637_v1 = vld [vmem:[#allocation61_spill] sm:$0xff]  ;;  %v8638_v36 = vrot.slane %v6923_v26, 3 }
 0x2b2   : > { %v2087_v45 = vadd.f32 %v2071_v11, %v2051_v42  ;;  %v8634_v11 = vrot.slane %v7304_v62, 4  ;;  %v810_v47 = vrot.slane %v754_v22, 3  ;;  %v935_v31 = vrot.slane %v879_v0, 4 }
 0x2b3   : > { %v686_v63 = vsel %vm666_vm1, %v8636_v21, %v685_v6  ;;  %v1040_v25 = vmul.f32 %v8637_v1, %v4577_v19  ;;  %v2832_v60 = vrot.slane %v2770_v55, 2  ;;  %v1164_v6 = vmul.f32 %v8637_v1, %v4580_v20 }
 0x2b4   : > { %v2211_v35 = vadd.f32 %v2178_v8, %v2087_v45  ;;  %v2550_v42 = vsel %vm916_vm3, %v2548_v44, %v8634_v11  ;;  %v2709_v8 = vrot.slane %v7329_v30, 1  ;;  %v2894_v45 = vmul.f32 %v4812_v51, %v445_v46 }
 0x2b5   : > { %v605_v44 = vadd.f32 %v561_v12, %v464_v4  ;;  %v811_v7 = vsel %vm791_vm2, %v8638_v36, %v810_v47  ;;  %v2833_v4 = vrot.slane %v7344_v33, 2  ;;  %v8639_v22 = vrot.slane %v6938_v3, 4 }
 0x2b6   : > { %v2335_v48 = vadd.f32 %v2302_v41, %v2211_v35  ;;  %v3018_v35 = vmul.f32 %v4837_v40, %v445_v46  ;;  %v7371_v41 = vmul.f32 %v4837_v40, %v7311_v24  ;;  %v1095_v26 = vrot.slane %v1040_v25, 1 }
 0x2b7   : > { %v730_v12 = vadd.f32 %v686_v63, %v605_v44  ;;  %v936_v0 = vsel %vm916_vm3, %v8639_v22, %v935_v31  ;;  %v1288_v47 = vmul.f32 %v8637_v1, %v4639_v53  ;;  %v2710_v46 = vsel %vm541_vm0, %v2708_v38, %v2709_v8 }
 0x2b8   : > { %v2459_v34 = vadd.f32 %v2426_v61, %v2335_v48  ;;  %v1000_v11 = vmul.f32 %v6950_v56, %v4610_v37  ;;  %v2956_v63 = vrot.slane %v2894_v45, 3  ;;  %v2957_v21 = vrot.slane %v7361_v13, 3 }
 0x2b9   : > { %v855_v61 = vadd.f32 %v811_v7, %v730_v12  ;;  %v1219_v48 = vrot.slane %v1164_v6, 2  ;;  %v1412_v31 = vmul.f32 %v8637_v1, %v4642_v54  ;;  %v3080_v25 = vrot.slane %v3018_v35, 4  ;;  %v8641_v7 = vld [vmem:[#allocation35_spill] sm:$0xff] }
 0x2ba   : > { %v2583_v55 = vadd.f32 %v2550_v42, %v2459_v34  ;;  %v3081_v44 = vrot.slane %v7371_v41, 4  ;;  %v2834_v38 = vsel %vm666_vm1, %v2832_v60, %v2833_v4  ;;  %v8640_v36 = vrot.slane %v6954_v27, 1 }
 0x2bb   : > { %v980_v42 = vadd.f32 %v936_v0, %v855_v61  ;;  %v1343_v45 = vrot.slane %v1288_v47, 3  ;;  %v1572_v6 = vmul.f32 %v8641_v7, %v4650_v58  ;;  %v2958_v1 = vsel %vm791_vm2, %v2956_v63, %v2957_v21 }
 0x2bc   : > { %v2619_v3 = vadd.f32 %v2603_v59, %v2583_v55  ;;  %v1096_v56 = vsel %vm541_vm0, %v8640_v36, %v1095_v26  ;;  %v8642_v59 = vrot.slane %v6960_v57, 2  ;;  %v1467_v22 = vrot.slane %v1412_v31, 4  ;;  %v8643_v26 = vld [vmem:[#allocation84_spill] sm:$0xff]  ;;  %v8646_v36 = vld [vmem:[#allocation85_spill] sm:$0xff] }
 0x2bd   : > { %v1016_v12 = vadd.f32 %v1000_v11, %v980_v42  ;;  %v3082_v27 = vsel %vm916_vm3, %v3080_v25, %v3081_v44  ;;  %v8644_v47 = vrot.slane %v8643_v26, 3  ;;  %v1696_v61 = vmul.f32 %v8641_v7, %v4686_v28 }
 0x2be   : > { %v2743_v34 = vadd.f32 %v2710_v46, %v2619_v3  ;;  %v1220_v35 = vsel %vm666_vm1, %v8642_v59, %v1219_v48  ;;  %v1627_v46 = vrot.slane %v1572_v6, 1  ;;  %v1820_v57 = vmul.f32 %v8641_v7, %v4692_v39 }
 0x2bf   : > { %v1140_v0 = vadd.f32 %v1096_v56, %v1016_v12  ;;  %v1344_v55 = vsel %vm791_vm2, %v8644_v47, %v1343_v45  ;;  %v8645_v48 = vrot.slane %v6991_v32, 4  ;;  %v1944_v3 = vmul.f32 %v8641_v7, %v8282_v5  ;;  %v8648_v32 = vld [vmem:[#allocation33_spill] sm:$0xff] }
 0x2c0   : > { %v2867_v60 = vadd.f32 %v2834_v38, %v2743_v34  ;;  %v1532_v38 = vmul.f32 %v6997_v23, %v8432_v9  ;;  %v8647_v56 = vrot.slane %v8646_v36, 1  ;;  %v1751_v6 = vrot.slane %v1696_v61, 2  ;;  %v8650_v23 = vld [vmem:[#allocation37_spill] sm:$0xff]  ;;  %v8651_v61 = vld [vmem:[#allocation59_spill] sm:$0xff] }
 0x2c1   : > { %v1264_v63 = vadd.f32 %v1220_v35, %v1140_v0  ;;  %v1468_v31 = vsel %vm916_vm3, %v8645_v48, %v1467_v22  ;;  %v1875_v34 = vrot.slane %v1820_v57, 3  ;;  %v516_v59 = vmul.f32 %v8648_v32, %v4565_v15  ;;  %v8649_v22 = vld [vmem:[#allocation39_spill] sm:$0xff]  ;;  %v8653_v48 = vld [vmem:[#allocation60_spill] sm:$0xff] }
 0x2c2   : > { %v2991_v11 = vadd.f32 %v2958_v1, %v2867_v60  ;;  %v1628_v45 = vsel %vm541_vm0, %v8647_v56, %v1627_v46  ;;  %v641_v7 = vmul.f32 %v8648_v32, %v4568_v16  ;;  %v1999_v35 = vrot.slane %v1944_v3, 4  ;;  %v8655_v3 = vld [vmem:[#allocation66_spill] sm:$0xff] }
 0x2c3   : > { %v1388_v42 = vadd.f32 %v1344_v55, %v1264_v63  ;;  %v2104_v60 = vmul.f32 %v8649_v22, %v4733_v29  ;;  %v766_v0 = vmul.f32 %v8648_v32, %v4571_v17  ;;  %v580_v55 = vrot.slane %v516_v59, 1  ;;  %v8658_v56 = vld [vmem:[#allocation34_spill] sm:$0xff] }
 0x2c4   : > { %v3115_v25 = vadd.f32 %v3082_v27, %v2991_v11  ;;  %v472_v27 = vmul.f32 %v8650_v23, %v4562_v14  ;;  %v705_v46 = vrot.slane %v641_v7, 2  ;;  %v8652_v57 = vrot.slane %v8651_v61, 2  ;;  %v8660_v7 = vld [vmem:[#allocation52_spill] sm:$0xff] }
 0x2c5   : > { %v1512_v1 = vadd.f32 %v1468_v31, %v1388_v42  ;;  %v2228_v16 = vmul.f32 %v8649_v22, %v4745_v49  ;;  %v830_v11 = vrot.slane %v766_v0, 3  ;;  %v891_v63 = vmul.f32 %v8648_v32, %v4574_v18 }
 0x2c6   : > { %v3138_v12 = vadd.f32 %v6962_v50, %v3115_v25  ;;  %v1752_v15 = vsel %vm666_vm1, %v8652_v57, %v1751_v6  ;;  %v8654_v17 = vrot.slane %v8653_v48, 1  ;;  %v8656_v25 = vrot.slane %v8655_v3, 2 }
 0x2c7   : > { %v1548_v47 = vadd.f32 %v1532_v38, %v1512_v1  ;;  %v8657_v38 = vld [vmem:[#allocation41_spill] sm:$0xff]  ;;  %v8659_v6 = vrot.slane %v8658_v56, 3  ;;  %v2352_v18 = vmul.f32 %v8649_v22, %v4755_v52  ;;  %v2064_v0 = vmul.f32 %v8660_v7, %v4725_v10 }
 0x2c8   : > { %v3154_v26 = vmax.f32 %v3138_v12, 0.0  ;;  %v581_v31 = vsel %vm541_vm0, %v8654_v17, %v580_v55  ;;  %v706_v42 = vsel %vm666_vm1, %v8656_v25, %v705_v46  ;;  %v1052_v36 = vmul.f32 %v8657_v38, %v4577_v19  ;;  %v8663_v46 = vld [vmem:[#allocation45_spill] sm:$0xff] }
 0x2c9   : > { %v1672_v14 = vadd.f32 %v1628_v45, %v1548_v47  ;;  %v1876_v12 = vsel %vm791_vm2, %v8659_v6, %v1875_v34  ;;  %v613_v1 = vadd.f32 %v581_v31, %v472_v27  ;;  %v955_v45 = vrot.slane %v891_v63, 4  ;;  %v8665_v63 = vld [vmem:[#allocation68_spill] sm:$0xff]  ;;  %v8667_v56 = vld [vmem:[#allocation53_spill] sm:$0xff] }
 0x2ca   : > { %3662 = vmatprep.mubr.msk.f32.mxu1 %vm3165_vm4, %v3154_v26  ;;  %v8661_v26 = vld [vmem:[#allocation72_spill] sm:$0xff]  ;;  %v1176_v19 = vmul.f32 %v8657_v38, %v4580_v20  ;;  %v8664_v61 = vrot.slane %v8663_v46, 4  ;;  %v2159_v57 = vrot.slane %v2104_v60, 1  ;;  %v2283_v48 = vrot.slane %v2228_v16, 2 }
 0x2cb   : > { %v1796_v59 = vadd.f32 %v1752_v15, %v1672_v14  ;;  %v8662_v47 = vrot.slane %v8661_v26, 3  ;;  %v738_v17 = vadd.f32 %v706_v42, %v613_v1  ;;  %v8666_v15 = vrot.slane %v8665_v63, 4  ;;  %v8673_v26 = vld [vmem:[#allocation36_spill] sm:$0xff] }
 0x2cc   : > { %v2000_v34 = vsel %vm916_vm3, %v8664_v61, %v1999_v35  ;;  %v1115_v31 = vrot.slane %v1052_v36, 1  ;;  %v1300_v3 = vmul.f32 %v8657_v38, %v4639_v53  ;;  %v2476_v20 = vmul.f32 %v8649_v22, %v4764_v43  ;;  %v8670_v22 = vld [vmem:[#allocation49_spill] sm:$0xff]  ;;  %v3856_v63 = vld [vmem:[%s4529_s6 + $0x28] sm:$0xf] }
 0x2cd   : > { %v831_v55 = vsel %vm791_vm2, %v8662_v47, %v830_v11  ;;  %v1920_v27 = vadd.f32 %v1876_v12, %v1796_v59  ;;  %v956_v14 = vsel %vm916_vm3, %v8666_v15, %v955_v45  ;;  %v2407_v11 = vrot.slane %v2352_v18, 3  ;;  %v8669_v12 = vld [vmem:[#allocation48_spill] sm:$0xff]  ;;  %v8671_v59 = vld [vmem:[#allocation73_spill] sm:$0xff] }
 0x2ce   : > { %v863_v25 = vadd.f32 %v831_v55, %v738_v17  ;;  %v1008_v35 = vmul.f32 %v7191_v2, %v4610_v37  ;;  %v1239_v16 = vrot.slane %v1176_v19, 2  ;;  %v1424_v42 = vmul.f32 %v8657_v38, %v4642_v54  ;;  %v8675_v38 = vld [vmem:[#allocation57_spill] sm:$0xff] }
 0x2cf   : > { %v2044_v60 = vadd.f32 %v2000_v34, %v1920_v27  ;;  %v8668_v6 = vrot.slane %v8667_v56, 1  ;;  %v2636_v53 = vmul.f32 %v8648_v32, %v8669_v12  ;;  %v2760_v45 = vmul.f32 %v8648_v32, %v8670_v22 }
 0x2d0   : > { %v988_v18 = vadd.f32 %v956_v14, %v863_v25  ;;  %v8672_v37 = vrot.slane %v8671_v59, 1  ;;  %v1363_v7 = vrot.slane %v1300_v3, 3  ;;  %v8674_v47 = vrot.slane %v8673_v26, 2  ;;  %v8679_v25 = vld [vmem:[#allocation70_spill] sm:$0xff] }
 0x2d1   : > { %v2160_v36 = vsel %vm541_vm0, %v8668_v6, %v2159_v57  ;;  %v2080_v1 = vadd.f32 %v2064_v0, %v2044_v60  ;;  %v8676_v55 = vrot.slane %v8675_v38, 3  ;;  %v2531_v46 = vrot.slane %v2476_v20, 4  ;;  %v8677_v0 = vld [vmem:[#allocation38_spill] sm:$0xff] }
 0x2d2   : > { %v1116_v2 = vsel %vm541_vm0, %v8672_v37, %v1115_v31  ;;  %v2284_v54 = vsel %vm666_vm1, %v8674_v47, %v2283_v48  ;;  %v1024_v61 = vadd.f32 %v1008_v35, %v988_v18  ;;  %v8678_v57 = vrot.slane %v8677_v0, 2  ;;  %v8683_v18 = vld [vmem:[#allocation47_spill] sm:$0xff] }
 0x2d3   : > { %v2408_v19 = vsel %vm791_vm2, %v8676_v55, %v2407_v11  ;;  %v2204_v34 = vadd.f32 %v2160_v36, %v2080_v1  ;;  %v1487_v27 = vrot.slane %v1424_v42, 4  ;;  %v1584_v15 = vmul.f32 %v3856_v63, %v4650_v58  ;;  %v8681_v42 = vld [vmem:[#allocation58_spill] sm:$0xff] }
 0x2d4   : > { %v1240_v17 = vsel %vm666_vm1, %v8678_v57, %v1239_v16  ;;  %v2691_v14 = vrot.slane %v2636_v53, 1  ;;  %v2884_v31 = vmul.f32 %v8648_v32, %v4812_v51  ;;  %v3008_v48 = vmul.f32 %v8648_v32, %v4837_v40 }
 0x2d5   : > { %v1148_v3 = vadd.f32 %v1116_v2, %v1024_v61  ;;  %v2328_v11 = vadd.f32 %v2284_v54, %v2204_v34  ;;  %v2815_v20 = vrot.slane %v2760_v45, 2  ;;  %v8680_v35 = vrot.slane %v8679_v25, 3  ;;  %v8684_v45 = vld [vmem:[#allocation40_spill] sm:$0xff] }
 0x2d6   : > { %v1708_v16 = vmul.f32 %v3856_v63, %v4686_v28  ;;  %v8682_v56 = vrot.slane %v8681_v42, 4  ;;  %v1832_v36 = vmul.f32 %v3856_v63, %v4692_v39  ;;  %v1956_v53 = vmul.f32 %v3856_v63, %v8282_v5  ;;  %v8686_v28 = vld [vmem:[#allocation62_spill] sm:$0xff]  ;;  %v8688_v39 = vld [vmem:[#allocation51_spill] sm:$0xff] }
 0x2d7   : > { %v1364_v60 = vsel %vm791_vm2, %v8680_v35, %v1363_v7  ;;  %v1272_v6 = vadd.f32 %v1240_v17, %v1148_v3  ;;  %v2452_v32 = vadd.f32 %v2408_v19, %v2328_v11  ;;  %v2596_v1 = vmul.f32 %v8650_v23, %v8683_v18  ;;  %v7514_v7 = vld [vmem:[#allocation11] ss:$0 sm:$0xff]  ;;  %v8689_v19 = vld [vmem:[#allocation55_spill] sm:$0xff] }
 0x2d8   : > { %v2532_v58 = vsel %vm916_vm3, %v8682_v56, %v2531_v46  ;;  %v8685_v59 = vrot.slane %v8684_v45, 4  ;;  %v1647_v2 = vrot.slane %v1584_v15, 1  ;;  %v8687_v26 = vrot.slane %v8686_v28, 1  ;;  %v8697_v56 = vld [vmem:[#allocation74_spill] sm:$0xff] }
 0x2d9   : > { %v2939_v54 = vrot.slane %v2884_v31, 3  ;;  %v1396_v38 = vadd.f32 %v1364_v60, %v1272_v6  ;;  %v1540_v5 = vmul.f32 %v8688_v39, %v8432_v9  ;;  %v2576_v55 = vadd.f32 %v2532_v58, %v2452_v32  ;;  %v8694_v9 = vld [vmem:[#allocation65_spill] sm:$0xff]  ;;  %v8696_v60 = vld [vmem:[#allocation54_spill] sm:$0xff] }
 0x2da   : > { %v1488_v37 = vsel %vm916_vm3, %v8685_v59, %v1487_v27  ;;  %v2692_v47 = vsel %vm541_vm0, %v8687_v26, %v2691_v14  ;;  %v8690_v23 = vrot.slane %v8689_v19, 2  ;;  %v3063_v61 = vrot.slane %v3008_v48, 4  ;;  %v8691_v27 = vld [vmem:[#allocation43_spill] sm:$0xff]  ;;  %v3646_v26 = vpop.f32.mrb[2].mxu0 }
 0x2db   : > { %v1771_v34 = vrot.slane %v1708_v16, 2  ;;  %v1520_v0 = vadd.f32 %v1488_v37, %v1396_v38  ;;  %v1895_v57 = vrot.slane %v1832_v36, 3  ;;  %v2019_v17 = vrot.slane %v1956_v53, 4  ;;  %v8692_v14 = vld [vmem:[#allocation71_spill] sm:$0xff] }
 0x2dc   : > { %v2816_v46 = vsel %vm666_vm1, %v8690_v23, %v2815_v20  ;;  %v3286_v63 = vadd.f32 %v8691_v27, %v7514_v7  ;;  %v2612_v15 = vadd.f32 %v2596_v1, %v2576_v55  ;;  %v8693_v31 = vrot.slane %v8692_v14, 1  ;;  %v8695_v20 = vld [vmem:[#allocation44_spill] sm:$0xff]  ;;  %v8699_v36 = vld [vmem:[#allocation79_spill] sm:$0xff]  ;;  %v3290_v55 = vpop.f32.mrb[3].mxu0 }
 0x2dd   : > { %v3326_v11 = vadd.f32 %v8694_v9, %v7514_v7  ;;  %v1556_v25 = vadd.f32 %v1540_v5, %v1520_v0  ;;  %v3281_v48 = vadd.f32 %v7514_v7, %v8695_v20  ;;  %v3321_v16 = vadd.f32 %v7514_v7, %v8696_v60  ;;  %v8700_v1 = vld [vmem:[#allocation63_spill] sm:$0xff]  ;;  %v8706_v27 = vld [vmem:[#allocation76_spill] sm:$0xff]  ;;  %v447_v20 = vld [vmem:[%s4529_s6 + $0x58] sm:$0xf] }
 0x2de   : > { %v1648_v3 = vsel %vm541_vm0, %v8693_v31, %v1647_v2  ;;  %v3360_v35 = vmax.f32 %v3286_v63, 0.0  ;;  %v2736_v42 = vadd.f32 %v2692_v47, %v2612_v15  ;;  %v8698_v58 = vrot.slane %v8697_v56, 2  ;;  %v8702_v38 = vld [vmem:[#allocation75_spill] sm:$0xff] }
 0x2df   : > { %v2116_v53 = vmul.f32 %v4733_v29, %v8699_v36  ;;  %v3368_v32 = vmax.f32 %v3326_v11, 0.0  ;;  %v8701_v45 = vrot.slane %v8700_v1, 3  ;;  %v1680_v37 = vadd.f32 %v1648_v3, %v1556_v25  ;;  %v8704_v19 = vld [vmem:[#allocation67_spill] sm:$0xff] }
 0x2e0   : > { %v1772_v6 = vsel %vm666_vm1, %v8698_v58, %v1771_v34  ;;  %3377 = vst.msk [vmem:[%s7544_s16 + $0x8] sm:$0xff] %vm3375_vm5, %v3360_v35  ;;  %v3359_v2 = vmax.f32 %v3281_v48, 0.0  ;;  %v3367_v28 = vmax.f32 %v3321_v16, 0.0  ;;  %v2860_v47 = vadd.f32 %v2816_v46, %v2736_v42  ;;  %v3857_v3 = vld [vmem:[%s4529_s6 + $0x38] sm:$0xff]  ;;  %s4033_s6 = scalar_lea.vmem %s4032_s20, 4096 }
 0x2e1   : > { %v2940_v59 = vsel %vm791_vm2, %v8701_v45, %v2939_v54  ;;  %v8703_v29 = vrot.slane %v8702_v38, 3  ;;  %v2240_v54 = vmul.f32 %v4745_v49, %v8699_v36  ;;  %3385 = vst.msk [vmem:[%s7544_s16 + $0x48] sm:$0xff] %vm3375_vm5, %v3368_v32  ;;  %v3296_v5 = vadd.f32 %v3646_v26, %v7514_v7  ;;  %v8712_v45 = vld [vmem:[#allocation82_spill] sm:$0xff]  ;;  %p4035_p0 = scmp.lt.s32.totalorder %s4033_s6, %s4027_s14 }
 0x2e2   : > { %v8705_v23 = vrot.slane %v8704_v19, 4  ;;  %v1804_v0 = vadd.f32 %v1772_v6, %v1680_v37  ;;  %v8707_v46 = vrot.slane %v8706_v27, 4  ;;  %3376 = vst.msk [vmem:[%s7544_s16] sm:$0xff] %vm3375_vm5, %v3359_v2  ;;  %3384 = vst.msk [vmem:[%s7544_s16 + $0x40] sm:$0xff] %vm3375_vm5, %v3367_v28  ;;  %v3291_v49 = vadd.f32 %v7514_v7, %v3290_v55  ;;  %v8710_v6 = vld [vmem:[#allocation80_spill] sm:$0xff] }
 0x2e3   : > { %v1896_v39 = vsel %vm791_vm2, %v8703_v29, %v1895_v57  ;;  %v2984_v57 = vadd.f32 %v2940_v59, %v2860_v47  ;;  %v2179_v15 = vrot.slane %v2116_v53, 1  ;;  %v2364_v14 = vmul.f32 %v4755_v52, %v8699_v36  ;;  %v8708_v52 = vld [vmem:[#allocation77_spill] sm:$0xff]  ;;  %p4036_p13 = por %p4035_p0, %p4034_p3 }
 0x2e4   : > { %v3064_v34 = vsel %vm916_vm3, %v8705_v23, %v3063_v61  ;;  %v2020_v63 = vsel %vm916_vm3, %v8707_v46, %v2019_v17  ;;  %v3362_v61 = vmax.f32 %v3296_v5, 0.0  ;;  %v1928_v31 = vadd.f32 %v1896_v39, %v1804_v0 }
 0x2e5   : > { %v2072_v9 = vmul.f32 %v3857_v3, %v4725_v10  ;;  %v3361_v11 = vmax.f32 %v3291_v49, 0.0  ;;  %v3108_v17 = vadd.f32 %v3064_v34, %v2984_v57  ;;  %v2303_v25 = vrot.slane %v2240_v54, 2  ;;  %p4037_p7 = pnand %p4036_p13, %p4030_p10 }
 0x2e6   : > { %v2488_v35 = vmul.f32 %v4764_v43, %v8699_v36  ;;  %3379 = vst.msk [vmem:[%s7544_s16 + $0x18] sm:$0xff] %vm3375_vm5, %v3362_v61  ;;  %v2052_v48 = vadd.f32 %v2020_v63, %v1928_v31  ;;  %v8709_v16 = vrot.slane %v8708_v52, 1  ;;  %v2427_v56 = vrot.slane %v2364_v14, 3 }
 0x2e7   : > { %3378 = vst.msk [vmem:[%s7544_s16 + $0x10] sm:$0xff] %vm3375_vm5, %v3361_v11  ;;  %v3131_v60 = vadd.f32 %v6962_v50, %v3108_v17  ;;  %v8711_v53 = vrot.slane %v8710_v6, 2  ;;  %v2648_v36 = vmul.f32 %v8669_v12, %v447_v20  ;;  %v8713_v59 = vrot.slane %v8712_v45, 3 }
 0x2e8   : > { %v2180_v42 = vsel %vm541_vm0, %v8709_v16, %v2179_v15  ;;  %v2088_v10 = vadd.f32 %v2072_v9, %v2052_v48  ;;  %v2551_v43 = vrot.slane %v2488_v35, 4  ;;  %v2772_v2 = vmul.f32 %v8670_v22, %v447_v20 }
 0x2e9   : > { %v3147_v58 = vmax.f32 %v3131_v60, 0.0  ;;  %v2304_v32 = vsel %vm666_vm1, %v8711_v53, %v2303_v25  ;;  %v2428_v37 = vsel %vm791_vm2, %v8713_v59, %v2427_v56  ;;  %v8714_v26 = vrot.slane %v7304_v62, 4 }
 0x2ea   : > { %v2212_v1 = vadd.f32 %v2180_v42, %v2088_v10  ;;  %v2711_v38 = vrot.slane %v2648_v36, 1  ;;  %v2896_v29 = vmul.f32 %v4812_v51, %v447_v20  ;;  %v2604_v12 = vmul.f32 %v8683_v18, %v7311_v24 }
 0x2eb   : > { %3651 = vmatmul.mubr.msk.f32.gmra.mrb[6].mxu0 %vm3165_vm4, %v3147_v58  ;;  %v2552_v47 = vsel %vm916_vm3, %v8714_v26, %v2551_v43  ;;  %v2835_v54 = vrot.slane %v2772_v2, 2  ;;  %v3020_v5 = vmul.f32 %v4837_v40, %v447_v20  ;;  %v3658_v40 = vpop.f32.mrb[2].mxu1 }
 0x2ec   : > { %v2336_v28 = vadd.f32 %v2304_v32, %v2212_v1  ;;  %v2712_v22 = vsel %vm541_vm0, %v2709_v8, %v2711_v38  ;;  %v2959_v19 = vrot.slane %v2896_v29, 3  ;;  %v3336_v30 = vadd.f32 %v3658_v40, %v7514_v7  ;;  %v3330_v0 = vpop.f32.mrb[3].mxu1 }
 0x2ed   : > { %v2836_v51 = vsel %vm666_vm1, %v2833_v4, %v2835_v54  ;;  %v3083_v23 = vrot.slane %v3020_v5, 4  ;;  %v3331_v33 = vadd.f32 %v7514_v7, %v3330_v0 }
 0x2ee   : > { %v2460_v39 = vadd.f32 %v2428_v37, %v2336_v28  ;;  %v2960_v24 = vsel %vm791_vm2, %v2957_v21, %v2959_v19  ;;  %v3370_v4 = vmax.f32 %v3336_v30, 0.0 }
 0x2ef   : > { %v3084_v8 = vsel %vm916_vm3, %v3081_v44, %v3083_v23  ;;  %v3369_v46 = vmax.f32 %v3331_v33, 0.0 }
 0x2f0   : > { %v2584_v55 = vadd.f32 %v2552_v47, %v2460_v39  ;;  %3387 = vst.msk [vmem:[%s7544_s16 + $0x58] sm:$0xff] %vm3375_vm5, %v3370_v4 }
 0x2f1   : > { %3386 = vst.msk [vmem:[%s7544_s16 + $0x50] sm:$0xff] %vm3375_vm5, %v3369_v46 }
 0x2f2   : > { %v2620_v62 = vadd.f32 %v2604_v12, %v2584_v55 }
 0x2f4   : > { %v2744_v34 = vadd.f32 %v2712_v22, %v2620_v62 }
 0x2f6   : > { %v2868_v18 = vadd.f32 %v2836_v51, %v2744_v34 }
 0x2f8   : > { %v2992_v27 = vadd.f32 %v2960_v24, %v2868_v18 }
 0x2fa   : > { %v3116_v63 = vadd.f32 %v3084_v8, %v2992_v27 }
 0x2fc   : > { %v3139_v13 = vadd.f32 %v6962_v50, %v3116_v63 }
 0x2fe   : > { %v3155_v21 = vmax.f32 %v3139_v13, 0.0 }
 0x300   : > { %3663 = vmatmul.mubr.msk.f32.gmra.mrb[6].mxu1 %vm3165_vm4, %v3155_v21 }
 0x34d   : > { %v3649_v41 = vpop.f32.mrb[4].mxu0 }
 0x34e   : > { %v3306_v44 = vadd.f32 %v3649_v41, %v7514_v7  ;;  %v3300_v49 = vpop.f32.mrb[5].mxu0 }
 0x34f   : > { %v3301_v57 = vadd.f32 %v7514_v7, %v3300_v49 }
 0x350   : > { %v3364_v15 = vmax.f32 %v3306_v44, 0.0 }
 0x351   : > { %v3363_v14 = vmax.f32 %v3301_v57, 0.0 }
 0x352   : > { %3381 = vst.msk [vmem:[%s7544_s16 + $0x28] sm:$0xff] %vm3375_vm5, %v3364_v15 }
 0x353   : > { %3380 = vst.msk [vmem:[%s7544_s16 + $0x20] sm:$0xff] %vm3375_vm5, %v3363_v14 }
 0x362   : > { %v3661_v50 = vpop.f32.mrb[4].mxu1 }
 0x363   : > { %v3346_v61 = vadd.f32 %v3661_v50, %v7514_v7  ;;  %v3340_v31 = vpop.f32.mrb[5].mxu1 }
 0x364   : > { %v3341_v3 = vadd.f32 %v7514_v7, %v3340_v31 }
 0x365   : > { %v3372_v9 = vmax.f32 %v3346_v61, 0.0 }
 0x366   : > { %v3371_v11 = vmax.f32 %v3341_v3, 0.0 }
 0x367   : > { %3389 = vst.msk [vmem:[%s7544_s16 + $0x68] sm:$0xff] %vm3375_vm5, %v3372_v9 }
 0x368   : > { %3388 = vst.msk [vmem:[%s7544_s16 + $0x60] sm:$0xff] %vm3375_vm5, %v3371_v11 }
 0x3be   : > { %v3652_v17 = vpop.f32.mrb[6].mxu0 }
 0x3bf   : > { %v3316_v25 = vadd.f32 %v3652_v17, %v7514_v7  ;;  %v3310_v35 = vpop.f32.mrb[7].mxu0 }
 0x3c0   : > { %v3311_v20 = vadd.f32 %v7514_v7, %v3310_v35 }
 0x3c1   : > { %v3366_v48 = vmax.f32 %v3316_v25, 0.0 }
 0x3c2   : > { %v3365_v60 = vmax.f32 %v3311_v20, 0.0 }
 0x3c3   : > { %3383 = vst.msk [vmem:[%s7544_s16 + $0x38] sm:$0xff] %vm3375_vm5, %v3366_v48 }
 0x3c4   : > { %3382 = vst.msk [vmem:[%s7544_s16 + $0x30] sm:$0xff] %vm3375_vm5, %v3365_v60 }
 0x3d3   : > { %v3664_v52 = vpop.f32.mrb[6].mxu1 }
 0x3d4   : > { %v3356_v16 = vadd.f32 %v3664_v52, %v7514_v7  ;;  %v3350_v42 = vpop.f32.mrb[7].mxu1 }
 0x3d5   : > { %v3351_v56 = vadd.f32 %v7514_v7, %v3350_v42 }
 0x3d6   : > { %v3374_v10 = vmax.f32 %v3356_v16, 0.0 }
 0x3d7   : > { %v3373_v58 = vmax.f32 %v3351_v56, 0.0 }
 0x3d8   : > { %3391 = vst.msk [vmem:[%s7544_s16 + $0x78] sm:$0xff] %vm3375_vm5, %v3374_v10 }
 0x3d9   : > { %3390 = vst.msk [vmem:[%s7544_s16 + $0x70] sm:$0xff] %vm3375_vm5, %v3373_v58 }
 0x3da   : > { %4040 = shalt.err (!%p4037_p7)
}
 0x3db   : > { %s4041_s8 = scalar_lea.hbm %s7644_s24, 2048  ;;  %s4045_s15 = scalar_lea.hbm %s8718_s13, 8192 }
 0x3dc   : > { %p4042_p4 = scmp.ne.s32.totalorder %s7644_s24, %s4041_s8  ;;  %p4046_p11 = scmp.lt.u32.totalorder %s7644_s24, %s8718_s13 }
 0x3dd   : > { %p4047_p12 = scmp.lt.u32.totalorder %s4045_s15, %s4041_s8  ;;  %p4049_p9 = scmp.lt.u32.totalorder %s4041_s8, %s7644_s24 }
 0x3de   : > { %p4043_p2 = pnand %p4042_p4, %p8719_p1 }
 0x3df   : > { %p4048_p8 = por %p4047_p12, %p4046_p11 }
 0x3e0   : > { %p4044_p5 = pneg %p4043_p2 }
 0x3e1   : > { %p4050_p6 = por %p4049_p9, %p4048_p8 }
 0x3e3   : > { %p4051_p10 = pnand %p4050_p6, %p4044_p5 }
 0x3e5   : > { %4054 = shalt.err (!%p4051_p10)
}
 0x3e6   : > { %s4182_s22 = smov 128   ;;  %s4183_s17 = smov 8  }
 0x3e7   : > { %3696 = dma.vmem_to_hbm [thread:$0]  (%p8719_p1), %s7646_s11, 2048, %s7644_s24, %s3393_s27, %s4182_s22, %s4182_s22, %s4183_s17  }
 0x3e8 PF: > { %s8720_s1 = sld [smem:[#allocation21_spill]]  ;;  %s8721_s18 = sld [smem:[#allocation30_spill]] }
 0x3e9   : > { %p3723_p3 = scmp.ge.s32.totalorder %s4167_s7, 2 }
 0x3ee   : > { %s3424_s14 = sand.u32 1, %s8720_s1   ;;  %p8722_p0 = scmp.ne.s32.totalorder %s8721_s18, 0 }
 0x3ef   : > { %s3425_s10 = scalar_lea.sflag [#allocation4], %s3424_s14 }
 0x3f0   : > { %p3712_p13 = pnand %p3723_p3, %p8722_p0 }
 0x3f2   : > { %4120 = dma.done.wait (!%p3712_p13), %s3425_s10, 2048  }
 0x3f3   : > { %4122 = vsyncadd (!%p3712_p13), %s3425_s10, 4294965248  ;;  %s27_s7 = sadd.s32 1, %s4167_s7   ;;  %s8723_s21 = sld [smem:[#allocation20_spill]] }
 0x3f4   : > { %p24_p7 = scmp.ge.s32.totalorder %s27_s7, 6   ;;  %s8724_s20 = sld [smem:[#allocation27_spill]] }
 0x3f5   : > { %s8725_s28 = sld [smem:[#allocation26_spill]]  ;;  %s8726_s3 = sld [smem:[#allocation24_spill]] }
 0x3f6   : > { %s8727_s11 = sld [smem:[#allocation25_spill]]  ;;  %s8728_s22 = smov %s4135_s23 }
 0x3f7   : > { %s8730_s24 = smov %s4143_s25  ;;  %s8731_s25 = smov %s4147_s26 }
 0x3f8   : > { %s8733_s27 = smov %s4159_s29  ;;  %26 = sbr.rel (!%p24_p7) target bundleno = 17 (0x11), region = 118 }
 0x3fa   : > { %s8729_s23 = smov %s8724_s20 }
 0x3fb   : > { %s8732_s26 = smov %s8725_s28  ;;  %s8734_s28 = smov %s4163_s30 }
 0x3fc   : > { %s8735_s29 = smov %s8726_s3  ;;  %s8736_s30 = smov %s8727_s11 }
 0x3ff   :  { %3430 = vsyncpa [#allocation3], 1 }
 0x400   :  { %3432 = vsyncpa [#allocation3 + $0x1], 1 }
 0x401   :  { %3433 = vsyncpa [#allocation6], 1 }
 0x402   :  { %3435 = vsyncpa [#allocation6 + $0x1], 1 }
 0x403   :  { %3436 = vsyncpa [#allocation9], 1 }
 0x404   :  { %3437 = vsyncpa [#allocation12], 1 }
 0x405   :  { %3438 = vsyncpa [#allocation4], 1 }
 0x406   :  { %3440 = vsyncpa [#allocation4 + $0x1], 1 }

// kernel: _lambda_.3
= control target key start
LH: loop header
LB: loop body
LE: loop exit
PB: predicated region body
PF: predicated region fallthrough
CT: control target
= control target key end

     0   :  { %s3184_s0 = inlined_call_operand.hbm [shape: f32[2,9,9,8], index: 0, kind: input, shape index: {}]   ;;  %s3185_s1 = inlined_call_operand.hbm [shape: f32[2,9,9,8], index: 1, kind: input, shape index: {}]   ;;  %s3186_s2 = inlined_call_operand.hbm [shape: f32[2,9,9,8], index: 2, kind: input, shape index: {}]   ;;  %s3187_s3 = inlined_call_operand.hbm [shape: f32[2,9,9,8], index: 3, kind: input, shape index: {}]   ;;  %s3188_s4 = inlined_call_operand.hbm [shape: f32[3,3,8], index: 4, kind: input, shape index: {}]   ;;  %s3189_s5 = inlined_call_operand.hbm [shape: f32[1,1,8], index: 5, kind: input, shape index: {}]   ;;  %s3190_s6 = inlined_call_operand.hbm [shape: f32[8,16], index: 6, kind: input, shape index: {}]   ;;  %s3191_s7 = inlined_call_operand.hbm [shape: f32[1,16], index: 7, kind: input, shape index: {}]   ;;  %s3192_s8 = inlined_call_operand.hbm [shape: f32[1,16], index: 8, kind: input, shape index: {}]   ;;  %s3193_s9 = inlined_call_operand.hbm [shape: f32[64,8], index: 9, kind: input, shape index: {}]   ;;  %s3194_s10 = inlined_call_operand.hbm [shape: f32[8,64], index: 10, kind: input, shape index: {}]   ;;  %s3195_s11 = inlined_call_operand.hbm [shape: f32[2,1,64,64], index: 11, kind: output, shape index: {}]  }
   0x1   :  { %3225 = sst [smem:[#allocation36_spill]] %s3185_s1 }
   0x2   :  { %3226 = sst [smem:[#allocation37_spill]] %s3187_s3 }
   0x3   :  { %3227 = sst [smem:[#allocation38_spill]] %s3188_s4 }
   0x4   :  { %3228 = sst [smem:[#allocation39_spill]] %s3189_s5 }
   0x5   :  { %3229 = sst [smem:[#allocation40_spill]] %s3191_s7 }
   0x6   :  { %3230 = sst [smem:[#allocation41_spill]] %s3193_s9 }
   0x7   :  { %3231 = sst [smem:[#allocation42_spill]] %s3195_s11 }
   0x8   :  { %16 = vsyncpa [#allocation3], 0 }
   0x9   :  { %18 = vsyncpa [#allocation3 + $0x1], 0 }
   0xa   :  { %19 = vsyncpa [#allocation6], 0 }
   0xb   :  { %21 = vsyncpa [#allocation6 + $0x1], 0 }
   0xc   :  { %22 = vsyncpa [#allocation9], 0 }
   0xd   :  { %24 = vsyncpa [#allocation9 + $0x1], 0 }
   0xe   :  { %25 = vsyncpa [#allocation12], 0 }
   0xf   :  { %26 = vsyncpa [#allocation15], 0 }
  0x10   :  { %27 = vsyncpa [#allocation18], 0 }
  0x11   :  { %28 = vsyncpa [#allocation4], 0 }
  0x12   :  { %30 = vsyncpa [#allocation4 + $0x1], 0  ;;  %s2495_s17 = smov 0   ;;  %s2497_s18 = smov 0  }
  0x13   :  { %s2499_s19 = smov 0   ;;  %s2501_s20 = smov 0  }
  0x14 LB: > { %3232 = sst [smem:[#allocation29_spill]] %s2403_s17  ;;  %s2417_s21 = smov [#allocation10]   ;;  %s2415_s20 = sphi %s2501_s20, %s3281_s20   ;;  %s2411_s19 = sphi %s2499_s19, %s3285_s19   ;;  %s2407_s18 = sphi %s2497_s18, %s3284_s18   ;;  %s2403_s17 = sphi %s2495_s17, %s3283_s17  }
  0x15   : > { %s330_s22 = sshll.u32 %s2417_s21, 4  ;;  %s2516_s23 = sadd.s32 4294967295, %s2415_s20   ;;  %s2521_s22 = int_to_ptr.vmem [resolvable:$true] %s330_s22 }
  0x16   : > { %3233 = sst [smem:[#allocation30_spill]] %s2516_s23  ;;  %p1680_p0 = scmp.ge.s32.totalorder %s2415_s20, 1 }
  0x17   : > { %p3199_p1 = scmp.eq.s32.totalorder %s2516_s23, 0  ;;  %p318_p2 = scmp.lt.s32.totalorder %s2415_s20, 3 }
  0x18   : > { %s2418_s25 = smov [#allocation11]   ;;  %s2419_s28 = smov [#allocation14]  }
  0x19   : > { %p2523_p3 = pnand %p1680_p0, %p318_p2  ;;  %s344_s26 = sshll.u32 %s2418_s25, 4  ;;  %s2536_s26 = int_to_ptr.vmem [resolvable:$true] %s344_s26 }
  0x1a   : > { %s366_s29 = sshll.u32 %s2419_s28, 4  ;;  %s3237_s4 = sld [smem:[#allocation38_spill]]  ;;  %s2538_s29 = int_to_ptr.vmem [resolvable:$true] %s366_s29 }
  0x1b   : > { %s3234_s24 = scalar_select %p2523_p3, 1, 0 }
  0x1c   : > { %p1877_p5 = pneg %p2523_p3 }
  0x1d   : > { %3235 = sst [smem:[#allocation31_spill]] %s3234_s24 }
  0x1e   : > { %p2532_p6 = pnand %p1877_p5, %p3199_p1 }
  0x20   : > { %s3236_s27 = scalar_select %p2532_p6, 1, 0 }
  0x21   : > { %s2009_s13 = scalar_lea.hbm %s3237_s4, 192  ;;  %p2548_p8 = pneg %p2532_p6 }
  0x22   : > { %p2010_p7 = scmp.ne.s32.totalorder %s3237_s4, %s2009_s13  ;;  %p2016_p11 = scmp.lt.u32.totalorder %s2009_s13, %s3237_s4 }
  0x23   : > { %s3238_s16 = scalar_select %p2548_p8, 1, 0 }
  0x24   : > { %p2012_p9 = pnand %p2548_p8, %p2010_p7 }
  0x26   : > { %p2013_p10 = pneg %p2012_p9 }
  0x28   : > { %p2018_p12 = pnand %p2016_p11, %p2013_p10 }
  0x2a   : > { %2021 = shalt.err (!%p2018_p12)
}
  0x2b   : > { %s2022_s28 = scalar_lea.vmem %s2521_s22, 192  ;;  %p2030_p5 = scmp.lt.s32.totalorder %s2521_s22, %s2521_s22 }
  0x2c   : > { %p2023_p13 = scmp.ne.s32.totalorder %s2521_s22, %s2022_s28  ;;  %p2031_p4 = scmp.lt.s32.totalorder %s2022_s28, %s2022_s28 }
  0x2e   : > { %p2025_p0 = pnand %p2023_p13, %p2548_p8  ;;  %p2032_p7 = por %p2031_p4, %p2030_p5 }
  0x30   : > { %p2026_p2 = pneg %p2025_p0 }
  0x32   : > { %p2033_p9 = pnand %p2032_p7, %p2026_p2 }
  0x34   : > { %2036 = shalt.err (!%p2033_p9)
}
  0x35   : > { %s2420_s30 = smov 64   ;;  %s2421_s12 = smov 4  }
  0x36   : > { %1880 = dma.hbm_to_vmem [thread:$0]  (!%p2532_p6), %s3237_s4, 192, %s2521_s22, [#allocation9], %s2420_s30, %s2420_s30, %s2421_s12  }
  0x37   : > { %s3239_s5 = sld [smem:[#allocation39_spill]] }
  0x3d   : > { %s2037_s25 = scalar_lea.hbm %s3239_s5, 16 }
  0x3e   : > { %p2038_p4 = scmp.ne.s32.totalorder %s3239_s5, %s2037_s25  ;;  %p2044_p12 = scmp.lt.u32.totalorder %s2037_s25, %s3239_s5 }
  0x40   : > { %p2040_p10 = pnand %p2038_p4, %p2548_p8 }
  0x42   : > { %p2041_p11 = pneg %p2040_p10 }
  0x44   : > { %p2046_p13 = pnand %p2044_p12, %p2041_p11 }
  0x46   : > { %2049 = shalt.err (!%p2046_p13)
}
  0x47   : > { %s2050_s22 = scalar_lea.vmem %s2536_s26, 16  ;;  %s2057_s11 = scalar_lea.vmem %s2536_s26, 32 }
  0x48   : > { %p2051_p0 = scmp.ne.s32.totalorder %s2536_s26, %s2050_s22  ;;  %p2058_p7 = scmp.lt.s32.totalorder %s2536_s26, %s2536_s26 }
  0x49   : > { %p2059_p9 = scmp.lt.s32.totalorder %s2057_s11, %s2050_s22 }
  0x4a   : > { %p2053_p2 = pnand %p2051_p0, %p2548_p8 }
  0x4b   : > { %p2060_p4 = por %p2059_p9, %p2058_p7 }
  0x4c   : > { %p2054_p5 = pneg %p2053_p2 }
  0x4e   : > { %p2061_p10 = pnand %p2060_p4, %p2054_p5 }
  0x50   : > { %2064 = shalt.err (!%p2061_p10)
}
  0x51   : > { %1883 = dma.hbm_to_vmem [thread:$0]  (!%p2532_p6), %s3239_s5, 16, %s2536_s26, [#allocation12]  }
  0x52   : > { %s3240_s7 = sld [smem:[#allocation40_spill]] }
  0x58   : > { %s2065_s13 = scalar_lea.hbm %s3240_s7, 16 }
  0x59   : > { %p2066_p11 = scmp.ne.s32.totalorder %s3240_s7, %s2065_s13  ;;  %p2072_p0 = scmp.lt.u32.totalorder %s2065_s13, %s3240_s7 }
  0x5b   : > { %p2068_p12 = pnand %p2066_p11, %p2548_p8 }
  0x5d   : > { %p2069_p13 = pneg %p2068_p12 }
  0x5f   : > { %p2074_p2 = pnand %p2072_p0, %p2069_p13 }
  0x61   : > { %2077 = shalt.err (!%p2074_p2)
}
  0x62   : > { %s2078_s26 = scalar_lea.vmem %s2538_s29, 16  ;;  %s2085_s28 = scalar_lea.vmem %s2538_s29, 32 }
  0x63   : > { %p2079_p5 = scmp.ne.s32.totalorder %s2538_s29, %s2078_s26  ;;  %p2086_p4 = scmp.lt.s32.totalorder %s2538_s29, %s2538_s29 }
  0x64   : > { %p2087_p10 = scmp.lt.s32.totalorder %s2085_s28, %s2078_s26 }
  0x65   : > { %p2081_p7 = pnand %p2079_p5, %p2548_p8 }
  0x66   : > { %p2088_p11 = por %p2087_p10, %p2086_p4 }
  0x67   : > { %p2082_p9 = pneg %p2081_p7 }
  0x69   : > { %p2089_p12 = pnand %p2088_p11, %p2082_p9 }
  0x6b   : > { %2092 = shalt.err (!%p2089_p12)
}
  0x6c   : > { %1889 = dma.hbm_to_vmem [thread:$0]  (!%p2532_p6), %s3240_s7, 16, %s2538_s29, [#allocation15]  }
  0x6d   : > { %s2422_s3 = smov [#allocation17]   ;;  %s3241_s9 = sld [smem:[#allocation41_spill]] }
  0x6e   : > { %s387_s24 = sshll.u32 %s2422_s3, 4  ;;  %s388_s24 = int_to_ptr.vmem [resolvable:$true] %s387_s24 }
  0x73   : > { %s2093_s13 = scalar_lea.hbm %s3241_s9, 1024 }
  0x74   : > { %p2094_p13 = scmp.ne.s32.totalorder %s3241_s9, %s2093_s13  ;;  %p2100_p5 = scmp.lt.u32.totalorder %s2093_s13, %s3241_s9 }
  0x76   : > { %p2096_p0 = pnand %p2094_p13, %p2548_p8 }
  0x78   : > { %p2097_p2 = pneg %p2096_p0 }
  0x7a   : > { %p2102_p7 = pnand %p2100_p5, %p2097_p2 }
  0x7c   : > { %2105 = shalt.err (!%p2102_p7)
}
  0x7d   : > { %s2106_s29 = scalar_lea.vmem %s388_s24, 1024  ;;  %p2114_p11 = scmp.lt.s32.totalorder %s388_s24, %s388_s24 }
  0x7e   : > { %p2107_p9 = scmp.ne.s32.totalorder %s388_s24, %s2106_s29  ;;  %p2115_p12 = scmp.lt.s32.totalorder %s2106_s29, %s2106_s29 }
  0x80   : > { %p2109_p4 = pnand %p2107_p9, %p2548_p8  ;;  %p2116_p1 = por %p2115_p12, %p2114_p11 }
  0x82   : > { %p2110_p10 = pneg %p2109_p4 }
  0x84   : > { %p2117_p3 = pnand %p2116_p1, %p2110_p10 }
  0x86   : > { %2120 = shalt.err (!%p2117_p3)
}
  0x87   : > { %s3201_s26 = smov 128   ;;  %s3204_s28 = smov 8  }
  0x88   : > { %1895 = dma.hbm_to_vmem [thread:$0]  (!%p2532_p6), %s3241_s9, 1024, %s388_s24, [#allocation18], %s3201_s26, %s3201_s26, %s3204_s28  }
  0x89   : > { %s1679_s3 = sadd.s32 4294967294, %s2415_s20   ;;  %s2640_s30 = sadd.s32 1, %s2415_s20  }
  0x8a   : > { %3242 = sst [smem:[#allocation32_spill]] %s2640_s30  ;;  %s40_s12 = ssub.s32 %s2415_s20, %s2640_s30 }
  0x8b   : > { %s43_s13 = sadd.s32 1, %s2411_s19  ;;  %p41_p1 = scmp.eq.s32.totalorder %s40_s12, 0 }
  0x8c   : > { %p50_p3 = scmp.ne.s32.totalorder %s2411_s19, %s2407_s18  ;;  %p51_p13 = scmp.eq.s32.totalorder %s2415_s20, 0 }
  0x8d   : > { %p56_p0 = scmp.ne.s32.totalorder %s2407_s18, %s2403_s17  ;;  %p3244_p5 = scmp.eq.s32.totalorder %s2516_s23, 0 }
  0x8e   : > { %s2651_s14 = scalar_select %p41_p1, %s2411_s19, %s43_s13  }
  0x8f   : > { %p52_p2 = por %p51_p13, %p50_p3  ;;  %p2655_p7 = por %p3244_p5, %p56_p0 }
  0x90   : > { %3243 = sst [smem:[#allocation33_spill]] %s2651_s14  ;;  %p305_p9 = scmp.eq.s32.totalorder %s2516_s23, 1 }
  0x91   : > { %s3245_s24 = scalar_select %p2655_p7, 1, 0 }
  0x92   : > { %p311_p4 = scmp.eq.s32.totalorder %s1679_s3, 1  ;;  %p1923_p10 = scmp.lt.s32.totalorder %s2415_s20, 2 }
  0x93   : > { %s3203_s15 = sand.u32 1, %s2411_s19   ;;  %p2662_p11 = por %p305_p9, %p50_p3 }
  0x94   : > { %p2666_p12 = por %p311_p4, %p56_p0  ;;  %s2672_s29 = smul.u32 144, %s3203_s15 }
  0x95   : > { %s3246_s21 = scalar_select %p2662_p11, 1, 0 }
  0x96   : > { %s3248_s25 = scalar_select %p2666_p12, 1, 0 }
  0x97   : > { %3247 = sst [smem:[#allocation34_spill]] %s3246_s21  ;;  %p2674_p1 = pnand %p1923_p10, %p52_p2 }
  0x98   : > { %3249 = sst [smem:[#allocation35_spill]] %s3248_s25  ;;  %s2679_s11 = smul.u32 2304, %s2415_s20 }
  0x99   : > { %s3250_s22 = scalar_select %p2674_p1, 1, 0 }
  0x9a   : > { %s3207_s3 = sand.u32 1, %s2415_s20   ;;  %s3251_s1 = sld [smem:[#allocation36_spill]] }
  0x9b   : > { %s437_s15 = scalar_lea.vmem [#allocation5], %s2672_s29  ;;  %s2693_s4 = scalar_lea.sflag [#allocation6], %s3207_s3 }
  0x9c   : > { %s444_s28 = sshll.u32 %s437_s15, 4  ;;  %p2699_p13 = pneg %p2674_p1  ;;  %s2689_s28 = int_to_ptr.vmem [resolvable:$true] %s444_s28 }
  0x9e   : > { %s3252_s7 = scalar_select %p2699_p13, 1, 0 }
  0xa0   : > { %s2686_s26 = scalar_lea.hbm %s3251_s1, %s2679_s11  ;;  %s2126_s15 = scalar_lea.hbm %s3251_s1, 4608 }
  0xa1   : > { %s2121_s5 = scalar_lea.hbm %s2686_s26, 2304  ;;  %p2127_p5 = scmp.lt.u32.totalorder %s2686_s26, %s3251_s1 }
  0xa2   : > { %p2122_p3 = scmp.ne.s32.totalorder %s2686_s26, %s2121_s5  ;;  %p2128_p9 = scmp.lt.u32.totalorder %s2126_s15, %s2121_s5 }
  0xa3   : > { %p2130_p10 = scmp.lt.u32.totalorder %s2121_s5, %s2686_s26 }
  0xa4   : > { %p2124_p0 = pnand %p2699_p13, %p2122_p3  ;;  %p2129_p4 = por %p2128_p9, %p2127_p5 }
  0xa6   : > { %p2125_p2 = pneg %p2124_p0  ;;  %p2131_p12 = por %p2130_p10, %p2129_p4 }
  0xa8   : > { %p2132_p11 = pnand %p2131_p12, %p2125_p2 }
  0xaa   : > { %2135 = shalt.err (!%p2132_p11)
}
  0xab   : > { %s2136_s3 = scalar_lea.vmem %s2689_s28, 2304  ;;  %s2425_s12 = smov [#allocation5]  }
  0xac   : > { %p2137_p3 = scmp.ne.s32.totalorder %s2689_s28, %s2136_s3  ;;  %s2141_s13 = sshll.u32 %s2425_s12, 4  ;;  %s2142_s13 = int_to_ptr.vmem [resolvable:$false] %s2141_s13 }
  0xad   : > { %s2143_s9 = scalar_lea.vmem %s2142_s13, 4608  ;;  %p2144_p6 = scmp.lt.s32.totalorder %s2689_s28, %s2142_s13 }
  0xae   : > { %p2139_p0 = pnand %p2137_p3, %p2699_p13  ;;  %p2145_p8 = scmp.lt.s32.totalorder %s2143_s9, %s2136_s3 }
  0xb0   : > { %p2140_p7 = pneg %p2139_p0  ;;  %p2146_p5 = por %p2145_p8, %p2144_p6 }
  0xb2   : > { %p2147_p9 = pnand %p2146_p5, %p2140_p7 }
  0xb4   : > { %2150 = shalt.err (!%p2147_p9)
}
  0xb5   : > { %s3253_s5 = smov 8   ;;  %s3254_s14 = smov 128  }
  0xb6   : > { %1905 = dma.hbm_to_vmem [thread:$0]  (!%p2674_p1), %s2686_s26, 2304, %s2689_s28, %s2693_s4, %s3254_s14, %s3254_s14, %s3253_s5  }
  0xb7   : > { %s2426_s15 = smov [#allocation13]   ;;  %s2427_s12 = smov [#allocation16]  }
  0xb8   : > { %s355_s1 = sshll.u32 %s2426_s15, 4  ;;  %s377_s30 = sshll.u32 %s2427_s12, 4  ;;  %s356_s1 = int_to_ptr.vmem [resolvable:$true] %s355_s1  ;;  %s378_s30 = int_to_ptr.vmem [resolvable:$true] %s377_s30 }
  0xb9   : > { %s2151_s9 = scalar_lea.hbm %s3190_s6, 128  ;;  %p3255_p8 = scmp.ne.s32.totalorder %s3238_s16, 0 }
  0xba   : > { %p2152_p6 = scmp.ne.s32.totalorder %s3190_s6, %s2151_s9  ;;  %p2158_p12 = scmp.lt.u32.totalorder %s2151_s9, %s3190_s6 }
  0xbc   : > { %p2154_p7 = pnand %p2152_p6, %p3255_p8 }
  0xbe   : > { %p2155_p11 = pneg %p2154_p7 }
  0xc0   : > { %p2160_p2 = pnand %p2158_p12, %p2155_p11 }
  0xc2   : > { %2163 = shalt.err (!%p2160_p2)
}
  0xc3   : > { %s2164_s26 = scalar_lea.vmem %s356_s1, 128  ;;  %p2172_p0 = scmp.lt.s32.totalorder %s356_s1, %s356_s1 }
  0xc4   : > { %p2165_p4 = scmp.ne.s32.totalorder %s356_s1, %s2164_s26  ;;  %p2173_p5 = scmp.lt.s32.totalorder %s2164_s26, %s2164_s26 }
  0xc6   : > { %p2167_p10 = pnand %p2165_p4, %p3255_p8  ;;  %p2174_p9 = por %p2173_p5, %p2172_p0 }
  0xc8   : > { %p2168_p3 = pneg %p2167_p10 }
  0xca   : > { %p2175_p1 = pnand %p2174_p9, %p2168_p3 }
  0xcc   : > { %2178 = shalt.err (!%p2175_p1)
}
  0xcd   : > { %p3256_p6 = scmp.ne.s32.totalorder %s3236_s27, 0  ;;  %s2179_s25 = scalar_lea.hbm %s3192_s8, 16 }
  0xce   : > { %p2180_p7 = scmp.ne.s32.totalorder %s3192_s8, %s2179_s25  ;;  %p2186_p1 = scmp.lt.u32.totalorder %s2179_s25, %s3192_s8 }
  0xcf   : > { %1886 = dma.hbm_to_vmem [thread:$0]  (!%p3256_p6), %s3190_s6, 128, %s356_s1, [#allocation12]  }
  0xd0   : > { %p2182_p11 = pnand %p2180_p7, %p3255_p8 }
  0xd2   : > { %p2183_p12 = pneg %p2182_p11 }
  0xd4   : > { %p2188_p2 = pnand %p2186_p1, %p2183_p12 }
  0xd6   : > { %2191 = shalt.err (!%p2188_p2)
}
  0xd7   : > { %s2192_s9 = scalar_lea.vmem %s378_s30, 16  ;;  %s2199_s1 = scalar_lea.vmem %s378_s30, 32 }
  0xd8   : > { %p2193_p4 = scmp.ne.s32.totalorder %s378_s30, %s2192_s9  ;;  %p2200_p0 = scmp.lt.s32.totalorder %s378_s30, %s378_s30 }
  0xd9   : > { %p2201_p5 = scmp.lt.s32.totalorder %s2199_s1, %s2192_s9 }
  0xda   : > { %p2195_p10 = pnand %p2193_p4, %p3255_p8 }
  0xdb   : > { %p2202_p9 = por %p2201_p5, %p2200_p0 }
  0xdc   : > { %p2196_p3 = pneg %p2195_p10 }
  0xde   : > { %p2203_p13 = pnand %p2202_p9, %p2196_p3 }
  0xe0   : > { %2206 = shalt.err (!%p2203_p13)
}
  0xe1   : > { %1892 = dma.hbm_to_vmem [thread:$0]  (!%p3256_p6), %s3192_s8, 16, %s378_s30, [#allocation15]  }
  0xe2   : > { %s2428_s28 = smov [#allocation19]   ;;  %s2207_s15 = scalar_lea.hbm %s3194_s10, 128 }
  0xe3   : > { %s401_s23 = sshll.u32 %s2428_s28, 4  ;;  %p2208_p7 = scmp.ne.s32.totalorder %s3194_s10, %s2207_s15  ;;  %s402_s23 = int_to_ptr.vmem [resolvable:$true] %s401_s23 }
  0xe4   : > { %p2214_p12 = scmp.lt.u32.totalorder %s2207_s15, %s3194_s10 }
  0xe5   : > { %p2210_p13 = pnand %p2208_p7, %p3255_p8 }
  0xe7   : > { %p2211_p11 = pneg %p2210_p13 }
  0xe9   : > { %p2216_p1 = pnand %p2214_p12, %p2211_p11 }
  0xeb   : > { %2219 = shalt.err (!%p2216_p1)
}
  0xec   : > { %s2220_s30 = scalar_lea.vmem %s402_s23, 128  ;;  %p2228_p3 = scmp.lt.s32.totalorder %s402_s23, %s402_s23 }
  0xed   : > { %p2221_p2 = scmp.ne.s32.totalorder %s402_s23, %s2220_s30  ;;  %p2229_p0 = scmp.lt.s32.totalorder %s2220_s30, %s2220_s30 }
  0xef   : > { %p2223_p4 = pnand %p2221_p2, %p3255_p8  ;;  %p2230_p5 = por %p2229_p0, %p2228_p3 }
  0xf1   : > { %p2224_p10 = pneg %p2223_p4 }
  0xf3   : > { %p2231_p9 = pnand %p2230_p5, %p2224_p10 }
  0xf5   : > { %2234 = shalt.err (!%p2231_p9)
}
  0xf6   : > { %1898 = dma.hbm_to_vmem [thread:$0]  (!%p3256_p6), %s3194_s10, 128, %s402_s23, [#allocation18]  }
  0xf7   : > { %s2784_s16 = scalar_lea.hbm %s3184_s0, %s2679_s11  ;;  %s416_s21 = scalar_lea.vmem [#allocation2], %s2672_s29 }
  0xf8   : > { %s423_s25 = sshll.u32 %s416_s21, 4  ;;  %s3257_s27 = sand.u32 1, %s2411_s19   ;;  %s2787_s25 = int_to_ptr.vmem [resolvable:$true] %s423_s25 }
  0xf9   : > { %s2791_s15 = scalar_lea.sflag [#allocation3], %s3257_s27  ;;  %s2235_s12 = scalar_lea.hbm %s2784_s16, 2304 }
  0xfa   : > { %p2236_p8 = scmp.ne.s32.totalorder %s2784_s16, %s2235_s12  ;;  %p3258_p7 = scmp.ne.s32.totalorder %s3252_s7, 0 }
  0xfb   : > { %s2240_s3 = scalar_lea.hbm %s3184_s0, 4608  ;;  %p2241_p11 = scmp.lt.u32.totalorder %s2784_s16, %s3184_s0 }
  0xfc   : > { %p2238_p6 = pnand %p2236_p8, %p3258_p7  ;;  %p2242_p12 = scmp.lt.u32.totalorder %s2240_s3, %s2235_s12 }
  0xfd   : > { %p2244_p2 = scmp.lt.u32.totalorder %s2235_s12, %s2784_s16 }
  0xfe   : > { %p2239_p13 = pneg %p2238_p6  ;;  %p2243_p1 = por %p2242_p12, %p2241_p11 }
 0x100   : > { %p2245_p4 = por %p2244_p2, %p2243_p1 }
 0x102   : > { %p2246_p10 = pnand %p2245_p4, %p2239_p13 }
 0x104   : > { %2249 = shalt.err (!%p2246_p10)
}
 0x105   : > { %s2250_s1 = scalar_lea.vmem %s2787_s25, 2304  ;;  %s2429_s26 = smov [#allocation2]  }
 0x106   : > { %p2251_p3 = scmp.ne.s32.totalorder %s2787_s25, %s2250_s1  ;;  %s2255_s17 = sshll.u32 %s2429_s26, 4  ;;  %s2256_s17 = int_to_ptr.vmem [resolvable:$false] %s2255_s17 }
 0x107   : > { %s2257_s28 = scalar_lea.vmem %s2256_s17, 4608  ;;  %p2258_p9 = scmp.lt.s32.totalorder %s2787_s25, %s2256_s17 }
 0x108   : > { %p2253_p0 = pnand %p2251_p3, %p3258_p7  ;;  %p2259_p8 = scmp.lt.s32.totalorder %s2257_s28, %s2250_s1 }
 0x10a   : > { %p2254_p5 = pneg %p2253_p0  ;;  %p2260_p6 = por %p2259_p8, %p2258_p9 }
 0x10c   : > { %p2261_p11 = pnand %p2260_p6, %p2254_p5 }
 0x10e   : > { %2264 = shalt.err (!%p2261_p11)
}
 0x10f   : > { %p3259_p13 = scmp.ne.s32.totalorder %s3250_s22, 0  ;;  %s2822_s12 = scalar_lea.hbm %s3186_s2, %s2679_s11 }
 0x110   : > { %s458_s23 = scalar_lea.vmem [#allocation7], %s2672_s29  ;;  %s2265_s3 = scalar_lea.hbm %s2822_s12, 2304 }
 0x111   : > { %1902 = dma.hbm_to_vmem [thread:$0]  (!%p3259_p13), %s2784_s16, 2304, %s2787_s25, %s2791_s15, %s3254_s14, %s3254_s14, %s3253_s5  }
 0x112   : > { %s465_s13 = sshll.u32 %s458_s23, 4  ;;  %p2266_p12 = scmp.ne.s32.totalorder %s2822_s12, %s2265_s3  ;;  %s2825_s13 = int_to_ptr.vmem [resolvable:$true] %s465_s13 }
 0x113   : > { %s2270_s25 = scalar_lea.hbm %s3186_s2, 4608  ;;  %p2271_p4 = scmp.lt.u32.totalorder %s2822_s12, %s3186_s2 }
 0x114   : > { %p2268_p1 = pnand %p2266_p12, %p3258_p7  ;;  %p2272_p10 = scmp.lt.u32.totalorder %s2270_s25, %s2265_s3 }
 0x115   : > { %p2274_p0 = scmp.lt.u32.totalorder %s2265_s3, %s2822_s12 }
 0x116   : > { %p2269_p2 = pneg %p2268_p1  ;;  %p2273_p3 = por %p2272_p10, %p2271_p4 }
 0x118   : > { %p2275_p5 = por %p2274_p0, %p2273_p3 }
 0x11a   : > { %p2276_p9 = pnand %p2275_p5, %p2269_p2 }
 0x11c   : > { %2279 = shalt.err (!%p2276_p9)
}
 0x11d   : > { %s2280_s1 = scalar_lea.vmem %s2825_s13, 2304  ;;  %s2430_s26 = smov [#allocation7]  }
 0x11e   : > { %p2281_p8 = scmp.ne.s32.totalorder %s2825_s13, %s2280_s1  ;;  %s2285_s17 = sshll.u32 %s2430_s26, 4  ;;  %s2286_s17 = int_to_ptr.vmem [resolvable:$false] %s2285_s17 }
 0x11f   : > { %s2287_s28 = scalar_lea.vmem %s2286_s17, 4608  ;;  %p2288_p12 = scmp.lt.s32.totalorder %s2825_s13, %s2286_s17 }
 0x120   : > { %p2283_p6 = pnand %p2281_p8, %p3258_p7  ;;  %p2289_p1 = scmp.lt.s32.totalorder %s2287_s28, %s2280_s1 }
 0x122   : > { %p2284_p11 = pneg %p2283_p6  ;;  %p2290_p4 = por %p2289_p1, %p2288_p12 }
 0x124   : > { %p2291_p10 = pnand %p2290_p4, %p2284_p11 }
 0x126   : > { %2294 = shalt.err (!%p2291_p10)
}
 0x127   : > { %1908 = dma.hbm_to_vmem [thread:$0]  (!%p3259_p13), %s2822_s12, 2304, %s2825_s13, %s2693_s4, %s3254_s14, %s3254_s14, %s3253_s5  }
 0x128   : > { %s3260_s23 = sld [smem:[#allocation37_spill]]  ;;  %s479_s9 = scalar_lea.vmem [#allocation8], %s2672_s29 }
 0x129   : > { %s486_s16 = sshll.u32 %s479_s9, 4  ;;  %s3261_s25 = sand.u32 1, %s2415_s20   ;;  %s2859_s16 = int_to_ptr.vmem [resolvable:$true] %s486_s16 }
 0x12a   : > { %s2863_s15 = scalar_lea.sflag [#allocation9], %s3261_s25 }
 0x12e   : > { %s2856_s3 = scalar_lea.hbm %s3260_s23, %s2679_s11  ;;  %s2300_s11 = scalar_lea.hbm %s3260_s23, 4608 }
 0x12f   : > { %s2295_s30 = scalar_lea.hbm %s2856_s3, 2304  ;;  %p2301_p5 = scmp.lt.u32.totalorder %s2856_s3, %s3260_s23 }
 0x130   : > { %p2296_p2 = scmp.ne.s32.totalorder %s2856_s3, %s2295_s30  ;;  %p2302_p9 = scmp.lt.u32.totalorder %s2300_s11, %s2295_s30 }
 0x131   : > { %p2304_p6 = scmp.lt.u32.totalorder %s2295_s30, %s2856_s3 }
 0x132   : > { %p2298_p3 = pnand %p2296_p2, %p3258_p7  ;;  %p2303_p8 = por %p2302_p9, %p2301_p5 }
 0x134   : > { %p2299_p0 = pneg %p2298_p3  ;;  %p2305_p11 = por %p2304_p6, %p2303_p8 }
 0x136   : > { %p2306_p12 = pnand %p2305_p11, %p2299_p0 }
 0x138   : > { %2309 = shalt.err (!%p2306_p12)
}
 0x139   : > { %s2310_s29 = scalar_lea.vmem %s2859_s16, 2304  ;;  %s2431_s26 = smov [#allocation8]  }
 0x13a   : > { %p2311_p1 = scmp.ne.s32.totalorder %s2859_s16, %s2310_s29  ;;  %s2315_s17 = sshll.u32 %s2431_s26, 4  ;;  %s2316_s17 = int_to_ptr.vmem [resolvable:$false] %s2315_s17 }
 0x13b   : > { %s2317_s28 = scalar_lea.vmem %s2316_s17, 4608  ;;  %p2318_p2 = scmp.lt.s32.totalorder %s2859_s16, %s2316_s17 }
 0x13c   : > { %p2313_p4 = pnand %p2311_p1, %p3258_p7  ;;  %p2319_p3 = scmp.lt.s32.totalorder %s2317_s28, %s2310_s29 }
 0x13e   : > { %p2314_p10 = pneg %p2313_p4  ;;  %p2320_p5 = por %p2319_p3, %p2318_p2 }
 0x140   : > { %p2321_p9 = pnand %p2320_p5, %p2314_p10 }
 0x142   : > { %2324 = shalt.err (!%p2321_p9)
}
 0x143   : > { %1911 = dma.hbm_to_vmem [thread:$0]  (!%p3259_p13), %s2856_s3, 2304, %s2859_s16, %s2863_s15, %s3254_s14, %s3254_s14, %s3253_s5  }
 0x144   : > { %s3262_s7 = sld [smem:[#allocation31_spill]] }
 0x14a   : > { %p3263_p7 = scmp.ne.s32.totalorder %s3262_s7, 0 }
 0x14b   : > { %s2893_s21 = sand.u32 (!%p3263_p7), 1, %s2407_s18   ;;  %p3264_p0 = scmp.ne.s32.totalorder (!%p3263_p7), %s3245_s24, 0 }
 0x14c   : > { %498 = sbr.rel (%p3263_p7) target bundleno = 1278 (0x4fe), region = 64  ;;  %s501_s9 = scalar_lea.sflag (!%p3263_p7), [#allocation3], %s2893_s21 }
 0x14d   : > { %s1838_s27 = smul.u32 (!%p3263_p7), 144, %s2893_s21 }
 0x14f   : > { %s2897_s25 = scalar_lea.vmem (!%p3263_p7), [#allocation2], %s1838_s27 }
 0x153   : > { %2370 = dma.done.wait (%p3264_p0), %s501_s9, 2304  }
 0x154   : > { %2372 = vsyncadd (%p3264_p0), %s501_s9, 4294964992  ;;  %s3265_s22 = sld [smem:[#allocation30_spill]]  ;;  %s2904_s3 = scalar_lea.vmem [#allocation5], %s1838_s27 }
 0x15a   : > { %s509_s5 = sand.u32 1, %s3265_s22  }
 0x15b   : > { %s510_s14 = scalar_lea.sflag [#allocation6], %s509_s5 }
 0x15c   : > { %2374 = dma.done.wait (%p3264_p0), %s510_s14, 4608  }
 0x15d   : > { %2376 = vsyncadd (%p3264_p0), %s510_s14, 4294962688  ;;  %s2910_s16 = scalar_lea.vmem [#allocation7], %s1838_s27  ;;  %s528_s15 = scalar_lea.sflag [#allocation9], %s509_s5 }
 0x15e   : > { %s2912_s30 = scalar_lea.vmem [#allocation8], %s1838_s27 }
 0x15f   : > { %2378 = dma.done.wait (%p3264_p0), %s528_s15, 2304  }
 0x160   : > { %2380 = vsyncadd (%p3264_p0), %s528_s15, 4294964992  ;;  %p3266_p13 = scmp.eq.s32.totalorder %s3265_s22, 0 }
 0x162   : > { %2382 = dma.done.wait (%p3266_p13), [#allocation9], 192   ;;  %p3267_p8 = pmov %p3266_p13 }
 0x164   : > { %2384 = vsyncadd (%p3267_p8), [#allocation9], 4294967104  ;;  %p3268_p6 = pmov %p3267_p8 }
 0x166   : > { %2386 = dma.done.wait (%p3268_p6), [#allocation12], 144   ;;  %p3269_p11 = pmov %p3268_p6 }
 0x167   : > { %p3270_p12 = pmov %p3268_p6 }
 0x168   : > { %2388 = vsyncadd (%p3269_p11), [#allocation12], 4294967152 }
 0x169   : > { %2390 = dma.done.wait (%p3270_p12), [#allocation15], 32   ;;  %p3271_p1 = pmov %p3268_p6 }
 0x16b   : > { %2392 = vsyncadd (%p3271_p1), [#allocation15], 4294967264  ;;  %p3272_p4 = pmov %p3271_p1 }
 0x16c   : > { %p3273_p10 = pmov %p3271_p1 }
 0x16d   : > { %2394 = dma.done.wait (%p3272_p4), [#allocation18], 1152  }
 0x16e   : > { %2396 = vsyncadd (%p3273_p10), [#allocation18], 4294966144  ;;  %v624_v0 = vlaneseq  ;;  %v893_v5 = vld [vmem:[#allocation13] sm:$0xff]  ;;  %v613_v6 = vld [vmem:[#allocation10] sm:$0x7]  ;;  %vm901_vm0 = vcmask 64512  }
 0x16f   : > { %v614_v7 = vld [vmem:[#allocation10 + $0x4] sm:$0x7]  ;;  %1786 = vmatprep.subr.mxu0 %v893_v5  ;;  %v615_v8 = vld [vmem:[#allocation10 + $0x8] sm:$0x7]  ;;  %1828 = vmatprep.subr.mxu1 %v893_v5  ;;  %vm1063_vm1 = vcmask 130048   ;;  %vm1130_vm2 = vcmask 1041409  }
 0x170   : > { %v2935_v1 = vshrl.u32 %v624_v0, 7  ;;  %v616_v9 = vld [vmem:[%s2897_s25] sm:$0xff]  ;;  %1787 = vmatpush3.msra.mxu0 %v893_v5  ;;  %v1702_v26 = vld [vmem:[%s2897_s25 + $0x10] sm:$0xff]  ;;  %1829 = vmatpush3.msra.mxu1 %v893_v5  ;;  %vm1132_vm3 = vcmask 1042434   ;;  %vm1134_vm4 = vcmask 1043459   ;;  %vm1136_vm5 = vcmask 1044484  }
 0x171   : > { %v644_v11 = vld [vmem:[%s2904_s3] sm:$0xff]  ;;  %v1710_v27 = vld [vmem:[%s2904_s3 + $0x10] sm:$0xff]  ;;  %vm1138_vm6 = vcmask 1045509   ;;  %vm1140_vm7 = vcmask 1046534   ;;  %vm1142_vm8 = vcmask 1047559   ;;  %s1701_s24 = sshll.u32 %s2893_s21, 6 }
 0x172   : > { %v626_v2 = vsub.s32 0, %v2935_v1  ;;  %v654_v3 = vsub.s32 1, %v2935_v1  ;;  %v682_v4 = vsub.s32 2, %v2935_v1  ;;  %v672_v15 = vld [vmem:[%s2897_s25 + $0x1] sm:$0xff]  ;;  %v1718_v31 = vld [vmem:[%s2897_s25 + $0x11] sm:$0xff]  ;;  %vm1451_vm9 = vcmask 523264  }
 0x173   : > { %v700_v16 = vld [vmem:[%s2910_s16] sm:$0xff]  ;;  %v701_v32 = vld [vmem:[%s2910_s16 + $0x10] sm:$0xff]  ;;  %s612_s4 = scalar_lea.vmem [#allocation20], %s1701_s24  ;;  %s3274_s12 = sld [smem:[#allocation34_spill]] }
 0x174   : > { %v2941_v10 = vrot.slane %v613_v6, %v626_v2  ;;  %v2944_v12 = vrot.slane %v613_v6, %v654_v3  ;;  %v2946_v13 = vrot.slane %v613_v6, %v682_v4  ;;  %v2948_v14 = vrot.slane %v614_v7, %v626_v2  ;;  %v728_v17 = vld [vmem:[%s2912_s30] sm:$0xff]  ;;  %v729_v37 = vld [vmem:[%s2912_s30 + $0x10] sm:$0xff]  ;;  %s1758_s11 = sshll.u32 %s3265_s22, 10  ;;  %s1474_s13 = sshll.u32 %s612_s4, 4  ;;  %s3139_s13 = int_to_ptr.vmem [resolvable:$true] %s1474_s13 }
 0x175   : > { %v2953_v18 = vrot.slane %v614_v7, %v654_v3  ;;  %v2955_v19 = vrot.slane %v614_v7, %v682_v4  ;;  %v2957_v20 = vrot.slane %v615_v8, %v626_v2  ;;  %v2959_v21 = vrot.slane %v615_v8, %v654_v3  ;;  %v756_v25 = vld [vmem:[%s2910_s16 + $0x1] sm:$0xff]  ;;  %v757_v38 = vld [vmem:[%s2910_s16 + $0x11] sm:$0xff]  ;;  %s3275_s26 = sld [smem:[#allocation42_spill]]  ;;  %s1461_s28 = scalar_lea.sflag [#allocation4], %s2893_s21 }
 0x176   : > { %v628_v22 = vmul.f32 %v2941_v10, %v616_v9  ;;  %v656_v23 = vmul.f32 %v2944_v12, %v644_v11  ;;  %v684_v24 = vmul.f32 %v2946_v13, %v672_v15  ;;  %v712_v28 = vmul.f32 %v2948_v14, %v700_v16  ;;  %v1703_v39 = vld [vmem:[%s2897_s25 + $0x20] sm:$0xff]  ;;  %v1704_v61 = vld [vmem:[%s2897_s25 + $0x30] sm:$0xff]  ;;  %s2325_s7 = scalar_lea.vmem %s3139_s13, 1024  ;;  %s2432_s27 = smov [#allocation20]  }
 0x177   : > { %v740_v29 = vmul.f32 %v2953_v18, %v728_v17  ;;  %v768_v30 = vmul.f32 %v2955_v19, %v756_v25  ;;  %v2972_v34 = vrot.slane %v615_v8, %v682_v4  ;;  %v629_v35 = vmul.f32 %v1702_v26, %v2941_v10  ;;  %v1711_v44 = vld [vmem:[%s2904_s3 + $0x20] sm:$0xff]  ;;  %v1712_v62 = vld [vmem:[%s2904_s3 + $0x30] sm:$0xff]  ;;  %p2326_p2 = scmp.ne.s32.totalorder %s3139_s13, %s2325_s7  ;;  %s2329_s9 = sshll.u32 %s2432_s27, 4  ;;  %s2330_s9 = int_to_ptr.vmem [resolvable:$false] %s2329_s9 }
 0x178   : > { %v664_v33 = vadd.f32 %v656_v23, %v628_v22  ;;  %v657_v36 = vmul.f32 %v1710_v27, %v2944_v12  ;;  %v797_v40 = vmul.f32 %v1702_v26, %v2957_v20  ;;  %v826_v41 = vmul.f32 %v1710_v27, %v2959_v21  ;;  %v1719_v45 = vld [vmem:[%s2897_s25 + $0x21] sm:$0xff]  ;;  %v1720_v63 = vld [vmem:[%s2897_s25 + $0x31] sm:$0xff]  ;;  %p2332_p7 = scmp.lt.s32.totalorder %s3139_s13, %s2330_s9 }
 0x179   : > { %v685_v42 = vmul.f32 %v1718_v31, %v2946_v13  ;;  %v713_v43 = vmul.f32 %v2948_v14, %v701_v32  ;;  %v741_v48 = vmul.f32 %v2953_v18, %v729_v37  ;;  %v769_v49 = vmul.f32 %v2955_v19, %v757_v38  ;;  %v702_v50 = vld [vmem:[%s2910_s16 + $0x20] sm:$0xff]  ;;  %v703_v11 = vld [vmem:[%s2910_s16 + $0x30] sm:$0xff]  ;;  %p3276_p3 = scmp.ne.s32.totalorder %s3274_s12, 0 }
 0x17a   : > { %v692_v46 = vadd.f32 %v684_v24, %v664_v33  ;;  %v665_v47 = vadd.f32 %v657_v36, %v629_v35  ;;  %v730_v51 = vld [vmem:[%s2912_s30 + $0x20] sm:$0xff]  ;;  %v854_v52 = vmul.f32 %v1718_v31, %v2972_v34  ;;  %v798_v53 = vmul.f32 %v1703_v39, %v2957_v20  ;;  %v731_v15 = vld [vmem:[%s2912_s30 + $0x30] sm:$0xff] }
 0x17b   : > { %v630_v54 = vmul.f32 %v1703_v39, %v2941_v10  ;;  %v658_v55 = vmul.f32 %v1711_v44, %v2944_v12  ;;  %v758_v56 = vld [vmem:[%s2910_s16 + $0x21] sm:$0xff]  ;;  %v827_v59 = vmul.f32 %v1711_v44, %v2959_v21  ;;  %v686_v60 = vmul.f32 %v1719_v45, %v2946_v13  ;;  %v759_v24 = vld [vmem:[%s2910_s16 + $0x31] sm:$0xff]  ;;  %s3137_s17 = scalar_lea.hbm %s3275_s26, %s1758_s11  ;;  %p2327_p5 = pnand %p2326_p2, %p3276_p3 }
 0x17c   : > { %v720_v57 = vadd.f32 %v712_v28, %v692_v46  ;;  %v693_v58 = vadd.f32 %v685_v42, %v665_v47  ;;  %v855_v2 = vmul.f32 %v1719_v45, %v2972_v34  ;;  %v714_v4 = vmul.f32 %v2948_v14, %v702_v50  ;;  %v1713_v31 = vld [vmem:[%s2904_s3 + $0x40] sm:$0xff] }
 0x17d   : > { %v666_v3 = vadd.f32 %v658_v55, %v630_v54  ;;  %v742_v5 = vmul.f32 %v2953_v18, %v730_v51  ;;  %v770_v8 = vmul.f32 %v2955_v19, %v758_v56  ;;  %v799_v9 = vmul.f32 %v1704_v61, %v2957_v20  ;;  %v1721_v37 = vld [vmem:[%s2897_s25 + $0x41] sm:$0xff]  ;;  %v3026_v55 = vld [vmem:[#allocation11] ss:$0 sm:$0xff]  ;;  %p2328_p9 = pneg %p2327_p5 }
 0x17e   : > { %v748_v6 = vadd.f32 %v740_v29, %v720_v57  ;;  %v721_v7 = vadd.f32 %v713_v43, %v693_v58  ;;  %v631_v17 = vmul.f32 %v1704_v61, %v2941_v10  ;;  %v659_v22 = vmul.f32 %v1712_v62, %v2944_v12  ;;  %v1705_v29 = vld [vmem:[%s2897_s25 + $0x40] sm:$0xff]  ;;  %v1706_v61 = vld [vmem:[%s2897_s25 + $0x50] sm:$0xff] }
 0x17f   : > { %v694_v16 = vadd.f32 %v686_v60, %v666_v3  ;;  %v687_v23 = vmul.f32 %v1720_v63, %v2946_v13  ;;  %v828_v27 = vmul.f32 %v1712_v62, %v2959_v21  ;;  %v856_v28 = vmul.f32 %v1720_v63, %v2972_v34  ;;  %v704_v43 = vld [vmem:[%s2910_s16 + $0x40] sm:$0xff]  ;;  %v1714_v3 = vld [vmem:[%s2904_s3 + $0x50] sm:$0xff] }
 0x180   : > { %v776_v25 = vadd.f32 %v768_v30, %v748_v6  ;;  %v749_v26 = vadd.f32 %v741_v48, %v721_v7  ;;  %v667_v33 = vadd.f32 %v659_v22, %v631_v17  ;;  %v715_v35 = vmul.f32 %v2948_v14, %v703_v11  ;;  %v732_v48 = vld [vmem:[%s2912_s30 + $0x40] sm:$0xff]  ;;  %v1722_v11 = vld [vmem:[%s2897_s25 + $0x51] sm:$0xff] }
 0x181   : > { %v722_v32 = vadd.f32 %v714_v4, %v694_v16  ;;  %v743_v36 = vmul.f32 %v2953_v18, %v731_v15  ;;  %v771_v39 = vmul.f32 %v2955_v19, %v759_v24  ;;  %v800_v42 = vmul.f32 %v1705_v29, %v2957_v20  ;;  %v733_v24 = vld [vmem:[%s2912_s30 + $0x50] sm:$0xff] }
 0x182   : > { %v805_v38 = vadd.f32 %v797_v40, %v776_v25  ;;  %v777_v30 = vadd.f32 %v769_v49, %v749_v26  ;;  %v695_v45 = vadd.f32 %v687_v23, %v667_v33  ;;  %v632_v46 = vmul.f32 %v1705_v29, %v2941_v10  ;;  %v760_v49 = vld [vmem:[%s2910_s16 + $0x41] sm:$0xff] }
 0x183   : > { %v750_v44 = vadd.f32 %v742_v5, %v722_v32  ;;  %v660_v47 = vmul.f32 %v1713_v31, %v2944_v12  ;;  %v829_v54 = vmul.f32 %v1713_v31, %v2959_v21  ;;  %v688_v40 = vmul.f32 %v1721_v37, %v2946_v13 }
 0x184   : > { %v834_v50 = vadd.f32 %v826_v41, %v805_v38  ;;  %v806_v51 = vadd.f32 %v798_v53, %v777_v30  ;;  %v723_v57 = vadd.f32 %v715_v35, %v695_v45  ;;  %v716_v60 = vmul.f32 %v2948_v14, %v704_v43 }
 0x185   : > { %v778_v56 = vadd.f32 %v770_v8, %v750_v44  ;;  %v668_v58 = vadd.f32 %v660_v47, %v632_v46  ;;  %v857_v41 = vmul.f32 %v1721_v37, %v2972_v34  ;;  %v744_v53 = vmul.f32 %v2953_v18, %v732_v48  ;;  %v705_v8 = vld [vmem:[%s2910_s16 + $0x50] sm:$0xff]  ;;  %v1715_v37 = vld [vmem:[%s2904_s3 + $0x60] sm:$0xff] }
 0x186   : > { %v862_v62 = vadd.f32 %v854_v52, %v834_v50  ;;  %v835_v63 = vadd.f32 %v827_v59, %v806_v51  ;;  %v751_v5 = vadd.f32 %v743_v36, %v723_v57  ;;  %v772_v7 = vmul.f32 %v2955_v19, %v760_v49  ;;  %v761_v36 = vld [vmem:[%s2910_s16 + $0x51] sm:$0xff]  ;;  %v706_v46 = vld [vmem:[%s2910_s16 + $0x60] sm:$0xff] }
 0x187   : > { %v807_v4 = vadd.f32 %v799_v9, %v778_v56  ;;  %v696_v6 = vadd.f32 %v688_v40, %v668_v58  ;;  %v801_v52 = vmul.f32 %v1706_v61, %v2957_v20  ;;  %v633_v59 = vmul.f32 %v1706_v61, %v2941_v10  ;;  %v734_v57 = vld [vmem:[%s2912_s30 + $0x60] sm:$0xff] }
 0x188   : > { %v877_v15 = vadd.f32 %v3026_v55, %v862_v62  ;;  %v863_v16 = vadd.f32 %v855_v2, %v835_v63  ;;  %v779_v22 = vadd.f32 %v771_v39, %v751_v5  ;;  %v661_v9 = vmul.f32 %v1714_v3, %v2944_v12  ;;  %v1708_v62 = vld [vmem:[%s2897_s25 + $0x70] sm:$0xff]  ;;  %v762_v5 = vld [vmem:[%s2910_s16 + $0x61] sm:$0xff] }
 0x189   : > { %v836_v17 = vadd.f32 %v828_v27, %v807_v4  ;;  %v724_v23 = vadd.f32 %v716_v60, %v696_v6  ;;  %v689_v29 = vmul.f32 %v1722_v11, %v2946_v13  ;;  %v717_v2 = vmul.f32 %v2948_v14, %v705_v8  ;;  %v1707_v27 = vld [vmem:[%s2897_s25 + $0x60] sm:$0xff]  ;;  %v1724_v6 = vld [vmem:[%s2897_s25 + $0x71] sm:$0xff] }
 0x18a   : > { %v885_v25 = vmax.f32 %v877_v15, 0.0  ;;  %v878_v26 = vadd.f32 %v3026_v55, %v863_v16  ;;  %v808_v32 = vadd.f32 %v800_v42, %v779_v22  ;;  %v669_v35 = vadd.f32 %v661_v9, %v633_v59  ;;  %v1723_v42 = vld [vmem:[%s2897_s25 + $0x61] sm:$0xff] }
 0x18b   : > { %v864_v31 = vadd.f32 %v856_v28, %v836_v17  ;;  %v752_v33 = vadd.f32 %v744_v53, %v724_v23  ;;  %v830_v30 = vmul.f32 %v1714_v3, %v2959_v21  ;;  %v745_v39 = vmul.f32 %v2953_v18, %v733_v24  ;;  %v707_v17 = vld [vmem:[%s2910_s16 + $0x70] sm:$0xff] }
 0x18c   : > { %1788 = vmatprep.mubr.msk.f32.mxu0 %vm901_vm0, %v885_v25  ;;  %v886_v38 = vmax.f32 %v878_v26, 0.0  ;;  %v837_v44 = vadd.f32 %v829_v54, %v808_v32  ;;  %v697_v28 = vadd.f32 %v689_v29, %v669_v35  ;;  %v858_v47 = vmul.f32 %v1722_v11, %v2972_v34 }
 0x18d   : > { %v879_v43 = vadd.f32 %v3026_v55, %v864_v31  ;;  %v780_v45 = vadd.f32 %v772_v7, %v752_v33  ;;  %v773_v48 = vmul.f32 %v2955_v19, %v761_v36  ;;  %v634_v50 = vmul.f32 %v1707_v27, %v2941_v10  ;;  %v763_v36 = vld [vmem:[%s2910_s16 + $0x71] sm:$0xff] }
 0x18e   : > { %1789 = vmatmul.mubr.msk.f32.vlgmr.msra.gmra.mrb[0].mxu0 %vm901_vm0, %v886_v38  ;;  %v662_v51 = vmul.f32 %v1715_v37, %v2944_v12  ;;  %v865_v54 = vadd.f32 %v857_v41, %v837_v44  ;;  %v725_v56 = vadd.f32 %v717_v2, %v697_v28  ;;  %v690_v60 = vmul.f32 %v1723_v42, %v2946_v13  ;;  %v1716_v41 = vld [vmem:[%s2904_s3 + $0x70] sm:$0xff] }
 0x18f   : > { %v887_v40 = vmax.f32 %v879_v43, 0.0  ;;  %v809_v49 = vadd.f32 %v801_v52, %v780_v45  ;;  %v718_v61 = vmul.f32 %v2948_v14, %v706_v46  ;;  %v802_v4 = vmul.f32 %v1707_v27, %v2957_v20  ;;  %v735_v2 = vld [vmem:[%s2912_s30 + $0x70] sm:$0xff] }
 0x190   : > { %v670_v58 = vadd.f32 %v662_v51, %v634_v50  ;;  %v880_v63 = vadd.f32 %v3026_v55, %v865_v54  ;;  %v753_v3 = vadd.f32 %v745_v39, %v725_v56  ;;  %v831_v7 = vmul.f32 %v1715_v37, %v2959_v21  ;;  %v1709_v39 = vld [vmem:[%s2897_s25 + $0x80] sm:$0xff] }
 0x191   : > { %1791 = vmatprep.mubr.msk.f32.mxu0 %vm901_vm0, %v887_v40  ;;  %v838_v53 = vadd.f32 %v830_v30, %v809_v49  ;;  %v746_v8 = vmul.f32 %v2953_v18, %v734_v57  ;;  %v635_v59 = vmul.f32 %v1708_v62, %v2941_v10  ;;  %v774_v23 = vmul.f32 %v2955_v19, %v762_v5  ;;  %v1725_v51 = vld [vmem:[%s2897_s25 + $0x81] sm:$0xff]  ;;  %s2331_s25 = scalar_lea.vmem %s2330_s9, 2048 }
 0x192   : > { %v698_v11 = vadd.f32 %v690_v60, %v670_v58  ;;  %v888_v15 = vmax.f32 %v880_v63, 0.0  ;;  %v781_v52 = vadd.f32 %v773_v48, %v753_v3  ;;  %v663_v9 = vmul.f32 %v1716_v41, %v2944_v12  ;;  %p2333_p0 = scmp.lt.s32.totalorder %s2331_s25, %s2325_s7 }
 0x193   : > { %v866_v16 = vadd.f32 %v858_v47, %v838_v53  ;;  %v691_v24 = vmul.f32 %v1724_v6, %v2946_v13  ;;  %v859_v29 = vmul.f32 %v1723_v42, %v2972_v34  ;;  %v803_v10 = vmul.f32 %v1708_v62, %v2957_v20  ;;  %v1717_v42 = vld [vmem:[%s2904_s3 + $0x80] sm:$0xff] }
 0x194   : > { %v726_v22 = vadd.f32 %v718_v61, %v698_v11  ;;  %1792 = vmatmul.mubr.msk.f32.gmra.mrb[2].mxu0 %vm901_vm0, %v888_v15  ;;  %v810_v26 = vadd.f32 %v802_v4, %v781_v52  ;;  %v671_v32 = vadd.f32 %v663_v9, %v635_v59  ;;  %v719_v33 = vmul.f32 %v2948_v14, %v707_v17  ;;  %v1727_v62 = vld [vmem:[#allocation14] ss:$0 sm:$0xff]  ;;  %v1736_v4 = vld [vmem:[#allocation16] ss:$0 sm:$0xff]  ;;  %p2334_p13 = por %p2333_p0, %p2332_p7 }
 0x195   : > { %v881_v25 = vadd.f32 %v3026_v55, %v866_v16  ;;  %v832_v27 = vmul.f32 %v1716_v41, %v2959_v21  ;;  %v747_v38 = vmul.f32 %v2953_v18, %v735_v2  ;;  %v860_v44 = vmul.f32 %v1724_v6, %v2972_v34 }
 0x196   : > { %v754_v31 = vadd.f32 %v746_v8, %v726_v22  ;;  %v839_v12 = vadd.f32 %v831_v7, %v810_v26  ;;  %v699_v37 = vadd.f32 %v691_v24, %v671_v32  ;;  %v775_v14 = vmul.f32 %v2955_v19, %v763_v36  ;;  %p2335_p8 = pnand %p2334_p13, %p2328_p9 }
 0x197   : > { %v889_v35 = vmax.f32 %v881_v25, 0.0  ;;  %v804_v48 = vmul.f32 %v1709_v39, %v2957_v20  ;;  %v833_v54 = vmul.f32 %v1717_v42, %v2959_v21  ;;  %v861_v19 = vmul.f32 %v1725_v51, %v2972_v34 }
 0x198   : > { %v782_v13 = vadd.f32 %v774_v23, %v754_v31  ;;  %v867_v30 = vadd.f32 %v859_v29, %v839_v12  ;;  %v727_v45 = vadd.f32 %v719_v33, %v699_v37 }
 0x199   : > { %1794 = vmatprep.mubr.msk.f32.mxu1 %vm901_vm0, %v889_v35 }
 0x19a   : > { %v811_v43 = vadd.f32 %v803_v10, %v782_v13  ;;  %v882_v28 = vadd.f32 %v3026_v55, %v867_v30  ;;  %v755_v47 = vadd.f32 %v747_v38, %v727_v45  ;;  %v1039_v45 = vld [vmem:[#allocation17] sm:$0xff] }
 0x19c   : > { %v840_v46 = vadd.f32 %v832_v27, %v811_v43  ;;  %v890_v50 = vmax.f32 %v882_v28, 0.0  ;;  %v783_v40 = vadd.f32 %v775_v14, %v755_v47  ;;  %v1047_v14 = vld [vmem:[#allocation19] sm:$0xff] }
 0x19d   : > { %1814 = vmatprep.subr.mxu0 %v1047_v14 }
 0x19e   : > { %v868_v18 = vadd.f32 %v860_v44, %v840_v46  ;;  %1795 = vmatmul.mubr.msk.f32.vlgmr.msra.gmra.mrb[0].mxu1 %vm901_vm0, %v890_v50  ;;  %v812_v56 = vadd.f32 %v804_v48, %v783_v40  ;;  %1815 = vmatpush3.msra.mxu0 %v1047_v14  ;;  %v1097_v46 = vand.u32 127, %v624_v0 }
 0x1a0   : > { %v883_v49 = vadd.f32 %v3026_v55, %v868_v18  ;;  %v841_v58 = vadd.f32 %v833_v54, %v812_v56  ;;  %v1100_v48 = vsub.s32 %v1097_v46, %v2935_v1 }
 0x1a2   : > { %v891_v57 = vmax.f32 %v883_v49, 0.0  ;;  %v869_v60 = vadd.f32 %v861_v19, %v841_v58 }
 0x1a4   : > { %1797 = vmatprep.mubr.msk.f32.mxu1 %vm901_vm0, %v891_v57  ;;  %v884_v20 = vadd.f32 %v3026_v55, %v869_v60 }
 0x1a6   : > { %v892_v61 = vmax.f32 %v884_v20, 0.0 }
 0x1a8   : > { %1798 = vmatmul.mubr.msk.f32.gmra.mrb[2].mxu1 %vm901_vm0, %v892_v61 }
 0x1a9   : > { %1802 = vmatprep.mubr.msk.f32.mxu1 %vm901_vm0, %v1039_v45 }
 0x261   : > { %v1790_v63 = vpop.f32.mrb[0].mxu0 }
 0x262   : > { %v998_v21 = vadd.f32 %v1790_v63, %v1727_v62  ;;  %v992_v53 = vpop.f32.mrb[1].mxu0 }
 0x263   : > { %v993_v3 = vadd.f32 %v1727_v62, %v992_v53 }
 0x264   : > { %v1032_v5 = vmax.f32 %v998_v21, 0.0 }
 0x265   : > { %v1031_v41 = vmax.f32 %v993_v3, 0.0 }
 0x266   : > { %v1056_v34 = vmul.f32 %v1736_v4, %v1032_v5  ;;  %v1041_v5 = vld [vmem:[#allocation17 + $0x10] sm:$0xff] }
 0x267   : > { %v1793_v6 = vpop.f32.mrb[2].mxu0  ;;  %v1055_v11 = vmul.f32 %v1736_v4, %v1031_v41  ;;  %v1042_v41 = vld [vmem:[#allocation17 + $0x18] sm:$0xff] }
 0x268   : > { %v1067_v7 = vsel %vm1063_vm1, %v1056_v34, 0.0  ;;  %v1008_v8 = vadd.f32 %v1793_v6, %v1727_v62  ;;  %v1002_v15 = vpop.f32.mrb[3].mxu0  ;;  %v1043_v34 = vld [vmem:[#allocation17 + $0x20] sm:$0xff]  ;;  %v1044_v6 = vld [vmem:[#allocation17 + $0x28] sm:$0xff] }
 0x269   : > { %1068 = vadd.xlane.f32.xlu0 %v1067_v7  ;;  %v1003_v55 = vadd.f32 %v1727_v62, %v1002_v15  ;;  %v1064_v59 = vsel %vm1063_vm1, %v1055_v11, 0.0  ;;  %v1045_v7 = vld [vmem:[#allocation17 + $0x30] sm:$0xff]  ;;  %v1046_v11 = vld [vmem:[#allocation17 + $0x38] sm:$0xff] }
 0x26a   : > { %v1034_v16 = vmax.f32 %v1008_v8, 0.0 }
 0x26b   : > { %v1033_v52 = vmax.f32 %v1003_v55, 0.0 }
 0x26c   : > { %v1058_v17 = vmul.f32 %v1736_v4, %v1034_v16 }
 0x26d   : > { %1065 = vadd.xlane.f32.xlu0 %v1064_v59  ;;  %v1057_v23 = vmul.f32 %v1736_v4, %v1033_v52 }
 0x26e   : > { %v1073_v22 = vsel %vm1063_vm1, %v1058_v17, 0.0 }
 0x26f   : > { %1074 = vadd.xlane.f32.xlu1 %v1073_v22  ;;  %v1070_v26 = vsel %vm1063_vm1, %v1057_v23, 0.0 }
 0x271   : > { %v1796_v9 = vpop.f32.mrb[0].mxu1 }
 0x272   : > { %v1018_v24 = vadd.f32 %v1796_v9, %v1727_v62  ;;  %v1012_v25 = vpop.f32.mrb[1].mxu1 }
 0x273   : > { %v1013_v29 = vadd.f32 %v1727_v62, %v1012_v25  ;;  %1071 = vadd.xlane.f32.xlu1 %v1070_v26 }
 0x274   : > { %v1036_v2 = vmax.f32 %v1018_v24, 0.0 }
 0x275   : > { %v1035_v31 = vmax.f32 %v1013_v29, 0.0 }
 0x276   : > { %v1060_v10 = vmul.f32 %v1736_v4, %v1036_v2 }
 0x277   : > { %v1059_v32 = vmul.f32 %v1736_v4, %v1035_v31 }
 0x278   : > { %v1079_v33 = vsel %vm1063_vm1, %v1060_v10, 0.0 }
 0x279   : > { %v1076_v35 = vsel %vm1063_vm1, %v1059_v32, 0.0  ;;  %1080 = vadd.xlane.f32.xlu1 %v1079_v33 }
 0x27a   : > { %1077 = vadd.xlane.f32.xlu0 %v1076_v35 }
 0x27b   : > { %v1799_v12 = vpop.f32.mrb[2].mxu1 }
 0x27c   : > { %v1028_v36 = vadd.f32 %v1799_v12, %v1727_v62  ;;  %v1022_v13 = vpop.f32.mrb[3].mxu1 }
 0x27d   : > { %v1023_v27 = vadd.f32 %v1727_v62, %v1022_v13 }
 0x27e   : > { %v1038_v37 = vmax.f32 %v1028_v36, 0.0 }
 0x27f   : > { %v1037_v38 = vmax.f32 %v1023_v27, 0.0 }
 0x280   : > { %v1062_v30 = vmul.f32 %v1736_v4, %v1038_v37 }
 0x281   : > { %v1061_v39 = vmul.f32 %v1736_v4, %v1037_v38  ;;  %v1040_v4 = vld [vmem:[#allocation17 + $0x8] sm:$0xff] }
 0x282   : > { %v1085_v43 = vsel %vm1063_vm1, %v1062_v30, 0.0 }
 0x283   : > { %v1082_v44 = vsel %vm1063_vm1, %v1061_v39, 0.0  ;;  %1086 = vadd.xlane.f32.xlu1 %v1085_v43 }
 0x284   : > { %1083 = vadd.xlane.f32.xlu0 %v1082_v44 }
 0x2f6   : > { %v1069_v28 = vpop.xlane.xlu0 %1068 }
 0x2f7   : > { %v1105_v40 = vrot.slane %v1069_v28, %v1100_v48 }
 0x2fa   : > { %v1066_v47 = vpop.xlane.xlu0 %1065 }
 0x2fb   : > { %v1101_v51 = vrot.slane %v1066_v47, %v1100_v48 }
 0x2fc   : > { %v1075_v42 = vpop.xlane.xlu1 %1074 }
 0x2fd   : > { %v1131_v54 = vsel %vm1130_vm2, %v1105_v40, %v1101_v51  ;;  %v1113_v19 = vrot.slane %v1075_v42, %v1100_v48 }
 0x300   : > { %v1072_v50 = vpop.xlane.xlu1 %1071 }
 0x301   : > { %v1109_v18 = vrot.slane %v1072_v50, %v1100_v48 }
 0x303   : > { %v1133_v56 = vsel %vm1132_vm3, %v1109_v18, %v1131_v54 }
 0x304   : > { %v1135_v60 = vsel %vm1134_vm4, %v1113_v19, %v1133_v56 }
 0x306   : > { %v1081_v58 = vpop.xlane.xlu1 %1080 }
 0x307   : > { %v1078_v49 = vpop.xlane.xlu0 %1077  ;;  %v1121_v20 = vrot.slane %v1081_v58, %v1100_v48 }
 0x308   : > { %v1117_v57 = vrot.slane %v1078_v49, %v1100_v48 }
 0x30a   : > { %v1137_v0 = vsel %vm1136_vm5, %v1117_v57, %v1135_v60 }
 0x30b   : > { %v1139_v1 = vsel %vm1138_vm6, %v1121_v20, %v1137_v0 }
 0x310   : > { %v1087_v61 = vpop.xlane.xlu1 %1086 }
 0x311   : > { %v1084_v62 = vpop.xlane.xlu0 %1083  ;;  %v1129_v63 = vrot.slane %v1087_v61, %v1100_v48 }
 0x312   : > { %v1125_v21 = vrot.slane %v1084_v62, %v1100_v48 }
 0x314   : > { %v1141_v53 = vsel %vm1140_vm7, %v1125_v21, %v1139_v1 }
 0x315   : > { %v1143_v3 = vsel %vm1142_vm8, %v1129_v63, %v1141_v53 }
 0x316   : > { %1800 = vmatprep.subr.mxu1 %v1143_v3 }
 0x317   : > { %1801 = vmatpush3.msra.mxu1 %v1143_v3 }
 0x318   : > { %1803 = vmatmul.mubr.msk.f32.vlgmr.msra.gmra.mrb[4].mxu1 %vm901_vm0, %v1040_v4 }
 0x319   : > { %1805 = vmatprep.mubr.msk.f32.mxu1 %vm901_vm0, %v1041_v5 }
 0x31c   : > { %1806 = vmatmul.mubr.msk.f32.gmra.mrb[6].mxu1 %vm901_vm0, %v1042_v41 }
 0x31d   : > { %1808 = vmatprep.mubr.msk.f32.mxu1 %vm901_vm0, %v1043_v34 }
 0x320   : > { %1809 = vmatmul.mubr.msk.f32.gmra.mrb[8].mxu1 %vm901_vm0, %v1044_v6 }
 0x321   : > { %1811 = vmatprep.mubr.msk.f32.mxu1 %vm901_vm0, %v1045_v7 }
 0x324   : > { %1812 = vmatmul.mubr.msk.f32.gmra.mrb[10].mxu1 %vm901_vm0, %v1046_v11 }
 0x3eb   : > { %v1804_v8 = vpop.f32.mrb[4].mxu1 }
 0x3ec   : > { %v1235_v15 = vpop.f32.mrb[5].mxu1 }
 0x3ed   : > { %1816 = vmatprep.mubr.msk.f32.mxu0 %vm901_vm0, %v1235_v15 }
 0x3ee   : > { %1817 = vmatmul.mubr.msk.f32.vlgmr.msra.gmra.mrb[4].mxu0 %vm901_vm0, %v1804_v8 }
 0x3ef   : > { %v1807_v55 = vpop.f32.mrb[6].mxu1 }
 0x3f0   : > { %v1245_v16 = vpop.f32.mrb[7].mxu1 }
 0x3f1   : > { %1819 = vmatprep.mubr.msk.f32.mxu0 %vm901_vm0, %v1245_v16 }
 0x3f2   : > { %1820 = vmatmul.mubr.msk.f32.gmra.mrb[6].mxu0 %vm901_vm0, %v1807_v55 }
 0x3f3   : > { %v1810_v52 = vpop.f32.mrb[8].mxu1 }
 0x3f4   : > { %v1255_v59 = vpop.f32.mrb[9].mxu1 }
 0x3f5   : > { %1822 = vmatprep.mubr.msk.f32.mxu0 %vm901_vm0, %v1255_v59 }
 0x3f6   : > { %1823 = vmatmul.mubr.msk.f32.gmra.mrb[8].mxu0 %vm901_vm0, %v1810_v52 }
 0x3f7   : > { %v1813_v17 = vpop.f32.mrb[10].mxu1 }
 0x3f8   : > { %v1265_v22 = vpop.f32.mrb[11].mxu1 }
 0x3f9   : > { %1825 = vmatprep.mubr.msk.f32.mxu0 %vm901_vm0, %v1265_v22 }
 0x3fa   : > { %1826 = vmatmul.mubr.msk.f32.gmra.mrb[10].mxu0 %vm901_vm0, %v1813_v17 }
 0x4c1   : > { %v1818_v23 = vpop.f32.mrb[4].mxu0 }
 0x4c2   : > { %v1404_v9 = vsub.f32 0.0, %v1818_v23  ;;  %v1364_v24 = vpop.f32.mrb[5].mxu0 }
 0x4c3   : > { %v1403_v25 = vsub.f32 0.0, %v1364_v24 }
 0x4c4   : > { %v1413_v26 = vmul.f32 1.442695, %v1404_v9 }
 0x4c5   : > { %v1411_v29 = vmul.f32 1.442695, %v1403_v25  ;;  %v1821_v2 = vpop.f32.mrb[6].mxu0 }
 0x4c6   : > { %1977 = vpow2.f32 %v1413_v26  ;;  %v1406_v31 = vsub.f32 0.0, %v1821_v2  ;;  %v1374_v10 = vpop.f32.mrb[7].mxu0 }
 0x4c7   : > { %1979 = vpow2.f32 %v1411_v29  ;;  %v1405_v32 = vsub.f32 0.0, %v1374_v10 }
 0x4c8   : > { %v1417_v33 = vmul.f32 1.442695, %v1406_v31 }
 0x4c9   : > { %v1415_v35 = vmul.f32 1.442695, %v1405_v32  ;;  %v1824_v12 = vpop.f32.mrb[8].mxu0 }
 0x4ca   : > { %1981 = vpow2.f32 %v1417_v33  ;;  %v1408_v36 = vsub.f32 0.0, %v1824_v12  ;;  %v1384_v13 = vpop.f32.mrb[9].mxu0 }
 0x4cb   : > { %1983 = vpow2.f32 %v1415_v35  ;;  %v1407_v27 = vsub.f32 0.0, %v1384_v13 }
 0x4cc   : > { %v1421_v37 = vmul.f32 1.442695, %v1408_v36 }
 0x4cd   : > { %v1419_v38 = vmul.f32 1.442695, %v1407_v27  ;;  %v1827_v30 = vpop.f32.mrb[10].mxu0 }
 0x4ce   : > { %1985 = vpow2.f32 %v1421_v37  ;;  %v1410_v39 = vsub.f32 0.0, %v1827_v30  ;;  %v1394_v43 = vpop.f32.mrb[11].mxu0 }
 0x4cf   : > { %1987 = vpow2.f32 %v1419_v38  ;;  %v1409_v44 = vsub.f32 0.0, %v1394_v43 }
 0x4d0   : > { %v1978_v45 = vpop.eup %1977  ;;  %v1425_v14 = vmul.f32 1.442695, %v1410_v39 }
 0x4d1   : > { %v1980_v28 = vpop.eup %1979  ;;  %v1428_v42 = vadd.f32 1.0, %v1978_v45  ;;  %v1423_v46 = vmul.f32 1.442695, %v1409_v44 }
 0x4d2   : > { %v1427_v47 = vadd.f32 1.0, %v1980_v28  ;;  %1989 = vpow2.f32 %v1425_v14 }
 0x4d3   : > { %1991 = vrcp.f32 %v1428_v42 }
 0x4d4   : > { %v1982_v48 = vpop.eup %1981  ;;  %1993 = vrcp.f32 %v1427_v47 }
 0x4d5   : > { %v1984_v50 = vpop.eup %1983  ;;  %v1430_v51 = vadd.f32 1.0, %v1982_v48  ;;  %1995 = vpow2.f32 %v1423_v46 }
 0x4d6   : > { %v1429_v18 = vadd.f32 1.0, %v1984_v50 }
 0x4d7   : > { %1997 = vrcp.f32 %v1430_v51 }
 0x4d8   : > { %v1986_v40 = vpop.eup %1985  ;;  %1999 = vrcp.f32 %v1429_v18 }
 0x4d9   : > { %v1988_v54 = vpop.eup %1987  ;;  %v1432_v49 = vadd.f32 1.0, %v1986_v40 }
 0x4da   : > { %v1431_v56 = vadd.f32 1.0, %v1988_v54 }
 0x4db   : > { %2001 = vrcp.f32 %v1432_v49 }
 0x4dc   : > { %v1990_v19 = vpop.eup %1989  ;;  %2003 = vrcp.f32 %v1431_v56 }
 0x4dd   : > { %v1992_v57 = vpop.eup %1991  ;;  %v1434_v58 = vadd.f32 1.0, %v1990_v19 }
 0x4de   : > { %v1994_v60 = vpop.eup %1993  ;;  %v1438_v20 = vmul.f32 88.0, %v1992_v57 }
 0x4df   : > { %v1996_v0 = vpop.eup %1995  ;;  %v1436_v61 = vmul.f32 88.0, %v1994_v60  ;;  %2005 = vrcp.f32 %v1434_v58 }
 0x4e0   : > { %1453 = vst.msk [vmem:[%s612_s4 + $0x8] sm:$0xff] %vm1451_vm9, %v1438_v20  ;;  %v1433_v1 = vadd.f32 1.0, %v1996_v0 }
 0x4e1   : > { %v1998_v62 = vpop.eup %1997  ;;  %1452 = vst.msk [vmem:[%s612_s4] sm:$0xff] %vm1451_vm9, %v1436_v61 }
 0x4e2   : > { %v2000_v63 = vpop.eup %1999  ;;  %v1442_v21 = vmul.f32 88.0, %v1998_v62  ;;  %2007 = vrcp.f32 %v1433_v1 }
 0x4e3   : > { %v1440_v53 = vmul.f32 88.0, %v2000_v63 }
 0x4e4   : > { %1455 = vst.msk [vmem:[%s612_s4 + $0x18] sm:$0xff] %vm1451_vm9, %v1442_v21 }
 0x4e5   : > { %v2002_v3 = vpop.eup %2001  ;;  %1454 = vst.msk [vmem:[%s612_s4 + $0x10] sm:$0xff] %vm1451_vm9, %v1440_v53 }
 0x4e6   : > { %v2004_v4 = vpop.eup %2003  ;;  %v1446_v5 = vmul.f32 88.0, %v2002_v3 }
 0x4e7   : > { %v1444_v41 = vmul.f32 88.0, %v2004_v4 }
 0x4e8   : > { %1457 = vst.msk [vmem:[%s612_s4 + $0x28] sm:$0xff] %vm1451_vm9, %v1446_v5 }
 0x4e9   : > { %v2006_v34 = vpop.eup %2005  ;;  %1456 = vst.msk [vmem:[%s612_s4 + $0x20] sm:$0xff] %vm1451_vm9, %v1444_v41 }
 0x4ea   : > { %v1450_v6 = vmul.f32 88.0, %v2006_v34 }
 0x4ec   : > { %v2008_v7 = vpop.eup %2007  ;;  %1459 = vst.msk [vmem:[%s612_s4 + $0x38] sm:$0xff] %vm1451_vm9, %v1450_v6 }
 0x4ed   : > { %v1448_v11 = vmul.f32 88.0, %v2008_v7 }
 0x4ef   : > { %1458 = vst.msk [vmem:[%s612_s4 + $0x30] sm:$0xff] %vm1451_vm9, %v1448_v11 }
 0x4f0   : > { %2338 = shalt.err (!%p2335_p8)
}
 0x4f1   : > { %s2339_s22 = scalar_lea.hbm %s3137_s17, 1024  ;;  %s2343_s3 = scalar_lea.hbm %s3275_s26, 2048 }
 0x4f2   : > { %p2340_p6 = scmp.ne.s32.totalorder %s3137_s17, %s2339_s22  ;;  %p2344_p1 = scmp.lt.u32.totalorder %s3137_s17, %s3275_s26 }
 0x4f3   : > { %p2345_p4 = scmp.lt.u32.totalorder %s2343_s3, %s2339_s22  ;;  %p2347_p2 = scmp.lt.u32.totalorder %s2339_s22, %s3137_s17 }
 0x4f4   : > { %p2341_p11 = pnand %p2340_p6, %p3276_p3 }
 0x4f5   : > { %p2346_p10 = por %p2345_p4, %p2344_p1 }
 0x4f6   : > { %p2342_p12 = pneg %p2341_p11 }
 0x4f7   : > { %p2348_p5 = por %p2347_p2, %p2346_p10 }
 0x4f9   : > { %p2349_p9 = pnand %p2348_p5, %p2342_p12 }
 0x4fb   : > { %2352 = shalt.err (!%p2349_p9)
}
 0x4fc   : > { %s2433_s30 = smov 128   ;;  %s2434_s24 = smov 8  }
 0x4fd   : > { %1875 = dma.vmem_to_hbm [thread:$0]  (%p3276_p3), %s3139_s13, 1024, %s3137_s17, %s1461_s28, %s2433_s30, %s2433_s30, %s2434_s24  }
 0x4fe PF: > { %s3277_s4 = sld [smem:[#allocation29_spill]]  ;;  %s3278_s11 = sld [smem:[#allocation35_spill]] }
 0x4ff   : > { %p3280_p0 = scmp.ge.s32.totalorder %s2415_s20, 2 }
 0x504   : > { %s1489_s1 = sand.u32 1, %s3277_s4   ;;  %p3279_p7 = scmp.ne.s32.totalorder %s3278_s11, 0 }
 0x505   : > { %s1490_s29 = scalar_lea.sflag [#allocation4], %s1489_s1 }
 0x506   : > { %p1913_p13 = pnand %p3280_p0, %p3279_p7 }
 0x508   : > { %2398 = dma.done.wait (!%p1913_p13), %s1490_s29, 1024  }
 0x509   : > { %2400 = vsyncadd (!%p1913_p13), %s1490_s29, 4294966272  ;;  %s3281_s20 = sld [smem:[#allocation32_spill]]  ;;  %s3282_s7 = sld [smem:[#allocation33_spill]] }
 0x50a   : > { %s3283_s17 = smov %s2407_s18  ;;  %s3284_s18 = smov %s2411_s19 }
 0x50f   : > { %p33_p8 = scmp.ge.s32.totalorder %s3281_s20, 4   ;;  %s3285_s19 = smov %s3282_s7 }
 0x511   :  { %35 = sbr.rel (!%p33_p8) target bundleno = 20 (0x14), region = 176 }
 0x518   :  { %1495 = vsyncpa [#allocation3], 1 }
 0x519   :  { %1497 = vsyncpa [#allocation3 + $0x1], 1 }
 0x51a   :  { %1498 = vsyncpa [#allocation6], 1 }
 0x51b   :  { %1500 = vsyncpa [#allocation6 + $0x1], 1 }
 0x51c   :  { %1501 = vsyncpa [#allocation9], 1 }
 0x51d   :  { %1503 = vsyncpa [#allocation9 + $0x1], 1 }
 0x51e   :  { %1504 = vsyncpa [#allocation12], 1 }
 0x51f   :  { %1505 = vsyncpa [#allocation15], 1 }
 0x520   :  { %1506 = vsyncpa [#allocation18], 1 }
 0x521   :  { %1507 = vsyncpa [#allocation4], 1 }
 0x522   :  { %1509 = vsyncpa [#allocation4 + $0x1], 1 }

</bundles_post_ra>
